<compile_context>
chip_gen: v7x
topology: tpu7x:2x2x1
jax: 0.10.0
libtpu: 0.0.40
codegen_flags: <defaults>
</compile_context>

<pallas_src>
import jax
import jax.numpy as jnp
from jax.experimental import pallas as pl
from jax.experimental.pallas import tpu as pltpu

EPS = 1e-5      # PyTorch BatchNorm2d default eps
LANE = 128      # TPU lane width: FC output padded to this for dense stores


# ----------------------------------------------------------------------------
# Fused kernel: [conv3x3(pad=1) + BN + ReLU + maxpool2x2] x3 + GAP + FC
# ----------------------------------------------------------------------------
def _fused_cnn_kernel(x_ref,
                      w1_ref, s1_ref, b1_ref,
                      w2_ref, s2_ref, b2_ref,
                      w3_ref, s3_ref, b3_ref,
                      fcw_ref, fcb_ref,
                      out_ref,
                      pad1_ref, pad2_ref, pad3_ref,
                      col2_ref, col3_ref):
    # x_ref    : (B, H, W, 3) bf16     input tile (NHWC)
    # w1_ref   : (9, 3, 32) bf16       block-1 taps, index = 3*ky + kx
    # w2_ref   : (9*32, 64) bf16       block-2 im2col weights (row = tap*Cin + c)
    # w3_ref   : (9*64, 128) bf16      block-3 im2col weights
    # s*_ref   : (1, Cout) f32         gamma / sqrt(running_var + eps)
    # b*_ref   : (1, Cout) f32         beta + (conv_bias - running_mean) * scale
    # fcw_ref  : (128, 128) bf16       FC weight, classes zero-padded to 128 lanes
    # fcb_ref  : (1, 128) f32          FC bias, zero-padded
    # out_ref  : (B, 128) f32          lane-dense logits (sliced outside)
    # pad*_ref : bf16 VMEM halo scratch for each conv block
    # col*_ref : bf16 VMEM im2col scratch for blocks 2 and 3

    B, H, W, Cin0 = x_ref.shape

    def zero_halo_border(pad_ref):
        # Zero only the 1-pixel frame; the interior is fully overwritten each
        # step.  Doing this every step (not @ program_id==0) stays correct if
        # the "parallel" batch axis is split across TensorCores (v7x).
        b, hp, wp, c = pad_ref.shape
        zrow = jnp.zeros((b, 1, wp, c), pad_ref.dtype)
        zcol = jnp.zeros((b, hp, 1, c), pad_ref.dtype)
        pad_ref[:, 0:1, :, :] = zrow
        pad_ref[:, hp - 1:hp, :, :] = zrow
        pad_ref[:, :, 0:1, :] = zcol
        pad_ref[:, :, wp - 1:wp, :] = zcol

    def pool2x2(y, b, h, w, c):
        # y may be (b*h*w, c) flat or (b, h, w, c); row order is identical.
        y = y.reshape(b, h, w // 2, 2, c)
        y = jnp.maximum(y[..., 0, :], y[..., 1, :])          # pool along W
        y = y.reshape(b, h // 2, 2, w // 2, c)
        y = jnp.maximum(y[:, :, 0], y[:, :, 1])              # pool along H
        return y                                             # (b, h//2, w//2, c)

    # ---- Block 1: conv3x3 (3 -> 32), 9 accumulated K=3 matmuls -------------
    # (Cin=3 is too small for im2col to pay off; accumulator seeded with the
    #  first tap's dot product instead of zeros + add.)
    zero_halo_border(pad1_ref)
    pad1_ref[:, 1:H + 1, 1:W + 1, :] = x_ref[...]            # bf16, no cast
    xp = pad1_ref[...]                                       # (B, H+2, W+2, 3)
    acc = None
    for ky in range(3):
        for kx in range(3):
            tap = xp[:, ky:ky + H, kx:kx + W, :].reshape(B * H * W, Cin0)
            d = jnp.dot(tap, w1_ref[3 * ky + kx],
                        preferred_element_type=jnp.float32)
            acc = d if acc is None else acc + d
    y = jnp.maximum(acc * s1_ref[...] + b1_ref[...], 0.0)    # f32 epilogue
    c1 = w1_ref.shape[2]
    y = pool2x2(y, B, H, W, c1)                              # (B, H/2, W/2, 32) f32

    # ---- Blocks 2 & 3: single im2col matmul (K = 9*Cin) --------------------
    # TODO(synk): if a bundle dump shows the shifted tap slices materializing
    # relayout copies, switch the kx shift to pltpu.roll (XLU) instead.
    def conv_block_im2col(y, pad_ref, col_ref, w_ref, s_ref, b_ref):
        b, h, w, cin = y.shape
        cout = w_ref.shape[1]
        zero_halo_border(pad_ref)
        pad_ref[:, 1:h + 1, 1:w + 1, :] = y.astype(jnp.bfloat16)   # single cast
        xp = pad_ref[...]                                          # (b, h+2, w+2, cin)
        for ky in range(3):
            for kx in range(3):
                t = 3 * ky + kx
                col_ref[:, t * cin:(t + 1) * cin] = (
                    xp[:, ky:ky + h, kx:kx + w, :].reshape(b * h * w, cin))
        acc = jnp.dot(col_ref[...], w_ref[...],
                      preferred_element_type=jnp.float32)          # one MXU pass
        z = jnp.maximum(acc * s_ref[...] + b_ref[...], 0.0)        # f32 epilogue
        return pool2x2(z, b, h, w, cout)

    y = conv_block_im2col(y, pad2_ref, col2_ref, w2_ref, s2_ref, b2_ref)
    y = conv_block_im2col(y, pad3_ref, col3_ref, w3_ref, s3_ref, b3_ref)

    # ---- Global average pool + FC (dropout is identity at inference) -------
    b, hf, wf, c = y.shape
    pooled = jnp.sum(y.reshape(b, hf * wf, c), axis=1) * (1.0 / float(hf * wf))
    logits = jnp.dot(pooled.astype(jnp.bfloat16), fcw_ref[...],
                     preferred_element_type=jnp.float32) + fcb_ref[...]
    out_ref[...] = logits.astype(out_ref.dtype)


# ----------------------------------------------------------------------------
# pallas_call wrapper
# ----------------------------------------------------------------------------
def _pick_batch_tile(n, cap=32):
    # Pack as much batch as possible into the matmul M dimension (B*H*W rows)
    # to amortize per-grid-step overhead and fill the MXU; cap so halo/im2col
    # scratch + f32 accumulators stay inside the scoped VMEM limit on every
    # generation (on v7x, with 64 MiB VMEM / 2 TCs, a cap of 16 may be
    # preferable for very large inputs -- override via batch_tile).
    if n <= cap:
        return n
    for bt in range(min(cap, n), 0, -1):
        if n % bt == 0 and bt % 8 == 0:
            return bt
    return n          # no aligned divisor <= cap: fall back to a single tile


def _fused_forward(x_nhwc, conv_blocks, fc_w, fc_b, *, batch_tile=None,
                   vmem_limit_bytes=64 * 1024 * 1024):
    N, H, W, Cin = x_nhwc.shape
    assert H % 8 == 0 and W % 8 == 0, "spatial dims must survive three 2x2 pools"
    bt = _pick_batch_tile(N) if batch_tile is None else batch_tile
    assert N % bt == 0
    ncp = fc_w.shape[1]
    c1 = conv_blocks[0][0].shape[2]          # block-1 Cout (= block-2 Cin)
    c2 = conv_blocks[1][0].shape[1]          # block-2 Cout (= block-3 Cin)

    def const_spec(arr):                     # weights: full block, VMEM-resident
        nd = arr.ndim
        return pl.BlockSpec(arr.shape, lambda n, _nd=nd: (0,) * _nd)

    in_specs = [pl.BlockSpec((bt, H, W, Cin), lambda n: (n, 0, 0, 0))]
    operands = [x_nhwc]
    for blk in conv_blocks:
        for arr in blk:
            in_specs.append(const_spec(arr))
            operands.append(arr)
    for arr in (fc_w, fc_b):
        in_specs.append(const_spec(arr))
        operands.append(arr)

    scratch_shapes = [
        # bf16 halo buffers (cast happens once at write time)
        pltpu.VMEM((bt, H + 2, W + 2, Cin), jnp.bfloat16),
        pltpu.VMEM((bt, H // 2 + 2, W // 2 + 2, c1), jnp.bfloat16),
        pltpu.VMEM((bt, H // 4 + 2, W // 4 + 2, c2), jnp.bfloat16),
        # bf16 im2col buffers for blocks 2 and 3 (K = 9*Cin)
        pltpu.VMEM((bt * (H // 2) * (W // 2), 9 * c1), jnp.bfloat16),
        pltpu.VMEM((bt * (H // 4) * (W // 4), 9 * c2), jnp.bfloat16),
    ]

    return pl.pallas_call(
        _fused_cnn_kernel,
        out_shape=jax.ShapeDtypeStruct((N, ncp), jnp.float32),
        grid=(N // bt,),
        in_specs=in_specs,
        out_specs=pl.BlockSpec((bt, ncp), lambda n: (n, 0)),
        scratch_shapes=scratch_shapes,
        compiler_params=pltpu.CompilerParams(
            dimension_semantics=("parallel",),
            vmem_limit_bytes=vmem_limit_bytes),
    )(*operands)


# ----------------------------------------------------------------------------
# One-time parameter preparation (outside jit): BN fold, relayout, bf16 cast
# ----------------------------------------------------------------------------
def prepare_params(params, num_classes):
    conv_blocks = []
    for li, blk in enumerate(params["blocks"]):
        w = blk["w"]                                      # (Cout, Cin, 3, 3) OIHW
        cout, cin = w.shape[0], w.shape[1]
        w_t = jnp.transpose(w, (2, 3, 1, 0))              # (3, 3, Cin, Cout)
        if li == 0:
            wk = w_t.reshape(9, cin, cout)                # tap-indexed (9-dot form)
        else:
            wk = w_t.reshape(9 * cin, cout)               # im2col: row = tap*Cin + c
        scale = blk["gamma"] / jnp.sqrt(blk["var"] + EPS)
        shift = blk["beta"] + (blk["bias"] - blk["mean"]) * scale
        conv_blocks.append((wk.astype(jnp.bfloat16),
                            scale.reshape(1, cout).astype(jnp.float32),
                            shift.reshape(1, cout).astype(jnp.float32)))
    C = params["fc_w"].shape[1]
    ncp = max(LANE, ((num_classes + LANE - 1) // LANE) * LANE)
    fc_w = jnp.zeros((C, ncp), jnp.float32).at[:, :num_classes].set(params["fc_w"].T)
    fc_b = jnp.zeros((1, ncp), jnp.float32).at[:, :num_classes].set(params["fc_b"])
    return conv_blocks, fc_w.astype(jnp.bfloat16), fc_b


def build_forward(params, num_classes=10, batch_tile=None):
    conv_blocks, fc_w, fc_b = prepare_params(params, num_classes)

    @jax.jit
    def forward(x_nchw):
        # NCHW -> NHWC, cast once to bf16 (halves the only recurring HBM stream;
        # the conv/FC matmul operands are bf16 anyway).
        x = jnp.transpose(x_nchw, (0, 2, 3, 1)).astype(jnp.bfloat16)
        logits = _fused_forward(x, conv_blocks, fc_w, fc_b, batch_tile=batch_tile)
        return logits[:, :num_classes]                    # drop lane padding

    return forward


# ----------------------------------------------------------------------------
# Pure-JAX f32 reference (mirrors the PyTorch module in eval mode).
# ----------------------------------------------------------------------------
def ref_forward(x, params):
    hi = jax.lax.Precision.HIGHEST
    for blk in params["blocks"]:
        y = jax.lax.conv_general_dilated(
            x, blk["w"], (1, 1), ((1, 1), (1, 1)),
            dimension_numbers=("NCHW", "OIHW", "NCHW"), precision=hi)
        y = y + blk["bias"][None, :, None, None]
        y = ((y - blk["mean"][None, :, None, None])
             / jnp.sqrt(blk["var"][None, :, None, None] + EPS)
             * blk["gamma"][None, :, None, None]
             + blk["beta"][None, :, None, None])
        y = jnp.maximum(y, 0.0)
        y = jax.lax.reduce_window(y, -jnp.inf, jax.lax.max,
                                  (1, 1, 2, 2), (1, 1, 2, 2), "VALID")
        x = y
    pooled = jnp.mean(x, axis=(2, 3))
    return jnp.dot(pooled, params["fc_w"].T, precision=hi) + params["fc_b"]


if __name__ == "__main__":
    key = jax.random.PRNGKey(0)
    keys = iter(jax.random.split(key, 32))

    channels = [(3, 32), (32, 64), (64, 128)]
    blocks = []
    for cin, cout in channels:
        blocks.append(dict(
            w=jax.random.normal(next(keys), (cout, cin, 3, 3), jnp.float32) * 0.1,
            bias=jax.random.normal(next(keys), (cout,), jnp.float32) * 0.1,
            gamma=jax.random.uniform(next(keys), (cout,), jnp.float32, 0.5, 1.5),
            beta=jax.random.normal(next(keys), (cout,), jnp.float32) * 0.1,
            mean=jax.random.normal(next(keys), (cout,), jnp.float32) * 0.1,
            var=jax.random.uniform(next(keys), (cout,), jnp.float32, 0.5, 1.5),
        ))
    params = dict(
        blocks=blocks,
        fc_w=jax.random.normal(next(keys), (10, 128), jnp.float32) * 0.1,  # (out,in)
        fc_b=jax.random.normal(next(keys), (10,), jnp.float32) * 0.1,
    )

    # Small CIFAR-like input: batch=2, 3 channels, 16x16 spatial (NCHW).
    x = jax.random.normal(next(keys), (2, 3, 16, 16), jnp.float32)

    forward = build_forward(params, num_classes=10)
    out = jax.block_until_ready(forward(x))
    assert out.shape == (2, 10)

    ref = ref_forward(x, params)
    max_err = float(jnp.max(jnp.abs(out - ref)))
    # Tolerance accounts for bf16 MXU operands / bf16 inter-layer activations
    # vs the f32 reference (logit scale here is O(1)).
    assert bool(jnp.allclose(out, ref, atol=1e-1, rtol=5e-2)), (
        f"mismatch: max abs diff = {max_err}")

    print("KERNEL_OK")
</pallas_src>

<mosaic_0001>
module attributes {stable_mosaic.version = 11 : i64} {
  func.func @_fused_cnn_kernel(%arg0: i32, %arg1: memref<2x16x16x3xbf16, #tpu.memory_space<vmem>>, %arg2: memref<9x3x32xbf16, #tpu.memory_space<vmem>>, %arg3: memref<1x32xf32, #tpu.memory_space<vmem>>, %arg4: memref<1x32xf32, #tpu.memory_space<vmem>>, %arg5: memref<288x64xbf16, #tpu.memory_space<vmem>>, %arg6: memref<1x64xf32, #tpu.memory_space<vmem>>, %arg7: memref<1x64xf32, #tpu.memory_space<vmem>>, %arg8: memref<576x128xbf16, #tpu.memory_space<vmem>>, %arg9: memref<1x128xf32, #tpu.memory_space<vmem>>, %arg10: memref<1x128xf32, #tpu.memory_space<vmem>>, %arg11: memref<128x128xbf16, #tpu.memory_space<vmem>>, %arg12: memref<1x128xf32, #tpu.memory_space<vmem>>, %arg13: memref<2x128xf32, #tpu.memory_space<vmem>>, %arg14: memref<2x18x18x3xbf16, #tpu.memory_space<vmem>>, %arg15: memref<2x10x10x32xbf16, #tpu.memory_space<vmem>>, %arg16: memref<2x6x6x64xbf16, #tpu.memory_space<vmem>>, %arg17: memref<128x288xbf16, #tpu.memory_space<vmem>>, %arg18: memref<32x576xbf16, #tpu.memory_space<vmem>>) attributes {dimension_semantics = [#tpu.dimension_semantics<parallel>], iteration_bounds = array<i64: 1>, scalar_prefetch = 0 : i64, scratch_operands = 5 : i64, tpu.core_type = #tpu.core_type<tc>, window_params = [{transform_indices = @transform_0, window_bounds = array<i64: 2, 16, 16, 3>}, {pipeline_mode = #tpu.pipeline_mode<synchronous>, transform_indices = @transform_1, window_bounds = array<i64: 9, 3, 32>}, {pipeline_mode = #tpu.pipeline_mode<synchronous>, transform_indices = @transform_2, window_bounds = array<i64: 1, 32>}, {pipeline_mode = #tpu.pipeline_mode<synchronous>, transform_indices = @transform_3, window_bounds = array<i64: 1, 32>}, {pipeline_mode = #tpu.pipeline_mode<synchronous>, transform_indices = @transform_4, window_bounds = array<i64: 288, 64>}, {pipeline_mode = #tpu.pipeline_mode<synchronous>, transform_indices = @transform_5, window_bounds = array<i64: 1, 64>}, {pipeline_mode = #tpu.pipeline_mode<synchronous>, transform_indices = @transform_6, window_bounds = array<i64: 1, 64>}, {pipeline_mode = #tpu.pipeline_mode<synchronous>, transform_indices = @transform_7, window_bounds = array<i64: 576, 128>}, {pipeline_mode = #tpu.pipeline_mode<synchronous>, transform_indices = @transform_8, window_bounds = array<i64: 1, 128>}, {pipeline_mode = #tpu.pipeline_mode<synchronous>, transform_indices = @transform_9, window_bounds = array<i64: 1, 128>}, {pipeline_mode = #tpu.pipeline_mode<synchronous>, transform_indices = @transform_10, window_bounds = array<i64: 128, 128>}, {pipeline_mode = #tpu.pipeline_mode<synchronous>, transform_indices = @transform_11, window_bounds = array<i64: 1, 128>}, {transform_indices = @transform_12, window_bounds = array<i64: 2, 128>}]} {
    %cst = arith.constant 0.000000e+00 : bf16
    %0 = vector.broadcast %cst : bf16 to vector<2x1x18x3xbf16>
    %cst_0 = arith.constant 0.000000e+00 : bf16
    %1 = vector.broadcast %cst_0 : bf16 to vector<2x18x1x3xbf16>
    %c0 = arith.constant 0 : index
    %c0_1 = arith.constant 0 : index
    %c0_2 = arith.constant 0 : index
    %c0_3 = arith.constant 0 : index
    %2 = vector.load %arg14[%c0, %c0_1, %c0_2, %c0_3] : memref<2x18x18x3xbf16, #tpu.memory_space<vmem>>, vector<2x1x18x3xbf16>
    tpu.vector_store %arg14[%c0, %c0_1, %c0_2, %c0_3], %0 {strides = array<i32>} : memref<2x18x18x3xbf16, #tpu.memory_space<vmem>>, vector<2x1x18x3xbf16>,
    %c0_4 = arith.constant 0 : index
    %c17 = arith.constant 17 : index
    %c0_5 = arith.constant 0 : index
    %c0_6 = arith.constant 0 : index
    %3 = vector.load %arg14[%c0_4, %c17, %c0_5, %c0_6] : memref<2x18x18x3xbf16, #tpu.memory_space<vmem>>, vector<2x1x18x3xbf16>
    tpu.vector_store %arg14[%c0_4, %c17, %c0_5, %c0_6], %0 {strides = array<i32>} : memref<2x18x18x3xbf16, #tpu.memory_space<vmem>>, vector<2x1x18x3xbf16>,
    %c0_7 = arith.constant 0 : index
    %c0_8 = arith.constant 0 : index
    %c0_9 = arith.constant 0 : index
    %c0_10 = arith.constant 0 : index
    %4 = vector.load %arg14[%c0_7, %c0_8, %c0_9, %c0_10] : memref<2x18x18x3xbf16, #tpu.memory_space<vmem>>, vector<2x18x1x3xbf16>
    tpu.vector_store %arg14[%c0_7, %c0_8, %c0_9, %c0_10], %1 {strides = array<i32>} : memref<2x18x18x3xbf16, #tpu.memory_space<vmem>>, vector<2x18x1x3xbf16>,
    %c0_11 = arith.constant 0 : index
    %c0_12 = arith.constant 0 : index
    %c17_13 = arith.constant 17 : index
    %c0_14 = arith.constant 0 : index
    %5 = vector.load %arg14[%c0_11, %c0_12, %c17_13, %c0_14] : memref<2x18x18x3xbf16, #tpu.memory_space<vmem>>, vector<2x18x1x3xbf16>
    tpu.vector_store %arg14[%c0_11, %c0_12, %c17_13, %c0_14], %1 {strides = array<i32>} : memref<2x18x18x3xbf16, #tpu.memory_space<vmem>>, vector<2x18x1x3xbf16>,
    %c0_15 = arith.constant 0 : index
    %c0_16 = arith.constant 0 : index
    %c0_17 = arith.constant 0 : index
    %c0_18 = arith.constant 0 : index
    %6 = vector.load %arg1[%c0_15, %c0_16, %c0_17, %c0_18] : memref<2x16x16x3xbf16, #tpu.memory_space<vmem>>, vector<2x16x16x3xbf16>
    %c0_19 = arith.constant 0 : index
    %c1 = arith.constant 1 : index
    %c1_20 = arith.constant 1 : index
    %c0_21 = arith.constant 0 : index
    %7 = vector.load %arg14[%c0_19, %c1, %c1_20, %c0_21] : memref<2x18x18x3xbf16, #tpu.memory_space<vmem>>, vector<2x16x16x3xbf16>
    tpu.vector_store %arg14[%c0_19, %c1, %c1_20, %c0_21], %6 {strides = array<i32>} : memref<2x18x18x3xbf16, #tpu.memory_space<vmem>>, vector<2x16x16x3xbf16>,
    %c0_22 = arith.constant 0 : index
    %c0_23 = arith.constant 0 : index
    %c0_24 = arith.constant 0 : index
    %c0_25 = arith.constant 0 : index
    %8 = vector.load %arg14[%c0_22, %c0_23, %c0_24, %c0_25] : memref<2x18x18x3xbf16, #tpu.memory_space<vmem>>, vector<2x18x18x3xbf16>
    %9 = vector.extract_strided_slice %8 {offsets = [0, 0, 0, 0], sizes = [2, 16, 16, 3], strides = [1, 1, 1, 1]} : vector<2x18x18x3xbf16> to vector<2x16x16x3xbf16>
    %10 = vector.shape_cast %9 : vector<2x16x16x3xbf16> to vector<512x3xbf16>
    %c0_26 = arith.constant 0 : index
    %c0_27 = arith.constant 0 : index
    %c0_28 = arith.constant 0 : index
    %11 = vector.load %arg2[%c0_26, %c0_27, %c0_28] : memref<9x3x32xbf16, #tpu.memory_space<vmem>>, vector<1x3x32xbf16>
    %12 = vector.shape_cast %11 : vector<1x3x32xbf16> to vector<3x32xbf16>
    %cst_29 = arith.constant dense<0.000000e+00> : vector<512x32xf32>
    %13 = tpu.matmul %10, %12, %cst_29 {dimension_numbers = #tpu.dot_dimension_numbers<[1], [0], [0], [1], [0, 0, 1, 1], [], []>} : vector<512x3xbf16>, vector<3x32xbf16>, vector<512x32xf32> -> vector<512x32xf32>
    %14 = vector.extract_strided_slice %8 {offsets = [0, 0, 1, 0], sizes = [2, 16, 16, 3], strides = [1, 1, 1, 1]} : vector<2x18x18x3xbf16> to vector<2x16x16x3xbf16>
    %15 = vector.shape_cast %14 : vector<2x16x16x3xbf16> to vector<512x3xbf16>
    %c1_30 = arith.constant 1 : index
    %c0_31 = arith.constant 0 : index
    %c0_32 = arith.constant 0 : index
    %16 = vector.load %arg2[%c1_30, %c0_31, %c0_32] : memref<9x3x32xbf16, #tpu.memory_space<vmem>>, vector<1x3x32xbf16>
    %17 = vector.shape_cast %16 : vector<1x3x32xbf16> to vector<3x32xbf16>
    %cst_33 = arith.constant dense<0.000000e+00> : vector<512x32xf32>
    %18 = tpu.matmul %15, %17, %cst_33 {dimension_numbers = #tpu.dot_dimension_numbers<[1], [0], [0], [1], [0, 0, 1, 1], [], []>} : vector<512x3xbf16>, vector<3x32xbf16>, vector<512x32xf32> -> vector<512x32xf32>
    %19 = arith.addf %13, %18 : vector<512x32xf32>
    %20 = vector.extract_strided_slice %8 {offsets = [0, 0, 2, 0], sizes = [2, 16, 16, 3], strides = [1, 1, 1, 1]} : vector<2x18x18x3xbf16> to vector<2x16x16x3xbf16>
    %21 = vector.shape_cast %20 : vector<2x16x16x3xbf16> to vector<512x3xbf16>
    %c2 = arith.constant 2 : index
    %c0_34 = arith.constant 0 : index
    %c0_35 = arith.constant 0 : index
    %22 = vector.load %arg2[%c2, %c0_34, %c0_35] : memref<9x3x32xbf16, #tpu.memory_space<vmem>>, vector<1x3x32xbf16>
    %23 = vector.shape_cast %22 : vector<1x3x32xbf16> to vector<3x32xbf16>
    %cst_36 = arith.constant dense<0.000000e+00> : vector<512x32xf32>
    %24 = tpu.matmul %21, %23, %cst_36 {dimension_numbers = #tpu.dot_dimension_numbers<[1], [0], [0], [1], [0, 0, 1, 1], [], []>} : vector<512x3xbf16>, vector<3x32xbf16>, vector<512x32xf32> -> vector<512x32xf32>
    %25 = arith.addf %19, %24 : vector<512x32xf32>
    %26 = vector.extract_strided_slice %8 {offsets = [0, 1, 0, 0], sizes = [2, 16, 16, 3], strides = [1, 1, 1, 1]} : vector<2x18x18x3xbf16> to vector<2x16x16x3xbf16>
    %27 = vector.shape_cast %26 : vector<2x16x16x3xbf16> to vector<512x3xbf16>
    %c3 = arith.constant 3 : index
    %c0_37 = arith.constant 0 : index
    %c0_38 = arith.constant 0 : index
    %28 = vector.load %arg2[%c3, %c0_37, %c0_38] : memref<9x3x32xbf16, #tpu.memory_space<vmem>>, vector<1x3x32xbf16>
    %29 = vector.shape_cast %28 : vector<1x3x32xbf16> to vector<3x32xbf16>
    %cst_39 = arith.constant dense<0.000000e+00> : vector<512x32xf32>
    %30 = tpu.matmul %27, %29, %cst_39 {dimension_numbers = #tpu.dot_dimension_numbers<[1], [0], [0], [1], [0, 0, 1, 1], [], []>} : vector<512x3xbf16>, vector<3x32xbf16>, vector<512x32xf32> -> vector<512x32xf32>
    %31 = arith.addf %25, %30 : vector<512x32xf32>
    %32 = vector.extract_strided_slice %8 {offsets = [0, 1, 1, 0], sizes = [2, 16, 16, 3], strides = [1, 1, 1, 1]} : vector<2x18x18x3xbf16> to vector<2x16x16x3xbf16>
    %33 = vector.shape_cast %32 : vector<2x16x16x3xbf16> to vector<512x3xbf16>
    %c4 = arith.constant 4 : index
    %c0_40 = arith.constant 0 : index
    %c0_41 = arith.constant 0 : index
    %34 = vector.load %arg2[%c4, %c0_40, %c0_41] : memref<9x3x32xbf16, #tpu.memory_space<vmem>>, vector<1x3x32xbf16>
    %35 = vector.shape_cast %34 : vector<1x3x32xbf16> to vector<3x32xbf16>
    %cst_42 = arith.constant dense<0.000000e+00> : vector<512x32xf32>
    %36 = tpu.matmul %33, %35, %cst_42 {dimension_numbers = #tpu.dot_dimension_numbers<[1], [0], [0], [1], [0, 0, 1, 1], [], []>} : vector<512x3xbf16>, vector<3x32xbf16>, vector<512x32xf32> -> vector<512x32xf32>
    %37 = arith.addf %31, %36 : vector<512x32xf32>
    %38 = vector.extract_strided_slice %8 {offsets = [0, 1, 2, 0], sizes = [2, 16, 16, 3], strides = [1, 1, 1, 1]} : vector<2x18x18x3xbf16> to vector<2x16x16x3xbf16>
    %39 = vector.shape_cast %38 : vector<2x16x16x3xbf16> to vector<512x3xbf16>
    %c5 = arith.constant 5 : index
    %c0_43 = arith.constant 0 : index
    %c0_44 = arith.constant 0 : index
    %40 = vector.load %arg2[%c5, %c0_43, %c0_44] : memref<9x3x32xbf16, #tpu.memory_space<vmem>>, vector<1x3x32xbf16>
    %41 = vector.shape_cast %40 : vector<1x3x32xbf16> to vector<3x32xbf16>
    %cst_45 = arith.constant dense<0.000000e+00> : vector<512x32xf32>
    %42 = tpu.matmul %39, %41, %cst_45 {dimension_numbers = #tpu.dot_dimension_numbers<[1], [0], [0], [1], [0, 0, 1, 1], [], []>} : vector<512x3xbf16>, vector<3x32xbf16>, vector<512x32xf32> -> vector<512x32xf32>
    %43 = arith.addf %37, %42 : vector<512x32xf32>
    %44 = vector.extract_strided_slice %8 {offsets = [0, 2, 0, 0], sizes = [2, 16, 16, 3], strides = [1, 1, 1, 1]} : vector<2x18x18x3xbf16> to vector<2x16x16x3xbf16>
    %45 = vector.shape_cast %44 : vector<2x16x16x3xbf16> to vector<512x3xbf16>
    %c6 = arith.constant 6 : index
    %c0_46 = arith.constant 0 : index
    %c0_47 = arith.constant 0 : index
    %46 = vector.load %arg2[%c6, %c0_46, %c0_47] : memref<9x3x32xbf16, #tpu.memory_space<vmem>>, vector<1x3x32xbf16>
    %47 = vector.shape_cast %46 : vector<1x3x32xbf16> to vector<3x32xbf16>
    %cst_48 = arith.constant dense<0.000000e+00> : vector<512x32xf32>
    %48 = tpu.matmul %45, %47, %cst_48 {dimension_numbers = #tpu.dot_dimension_numbers<[1], [0], [0], [1], [0, 0, 1, 1], [], []>} : vector<512x3xbf16>, vector<3x32xbf16>, vector<512x32xf32> -> vector<512x32xf32>
    %49 = arith.addf %43, %48 : vector<512x32xf32>
    %50 = vector.extract_strided_slice %8 {offsets = [0, 2, 1, 0], sizes = [2, 16, 16, 3], strides = [1, 1, 1, 1]} : vector<2x18x18x3xbf16> to vector<2x16x16x3xbf16>
    %51 = vector.shape_cast %50 : vector<2x16x16x3xbf16> to vector<512x3xbf16>
    %c7 = arith.constant 7 : index
    %c0_49 = arith.constant 0 : index
    %c0_50 = arith.constant 0 : index
    %52 = vector.load %arg2[%c7, %c0_49, %c0_50] : memref<9x3x32xbf16, #tpu.memory_space<vmem>>, vector<1x3x32xbf16>
    %53 = vector.shape_cast %52 : vector<1x3x32xbf16> to vector<3x32xbf16>
    %cst_51 = arith.constant dense<0.000000e+00> : vector<512x32xf32>
    %54 = tpu.matmul %51, %53, %cst_51 {dimension_numbers = #tpu.dot_dimension_numbers<[1], [0], [0], [1], [0, 0, 1, 1], [], []>} : vector<512x3xbf16>, vector<3x32xbf16>, vector<512x32xf32> -> vector<512x32xf32>
    %55 = arith.addf %49, %54 : vector<512x32xf32>
    %56 = vector.extract_strided_slice %8 {offsets = [0, 2, 2, 0], sizes = [2, 16, 16, 3], strides = [1, 1, 1, 1]} : vector<2x18x18x3xbf16> to vector<2x16x16x3xbf16>
    %57 = vector.shape_cast %56 : vector<2x16x16x3xbf16> to vector<512x3xbf16>
    %c8 = arith.constant 8 : index
    %c0_52 = arith.constant 0 : index
    %c0_53 = arith.constant 0 : index
    %58 = vector.load %arg2[%c8, %c0_52, %c0_53] : memref<9x3x32xbf16, #tpu.memory_space<vmem>>, vector<1x3x32xbf16>
    %59 = vector.shape_cast %58 : vector<1x3x32xbf16> to vector<3x32xbf16>
    %cst_54 = arith.constant dense<0.000000e+00> : vector<512x32xf32>
    %60 = tpu.matmul %57, %59, %cst_54 {dimension_numbers = #tpu.dot_dimension_numbers<[1], [0], [0], [1], [0, 0, 1, 1], [], []>} : vector<512x3xbf16>, vector<3x32xbf16>, vector<512x32xf32> -> vector<512x32xf32>
    %61 = arith.addf %55, %60 : vector<512x32xf32>
    %c0_55 = arith.constant 0 : index
    %c0_56 = arith.constant 0 : index
    %62 = vector.load %arg3[%c0_55, %c0_56] : memref<1x32xf32, #tpu.memory_space<vmem>>, vector<1x32xf32>
    %63 = vector.broadcast %62 : vector<1x32xf32> to vector<512x32xf32>
    %64 = arith.mulf %61, %63 : vector<512x32xf32>
    %c0_57 = arith.constant 0 : index
    %c0_58 = arith.constant 0 : index
    %65 = vector.load %arg4[%c0_57, %c0_58] : memref<1x32xf32, #tpu.memory_space<vmem>>, vector<1x32xf32>
    %66 = vector.broadcast %65 : vector<1x32xf32> to vector<512x32xf32>
    %67 = arith.addf %64, %66 : vector<512x32xf32>
    %cst_59 = arith.constant 0.000000e+00 : f32
    %68 = vector.broadcast %cst_59 : f32 to vector<512x32xf32>
    %69 = arith.maximumf %67, %68 : vector<512x32xf32>
    %70 = vector.shape_cast %69 : vector<512x32xf32> to vector<2x16x8x2x32xf32>
    %71 = vector.extract_strided_slice %70 {offsets = [0, 0, 0, 0, 0], sizes = [2, 16, 8, 1, 32], strides = [1, 1, 1, 1, 1]} : vector<2x16x8x2x32xf32> to vector<2x16x8x1x32xf32>
    %72 = vector.shape_cast %71 : vector<2x16x8x1x32xf32> to vector<2x16x8x32xf32>
    %73 = vector.extract_strided_slice %70 {offsets = [0, 0, 0, 1, 0], sizes = [2, 16, 8, 1, 32], strides = [1, 1, 1, 1, 1]} : vector<2x16x8x2x32xf32> to vector<2x16x8x1x32xf32>
    %74 = vector.shape_cast %73 : vector<2x16x8x1x32xf32> to vector<2x16x8x32xf32>
    %75 = arith.maximumf %72, %74 : vector<2x16x8x32xf32>
    %76 = vector.shape_cast %75 : vector<2x16x8x32xf32> to vector<2x8x2x8x32xf32>
    %77 = vector.extract_strided_slice %76 {offsets = [0, 0, 0, 0, 0], sizes = [2, 8, 1, 8, 32], strides = [1, 1, 1, 1, 1]} : vector<2x8x2x8x32xf32> to vector<2x8x1x8x32xf32>
    %78 = vector.shape_cast %77 : vector<2x8x1x8x32xf32> to vector<2x8x8x32xf32>
    %79 = vector.extract_strided_slice %76 {offsets = [0, 0, 1, 0, 0], sizes = [2, 8, 1, 8, 32], strides = [1, 1, 1, 1, 1]} : vector<2x8x2x8x32xf32> to vector<2x8x1x8x32xf32>
    %80 = vector.shape_cast %79 : vector<2x8x1x8x32xf32> to vector<2x8x8x32xf32>
    %81 = arith.maximumf %78, %80 : vector<2x8x8x32xf32>
    %cst_60 = arith.constant 0.000000e+00 : bf16
    %82 = vector.broadcast %cst_60 : bf16 to vector<2x1x10x32xbf16>
    %cst_61 = arith.constant 0.000000e+00 : bf16
    %83 = vector.broadcast %cst_61 : bf16 to vector<2x10x1x32xbf16>
    %c0_62 = arith.constant 0 : index
    %c0_63 = arith.constant 0 : index
    %c0_64 = arith.constant 0 : index
    %c0_65 = arith.constant 0 : index
    %84 = vector.load %arg15[%c0_62, %c0_63, %c0_64, %c0_65] : memref<2x10x10x32xbf16, #tpu.memory_space<vmem>>, vector<2x1x10x32xbf16>
    tpu.vector_store %arg15[%c0_62, %c0_63, %c0_64, %c0_65], %82 {strides = array<i32>} : memref<2x10x10x32xbf16, #tpu.memory_space<vmem>>, vector<2x1x10x32xbf16>,
    %c0_66 = arith.constant 0 : index
    %c9 = arith.constant 9 : index
    %c0_67 = arith.constant 0 : index
    %c0_68 = arith.constant 0 : index
    %85 = vector.load %arg15[%c0_66, %c9, %c0_67, %c0_68] : memref<2x10x10x32xbf16, #tpu.memory_space<vmem>>, vector<2x1x10x32xbf16>
    tpu.vector_store %arg15[%c0_66, %c9, %c0_67, %c0_68], %82 {strides = array<i32>} : memref<2x10x10x32xbf16, #tpu.memory_space<vmem>>, vector<2x1x10x32xbf16>,
    %c0_69 = arith.constant 0 : index
    %c0_70 = arith.constant 0 : index
    %c0_71 = arith.constant 0 : index
    %c0_72 = arith.constant 0 : index
    %86 = vector.load %arg15[%c0_69, %c0_70, %c0_71, %c0_72] : memref<2x10x10x32xbf16, #tpu.memory_space<vmem>>, vector<2x10x1x32xbf16>
    tpu.vector_store %arg15[%c0_69, %c0_70, %c0_71, %c0_72], %83 {strides = array<i32>} : memref<2x10x10x32xbf16, #tpu.memory_space<vmem>>, vector<2x10x1x32xbf16>,
    %c0_73 = arith.constant 0 : index
    %c0_74 = arith.constant 0 : index
    %c9_75 = arith.constant 9 : index
    %c0_76 = arith.constant 0 : index
    %87 = vector.load %arg15[%c0_73, %c0_74, %c9_75, %c0_76] : memref<2x10x10x32xbf16, #tpu.memory_space<vmem>>, vector<2x10x1x32xbf16>
    tpu.vector_store %arg15[%c0_73, %c0_74, %c9_75, %c0_76], %83 {strides = array<i32>} : memref<2x10x10x32xbf16, #tpu.memory_space<vmem>>, vector<2x10x1x32xbf16>,
    %88 = arith.truncf %81 : vector<2x8x8x32xf32> to vector<2x8x8x32xbf16>
    %c0_77 = arith.constant 0 : index
    %c1_78 = arith.constant 1 : index
    %c1_79 = arith.constant 1 : index
    %c0_80 = arith.constant 0 : index
    %89 = vector.load %arg15[%c0_77, %c1_78, %c1_79, %c0_80] : memref<2x10x10x32xbf16, #tpu.memory_space<vmem>>, vector<2x8x8x32xbf16>
    tpu.vector_store %arg15[%c0_77, %c1_78, %c1_79, %c0_80], %88 {strides = array<i32>} : memref<2x10x10x32xbf16, #tpu.memory_space<vmem>>, vector<2x8x8x32xbf16>,
    %c0_81 = arith.constant 0 : index
    %c0_82 = arith.constant 0 : index
    %c0_83 = arith.constant 0 : index
    %c0_84 = arith.constant 0 : index
    %90 = vector.load %arg15[%c0_81, %c0_82, %c0_83, %c0_84] : memref<2x10x10x32xbf16, #tpu.memory_space<vmem>>, vector<2x10x10x32xbf16>
    %91 = vector.extract_strided_slice %90 {offsets = [0, 0, 0, 0], sizes = [2, 8, 8, 32], strides = [1, 1, 1, 1]} : vector<2x10x10x32xbf16> to vector<2x8x8x32xbf16>
    %92 = vector.shape_cast %91 : vector<2x8x8x32xbf16> to vector<128x32xbf16>
    %c0_85 = arith.constant 0 : index
    %c0_86 = arith.constant 0 : index
    %93 = vector.load %arg17[%c0_85, %c0_86] : memref<128x288xbf16, #tpu.memory_space<vmem>>, vector<128x32xbf16>
    tpu.vector_store %arg17[%c0_85, %c0_86], %92 {strides = array<i32>} : memref<128x288xbf16, #tpu.memory_space<vmem>>, vector<128x32xbf16>,
    %94 = vector.extract_strided_slice %90 {offsets = [0, 0, 1, 0], sizes = [2, 8, 8, 32], strides = [1, 1, 1, 1]} : vector<2x10x10x32xbf16> to vector<2x8x8x32xbf16>
    %95 = vector.shape_cast %94 : vector<2x8x8x32xbf16> to vector<128x32xbf16>
    %c0_87 = arith.constant 0 : index
    %c32 = arith.constant 32 : index
    %96 = vector.load %arg17[%c0_87, %c32] : memref<128x288xbf16, #tpu.memory_space<vmem>>, vector<128x32xbf16>
    tpu.vector_store %arg17[%c0_87, %c32], %95 {strides = array<i32>} : memref<128x288xbf16, #tpu.memory_space<vmem>>, vector<128x32xbf16>,
    %97 = vector.extract_strided_slice %90 {offsets = [0, 0, 2, 0], sizes = [2, 8, 8, 32], strides = [1, 1, 1, 1]} : vector<2x10x10x32xbf16> to vector<2x8x8x32xbf16>
    %98 = vector.shape_cast %97 : vector<2x8x8x32xbf16> to vector<128x32xbf16>
    %c0_88 = arith.constant 0 : index
    %c64 = arith.constant 64 : index
    %99 = vector.load %arg17[%c0_88, %c64] : memref<128x288xbf16, #tpu.memory_space<vmem>>, vector<128x32xbf16>
    tpu.vector_store %arg17[%c0_88, %c64], %98 {strides = array<i32>} : memref<128x288xbf16, #tpu.memory_space<vmem>>, vector<128x32xbf16>,
    %100 = vector.extract_strided_slice %90 {offsets = [0, 1, 0, 0], sizes = [2, 8, 8, 32], strides = [1, 1, 1, 1]} : vector<2x10x10x32xbf16> to vector<2x8x8x32xbf16>
    %101 = vector.shape_cast %100 : vector<2x8x8x32xbf16> to vector<128x32xbf16>
    %c0_89 = arith.constant 0 : index
    %c96 = arith.constant 96 : index
    %102 = vector.load %arg17[%c0_89, %c96] : memref<128x288xbf16, #tpu.memory_space<vmem>>, vector<128x32xbf16>
    tpu.vector_store %arg17[%c0_89, %c96], %101 {strides = array<i32>} : memref<128x288xbf16, #tpu.memory_space<vmem>>, vector<128x32xbf16>,
    %103 = vector.extract_strided_slice %90 {offsets = [0, 1, 1, 0], sizes = [2, 8, 8, 32], strides = [1, 1, 1, 1]} : vector<2x10x10x32xbf16> to vector<2x8x8x32xbf16>
    %104 = vector.shape_cast %103 : vector<2x8x8x32xbf16> to vector<128x32xbf16>
    %c0_90 = arith.constant 0 : index
    %c128 = arith.constant 128 : index
    %105 = vector.load %arg17[%c0_90, %c128] : memref<128x288xbf16, #tpu.memory_space<vmem>>, vector<128x32xbf16>
    tpu.vector_store %arg17[%c0_90, %c128], %104 {strides = array<i32>} : memref<128x288xbf16, #tpu.memory_space<vmem>>, vector<128x32xbf16>,
    %106 = vector.extract_strided_slice %90 {offsets = [0, 1, 2, 0], sizes = [2, 8, 8, 32], strides = [1, 1, 1, 1]} : vector<2x10x10x32xbf16> to vector<2x8x8x32xbf16>
    %107 = vector.shape_cast %106 : vector<2x8x8x32xbf16> to vector<128x32xbf16>
    %c0_91 = arith.constant 0 : index
    %c160 = arith.constant 160 : index
    %108 = vector.load %arg17[%c0_91, %c160] : memref<128x288xbf16, #tpu.memory_space<vmem>>, vector<128x32xbf16>
    tpu.vector_store %arg17[%c0_91, %c160], %107 {strides = array<i32>} : memref<128x288xbf16, #tpu.memory_space<vmem>>, vector<128x32xbf16>,
    %109 = vector.extract_strided_slice %90 {offsets = [0, 2, 0, 0], sizes = [2, 8, 8, 32], strides = [1, 1, 1, 1]} : vector<2x10x10x32xbf16> to vector<2x8x8x32xbf16>
    %110 = vector.shape_cast %109 : vector<2x8x8x32xbf16> to vector<128x32xbf16>
    %c0_92 = arith.constant 0 : index
    %c192 = arith.constant 192 : index
    %111 = vector.load %arg17[%c0_92, %c192] : memref<128x288xbf16, #tpu.memory_space<vmem>>, vector<128x32xbf16>
    tpu.vector_store %arg17[%c0_92, %c192], %110 {strides = array<i32>} : memref<128x288xbf16, #tpu.memory_space<vmem>>, vector<128x32xbf16>,
    %112 = vector.extract_strided_slice %90 {offsets = [0, 2, 1, 0], sizes = [2, 8, 8, 32], strides = [1, 1, 1, 1]} : vector<2x10x10x32xbf16> to vector<2x8x8x32xbf16>
    %113 = vector.shape_cast %112 : vector<2x8x8x32xbf16> to vector<128x32xbf16>
    %c0_93 = arith.constant 0 : index
    %c224 = arith.constant 224 : index
    %114 = vector.load %arg17[%c0_93, %c224] : memref<128x288xbf16, #tpu.memory_space<vmem>>, vector<128x32xbf16>
    tpu.vector_store %arg17[%c0_93, %c224], %113 {strides = array<i32>} : memref<128x288xbf16, #tpu.memory_space<vmem>>, vector<128x32xbf16>,
    %115 = vector.extract_strided_slice %90 {offsets = [0, 2, 2, 0], sizes = [2, 8, 8, 32], strides = [1, 1, 1, 1]} : vector<2x10x10x32xbf16> to vector<2x8x8x32xbf16>
    %116 = vector.shape_cast %115 : vector<2x8x8x32xbf16> to vector<128x32xbf16>
    %c0_94 = arith.constant 0 : index
    %c256 = arith.constant 256 : index
    %117 = vector.load %arg17[%c0_94, %c256] : memref<128x288xbf16, #tpu.memory_space<vmem>>, vector<128x32xbf16>
    tpu.vector_store %arg17[%c0_94, %c256], %116 {strides = array<i32>} : memref<128x288xbf16, #tpu.memory_space<vmem>>, vector<128x32xbf16>,
    %c0_95 = arith.constant 0 : index
    %c0_96 = arith.constant 0 : index
    %118 = vector.load %arg17[%c0_95, %c0_96] : memref<128x288xbf16, #tpu.memory_space<vmem>>, vector<128x288xbf16>
    %c0_97 = arith.constant 0 : index
    %c0_98 = arith.constant 0 : index
    %119 = vector.load %arg5[%c0_97, %c0_98] : memref<288x64xbf16, #tpu.memory_space<vmem>>, vector<288x64xbf16>
    %cst_99 = arith.constant dense<0.000000e+00> : vector<128x64xf32>
    %120 = tpu.matmul %118, %119, %cst_99 {dimension_numbers = #tpu.dot_dimension_numbers<[1], [0], [0], [1], [0, 0, 1, 1], [], []>} : vector<128x288xbf16>, vector<288x64xbf16>, vector<128x64xf32> -> vector<128x64xf32>
    %c0_100 = arith.constant 0 : index
    %c0_101 = arith.constant 0 : index
    %121 = vector.load %arg6[%c0_100, %c0_101] : memref<1x64xf32, #tpu.memory_space<vmem>>, vector<1x64xf32>
    %122 = vector.broadcast %121 : vector<1x64xf32> to vector<128x64xf32>
    %123 = arith.mulf %120, %122 : vector<128x64xf32>
    %c0_102 = arith.constant 0 : index
    %c0_103 = arith.constant 0 : index
    %124 = vector.load %arg7[%c0_102, %c0_103] : memref<1x64xf32, #tpu.memory_space<vmem>>, vector<1x64xf32>
    %125 = vector.broadcast %124 : vector<1x64xf32> to vector<128x64xf32>
    %126 = arith.addf %123, %125 : vector<128x64xf32>
    %cst_104 = arith.constant 0.000000e+00 : f32
    %127 = vector.broadcast %cst_104 : f32 to vector<128x64xf32>
    %128 = arith.maximumf %126, %127 : vector<128x64xf32>
    %129 = vector.shape_cast %128 : vector<128x64xf32> to vector<2x8x4x2x64xf32>
    %130 = vector.extract_strided_slice %129 {offsets = [0, 0, 0, 0, 0], sizes = [2, 8, 4, 1, 64], strides = [1, 1, 1, 1, 1]} : vector<2x8x4x2x64xf32> to vector<2x8x4x1x64xf32>
    %131 = vector.shape_cast %130 : vector<2x8x4x1x64xf32> to vector<2x8x4x64xf32>
    %132 = vector.extract_strided_slice %129 {offsets = [0, 0, 0, 1, 0], sizes = [2, 8, 4, 1, 64], strides = [1, 1, 1, 1, 1]} : vector<2x8x4x2x64xf32> to vector<2x8x4x1x64xf32>
    %133 = vector.shape_cast %132 : vector<2x8x4x1x64xf32> to vector<2x8x4x64xf32>
    %134 = arith.maximumf %131, %133 : vector<2x8x4x64xf32>
    %135 = vector.shape_cast %134 : vector<2x8x4x64xf32> to vector<2x4x2x4x64xf32>
    %136 = vector.extract_strided_slice %135 {offsets = [0, 0, 0, 0, 0], sizes = [2, 4, 1, 4, 64], strides = [1, 1, 1, 1, 1]} : vector<2x4x2x4x64xf32> to vector<2x4x1x4x64xf32>
    %137 = vector.shape_cast %136 : vector<2x4x1x4x64xf32> to vector<2x4x4x64xf32>
    %138 = vector.extract_strided_slice %135 {offsets = [0, 0, 1, 0, 0], sizes = [2, 4, 1, 4, 64], strides = [1, 1, 1, 1, 1]} : vector<2x4x2x4x64xf32> to vector<2x4x1x4x64xf32>
    %139 = vector.shape_cast %138 : vector<2x4x1x4x64xf32> to vector<2x4x4x64xf32>
    %140 = arith.maximumf %137, %139 : vector<2x4x4x64xf32>
    %cst_105 = arith.constant 0.000000e+00 : bf16
    %141 = vector.broadcast %cst_105 : bf16 to vector<2x1x6x64xbf16>
    %cst_106 = arith.constant 0.000000e+00 : bf16
    %142 = vector.broadcast %cst_106 : bf16 to vector<2x6x1x64xbf16>
    %c0_107 = arith.constant 0 : index
    %c0_108 = arith.constant 0 : index
    %c0_109 = arith.constant 0 : index
    %c0_110 = arith.constant 0 : index
    %143 = vector.load %arg16[%c0_107, %c0_108, %c0_109, %c0_110] : memref<2x6x6x64xbf16, #tpu.memory_space<vmem>>, vector<2x1x6x64xbf16>
    tpu.vector_store %arg16[%c0_107, %c0_108, %c0_109, %c0_110], %141 {strides = array<i32>} : memref<2x6x6x64xbf16, #tpu.memory_space<vmem>>, vector<2x1x6x64xbf16>,
    %c0_111 = arith.constant 0 : index
    %c5_112 = arith.constant 5 : index
    %c0_113 = arith.constant 0 : index
    %c0_114 = arith.constant 0 : index
    %144 = vector.load %arg16[%c0_111, %c5_112, %c0_113, %c0_114] : memref<2x6x6x64xbf16, #tpu.memory_space<vmem>>, vector<2x1x6x64xbf16>
    tpu.vector_store %arg16[%c0_111, %c5_112, %c0_113, %c0_114], %141 {strides = array<i32>} : memref<2x6x6x64xbf16, #tpu.memory_space<vmem>>, vector<2x1x6x64xbf16>,
    %c0_115 = arith.constant 0 : index
    %c0_116 = arith.constant 0 : index
    %c0_117 = arith.constant 0 : index
    %c0_118 = arith.constant 0 : index
    %145 = vector.load %arg16[%c0_115, %c0_116, %c0_117, %c0_118] : memref<2x6x6x64xbf16, #tpu.memory_space<vmem>>, vector<2x6x1x64xbf16>
    tpu.vector_store %arg16[%c0_115, %c0_116, %c0_117, %c0_118], %142 {strides = array<i32>} : memref<2x6x6x64xbf16, #tpu.memory_space<vmem>>, vector<2x6x1x64xbf16>,
    %c0_119 = arith.constant 0 : index
    %c0_120 = arith.constant 0 : index
    %c5_121 = arith.constant 5 : index
    %c0_122 = arith.constant 0 : index
    %146 = vector.load %arg16[%c0_119, %c0_120, %c5_121, %c0_122] : memref<2x6x6x64xbf16, #tpu.memory_space<vmem>>, vector<2x6x1x64xbf16>
    tpu.vector_store %arg16[%c0_119, %c0_120, %c5_121, %c0_122], %142 {strides = array<i32>} : memref<2x6x6x64xbf16, #tpu.memory_space<vmem>>, vector<2x6x1x64xbf16>,
    %147 = arith.truncf %140 : vector<2x4x4x64xf32> to vector<2x4x4x64xbf16>
    %c0_123 = arith.constant 0 : index
    %c1_124 = arith.constant 1 : index
    %c1_125 = arith.constant 1 : index
    %c0_126 = arith.constant 0 : index
    %148 = vector.load %arg16[%c0_123, %c1_124, %c1_125, %c0_126] : memref<2x6x6x64xbf16, #tpu.memory_space<vmem>>, vector<2x4x4x64xbf16>
    tpu.vector_store %arg16[%c0_123, %c1_124, %c1_125, %c0_126], %147 {strides = array<i32>} : memref<2x6x6x64xbf16, #tpu.memory_space<vmem>>, vector<2x4x4x64xbf16>,
    %c0_127 = arith.constant 0 : index
    %c0_128 = arith.constant 0 : index
    %c0_129 = arith.constant 0 : index
    %c0_130 = arith.constant 0 : index
    %149 = vector.load %arg16[%c0_127, %c0_128, %c0_129, %c0_130] : memref<2x6x6x64xbf16, #tpu.memory_space<vmem>>, vector<2x6x6x64xbf16>
    %150 = vector.extract_strided_slice %149 {offsets = [0, 0, 0, 0], sizes = [2, 4, 4, 64], strides = [1, 1, 1, 1]} : vector<2x6x6x64xbf16> to vector<2x4x4x64xbf16>
    %151 = vector.shape_cast %150 : vector<2x4x4x64xbf16> to vector<32x64xbf16>
    %c0_131 = arith.constant 0 : index
    %c0_132 = arith.constant 0 : index
    %152 = vector.load %arg18[%c0_131, %c0_132] : memref<32x576xbf16, #tpu.memory_space<vmem>>, vector<32x64xbf16>
    tpu.vector_store %arg18[%c0_131, %c0_132], %151 {strides = array<i32>} : memref<32x576xbf16, #tpu.memory_space<vmem>>, vector<32x64xbf16>,
    %153 = vector.extract_strided_slice %149 {offsets = [0, 0, 1, 0], sizes = [2, 4, 4, 64], strides = [1, 1, 1, 1]} : vector<2x6x6x64xbf16> to vector<2x4x4x64xbf16>
    %154 = vector.shape_cast %153 : vector<2x4x4x64xbf16> to vector<32x64xbf16>
    %c0_133 = arith.constant 0 : index
    %c64_134 = arith.constant 64 : index
    %155 = vector.load %arg18[%c0_133, %c64_134] : memref<32x576xbf16, #tpu.memory_space<vmem>>, vector<32x64xbf16>
    tpu.vector_store %arg18[%c0_133, %c64_134], %154 {strides = array<i32>} : memref<32x576xbf16, #tpu.memory_space<vmem>>, vector<32x64xbf16>,
    %156 = vector.extract_strided_slice %149 {offsets = [0, 0, 2, 0], sizes = [2, 4, 4, 64], strides = [1, 1, 1, 1]} : vector<2x6x6x64xbf16> to vector<2x4x4x64xbf16>
    %157 = vector.shape_cast %156 : vector<2x4x4x64xbf16> to vector<32x64xbf16>
    %c0_135 = arith.constant 0 : index
    %c128_136 = arith.constant 128 : index
    %158 = vector.load %arg18[%c0_135, %c128_136] : memref<32x576xbf16, #tpu.memory_space<vmem>>, vector<32x64xbf16>
    tpu.vector_store %arg18[%c0_135, %c128_136], %157 {strides = array<i32>} : memref<32x576xbf16, #tpu.memory_space<vmem>>, vector<32x64xbf16>,
    %159 = vector.extract_strided_slice %149 {offsets = [0, 1, 0, 0], sizes = [2, 4, 4, 64], strides = [1, 1, 1, 1]} : vector<2x6x6x64xbf16> to vector<2x4x4x64xbf16>
    %160 = vector.shape_cast %159 : vector<2x4x4x64xbf16> to vector<32x64xbf16>
    %c0_137 = arith.constant 0 : index
    %c192_138 = arith.constant 192 : index
    %161 = vector.load %arg18[%c0_137, %c192_138] : memref<32x576xbf16, #tpu.memory_space<vmem>>, vector<32x64xbf16>
    tpu.vector_store %arg18[%c0_137, %c192_138], %160 {strides = array<i32>} : memref<32x576xbf16, #tpu.memory_space<vmem>>, vector<32x64xbf16>,
    %162 = vector.extract_strided_slice %149 {offsets = [0, 1, 1, 0], sizes = [2, 4, 4, 64], strides = [1, 1, 1, 1]} : vector<2x6x6x64xbf16> to vector<2x4x4x64xbf16>
    %163 = vector.shape_cast %162 : vector<2x4x4x64xbf16> to vector<32x64xbf16>
    %c0_139 = arith.constant 0 : index
    %c256_140 = arith.constant 256 : index
    %164 = vector.load %arg18[%c0_139, %c256_140] : memref<32x576xbf16, #tpu.memory_space<vmem>>, vector<32x64xbf16>
    tpu.vector_store %arg18[%c0_139, %c256_140], %163 {strides = array<i32>} : memref<32x576xbf16, #tpu.memory_space<vmem>>, vector<32x64xbf16>,
    %165 = vector.extract_strided_slice %149 {offsets = [0, 1, 2, 0], sizes = [2, 4, 4, 64], strides = [1, 1, 1, 1]} : vector<2x6x6x64xbf16> to vector<2x4x4x64xbf16>
    %166 = vector.shape_cast %165 : vector<2x4x4x64xbf16> to vector<32x64xbf16>
    %c0_141 = arith.constant 0 : index
    %c320 = arith.constant 320 : index
    %167 = vector.load %arg18[%c0_141, %c320] : memref<32x576xbf16, #tpu.memory_space<vmem>>, vector<32x64xbf16>
    tpu.vector_store %arg18[%c0_141, %c320], %166 {strides = array<i32>} : memref<32x576xbf16, #tpu.memory_space<vmem>>, vector<32x64xbf16>,
    %168 = vector.extract_strided_slice %149 {offsets = [0, 2, 0, 0], sizes = [2, 4, 4, 64], strides = [1, 1, 1, 1]} : vector<2x6x6x64xbf16> to vector<2x4x4x64xbf16>
    %169 = vector.shape_cast %168 : vector<2x4x4x64xbf16> to vector<32x64xbf16>
    %c0_142 = arith.constant 0 : index
    %c384 = arith.constant 384 : index
    %170 = vector.load %arg18[%c0_142, %c384] : memref<32x576xbf16, #tpu.memory_space<vmem>>, vector<32x64xbf16>
    tpu.vector_store %arg18[%c0_142, %c384], %169 {strides = array<i32>} : memref<32x576xbf16, #tpu.memory_space<vmem>>, vector<32x64xbf16>,
    %171 = vector.extract_strided_slice %149 {offsets = [0, 2, 1, 0], sizes = [2, 4, 4, 64], strides = [1, 1, 1, 1]} : vector<2x6x6x64xbf16> to vector<2x4x4x64xbf16>
    %172 = vector.shape_cast %171 : vector<2x4x4x64xbf16> to vector<32x64xbf16>
    %c0_143 = arith.constant 0 : index
    %c448 = arith.constant 448 : index
    %173 = vector.load %arg18[%c0_143, %c448] : memref<32x576xbf16, #tpu.memory_space<vmem>>, vector<32x64xbf16>
    tpu.vector_store %arg18[%c0_143, %c448], %172 {strides = array<i32>} : memref<32x576xbf16, #tpu.memory_space<vmem>>, vector<32x64xbf16>,
    %174 = vector.extract_strided_slice %149 {offsets = [0, 2, 2, 0], sizes = [2, 4, 4, 64], strides = [1, 1, 1, 1]} : vector<2x6x6x64xbf16> to vector<2x4x4x64xbf16>
    %175 = vector.shape_cast %174 : vector<2x4x4x64xbf16> to vector<32x64xbf16>
    %c0_144 = arith.constant 0 : index
    %c512 = arith.constant 512 : index
    %176 = vector.load %arg18[%c0_144, %c512] : memref<32x576xbf16, #tpu.memory_space<vmem>>, vector<32x64xbf16>
    tpu.vector_store %arg18[%c0_144, %c512], %175 {strides = array<i32>} : memref<32x576xbf16, #tpu.memory_space<vmem>>, vector<32x64xbf16>,
    %c0_145 = arith.constant 0 : index
    %c0_146 = arith.constant 0 : index
    %177 = vector.load %arg18[%c0_145, %c0_146] : memref<32x576xbf16, #tpu.memory_space<vmem>>, vector<32x576xbf16>
    %c0_147 = arith.constant 0 : index
    %c0_148 = arith.constant 0 : index
    %178 = vector.load %arg8[%c0_147, %c0_148] : memref<576x128xbf16, #tpu.memory_space<vmem>>, vector<576x128xbf16>
    %cst_149 = arith.constant dense<0.000000e+00> : vector<32x128xf32>
    %179 = tpu.matmul %177, %178, %cst_149 {dimension_numbers = #tpu.dot_dimension_numbers<[1], [0], [0], [1], [0, 0, 1, 1], [], []>} : vector<32x576xbf16>, vector<576x128xbf16>, vector<32x128xf32> -> vector<32x128xf32>
    %c0_150 = arith.constant 0 : index
    %c0_151 = arith.constant 0 : index
    %180 = vector.load %arg9[%c0_150, %c0_151] : memref<1x128xf32, #tpu.memory_space<vmem>>, vector<1x128xf32>
    %181 = vector.broadcast %180 : vector<1x128xf32> to vector<32x128xf32>
    %182 = arith.mulf %179, %181 : vector<32x128xf32>
    %c0_152 = arith.constant 0 : index
    %c0_153 = arith.constant 0 : index
    %183 = vector.load %arg10[%c0_152, %c0_153] : memref<1x128xf32, #tpu.memory_space<vmem>>, vector<1x128xf32>
    %184 = vector.broadcast %183 : vector<1x128xf32> to vector<32x128xf32>
    %185 = arith.addf %182, %184 : vector<32x128xf32>
    %cst_154 = arith.constant 0.000000e+00 : f32
    %186 = vector.broadcast %cst_154 : f32 to vector<32x128xf32>
    %187 = arith.maximumf %185, %186 : vector<32x128xf32>
    %188 = vector.shape_cast %187 : vector<32x128xf32> to vector<2x4x2x2x128xf32>
    %189 = vector.extract_strided_slice %188 {offsets = [0, 0, 0, 0, 0], sizes = [2, 4, 2, 1, 128], strides = [1, 1, 1, 1, 1]} : vector<2x4x2x2x128xf32> to vector<2x4x2x1x128xf32>
    %190 = vector.shape_cast %189 : vector<2x4x2x1x128xf32> to vector<2x4x2x128xf32>
    %191 = vector.extract_strided_slice %188 {offsets = [0, 0, 0, 1, 0], sizes = [2, 4, 2, 1, 128], strides = [1, 1, 1, 1, 1]} : vector<2x4x2x2x128xf32> to vector<2x4x2x1x128xf32>
    %192 = vector.shape_cast %191 : vector<2x4x2x1x128xf32> to vector<2x4x2x128xf32>
    %193 = arith.maximumf %190, %192 : vector<2x4x2x128xf32>
    %194 = vector.shape_cast %193 : vector<2x4x2x128xf32> to vector<2x2x2x2x128xf32>
    %195 = vector.extract_strided_slice %194 {offsets = [0, 0, 0, 0, 0], sizes = [2, 2, 1, 2, 128], strides = [1, 1, 1, 1, 1]} : vector<2x2x2x2x128xf32> to vector<2x2x1x2x128xf32>
    %196 = vector.shape_cast %195 : vector<2x2x1x2x128xf32> to vector<2x2x2x128xf32>
    %197 = vector.extract_strided_slice %194 {offsets = [0, 0, 1, 0, 0], sizes = [2, 2, 1, 2, 128], strides = [1, 1, 1, 1, 1]} : vector<2x2x2x2x128xf32> to vector<2x2x1x2x128xf32>
    %198 = vector.shape_cast %197 : vector<2x2x1x2x128xf32> to vector<2x2x2x128xf32>
    %199 = arith.maximumf %196, %198 : vector<2x2x2x128xf32>
    %200 = vector.shape_cast %199 : vector<2x2x2x128xf32> to vector<2x4x128xf32>
    %cst_155 = arith.constant dense<0.000000e+00> : vector<2x128xf32>
    %201 = vector.multi_reduction <add>, %200, %cst_155 [1] : vector<2x4x128xf32> to vector<2x128xf32>
    %cst_156 = arith.constant 2.500000e-01 : f32
    %202 = vector.broadcast %cst_156 : f32 to vector<2x128xf32>
    %203 = arith.mulf %201, %202 : vector<2x128xf32>
    %204 = arith.truncf %203 : vector<2x128xf32> to vector<2x128xbf16>
    %c0_157 = arith.constant 0 : index
    %c0_158 = arith.constant 0 : index
    %205 = vector.load %arg11[%c0_157, %c0_158] : memref<128x128xbf16, #tpu.memory_space<vmem>>, vector<128x128xbf16>
    %cst_159 = arith.constant dense<0.000000e+00> : vector<2x128xf32>
    %206 = tpu.matmul %204, %205, %cst_159 {dimension_numbers = #tpu.dot_dimension_numbers<[1], [0], [0], [1], [0, 0, 1, 1], [], []>} : vector<2x128xbf16>, vector<128x128xbf16>, vector<2x128xf32> -> vector<2x128xf32>
    %c0_160 = arith.constant 0 : index
    %c0_161 = arith.constant 0 : index
    %207 = vector.load %arg12[%c0_160, %c0_161] : memref<1x128xf32, #tpu.memory_space<vmem>>, vector<1x128xf32>
    %208 = vector.broadcast %207 : vector<1x128xf32> to vector<2x128xf32>
    %209 = arith.addf %206, %208 : vector<2x128xf32>
    %c0_162 = arith.constant 0 : index
    %c0_163 = arith.constant 0 : index
    %210 = vector.load %arg13[%c0_162, %c0_163] : memref<2x128xf32, #tpu.memory_space<vmem>>, vector<2x128xf32>
    tpu.vector_store %arg13[%c0_162, %c0_163], %209 {strides = array<i32>} : memref<2x128xf32, #tpu.memory_space<vmem>>, vector<2x128xf32>,
    return
  }
  func.func @transform_0(%arg0: i32) -> (i32, i32, i32, i32) {
    %c0_i32 = arith.constant 0 : i32
    %c0_i32_0 = arith.constant 0 : i32
    %c0_i32_1 = arith.constant 0 : i32
    %c0_i32_2 = arith.constant 0 : i32
    return %arg0, %c0_i32, %c0_i32_0, %c0_i32_1 : i32, i32, i32, i32
  }
  func.func @transform_1(%arg0: i32) -> (i32, i32, i32) {
    %c0_i32 = arith.constant 0 : i32
    %c0_i32_0 = arith.constant 0 : i32
    %c0_i32_1 = arith.constant 0 : i32
    %c0_i32_2 = arith.constant 0 : i32
    return %c0_i32, %c0_i32_0, %c0_i32_1 : i32, i32, i32
  }
  func.func @transform_2(%arg0: i32) -> (i32, i32) {
    %c0_i32 = arith.constant 0 : i32
    %c0_i32_0 = arith.constant 0 : i32
    %c0_i32_1 = arith.constant 0 : i32
    return %c0_i32, %c0_i32_0 : i32, i32
  }
  func.func @transform_3(%arg0: i32) -> (i32, i32) {
    %c0_i32 = arith.constant 0 : i32
    %c0_i32_0 = arith.constant 0 : i32
    %c0_i32_1 = arith.constant 0 : i32
    return %c0_i32, %c0_i32_0 : i32, i32
  }
  func.func @transform_4(%arg0: i32) -> (i32, i32) {
    %c0_i32 = arith.constant 0 : i32
    %c0_i32_0 = arith.constant 0 : i32
    %c0_i32_1 = arith.constant 0 : i32
    return %c0_i32, %c0_i32_0 : i32, i32
  }
  func.func @transform_5(%arg0: i32) -> (i32, i32) {
    %c0_i32 = arith.constant 0 : i32
    %c0_i32_0 = arith.constant 0 : i32
    %c0_i32_1 = arith.constant 0 : i32
    return %c0_i32, %c0_i32_0 : i32, i32
  }
  func.func @transform_6(%arg0: i32) -> (i32, i32) {
    %c0_i32 = arith.constant 0 : i32
    %c0_i32_0 = arith.constant 0 : i32
    %c0_i32_1 = arith.constant 0 : i32
    return %c0_i32, %c0_i32_0 : i32, i32
  }
  func.func @transform_7(%arg0: i32) -> (i32, i32) {
    %c0_i32 = arith.constant 0 : i32
    %c0_i32_0 = arith.constant 0 : i32
    %c0_i32_1 = arith.constant 0 : i32
    return %c0_i32, %c0_i32_0 : i32, i32
  }
  func.func @transform_8(%arg0: i32) -> (i32, i32) {
    %c0_i32 = arith.constant 0 : i32
    %c0_i32_0 = arith.constant 0 : i32
    %c0_i32_1 = arith.constant 0 : i32
    return %c0_i32, %c0_i32_0 : i32, i32
  }
  func.func @transform_9(%arg0: i32) -> (i32, i32) {
    %c0_i32 = arith.constant 0 : i32
    %c0_i32_0 = arith.constant 0 : i32
    %c0_i32_1 = arith.constant 0 : i32
    return %c0_i32, %c0_i32_0 : i32, i32
  }
  func.func @transform_10(%arg0: i32) -> (i32, i32) {
    %c0_i32 = arith.constant 0 : i32
    %c0_i32_0 = arith.constant 0 : i32
    %c0_i32_1 = arith.constant 0 : i32
    return %c0_i32, %c0_i32_0 : i32, i32
  }
  func.func @transform_11(%arg0: i32) -> (i32, i32) {
    %c0_i32 = arith.constant 0 : i32
    %c0_i32_0 = arith.constant 0 : i32
    %c0_i32_1 = arith.constant 0 : i32
    return %c0_i32, %c0_i32_0 : i32, i32
  }
  func.func @transform_12(%arg0: i32) -> (i32, i32) {
    %c0_i32 = arith.constant 0 : i32
    %c0_i32_0 = arith.constant 0 : i32
    return %arg0, %c0_i32 : i32, i32
  }
}

</mosaic_0001>

<bundles_post_ra>
// kernel: forward.1
= control target key start
LH: loop header
LB: loop body
LE: loop exit
PB: predicated region body
PF: predicated region fallthrough
CT: control target
= control target key end

     0   :  { %17 = vsyncpa [#allocation8], 0  ;;  %s21811_s0 = inlined_call_operand.hbm [shape: bf16[2,16,16,3], index: 0, kind: input, shape index: {}]   ;;  %s21812_s1 = inlined_call_operand.hbm [shape: bf16[9,3,32], index: 1, kind: input, shape index: {}]   ;;  %s21813_s2 = inlined_call_operand.hbm [shape: f32[1,32], index: 2, kind: input, shape index: {}]   ;;  %s21814_s3 = inlined_call_operand.hbm [shape: f32[1,32], index: 3, kind: input, shape index: {}]   ;;  %s21815_s4 = inlined_call_operand.hbm [shape: bf16[288,64], index: 4, kind: input, shape index: {}]   ;;  %s21816_s5 = inlined_call_operand.hbm [shape: f32[1,64], index: 5, kind: input, shape index: {}]   ;;  %s21817_s6 = inlined_call_operand.hbm [shape: f32[1,64], index: 6, kind: input, shape index: {}]   ;;  %s21818_s7 = inlined_call_operand.hbm [shape: bf16[576,128], index: 7, kind: input, shape index: {}]   ;;  %s21819_s8 = inlined_call_operand.hbm [shape: f32[1,128], index: 8, kind: input, shape index: {}]   ;;  %s21820_s9 = inlined_call_operand.hbm [shape: f32[1,128], index: 9, kind: input, shape index: {}]   ;;  %s21821_s10 = inlined_call_operand.hbm [shape: bf16[128,128], index: 10, kind: input, shape index: {}]   ;;  %s21822_s11 = inlined_call_operand.hbm [shape: f32[1,128], index: 11, kind: input, shape index: {}]   ;;  %s21823_s12 = inlined_call_operand.hbm [shape: f32[2,128], index: 12, kind: output, shape index: {}]  }
   0x1   :  { %18 = vsyncpa [#allocation11], 0 }
   0x2   :  { %19 = vsyncpa [#allocation14], 0 }
   0x3   :  { %20 = vsyncpa [#allocation17], 0 }
   0x4   :  { %21 = vsyncpa [#allocation20], 0 }
   0x5   :  { %22 = vsyncpa [#allocation23], 0 }
   0x6   :  { %23 = vsyncpa [#allocation26], 0 }
   0x7   :  { %24 = vsyncpa [#allocation9], 0  ;;  %s17493_s21 = smov [#allocation10]   ;;  %s17191_s25 = scalar_lea.hbm %s21812_s1, 288 }
   0x8   :  { %s42_s22 = sshll.u32 %s17493_s21, 4  ;;  %p17192_p0 = scmp.ne.s32.totalorder %s21812_s1, %s17191_s25  ;;  %s43_s22 = int_to_ptr.vmem [resolvable:$true] %s42_s22 }
   0x9   :  { %p17195_p1 = scmp.lt.u32.totalorder %s17191_s25, %s21812_s1 }
   0xb   :  { %p17197_p2 = pnand %p17195_p1, %p17192_p0 }
   0xd   :  { %17200 = shalt.err (!%p17197_p2)
}
   0xe   :  { %s17201_s30 = scalar_lea.vmem %s43_s22, 288  ;;  %p17206_p4 = scmp.lt.s32.totalorder %s43_s22, %s43_s22 }
   0xf   :  { %p17202_p3 = scmp.ne.s32.totalorder %s43_s22, %s17201_s30  ;;  %p17207_p5 = scmp.lt.s32.totalorder %s17201_s30, %s17201_s30 }
  0x11   :  { %p17208_p6 = por %p17207_p5, %p17206_p4 }
  0x13   :  { %p17209_p7 = pnand %p17208_p6, %p17202_p3 }
  0x15   :  { %17212 = shalt.err (!%p17209_p7)
}
  0x16   :  { %s17494_s13 = smov 32   ;;  %s17495_s14 = smov 2  }
  0x17   :  { %48 = dma.hbm_to_vmem [thread:$0]  %s21812_s1, 288, %s43_s22, [#allocation11], %s17494_s13, %s17494_s13, %s17495_s14  }
  0x18   :  { %s17496_s17 = smov [#allocation13]   ;;  %s17497_s19 = smov [#allocation16]  }
  0x19   :  { %s65_s18 = sshll.u32 %s17496_s17, 4  ;;  %s87_s20 = sshll.u32 %s17497_s19, 4  ;;  %s66_s18 = int_to_ptr.vmem [resolvable:$true] %s65_s18  ;;  %s88_s20 = int_to_ptr.vmem [resolvable:$true] %s87_s20 }
  0x1a   :  { %s17213_s24 = scalar_lea.hbm %s21814_s3, 16 }
  0x1b   :  { %p17214_p8 = scmp.ne.s32.totalorder %s21814_s3, %s17213_s24  ;;  %p17217_p9 = scmp.lt.u32.totalorder %s17213_s24, %s21814_s3 }
  0x1d   :  { %p17219_p10 = pnand %p17217_p9, %p17214_p8 }
  0x1f   :  { %17222 = shalt.err (!%p17219_p10)
}
  0x20   :  { %s17223_s1 = scalar_lea.vmem %s66_s18, 16  ;;  %s17227_s22 = scalar_lea.vmem %s66_s18, 32 }
  0x21   :  { %p17224_p11 = scmp.ne.s32.totalorder %s66_s18, %s17223_s1  ;;  %p17228_p12 = scmp.lt.s32.totalorder %s66_s18, %s66_s18 }
  0x22   :  { %p17229_p13 = scmp.lt.s32.totalorder %s17227_s22, %s17223_s1 }
  0x24   :  { %p17230_p0 = por %p17229_p13, %p17228_p12 }
  0x26   :  { %p17231_p1 = pnand %p17230_p0, %p17224_p11 }
  0x28   :  { %17234 = shalt.err (!%p17231_p1)
}
  0x29   :  { %68 = dma.hbm_to_vmem [thread:$0]  %s21814_s3, 16, %s66_s18, [#allocation14]  }
  0x2a   :  { %s17235_s16 = scalar_lea.hbm %s21816_s5, 16 }
  0x2b   :  { %p17236_p2 = scmp.ne.s32.totalorder %s21816_s5, %s17235_s16  ;;  %p17239_p3 = scmp.lt.u32.totalorder %s17235_s16, %s21816_s5 }
  0x2d   :  { %p17241_p4 = pnand %p17239_p3, %p17236_p2 }
  0x2f   :  { %17244 = shalt.err (!%p17241_p4)
}
  0x30   :  { %s17245_s24 = scalar_lea.vmem %s88_s20, 16  ;;  %s17249_s25 = scalar_lea.vmem %s88_s20, 32 }
  0x31   :  { %p17246_p5 = scmp.ne.s32.totalorder %s88_s20, %s17245_s24  ;;  %p17250_p6 = scmp.lt.s32.totalorder %s88_s20, %s88_s20 }
  0x32   :  { %p17251_p7 = scmp.lt.s32.totalorder %s17249_s25, %s17245_s24 }
  0x34   :  { %p17252_p8 = por %p17251_p7, %p17250_p6 }
  0x36   :  { %p17253_p9 = pnand %p17252_p8, %p17246_p5 }
  0x38   :  { %17256 = shalt.err (!%p17253_p9)
}
  0x39   :  { %90 = dma.hbm_to_vmem [thread:$0]  %s21816_s5, 16, %s88_s20, [#allocation17]  }
  0x3a   :  { %s17498_s26 = smov [#allocation19]   ;;  %s17499_s28 = smov [#allocation22]  }
  0x3b   :  { %s106_s27 = sshll.u32 %s17498_s26, 4  ;;  %s129_s1 = sshll.u32 %s17499_s28, 4  ;;  %s107_s27 = int_to_ptr.vmem [resolvable:$true] %s106_s27  ;;  %s130_s1 = int_to_ptr.vmem [resolvable:$true] %s129_s1 }
  0x3c   :  { %s17257_s30 = scalar_lea.hbm %s21818_s7, 4608 }
  0x3d   :  { %p17258_p10 = scmp.ne.s32.totalorder %s21818_s7, %s17257_s30  ;;  %p17261_p11 = scmp.lt.u32.totalorder %s17257_s30, %s21818_s7 }
  0x3f   :  { %p17263_p12 = pnand %p17261_p11, %p17258_p10 }
  0x41   :  { %17266 = shalt.err (!%p17263_p12)
}
  0x42   :  { %s17267_s5 = scalar_lea.vmem %s107_s27, 4608  ;;  %p17272_p0 = scmp.lt.s32.totalorder %s107_s27, %s107_s27 }
  0x43   :  { %p17268_p13 = scmp.ne.s32.totalorder %s107_s27, %s17267_s5  ;;  %p17273_p1 = scmp.lt.s32.totalorder %s17267_s5, %s17267_s5 }
  0x45   :  { %p17274_p2 = por %p17273_p1, %p17272_p0 }
  0x47   :  { %p17275_p3 = pnand %p17274_p2, %p17268_p13 }
  0x49   :  { %17278 = shalt.err (!%p17275_p3)
}
  0x4a   :  { %s17500_s20 = smov 64   ;;  %s17501_s19 = smov 4  }
  0x4b   :  { %112 = dma.hbm_to_vmem [thread:$0]  %s21818_s7, 4608, %s107_s27, [#allocation20], %s17500_s20, %s17500_s20, %s17501_s19  }
  0x4c   :  { %s17279_s3 = scalar_lea.hbm %s21820_s9, 16 }
  0x4d   :  { %p17280_p4 = scmp.ne.s32.totalorder %s21820_s9, %s17279_s3  ;;  %p17283_p5 = scmp.lt.u32.totalorder %s17279_s3, %s21820_s9 }
  0x4f   :  { %p17285_p6 = pnand %p17283_p5, %p17280_p4 }
  0x51   :  { %17288 = shalt.err (!%p17285_p6)
}
  0x52   :  { %s17289_s29 = scalar_lea.vmem %s130_s1, 16  ;;  %s17293_s30 = scalar_lea.vmem %s130_s1, 32 }
  0x53   :  { %p17290_p7 = scmp.ne.s32.totalorder %s130_s1, %s17289_s29  ;;  %p17294_p8 = scmp.lt.s32.totalorder %s130_s1, %s130_s1 }
  0x54   :  { %p17295_p9 = scmp.lt.s32.totalorder %s17293_s30, %s17289_s29 }
  0x56   :  { %p17296_p10 = por %p17295_p9, %p17294_p8 }
  0x58   :  { %p17297_p11 = pnand %p17296_p10, %p17290_p7 }
  0x5a   :  { %17300 = shalt.err (!%p17297_p11)
}
  0x5b   :  { %132 = dma.hbm_to_vmem [thread:$0]  %s21820_s9, 16, %s130_s1, [#allocation23]  }
  0x5c   :  { %s17502_s14 = smov [#allocation7]   ;;  %s17503_s16 = smov [#allocation12]  }
  0x5d   :  { %s30_s15 = sshll.u32 %s17502_s14, 4  ;;  %s55_s17 = sshll.u32 %s17503_s16, 4  ;;  %s31_s15 = int_to_ptr.vmem [resolvable:$true] %s30_s15  ;;  %s56_s17 = int_to_ptr.vmem [resolvable:$true] %s55_s17 }
  0x5e   :  { %s17301_s23 = scalar_lea.hbm %s21811_s0, 4096 }
  0x5f   :  { %p17302_p12 = scmp.ne.s32.totalorder %s21811_s0, %s17301_s23  ;;  %p17305_p13 = scmp.lt.u32.totalorder %s17301_s23, %s21811_s0 }
  0x61   :  { %p17307_p0 = pnand %p17305_p13, %p17302_p12 }
  0x63   :  { %17310 = shalt.err (!%p17307_p0)
}
  0x64   :  { %s17311_s9 = scalar_lea.vmem %s31_s15, 4096  ;;  %p17316_p2 = scmp.lt.s32.totalorder %s31_s15, %s31_s15 }
  0x65   :  { %p17312_p1 = scmp.ne.s32.totalorder %s31_s15, %s17311_s9  ;;  %p17317_p3 = scmp.lt.s32.totalorder %s17311_s9, %s17311_s9 }
  0x67   :  { %p17318_p4 = por %p17317_p3, %p17316_p2 }
  0x69   :  { %p17319_p5 = pnand %p17318_p4, %p17312_p1 }
  0x6b   :  { %17322 = shalt.err (!%p17319_p5)
}
  0x6c   :  { %36 = dma.hbm_to_vmem [thread:$0]  %s21811_s0, 4096, %s31_s15, [#allocation8], %s17500_s20, %s17500_s20, %s17501_s19  }
  0x6d   :  { %s17323_s29 = scalar_lea.hbm %s21813_s2, 16 }
  0x6e   :  { %p17324_p6 = scmp.ne.s32.totalorder %s21813_s2, %s17323_s29  ;;  %p17327_p7 = scmp.lt.u32.totalorder %s17323_s29, %s21813_s2 }
  0x70   :  { %p17329_p8 = pnand %p17327_p7, %p17324_p6 }
  0x72   :  { %17332 = shalt.err (!%p17329_p8)
}
  0x73   :  { %s17333_s16 = scalar_lea.vmem %s56_s17, 16  ;;  %s17337_s5 = scalar_lea.vmem %s56_s17, 32 }
  0x74   :  { %p17334_p9 = scmp.ne.s32.totalorder %s56_s17, %s17333_s16  ;;  %p17338_p10 = scmp.lt.s32.totalorder %s56_s17, %s56_s17 }
  0x75   :  { %p17339_p11 = scmp.lt.s32.totalorder %s17337_s5, %s17333_s16 }
  0x77   :  { %p17340_p12 = por %p17339_p11, %p17338_p10 }
  0x79   :  { %p17341_p13 = pnand %p17340_p12, %p17334_p9 }
  0x7b   :  { %17344 = shalt.err (!%p17341_p13)
}
  0x7c   :  { %58 = dma.hbm_to_vmem [thread:$0]  %s21813_s2, 16, %s56_s17, [#allocation11]  }
  0x7d   :  { %s17504_s21 = smov [#allocation15]   ;;  %s17505_s24 = smov [#allocation18]  }
  0x7e   :  { %s74_s23 = sshll.u32 %s17504_s21, 4  ;;  %s97_s25 = sshll.u32 %s17505_s24, 4  ;;  %s75_s23 = int_to_ptr.vmem [resolvable:$true] %s74_s23  ;;  %s98_s25 = int_to_ptr.vmem [resolvable:$true] %s97_s25 }
  0x7f   :  { %s17345_s9 = scalar_lea.hbm %s21815_s4, 2304 }
  0x80   :  { %p17346_p0 = scmp.ne.s32.totalorder %s21815_s4, %s17345_s9  ;;  %p17349_p1 = scmp.lt.u32.totalorder %s17345_s9, %s21815_s4 }
  0x82   :  { %p17351_p2 = pnand %p17349_p1, %p17346_p0 }
  0x84   :  { %17354 = shalt.err (!%p17351_p2)
}
  0x85   :  { %s17355_s2 = scalar_lea.vmem %s75_s23, 2304  ;;  %p17360_p4 = scmp.lt.s32.totalorder %s75_s23, %s75_s23 }
  0x86   :  { %p17356_p3 = scmp.ne.s32.totalorder %s75_s23, %s17355_s2  ;;  %p17361_p5 = scmp.lt.s32.totalorder %s17355_s2, %s17355_s2 }
  0x88   :  { %p17362_p6 = por %p17361_p5, %p17360_p4 }
  0x8a   :  { %p17363_p7 = pnand %p17362_p6, %p17356_p3 }
  0x8c   :  { %17366 = shalt.err (!%p17363_p7)
}
  0x8d   :  { %80 = dma.hbm_to_vmem [thread:$0]  %s21815_s4, 2304, %s75_s23, [#allocation14], %s17500_s20, %s17500_s20, %s17501_s19  }
  0x8e   :  { %s17367_s27 = scalar_lea.hbm %s21817_s6, 16 }
  0x8f   :  { %p17368_p8 = scmp.ne.s32.totalorder %s21817_s6, %s17367_s27  ;;  %p17371_p9 = scmp.lt.u32.totalorder %s17367_s27, %s21817_s6 }
  0x91   :  { %p17373_p10 = pnand %p17371_p9, %p17368_p8 }
  0x93   :  { %17376 = shalt.err (!%p17373_p10)
}
  0x94   :  { %s17377_s15 = scalar_lea.vmem %s98_s25, 16  ;;  %s17381_s21 = scalar_lea.vmem %s98_s25, 32 }
  0x95   :  { %p17378_p11 = scmp.ne.s32.totalorder %s98_s25, %s17377_s15  ;;  %p17382_p12 = scmp.lt.s32.totalorder %s98_s25, %s98_s25 }
  0x96   :  { %p17383_p13 = scmp.lt.s32.totalorder %s17381_s21, %s17377_s15 }
  0x98   :  { %p17384_p0 = por %p17383_p13, %p17382_p12 }
  0x9a   :  { %p17385_p1 = pnand %p17384_p0, %p17378_p11 }
  0x9c   :  { %17388 = shalt.err (!%p17385_p1)
}
  0x9d   :  { %100 = dma.hbm_to_vmem [thread:$0]  %s21817_s6, 16, %s98_s25, [#allocation17]  }
  0x9e   :  { %s17506_s24 = smov [#allocation21]   ;;  %s17507_s18 = smov [#allocation24]  }
  0x9f   :  { %s119_s3 = sshll.u32 %s17506_s24, 4  ;;  %s138_s9 = sshll.u32 %s17507_s18, 4  ;;  %s120_s3 = int_to_ptr.vmem [resolvable:$true] %s119_s3  ;;  %s139_s9 = int_to_ptr.vmem [resolvable:$true] %s138_s9 }
  0xa0   :  { %s17389_s28 = scalar_lea.hbm %s21819_s8, 16 }
  0xa1   :  { %p17390_p2 = scmp.ne.s32.totalorder %s21819_s8, %s17389_s28  ;;  %p17393_p3 = scmp.lt.u32.totalorder %s17389_s28, %s21819_s8 }
  0xa3   :  { %p17395_p4 = pnand %p17393_p3, %p17390_p2 }
  0xa5   :  { %17398 = shalt.err (!%p17395_p4)
}
  0xa6   :  { %s17399_s6 = scalar_lea.vmem %s120_s3, 16  ;;  %s17403_s25 = scalar_lea.vmem %s120_s3, 32 }
  0xa7   :  { %p17400_p5 = scmp.ne.s32.totalorder %s120_s3, %s17399_s6  ;;  %p17404_p6 = scmp.lt.s32.totalorder %s120_s3, %s120_s3 }
  0xa8   :  { %p17405_p7 = scmp.lt.s32.totalorder %s17403_s25, %s17399_s6 }
  0xaa   :  { %p17406_p8 = por %p17405_p7, %p17404_p6 }
  0xac   :  { %p17407_p9 = pnand %p17406_p8, %p17400_p5 }
  0xae   :  { %17410 = shalt.err (!%p17407_p9)
}
  0xaf   :  { %122 = dma.hbm_to_vmem [thread:$0]  %s21819_s8, 16, %s120_s3, [#allocation20]  }
  0xb0   :  { %s17411_s16 = scalar_lea.hbm %s21821_s10, 1024 }
  0xb1   :  { %p17412_p10 = scmp.ne.s32.totalorder %s21821_s10, %s17411_s16  ;;  %p17415_p11 = scmp.lt.u32.totalorder %s17411_s16, %s21821_s10 }
  0xb3   :  { %p17417_p12 = pnand %p17415_p11, %p17412_p10 }
  0xb5   :  { %17420 = shalt.err (!%p17417_p12)
}
  0xb6   :  { %s17421_s4 = scalar_lea.vmem %s139_s9, 1024  ;;  %p17426_p0 = scmp.lt.s32.totalorder %s139_s9, %s139_s9 }
  0xb7   :  { %p17422_p13 = scmp.ne.s32.totalorder %s139_s9, %s17421_s4  ;;  %p17427_p1 = scmp.lt.s32.totalorder %s17421_s4, %s17421_s4 }
  0xb9   :  { %p17428_p2 = por %p17427_p1, %p17426_p0 }
  0xbb   :  { %p17429_p3 = pnand %p17428_p2, %p17422_p13 }
  0xbd   :  { %17432 = shalt.err (!%p17429_p3)
}
  0xbe   :  { %144 = dma.hbm_to_vmem [thread:$0]  %s21821_s10, 1024, %s139_s9, [#allocation23], %s17500_s20, %s17500_s20, %s17501_s19  }
  0xbf   :  { %s17508_s24 = smov [#allocation25]   ;;  %s17433_s26 = scalar_lea.hbm %s21822_s11, 16 }
  0xc0   :  { %s151_s3 = sshll.u32 %s17508_s24, 4  ;;  %p17434_p4 = scmp.ne.s32.totalorder %s21822_s11, %s17433_s26  ;;  %s152_s3 = int_to_ptr.vmem [resolvable:$true] %s151_s3 }
  0xc1   :  { %p17437_p5 = scmp.lt.u32.totalorder %s17433_s26, %s21822_s11 }
  0xc3   :  { %p17439_p6 = pnand %p17437_p5, %p17434_p4 }
  0xc5   :  { %17442 = shalt.err (!%p17439_p6)
}
  0xc6   :  { %s17443_s29 = scalar_lea.vmem %s152_s3, 16  ;;  %s17447_s10 = scalar_lea.vmem %s152_s3, 32 }
  0xc7   :  { %p17444_p7 = scmp.ne.s32.totalorder %s152_s3, %s17443_s29  ;;  %p17448_p8 = scmp.lt.s32.totalorder %s152_s3, %s152_s3 }
  0xc8   :  { %p17449_p9 = scmp.lt.s32.totalorder %s17447_s10, %s17443_s29 }
  0xca   :  { %p17450_p10 = por %p17449_p9, %p17448_p8 }
  0xcc   :  { %p17451_p11 = pnand %p17450_p10, %p17444_p7 }
  0xce   :  { %17454 = shalt.err (!%p17451_p11)
}
  0xcf   :  { %154 = dma.hbm_to_vmem [thread:$0]  %s21822_s11, 16, %s152_s3, [#allocation26]  }
  0xd0   :  { %17477 = dma.done.wait [#allocation8], 4096  }
  0xd1   :  { %17478 = vsyncadd [#allocation8], 4294963200 }
  0xd2   :  { %17479 = dma.done.wait [#allocation11], 304  }
  0xd3   :  { %17480 = vsyncadd [#allocation11], 4294966992 }
  0xd4   :  { %17481 = dma.done.wait [#allocation14], 2320  }
  0xd5   :  { %17482 = vsyncadd [#allocation14], 4294964976 }
  0xd6   :  { %17483 = dma.done.wait [#allocation17], 32  }
  0xd7   :  { %17484 = vsyncadd [#allocation17], 4294967264 }
  0xd8   :  { %17485 = dma.done.wait [#allocation20], 4624  }
  0xd9   :  { %17486 = vsyncadd [#allocation20], 4294962672 }
  0xda   :  { %17487 = dma.done.wait [#allocation23], 1040  }
  0xdb   :  { %17488 = vsyncadd [#allocation23], 4294966256 }
  0xdc   :  { %17489 = dma.done.wait [#allocation26], 16  }
  0xdd   :  { %17490 = vsyncadd [#allocation26], 4294967280  ;;  %vm2436_vm0 = vcmask 1040384   ;;  %vm192_vm1 = vcmask 19456   ;;  %vm2437_vm2 = vcmask 1041408   ;;  %v17509_v0 = vmov 65535  }
  0xde   :  { %v2438_v1 = vsel %vm2436_vm0, 4294967295, %v17509_v0  ;;  %vm195_vm3 = vcmask 16384   ;;  %vm208_vm4 = vsmask.f32 256  ;;  %v21824_v2 = vmov 0   ;;  %s17512_s11 = smov 96  }
  0xdf   :  { %193 = vst.msk [vmem:[#allocation2] sm:$0xf] %vm192_vm1, %v21824_v2  ;;  %194 = vst.msk [vmem:[#allocation2 + $0x4] sm:$0xf] %vm192_vm1, %v21824_v2  ;;  %v17765_v3 = vsel %vm2437_vm2, %v2438_v1, 0  ;;  %v21925_v32 = vmov 0 }
  0xe0   :  { %196 = vst.msk [vmem:[#allocation2 + $0x8] sm:$0x1] %vm195_vm3, %v21824_v2  ;;  %199 = vst.msk [vmem:[#allocation2 + $0xe0] sm:$0x1] %vm195_vm3, %v21824_v2  ;;  %vm318_vm6 = vsmask.f32 7938 }
  0xe1   :  { %197 = vst.msk [vmem:[#allocation2 + $0xd8] sm:$0xf] %vm192_vm1, %v21824_v2  ;;  %198 = vst.msk [vmem:[#allocation2 + $0xdc] sm:$0xf] %vm192_vm1, %v21824_v2  ;;  %vm492_vm7 = vsmask.f32 4368 }
  0xe2   :  { %201 = vst.msk [vmem:[#allocation2 + $0xcc] sm:$0xf] %vm192_vm1, %v21824_v2  ;;  %202 = vst.msk [vmem:[#allocation2 + $0xd0] sm:$0xf] %vm192_vm1, %v21824_v2  ;;  %v4090_v5 = vld [vmem:[#allocation10 + $0x6] sm:$0x3] }
  0xe3   :  { %203 = vst.msk [vmem:[#allocation2 + $0xd4] sm:$0x1] %vm195_vm3, %v21824_v2  ;;  %206 = vst.msk [vmem:[#allocation2 + $0x1ac] sm:$0x1] %vm195_vm3, %v21824_v2  ;;  %v213_v6 = vld [vmem:[#allocation2 + $0xc] sm:$0x1]  ;;  %v17774_v8 = vand.u32 %v4090_v5, %v17765_v3 }
  0xe4   :  { %204 = vst.msk [vmem:[#allocation2 + $0x1a4] sm:$0xf] %vm192_vm1, %v21824_v2  ;;  %205 = vst.msk [vmem:[#allocation2 + $0x1a8] sm:$0xf] %vm192_vm1, %v21824_v2  ;;  %v428_v7 = vld [vmem:[#allocation7] sm:$0xf] }
  0xe5   :  { %vm17769_vm5 = vmand %vm195_vm3, %vm208_vm4  ;;  %v429_v10 = vld [vmem:[#allocation7 + $0x4] sm:$0xf]  ;;  %v495_v11 = vshrl.u32 %v428_v7, 16  ;;  %v498_v12 = vshll.u32 %v428_v7, 16  ;;  %v216_v15 = vld [vmem:[#allocation2 + $0x18] sm:$0x1]  ;;  %16024 = vmatprep.subr.bf16.mxu0 %v17774_v8 }
  0xe6   :  { %v214_v9 = vsel %vm17769_vm5, 0, %v213_v6  ;;  %v503_v13 = vshrl.u32 %v429_v10, 16  ;;  %v506_v14 = vshll.u32 %v429_v10, 16  ;;  %v430_v16 = vld [vmem:[#allocation7 + $0x8] sm:$0xf]  ;;  %v217_v18 = vsel %vm17769_vm5, 0, %v216_v15  ;;  %16025 = vmatpush3.bf16.msra.mxu0 %v17774_v8  ;;  %vm17786_vm8 = vmor %vm208_vm4, %vm492_vm7 }
  0xe7   :  { %215 = vst [vmem:[#allocation2 + $0xc] sm:$0x1] %v214_v9  ;;  %v497_v17 = vrot.slane %v495_v11, 7  ;;  %v431_v19 = vld [vmem:[#allocation7 + $0xc] sm:$0xf]  ;;  %v512_v20 = vshrl.u32 %v430_v16, 16  ;;  %vm17795_vm9 = vmand %vm195_vm3, %vm318_vm6 }
  0xe8   :  { %v17782_v21 = vrot.slane %v503_v13, 7  ;;  %218 = vst [vmem:[#allocation2 + $0x18] sm:$0x1] %v217_v18  ;;  %v515_v22 = vshll.u32 %v430_v16, 16  ;;  %v520_v23 = vshrl.u32 %v431_v19, 16  ;;  %v523_v24 = vshll.u32 %v431_v19, 16  ;;  %vm17805_vm10 = vmand %vm192_vm1, %vm318_vm6 }
  0xe9   :  { %v4512_v25 = vld [vmem:[#allocation10 + $0x8] sm:$0x3]  ;;  %v501_v27 = vrot.slane %v497_v17, 4  ;;  %v514_v28 = vrot.slane %v512_v20, 7  ;;  %v2242_v30 = vld [vmem:[#allocation10 + $0x2] sm:$0x3]  ;;  %v500_v33 = vor.u32 %v498_v12, %v497_v17 }
  0xea   :  { %v17791_v29 = vand.u32 %v4512_v25, %v17765_v3  ;;  %v210_v31 = vld [vmem:[#allocation2] sm:$0x1]  ;;  %v21926_v32 = vsel %vm17795_vm9, 4294967295, %v21925_v32  ;;  %v508_v34 = vor.u32 %v506_v14, %v17782_v21  ;;  %v17800_v35 = vrot.slane %v520_v23, 7  ;;  %v320_v37 = vld [vmem:[#allocation2 + $0x8] sm:$0x1] }
  0xeb   :  { %21927 = vst [vmem:[#allocation36_spill] sm:$0xff] %v21926_v32  ;;  %v2441_v36 = vand.u32 %v17765_v3, %v2242_v30  ;;  %v1362_v38 = vld [vmem:[#allocation2 + $0x4] sm:$0xf]  ;;  %v518_v40 = vrot.slane %v514_v28, 4  ;;  %v211_v41 = vsel %vm17769_vm5, 0, %v210_v31  ;;  %v321_v42 = vsel %vm17795_vm9, 0, %v320_v37 }
  0xec   :  { %16090 = vmatprep.subr.bf16.mxu0 %v17791_v29  ;;  %v219_v43 = vld [vmem:[#allocation2 + $0x24] sm:$0x1]  ;;  %v509_v44 = vsel %vm17786_vm8, %v501_v27, %v508_v34  ;;  %v517_v45 = vor.u32 %v515_v22, %v514_v28  ;;  %v525_v46 = vor.u32 %v523_v24, %v17800_v35  ;;  %212 = vst [vmem:[#allocation2] sm:$0x1] %v211_v41  ;;  %322 = vst [vmem:[#allocation2 + $0x8] sm:$0x1] %v321_v42 }
  0xed   :  { %15826 = vmatprep.subr.bf16.mxu1 %v2441_v36  ;;  %v1483_v47 = vshll.u32 %v1362_v38, 16  ;;  %v432_v48 = vld [vmem:[#allocation7 + $0x10] sm:$0xf]  ;;  %v433_v49 = vld [vmem:[#allocation7 + $0x14] sm:$0xf]  ;;  %v1487_v51 = vshrl.u32 %v1362_v38, 16 }
  0xee   :  { %v1137_v50 = vld [vmem:[#allocation2 + $0xc] sm:$0xf]  ;;  %1140 = vst.msk [vmem:[#allocation2 + $0x10] sm:$0xf] %vm192_vm1, %v509_v44  ;;  %15827 = vmatpush3.bf16.msra.mxu1 %v2441_v36  ;;  %v220_v52 = vsel %vm17769_vm5, 0, %v219_v43  ;;  %v529_v53 = vshrl.u32 %v432_v48, 16  ;;  %v526_v55 = vsel %vm17786_vm8, %v518_v40, %v525_v46 }
  0xef   :  { %v1138_v54 = vsel %vm17805_vm10, %v500_v33, %v1137_v50  ;;  %221 = vst [vmem:[#allocation2 + $0x24] sm:$0x1] %v220_v52  ;;  %v532_v56 = vshll.u32 %v432_v48, 16  ;;  %v537_v57 = vshrl.u32 %v433_v49, 16  ;;  %v323_v58 = vld [vmem:[#allocation2 + $0x14] sm:$0x1] }
  0xf0   :  { %v222_v59 = vld [vmem:[#allocation2 + $0x30] sm:$0x1]  ;;  %1139 = vst [vmem:[#allocation2 + $0xc] sm:$0xf] %v1138_v54  ;;  %v1144_v60 = vld [vmem:[#allocation2 + $0x18] sm:$0xf] }
  0xf1   :  { %1147 = vst.msk [vmem:[#allocation2 + $0x1c] sm:$0xf] %vm192_vm1, %v526_v55  ;;  %v17825_v61 = vrot.slane %v1483_v47, 5  ;;  %v531_v62 = vrot.slane %v529_v53, 7  ;;  %v540_v63 = vshll.u32 %v433_v49, 16  ;;  %v324_v0 = vsel %vm17795_vm9, 0, %v323_v58 }
  0xf2   :  { %v1145_v1 = vsel %vm17805_vm10, %v517_v45, %v1144_v60  ;;  %v1489_v5 = vrot.slane %v1487_v51, 4  ;;  %v17831_v6 = vrot.slane %v537_v57, 7  ;;  %325 = vst [vmem:[#allocation2 + $0x14] sm:$0x1] %v324_v0  ;;  %v223_v7 = vsel %vm17769_vm5, 0, %v222_v59 }
  0xf3   :  { %v434_v9 = vld [vmem:[#allocation7 + $0x18] sm:$0xf]  ;;  %1146 = vst [vmem:[#allocation2 + $0x18] sm:$0xf] %v1145_v1  ;;  %v535_v10 = vrot.slane %v531_v62, 4  ;;  %v534_v12 = vor.u32 %v532_v56, %v531_v62  ;;  %v510_v14 = vrot.slane %v17782_v21, 4 }
  0xf4   :  { %224 = vst [vmem:[#allocation2 + $0x30] sm:$0x1] %v223_v7  ;;  %v546_v11 = vshrl.u32 %v434_v9, 16  ;;  %vm1470_vm11 = vsmask.f32 3328  ;;  %v542_v13 = vor.u32 %v540_v63, %v17831_v6  ;;  %vm2339_vm13 = vcmask 23552  }
  0xf5   :  { %vm1471_vm12 = vsmask.f32 7440  ;;  %v1361_v15 = vld [vmem:[#allocation2] sm:$0xf]  ;;  %v1363_v16 = vld [vmem:[#allocation2 + $0x8] sm:$0x1]  ;;  %v1490_v20 = vor.u32 %v1489_v5, %v17825_v61 }
  0xf6   :  { %v17837_v17 = vld [vmem:[#allocation2 + $0x10] sm:$0xf]  ;;  %v1474_v18 = vshrl.u32 %v1361_v15, 16  ;;  %v1477_v19 = vshll.u32 %v1361_v15, 16  ;;  %v17840_v22 = vld [vmem:[#allocation7 + $0x1c] sm:$0xf]  ;;  %v543_v24 = vsel %vm17786_vm8, %v535_v10, %v542_v13  ;;  %vm17881_vm14 = vmor %vm1470_vm11, %vm1471_vm12 }
  0xf7   :  { %v1493_v23 = vshll.u32 %v1363_v16, 16  ;;  %v1151_v25 = vld [vmem:[#allocation2 + $0x24] sm:$0xf]  ;;  %v17844_v27 = vrot.slane %v546_v11, 7  ;;  %v549_v28 = vshll.u32 %v434_v9, 16  ;;  %v1507_v30 = vshll.u32 %v17837_v17, 16 }
  0xf8   :  { %v17846_v21 = vld [vmem:[#allocation2 + $0xc] sm:$0xf]  ;;  %v1511_v31 = vshrl.u32 %v17837_v17, 16  ;;  %v21827_v33 = vrot.slane %v17837_v17, 5  ;;  %v1152_v34 = vsel %vm17805_vm10, %v534_v12, %v1151_v25  ;;  %1154 = vst.msk [vmem:[#allocation2 + $0x28] sm:$0xf] %vm192_vm1, %v543_v24 }
  0xf9   :  { %v1498_v36 = vshrl.u32 %v17846_v21, 16  ;;  %v1501_v37 = vshll.u32 %v17846_v21, 16  ;;  %v17856_v38 = vld [vmem:[#allocation2 + $0x1c] sm:$0xf]  ;;  %v1476_v40 = vrot.slane %v1474_v18, 4  ;;  %v1479_v41 = vrot.slane %v1477_v19, 5 }
  0xfa   :  { %1153 = vst [vmem:[#allocation2 + $0x24] sm:$0xf] %v1152_v34  ;;  %v17860_v42 = vcombine.low %v17846_v21, %v17837_v17  ;;  %v527_v43 = vrot.slane %v17800_v35, 4  ;;  %v17863_v44 = vld [vmem:[#allocation2 + $0x18] sm:$0xf]  ;;  %v544_v45 = vrot.slane %v17831_v6, 4  ;;  %v551_v51 = vor.u32 %v549_v28, %v17844_v27 }
  0xfb   :  { %v554_v46 = vshrl.u32 %v17840_v22, 16  ;;  %v1500_v47 = vrot.slane %v1498_v36, 4  ;;  %v1503_v48 = vrot.slane %v1501_v37, 5  ;;  %v1491_v49 = vrot.slane %v1490_v20, 4  ;;  %v1141_v50 = vld [vmem:[#allocation2 + $0x14] sm:$0x1] }
  0xfc   :  { %v17868_v52 = vrot.slane %v1507_v30, 5  ;;  %v17870_v53 = vrot.slane %v1511_v31, 4  ;;  %16026 = vmatprep.mubr.msk.bf16.mxu0 %vm2339_vm13, %v17860_v42  ;;  %v17877_v55 = vcombine.low %v17863_v44, %v17856_v38  ;;  %v21930_v56 = vmov 0  ;;  %v1158_v62 = vld [vmem:[#allocation2 + $0x30] sm:$0xf] }
  0xfd   :  { %v21931_v56 = vsel %vm17881_vm14, 4294967295, %v21930_v56  ;;  %v1504_v57 = vor.u32 %v1503_v48, %v1500_v47  ;;  %v17887_v58 = vrot.slane %v21827_v33, 4  ;;  %v1480_v59 = vor.u32 %v1479_v41, %v1476_v40  ;;  %v326_v63 = vld [vmem:[#allocation2 + $0x20] sm:$0x1]  ;;  %v225_v19 = vld [vmem:[#allocation2 + $0x3c] sm:$0x1] }
  0xfe   :  { %21932 = vst [vmem:[#allocation37_spill] sm:$0xff] %v21931_v56  ;;  %v1495_v60 = vrot.slane %v1493_v23, 5  ;;  %v1522_v0 = vshrl.u32 %v17863_v44, 16  ;;  %v1535_v1 = vshrl.u32 %v17856_v38, 16  ;;  %16027 = vmatmul.mubr.msk.bf16.vlgmr.msra.gmra.mrb[0].mxu0 %vm2339_vm13, %v17877_v55  ;;  %v1142_v5 = vsel %vm17769_vm5, %v510_v14, %v1141_v50  ;;  %v436_v25 = vld [vmem:[#allocation7 + $0x20] sm:$0xf] }
  0xff   :  { %v17895_v7 = vrot.slane %v554_v46, 7  ;;  %v1525_v9 = vshll.u32 %v17863_v44, 16  ;;  %16091 = vmatpush3.bf16.msra.mxu0 %v17791_v29  ;;  %v1481_v10 = vrot.slane %v1480_v59, 4  ;;  %v17901_v12 = vld [vmem:[#allocation2 + $0x28] sm:$0xf]  ;;  %v557_v13 = vshll.u32 %v17840_v22, 16 }
 0x100   :  { %v1496_v11 = vsel %vm17881_vm14, %v1491_v49, %v1495_v60  ;;  %1143 = vst [vmem:[#allocation2 + $0x14] sm:$0x1] %v1142_v5  ;;  %v1514_v15 = vor.u32 %v17870_v53, %v17868_v52  ;;  %v552_v14 = vrot.slane %v17844_v27, 4  ;;  %v1159_v18 = vsel %vm17805_vm10, %v551_v51, %v1158_v62  ;;  %v437_v27 = vld [vmem:[#allocation7 + $0x24] sm:$0xf] }
 0x101   :  { %v1370_v16 = vld [vmem:[#allocation2 + $0x24] sm:$0xf]  ;;  %v327_v29 = vsel %vm17795_vm9, 0, %v326_v63  ;;  %v17911_v20 = vrot.slane %v1504_v57, 4  ;;  %v1486_v23 = vsel %vm17881_vm14, %v1481_v10, %v17825_v61  ;;  %1160 = vst [vmem:[#allocation2 + $0x30] sm:$0xf] %v1159_v18  ;;  %v559_v31 = vor.u32 %v557_v13, %v17895_v7 }
 0x102   :  { %v1546_v22 = vshrl.u32 %v1370_v16, 16  ;;  %v17917_v24 = vcombine.low %v1370_v16, %v17901_v12  ;;  %328 = vst [vmem:[#allocation2 + $0x20] sm:$0x1] %v327_v29  ;;  %v14099_v28 = vcombine.low %v1486_v23, %v1496_v11  ;;  %v1549_v30 = vshll.u32 %v1370_v16, 16  ;;  %v329_v36 = vld [vmem:[#allocation2 + $0x2c] sm:$0x1] }
 0x103   :  { %v1524_v34 = vrot.slane %v1522_v0, 4  ;;  %v1527_v37 = vrot.slane %v1525_v9, 5  ;;  %v1531_v61 = vshll.u32 %v17856_v38, 16  ;;  %v17923_v40 = vrot.slane %v1535_v1, 4  ;;  %v228_v18 = vld [vmem:[#allocation2 + $0x48] sm:$0x1] }
 0x104   :  { %16030 = vmatprep.mubr.msk.bf16.mxu0 %vm2339_vm13, %v17917_v24  ;;  %v226_v41 = vsel %vm17769_vm5, 0, %v225_v19  ;;  %15828 = vmatprep.mubr.msk.bf16.mxu1 %vm2339_vm13, %v14099_v28  ;;  %v560_v46 = vsel %vm17786_vm8, %v552_v14, %v559_v31  ;;  %v563_v47 = vshrl.u32 %v436_v25, 16  ;;  %v566_v48 = vshll.u32 %v436_v25, 16  ;;  %v439_v25 = vld [vmem:[#allocation7 + $0x2c] sm:$0xf] }
 0x105   :  { %227 = vst [vmem:[#allocation2 + $0x3c] sm:$0x1] %v226_v41  ;;  %v571_v49 = vshrl.u32 %v437_v27, 16  ;;  %1161 = vst.msk [vmem:[#allocation2 + $0x34] sm:$0xf] %vm192_vm1, %v560_v46  ;;  %v1528_v50 = vor.u32 %v1527_v37, %v1524_v34  ;;  %v17931_v51 = vrot.slane %v1531_v61, 5  ;;  %v1510_v29 = vsel %vm17881_vm14, %v17911_v20, %v17868_v52 }
 0x106   :  { %v574_v38 = vshll.u32 %v437_v27, 16  ;;  %v330_v53 = vsel %vm17795_vm9, 0, %v329_v36  ;;  %v565_v59 = vrot.slane %v563_v47, 7  ;;  %v1548_v62 = vrot.slane %v1546_v22, 4  ;;  %v438_v22 = vld [vmem:[#allocation7 + $0x28] sm:$0xf] }
 0x107   :  { %v1366_v57 = vld [vmem:[#allocation2 + $0x14] sm:$0x1]  ;;  %v17935_v60 = vrot.slane %v571_v49, 7  ;;  %331 = vst [vmem:[#allocation2 + $0x2c] sm:$0x1] %v330_v53  ;;  %v1551_v63 = vrot.slane %v1549_v30, 5  ;;  %v1538_v28 = vor.u32 %v17923_v40, %v17931_v51 }
 0x108   :  { %v1515_v0 = vrot.slane %v1514_v15, 4  ;;  %v1559_v1 = vshrl.u32 %v17901_v12, 16  ;;  %v1517_v5 = vshll.u32 %v1366_v57, 16  ;;  %v561_v9 = vrot.slane %v17895_v7, 4  ;;  %v1373_v27 = vld [vmem:[#allocation2 + $0x30] sm:$0xf] }
 0x109   :  { %v1148_v10 = vld [vmem:[#allocation2 + $0x20] sm:$0x1]  ;;  %v17939_v11 = vrot.slane %v1528_v50, 4  ;;  %v568_v13 = vor.u32 %v566_v48, %v565_v59  ;;  %v569_v16 = vrot.slane %v565_v59, 4  ;;  %v576_v14 = vor.u32 %v574_v38, %v17935_v60  ;;  %v332_v31 = vld [vmem:[#allocation2 + $0x38] sm:$0x1] }
 0x10a   :  { %v1519_v19 = vrot.slane %v1517_v5, 5  ;;  %v1149_v15 = vsel %vm17769_vm5, %v527_v43, %v1148_v10  ;;  %v1555_v23 = vshll.u32 %v17901_v12, 16  ;;  %v578_v52 = vrot.slane %v17935_v60, 4  ;;  %v231_v47 = vld [vmem:[#allocation2 + $0x54] sm:$0x1] }
 0x10b   :  { %1150 = vst [vmem:[#allocation2 + $0x20] sm:$0x1] %v1149_v15  ;;  %v577_v30 = vsel %vm17786_vm8, %v569_v16, %v576_v14  ;;  %v1552_v20 = vor.u32 %v1551_v63, %v1548_v62  ;;  %v1570_v43 = vshrl.u32 %v1373_v27, 16  ;;  %v1573_v34 = vshll.u32 %v1373_v27, 16  ;;  %v6076_v4 = vld [vmem:[#allocation10 + $0x10] sm:$0x3] }
 0x10c   :  { %v1520_v35 = vsel %vm17881_vm14, %v1515_v0, %v1519_v19  ;;  %v1165_v12 = vld [vmem:[#allocation2 + $0x3c] sm:$0xf]  ;;  %1168 = vst.msk [vmem:[#allocation2 + $0x40] sm:$0xf] %vm192_vm1, %v577_v30  ;;  %v229_v36 = vsel %vm17769_vm5, 0, %v228_v18  ;;  %v1534_v40 = vsel %vm17881_vm14, %v17939_v11, %v17931_v51  ;;  %v580_v46 = vshrl.u32 %v438_v22, 16 }
 0x10d   :  { %v17961_v37 = vcombine.low %v1510_v29, %v1520_v35  ;;  %v1374_v61 = vld [vmem:[#allocation2 + $0x34] sm:$0xf]  ;;  %v1166_v41 = vsel %vm17805_vm10, %v568_v13, %v1165_v12  ;;  %230 = vst [vmem:[#allocation2 + $0x48] sm:$0x1] %v229_v36  ;;  %v17971_v50 = vrot.slane %v1555_v23, 5  ;;  %v1561_v38 = vrot.slane %v1559_v1, 4 }
 0x10e   :  { %v17969_v48 = vcombine.low %v1373_v27, %v1374_v61  ;;  %1167 = vst [vmem:[#allocation2 + $0x3c] sm:$0xf] %v1166_v41  ;;  %v1155_v49 = vld [vmem:[#allocation2 + $0x2c] sm:$0x1]  ;;  %v583_v53 = vshll.u32 %v438_v22, 16  ;;  %v17979_v59 = vrot.slane %v1552_v20, 4 }
 0x10f   :  { %15829 = vmatmul.mubr.msk.bf16.vlgmr.msra.gmra.mrb[0].mxu1 %vm2339_vm13, %v17961_v37  ;;  %v1156_v57 = vsel %vm17769_vm5, %v544_v45, %v1155_v49  ;;  %v582_v62 = vrot.slane %v580_v46, 7  ;;  %v588_v63 = vshrl.u32 %v439_v25, 16  ;;  %v440_v0 = vld [vmem:[#allocation7 + $0x30] sm:$0xf]  ;;  %v1583_v5 = vshrl.u32 %v1374_v61, 16 }
 0x110   :  { %16031 = vmatmul.mubr.msk.bf16.gmra.mrb[4].mxu0 %vm2339_vm13, %v17969_v48  ;;  %1157 = vst [vmem:[#allocation2 + $0x2c] sm:$0x1] %v1156_v57  ;;  %v591_v1 = vshll.u32 %v439_v25, 16  ;;  %v333_v10 = vsel %vm17795_vm9, 0, %v332_v31  ;;  %v1572_v13 = vrot.slane %v1570_v43, 4  ;;  %v1575_v45 = vrot.slane %v1573_v34, 5 }
 0x111   :  { %v585_v16 = vor.u32 %v583_v53, %v582_v62  ;;  %v586_v6 = vrot.slane %v582_v62, 4  ;;  %v17985_v14 = vrot.slane %v588_v63, 7  ;;  %334 = vst [vmem:[#allocation2 + $0x38] sm:$0x1] %v333_v10  ;;  %v1562_v29 = vor.u32 %v1561_v38, %v17971_v50  ;;  %v441_v46 = vld [vmem:[#allocation7 + $0x34] sm:$0xf] }
 0x112   :  { %v1369_v18 = vld [vmem:[#allocation2 + $0x20] sm:$0x1]  ;;  %v1579_v19 = vshll.u32 %v1374_v61, 16  ;;  %v232_v15 = vsel %vm17769_vm5, 0, %v231_v47  ;;  %v597_v23 = vshrl.u32 %v440_v0, 16  ;;  %v1539_v22 = vrot.slane %v1538_v28, 4 }
 0x113   :  { %v1541_v25 = vshll.u32 %v1369_v18, 16  ;;  %v17990_v27 = vld [vmem:[#allocation2 + $0x40] sm:$0xf]  ;;  %v1558_v30 = vsel %vm17881_vm14, %v17979_v59, %v17971_v50  ;;  %v593_v20 = vor.u32 %v591_v1, %v17985_v14  ;;  %233 = vst [vmem:[#allocation2 + $0x54] sm:$0x1] %v232_v15  ;;  %v1576_v35 = vor.u32 %v1575_v45, %v1572_v13 }
 0x114   :  { %v1172_v31 = vld [vmem:[#allocation2 + $0x48] sm:$0xf]  ;;  %v17997_v43 = vrot.slane %v1579_v19, 5  ;;  %v1585_v34 = vrot.slane %v1583_v5, 4  ;;  %v17999_v12 = vrot.slane %v597_v23, 7  ;;  %v600_v47 = vshll.u32 %v440_v0, 16 }
 0x115   :  { %v1543_v36 = vrot.slane %v1541_v25, 5  ;;  %v1376_v28 = vld [vmem:[#allocation2 + $0x3c] sm:$0xf]  ;;  %v594_v61 = vsel %vm17786_vm8, %v586_v6, %v593_v20  ;;  %v1173_v41 = vsel %vm17805_vm10, %v585_v16, %v1172_v31  ;;  %v1563_v53 = vrot.slane %v1562_v29, 4  ;;  %v335_v57 = vld [vmem:[#allocation2 + $0x44] sm:$0x1] }
 0x116   :  { %v1594_v49 = vshrl.u32 %v1376_v28, 16  ;;  %v1597_v50 = vshll.u32 %v1376_v28, 16  ;;  %v18006_v38 = vcombine.low %v1376_v28, %v17990_v27  ;;  %1174 = vst [vmem:[#allocation2 + $0x48] sm:$0xf] %v1173_v41  ;;  %1175 = vst.msk [vmem:[#allocation2 + $0x4c] sm:$0xf] %vm192_vm1, %v594_v61  ;;  %v602_v0 = vor.u32 %v600_v47, %v17999_v12 }
 0x117   :  { %v1544_v59 = vsel %vm17881_vm14, %v1539_v22, %v1543_v36  ;;  %v1607_v62 = vshrl.u32 %v17990_v27, 16  ;;  %v1372_v63 = vld [vmem:[#allocation2 + $0x2c] sm:$0x1]  ;;  %v595_v5 = vrot.slane %v17985_v14, 4  ;;  %v234_v1 = vld [vmem:[#allocation2 + $0x60] sm:$0x1]  ;;  %v1586_v6 = vor.u32 %v1585_v34, %v17997_v43 }
 0x118   :  { %v18019_v10 = vcombine.low %v1534_v40, %v1544_v59  ;;  %16034 = vmatprep.mubr.msk.bf16.mxu0 %vm2339_vm13, %v18006_v38  ;;  %v1565_v13 = vshll.u32 %v1372_v63, 16  ;;  %v1162_v16 = vld [vmem:[#allocation2 + $0x38] sm:$0x1]  ;;  %v605_v45 = vshrl.u32 %v441_v46, 16  ;;  %v442_v18 = vld [vmem:[#allocation7 + $0x38] sm:$0xf] }
 0x119   :  { %v1163_v29 = vsel %vm17769_vm5, %v561_v9, %v1162_v16  ;;  %v18028_v19 = vrot.slane %v1576_v35, 4  ;;  %v608_v15 = vshll.u32 %v441_v46, 16  ;;  %v336_v51 = vsel %vm17795_vm9, 0, %v335_v57  ;;  %v4898_v11 = vld [vmem:[#allocation10 + $0xa] sm:$0x3] }
 0x11a   :  { %21933 = vst [vmem:[#allocation38_spill] sm:$0xff] %v18019_v10  ;;  %15832 = vmatprep.mubr.msk.bf16.mxu1 %vm2339_vm13, %v18019_v10  ;;  %v1567_v40 = vrot.slane %v1565_v13, 5  ;;  %1164 = vst [vmem:[#allocation2 + $0x38] sm:$0x1] %v1163_v29  ;;  %v18034_v23 = vrot.slane %v605_v45, 7  ;;  %v1596_v7 = vrot.slane %v1594_v49, 4  ;;  %v18050_v57 = vand.u32 %v4898_v11, %v17765_v3 }
 0x11b   :  { %v1179_v22 = vld [vmem:[#allocation2 + $0x54] sm:$0xf]  ;;  %337 = vst [vmem:[#allocation2 + $0x44] sm:$0x1] %v336_v51  ;;  %v1599_v25 = vrot.slane %v1597_v50, 5  ;;  %v603_v9 = vrot.slane %v17999_v12, 4 }
 0x11c   :  { %v1180_v20 = vsel %vm17805_vm10, %v602_v0, %v1179_v22  ;;  %v1603_v31 = vshll.u32 %v17990_v27, 16  ;;  %v235_v35 = vsel %vm17769_vm5, 0, %v234_v1  ;;  %v1568_v34 = vsel %vm17881_vm14, %v1563_v53, %v1567_v40  ;;  %v443_v41 = vld [vmem:[#allocation7 + $0x3c] sm:$0xf]  ;;  %v338_v12 = vld [vmem:[#allocation2 + $0x50] sm:$0x1]  ;;  %16156 = vmatprep.subr.bf16.mxu0 %v18050_v57 }
 0x11d   :  { %v1587_v36 = vrot.slane %v1586_v6, 4  ;;  %v610_v28 = vor.u32 %v608_v15, %v18034_v23  ;;  %1181 = vst [vmem:[#allocation2 + $0x54] sm:$0xf] %v1180_v20  ;;  %v18045_v61 = vrot.slane %v1607_v62, 4  ;;  %236 = vst [vmem:[#allocation2 + $0x60] sm:$0x1] %v235_v35  ;;  %v18047_v46 = vcombine.low %v1558_v30, %v1568_v34 }
 0x11e   :  { %v1379_v47 = vld [vmem:[#allocation2 + $0x48] sm:$0xf]  ;;  %v1380_v49 = vld [vmem:[#allocation2 + $0x4c] sm:$0xf]  ;;  %v1600_v27 = vor.u32 %v1599_v25, %v1596_v7  ;;  %v614_v50 = vshrl.u32 %v442_v18, 16  ;;  %v612_v63 = vrot.slane %v18034_v23, 4  ;;  %v1582_v20 = vsel %vm17881_vm14, %v18028_v19, %v17997_v43 }
 0x11f   :  { %21934 = vst [vmem:[#allocation39_spill] sm:$0xff] %v18047_v46  ;;  %v1618_v59 = vshrl.u32 %v1379_v47, 16  ;;  %v18052_v53 = vcombine.low %v1379_v47, %v1380_v49  ;;  %v18055_v0 = vrot.slane %v1603_v31, 5  ;;  %15833 = vmatmul.mubr.msk.bf16.gmra.mrb[4].mxu1 %vm2339_vm13, %v18047_v46  ;;  %v1621_v62 = vshll.u32 %v1379_v47, 16 }
 0x120   :  { %v1631_v30 = vshrl.u32 %v1380_v49, 16  ;;  %v611_v1 = vsel %vm17786_vm8, %v603_v9, %v610_v28  ;;  %v616_v13 = vrot.slane %v614_v50, 7  ;;  %v617_v16 = vshll.u32 %v442_v18, 16  ;;  %v341_v18 = vld [vmem:[#allocation2 + $0x5c] sm:$0x1] }
 0x121   :  { %16035 = vmatmul.mubr.msk.bf16.gmra.mrb[8].mxu0 %vm2339_vm13, %v18052_v53  ;;  %1182 = vst.msk [vmem:[#allocation2 + $0x58] sm:$0xf] %vm192_vm1, %v611_v1  ;;  %v622_v6 = vshrl.u32 %v443_v41, 16  ;;  %v625_v45 = vshll.u32 %v443_v41, 16  ;;  %v339_v29 = vsel %vm17795_vm9, 0, %v338_v12  ;;  %v18067_v11 = vrot.slane %v1600_v27, 4 }
 0x122   :  { %v1375_v15 = vld [vmem:[#allocation2 + $0x38] sm:$0x1]  ;;  %v1169_v51 = vld [vmem:[#allocation2 + $0x44] sm:$0x1]  ;;  %v620_v40 = vrot.slane %v616_v13, 4  ;;  %v619_v25 = vor.u32 %v617_v16, %v616_v13  ;;  %v1620_v34 = vrot.slane %v1618_v59, 4 }
 0x123   :  { %340 = vst [vmem:[#allocation2 + $0x50] sm:$0x1] %v339_v29  ;;  %v1589_v22 = vshll.u32 %v1375_v15, 16  ;;  %v1170_v7 = vsel %vm17769_vm5, %v578_v52, %v1169_v51  ;;  %v18073_v9 = vrot.slane %v622_v6, 7  ;;  %v1623_v28 = vrot.slane %v1621_v62, 5 }
 0x124   :  { %v1382_v31 = vld [vmem:[#allocation2 + $0x54] sm:$0xf]  ;;  %1171 = vst [vmem:[#allocation2 + $0x44] sm:$0x1] %v1170_v7  ;;  %v1186_v35 = vld [vmem:[#allocation2 + $0x60] sm:$0xf]  ;;  %v1610_v52 = vor.u32 %v18045_v61, %v18055_v0 }
 0x125   :  { %v1591_v41 = vrot.slane %v1589_v22, 5  ;;  %v1642_v12 = vshrl.u32 %v1382_v31, 16  ;;  %v1645_v60 = vshll.u32 %v1382_v31, 16  ;;  %v627_v47 = vor.u32 %v625_v45, %v18073_v9  ;;  %v344_v13 = vld [vmem:[#allocation2 + $0x68] sm:$0x1] }
 0x126   :  { %v1187_v27 = vsel %vm17805_vm10, %v619_v25, %v1186_v35  ;;  %v1624_v50 = vor.u32 %v1623_v28, %v1620_v34  ;;  %v1627_v1 = vshll.u32 %v1380_v49, 16  ;;  %v1633_v59 = vrot.slane %v1631_v30, 4  ;;  %v237_v16 = vld [vmem:[#allocation2 + $0x6c] sm:$0x1]  ;;  %v347_v6 = vld [vmem:[#allocation2 + $0x74] sm:$0x1] }
 0x127   :  { %v1592_v43 = vsel %vm17881_vm14, %v1587_v36, %v1591_v41  ;;  %v628_v19 = vsel %vm17786_vm8, %v620_v40, %v627_v47  ;;  %1188 = vst [vmem:[#allocation2 + $0x60] sm:$0xf] %v1187_v27  ;;  %v342_v62 = vsel %vm17795_vm9, 0, %v341_v18  ;;  %v1606_v49 = vsel %vm17881_vm14, %v18067_v11, %v18055_v0  ;;  %v444_v30 = vld [vmem:[#allocation7 + $0x40] sm:$0xf] }
 0x128   :  { %v18090_v61 = vcombine.low %v1582_v20, %v1592_v43  ;;  %v1383_v45 = vld [vmem:[#allocation2 + $0x58] sm:$0xf]  ;;  %1189 = vst.msk [vmem:[#allocation2 + $0x64] sm:$0xf] %vm192_vm1, %v628_v19  ;;  %v18097_v36 = vrot.slane %v1627_v1, 5  ;;  %v1644_v29 = vrot.slane %v1642_v12, 4 }
 0x129   :  { %343 = vst [vmem:[#allocation2 + $0x5c] sm:$0x1] %v342_v62  ;;  %v1655_v15 = vshrl.u32 %v1383_v45, 16  ;;  %v18099_v51 = vcombine.low %v1382_v31, %v1383_v45  ;;  %v1647_v22 = vrot.slane %v1645_v60, 5  ;;  %v1651_v7 = vshll.u32 %v1383_v45, 16 }
 0x12a   :  { %21935 = vst [vmem:[#allocation40_spill] sm:$0xff] %v18090_v61  ;;  %v1176_v40 = vld [vmem:[#allocation2 + $0x50] sm:$0x1]  ;;  %15836 = vmatprep.mubr.msk.bf16.mxu1 %vm2339_vm13, %v18090_v61  ;;  %v18107_v11 = vrot.slane %v1624_v50, 4  ;;  %v1634_v25 = vor.u32 %v1633_v59, %v18097_v36  ;;  %v345_v18 = vsel %vm17795_vm9, 0, %v344_v13  ;;  %v1611_v41 = vrot.slane %v1610_v52, 4 }
 0x12b   :  { %v1177_v0 = vsel %vm17769_vm5, %v595_v5, %v1176_v40  ;;  %v18112_v20 = vld [vmem:[#allocation7 + $0x44] sm:$0xf]  ;;  %v240_v31 = vld [vmem:[#allocation2 + $0x78] sm:$0x1]  ;;  %16038 = vmatprep.mubr.msk.bf16.mxu0 %vm2339_vm13, %v18099_v51  ;;  %v1378_v35 = vld [vmem:[#allocation2 + $0x44] sm:$0x1]  ;;  %v1648_v34 = vor.u32 %v1647_v22, %v1644_v29 }
 0x12c   :  { %1178 = vst [vmem:[#allocation2 + $0x50] sm:$0x1] %v1177_v0  ;;  %v18116_v14 = vrot.slane %v1651_v7, 5  ;;  %v1657_v28 = vrot.slane %v1655_v15, 4  ;;  %346 = vst [vmem:[#allocation2 + $0x68] sm:$0x1] %v345_v18 }
 0x12d   :  { %v238_v5 = vsel %vm17769_vm5, 0, %v237_v16  ;;  %v1613_v12 = vshll.u32 %v1378_v35, 16  ;;  %v348_v60 = vsel %vm17795_vm9, 0, %v347_v6  ;;  %v631_v47 = vshrl.u32 %v444_v30, 16  ;;  %v350_v0 = vld [vmem:[#allocation2 + $0x80] sm:$0x1] }
 0x12e   :  { %239 = vst [vmem:[#allocation2 + $0x6c] sm:$0x1] %v238_v5  ;;  %v629_v27 = vrot.slane %v18073_v9, 4  ;;  %v18123_v50 = vrot.slane %v1634_v25, 4  ;;  %v18125_v1 = vrot.slane %v1648_v34, 4  ;;  %v634_v13 = vshll.u32 %v444_v30, 16 }
 0x12f   :  { %349 = vst [vmem:[#allocation2 + $0x74] sm:$0x1] %v348_v60  ;;  %v1615_v43 = vrot.slane %v1613_v12, 5  ;;  %v1385_v19 = vld [vmem:[#allocation2 + $0x60] sm:$0xf]  ;;  %v18127_v59 = vrot.slane %v631_v47, 7  ;;  %v1630_v9 = vsel %vm17881_vm14, %v18107_v11, %v18097_v36  ;;  %v1658_v30 = vor.u32 %v1657_v28, %v18116_v14 }
 0x130   :  { %v639_v52 = vshrl.u32 %v18112_v20, 16  ;;  %v241_v62 = vsel %vm17769_vm5, 0, %v240_v31  ;;  %v1386_v16 = vld [vmem:[#allocation2 + $0x64] sm:$0xf]  ;;  %v1666_v6 = vshrl.u32 %v1385_v19, 16  ;;  %v1669_v45 = vshll.u32 %v1385_v19, 16 }
 0x131   :  { %v1183_v29 = vld [vmem:[#allocation2 + $0x5c] sm:$0x1]  ;;  %242 = vst [vmem:[#allocation2 + $0x78] sm:$0x1] %v241_v62  ;;  %v1616_v15 = vsel %vm17881_vm14, %v1611_v41, %v1615_v43  ;;  %v1679_v40 = vshrl.u32 %v1386_v16, 16  ;;  %v18139_v22 = vcombine.low %v1385_v19, %v1386_v16  ;;  %v642_v18 = vshll.u32 %v18112_v20, 16 }
 0x132   :  { %v1184_v7 = vsel %vm17769_vm5, %v612_v63, %v1183_v29  ;;  %v18145_v25 = vcombine.low %v1606_v49, %v1616_v15  ;;  %v1668_v36 = vrot.slane %v1666_v6, 4  ;;  %v1671_v11 = vrot.slane %v1669_v45, 5  ;;  %v446_v31 = vld [vmem:[#allocation7 + $0x48] sm:$0xf]  ;;  %v447_v47 = vld [vmem:[#allocation7 + $0x4c] sm:$0xf] }
 0x133   :  { %1185 = vst [vmem:[#allocation2 + $0x5c] sm:$0x1] %v1184_v7  ;;  %16039 = vmatmul.mubr.msk.bf16.gmra.mrb[12].mxu0 %vm2339_vm13, %v18139_v22  ;;  %v1381_v35 = vld [vmem:[#allocation2 + $0x50] sm:$0x1]  ;;  %v1654_v23 = vsel %vm17881_vm14, %v18125_v1, %v18116_v14  ;;  %v1190_v34 = vld [vmem:[#allocation2 + $0x68] sm:$0x1]  ;;  %v636_v49 = vor.u32 %v634_v13, %v18127_v59 }
 0x134   :  { %21936 = vst [vmem:[#allocation41_spill] sm:$0xff] %v18145_v25  ;;  %v1675_v63 = vshll.u32 %v1386_v16, 16  ;;  %v1681_v28 = vrot.slane %v1679_v40, 4  ;;  %15837 = vmatmul.mubr.msk.bf16.gmra.mrb[8].mxu1 %vm2339_vm13, %v18145_v25  ;;  %v1637_v5 = vshll.u32 %v1381_v35, 16  ;;  %16092 = vmatprep.mubr.msk.bf16.mxu0 %vm2339_vm13, %v17961_v37  ;;  %v1191_v20 = vsel %vm17769_vm5, %v629_v27, %v1190_v34  ;;  %v243_v7 = vld [vmem:[#allocation2 + $0x84] sm:$0x1] }
 0x135   :  { %v1672_v41 = vor.u32 %v1671_v11, %v1668_v36  ;;  %v637_v12 = vrot.slane %v18127_v59, 4  ;;  %v1193_v60 = vld [vmem:[#allocation2 + $0x6c] sm:$0xf]  ;;  %1192 = vst [vmem:[#allocation2 + $0x68] sm:$0x1] %v1191_v20  ;;  %v641_v19 = vrot.slane %v639_v52, 7 }
 0x136   :  { %v18162_v43 = vrot.slane %v1675_v63, 5  ;;  %v1194_v13 = vsel %vm17805_vm10, %v636_v49, %v1193_v60  ;;  %v351_v62 = vsel %vm17795_vm9, 0, %v350_v0  ;;  %v1639_v16 = vrot.slane %v1637_v5, 5  ;;  %v1197_v6 = vld [vmem:[#allocation2 + $0x74] sm:$0x1] }
 0x137   :  { %v1659_v37 = vrot.slane %v1658_v30, 4  ;;  %1195 = vst [vmem:[#allocation2 + $0x6c] sm:$0xf] %v1194_v13  ;;  %352 = vst [vmem:[#allocation2 + $0x80] sm:$0x1] %v351_v62  ;;  %v648_v27 = vshrl.u32 %v446_v31, 16  ;;  %v644_v29 = vor.u32 %v642_v18, %v641_v19 }
 0x138   :  { %v651_v45 = vshll.u32 %v446_v31, 16  ;;  %v1682_v59 = vor.u32 %v1681_v28, %v18162_v43  ;;  %v646_v15 = vrot.slane %v641_v19, 4  ;;  %v656_v40 = vshrl.u32 %v447_v47, 16  ;;  %v353_v52 = vld [vmem:[#allocation2 + $0x8c] sm:$0x1] }
 0x139   :  { %v1640_v36 = vsel %vm17881_vm14, %v18123_v50, %v1639_v16  ;;  %v1673_v11 = vrot.slane %v1672_v41, 4  ;;  %v650_v0 = vrot.slane %v648_v27, 7  ;;  %v659_v35 = vshll.u32 %v447_v47, 16  ;;  %v448_v30 = vld [vmem:[#allocation7 + $0x50] sm:$0xf] }
 0x13a   :  { %v18172_v34 = vcombine.low %v1630_v9, %v1640_v36  ;;  %v1384_v63 = vld [vmem:[#allocation2 + $0x5c] sm:$0x1]  ;;  %v1683_v49 = vrot.slane %v1682_v59, 4  ;;  %v645_v31 = vsel %vm17786_vm8, %v637_v12, %v644_v29  ;;  %v1198_v18 = vsel %vm17769_vm5, %v646_v15, %v1197_v6  ;;  %v1200_v28 = vld [vmem:[#allocation2 + $0x78] sm:$0xf] }
 0x13b   :  { %v1661_v5 = vshll.u32 %v1384_v63, 16  ;;  %1196 = vst.msk [vmem:[#allocation2 + $0x70] sm:$0xf] %vm192_vm1, %v645_v31  ;;  %1199 = vst [vmem:[#allocation2 + $0x74] sm:$0x1] %v1198_v18  ;;  %v653_v50 = vor.u32 %v651_v45, %v650_v0  ;;  %v654_v20 = vrot.slane %v650_v0, 4  ;;  %16093 = vmatmul.mubr.msk.bf16.vlgmr.msra.gmra.mrb[0].mxu0 %vm2339_vm13, %v18019_v10 }
 0x13c   :  { %21937 = vst [vmem:[#allocation42_spill] sm:$0xff] %v18172_v34  ;;  %v658_v41 = vrot.slane %v656_v40, 7  ;;  %15840 = vmatprep.mubr.msk.bf16.mxu1 %vm2339_vm13, %v18172_v34  ;;  %v244_v9 = vsel %vm17769_vm5, 0, %v243_v7  ;;  %v354_v12 = vsel %vm17795_vm9, 0, %v353_v52  ;;  %v665_v60 = vshrl.u32 %v448_v30, 16  ;;  %16157 = vmatpush3.bf16.msra.mxu0 %v18050_v57 }
 0x13d   :  { %v668_v47 = vshll.u32 %v448_v30, 16  ;;  %v1663_v19 = vrot.slane %v1661_v5, 5  ;;  %v1387_v13 = vld [vmem:[#allocation2 + $0x68] sm:$0x1]  ;;  %16096 = vmatprep.mubr.msk.bf16.mxu0 %vm2339_vm13, %v18047_v46  ;;  %v1201_v6 = vsel %vm17805_vm10, %v653_v50, %v1200_v28  ;;  %245 = vst [vmem:[#allocation2 + $0x84] sm:$0x1] %v244_v9 }
 0x13e   :  { %v661_v62 = vor.u32 %v659_v35, %v658_v41  ;;  %v663_v16 = vrot.slane %v658_v41, 4  ;;  %355 = vst [vmem:[#allocation2 + $0x8c] sm:$0x1] %v354_v12  ;;  %v449_v27 = vld [vmem:[#allocation7 + $0x54] sm:$0xf]  ;;  %v1685_v45 = vshll.u32 %v1387_v13, 16  ;;  %v1678_v35 = vsel %vm17881_vm14, %v1673_v11, %v18162_v43 }
 0x13f   :  { %v1388_v59 = vld [vmem:[#allocation2 + $0x6c] sm:$0xf]  ;;  %1202 = vst [vmem:[#allocation2 + $0x78] sm:$0xf] %v1201_v6  ;;  %v1204_v29 = vld [vmem:[#allocation2 + $0x80] sm:$0x1]  ;;  %v1664_v57 = vsel %vm17881_vm14, %v1659_v37, %v1663_v19 }
 0x140   :  { %v18192_v15 = vrot.slane %v665_v60, 7  ;;  %v1690_v40 = vshrl.u32 %v1388_v59, 16  ;;  %v1693_v7 = vshll.u32 %v1388_v59, 16  ;;  %v662_v52 = vsel %vm17786_vm8, %v654_v20, %v661_v62  ;;  %v246_v36 = vld [vmem:[#allocation2 + $0x90] sm:$0x1] }
 0x141   :  { %v18203_v0 = vcombine.low %v1654_v23, %v1664_v57  ;;  %v1687_v30 = vrot.slane %v1685_v45, 5  ;;  %1203 = vst.msk [vmem:[#allocation2 + $0x7c] sm:$0xf] %vm192_vm1, %v662_v52  ;;  %v1205_v37 = vsel %vm17769_vm5, %v663_v16, %v1204_v29  ;;  %v673_v28 = vshrl.u32 %v449_v27, 16  ;;  %v356_v9 = vld [vmem:[#allocation2 + $0x98] sm:$0x1] }
 0x142   :  { %v1692_v63 = vrot.slane %v1690_v40, 4  ;;  %v1695_v31 = vrot.slane %v1693_v7, 5  ;;  %1206 = vst [vmem:[#allocation2 + $0x80] sm:$0x1] %v1205_v37  ;;  %v670_v18 = vor.u32 %v668_v47, %v18192_v15  ;;  %v1389_v1 = vld [vmem:[#allocation2 + $0x70] sm:$0xf] }
 0x143   :  { %21938 = vst [vmem:[#allocation43_spill] sm:$0xff] %v18203_v0  ;;  %15841 = vmatmul.mubr.msk.bf16.gmra.mrb[12].mxu1 %vm2339_vm13, %v18203_v0  ;;  %v1688_v14 = vsel %vm17881_vm14, %v1683_v49, %v1687_v30  ;;  %v1390_v23 = vld [vmem:[#allocation2 + $0x74] sm:$0x1]  ;;  %v676_v43 = vshll.u32 %v449_v27, 16  ;;  %v247_v11 = vsel %vm17769_vm5, 0, %v246_v36  ;;  %v1699_v20 = vshll.u32 %v1389_v1, 16  ;;  %16097 = vmatmul.mubr.msk.bf16.gmra.mrb[4].mxu0 %vm2339_vm13, %v18090_v61 }
 0x144   :  { %v18218_v5 = vcombine.low %v1678_v35, %v1688_v14  ;;  %v1696_v50 = vor.u32 %v1695_v31, %v1692_v63  ;;  %v1703_v41 = vshrl.u32 %v1389_v1, 16  ;;  %248 = vst [vmem:[#allocation2 + $0x90] sm:$0x1] %v247_v11  ;;  %v1709_v60 = vshll.u32 %v1390_v23, 16  ;;  %v1207_v19 = vld [vmem:[#allocation2 + $0x84] sm:$0xf]  ;;  %16100 = vmatprep.mubr.msk.bf16.mxu0 %vm2339_vm13, %v18145_v25 }
 0x145   :  { %v671_v49 = vrot.slane %v18192_v15, 4  ;;  %v675_v47 = vrot.slane %v673_v28, 7  ;;  %v1701_v62 = vrot.slane %v1699_v20, 5  ;;  %v1208_v27 = vsel %vm17805_vm10, %v670_v18, %v1207_v19  ;;  %v450_v45 = vld [vmem:[#allocation7 + $0x58] sm:$0xf] }
 0x146   :  { %21939 = vst [vmem:[#allocation44_spill] sm:$0xff] %v18218_v5  ;;  %15844 = vmatprep.mubr.msk.bf16.mxu1 %vm2339_vm13, %v18218_v5  ;;  %v1697_v13 = vrot.slane %v1696_v50, 4  ;;  %v1705_v16 = vrot.slane %v1703_v41, 4  ;;  %v1391_v6 = vld [vmem:[#allocation2 + $0x78] sm:$0xf]  ;;  %v1711_v59 = vrot.slane %v1709_v60, 5 }
 0x147   :  { %v1714_v29 = vshrl.u32 %v1391_v6, 16  ;;  %v1717_v57 = vshll.u32 %v1391_v6, 16  ;;  %v678_v15 = vor.u32 %v676_v43, %v675_v47  ;;  %1209 = vst [vmem:[#allocation2 + $0x84] sm:$0xf] %v1208_v27  ;;  %v1211_v40 = vld [vmem:[#allocation2 + $0x8c] sm:$0x1] }
 0x148   :  { %v1702_v7 = vsel %vm17881_vm14, %v1697_v13, %v1701_v62  ;;  %v1706_v52 = vor.u32 %v1705_v16, %v1701_v62  ;;  %v1392_v36 = vld [vmem:[#allocation2 + $0x7c] sm:$0xf]  ;;  %v680_v35 = vrot.slane %v675_v47, 4  ;;  %v357_v30 = vsel %vm17795_vm9, 0, %v356_v9  ;;  %v451_v37 = vld [vmem:[#allocation7 + $0x5c] sm:$0xf] }
 0x149   :  { %v1393_v63 = vld [vmem:[#allocation2 + $0x80] sm:$0x1]  ;;  %v1716_v31 = vrot.slane %v1714_v29, 4  ;;  %v1719_v18 = vrot.slane %v1717_v57, 5  ;;  %v1723_v28 = vshll.u32 %v1392_v36, 16  ;;  %v1727_v14 = vshrl.u32 %v1392_v36, 16 }
 0x14a   :  { %358 = vst [vmem:[#allocation2 + $0x98] sm:$0x1] %v357_v30  ;;  %v1707_v1 = vrot.slane %v1706_v52, 4  ;;  %v1733_v23 = vshll.u32 %v1393_v63, 16  ;;  %v679_v43 = vsel %vm17786_vm8, %v671_v49, %v678_v15  ;;  %v1212_v11 = vsel %vm17769_vm5, %v680_v35, %v1211_v40  ;;  %v249_v50 = vld [vmem:[#allocation2 + $0x9c] sm:$0x1] }
 0x14b   :  { %v1720_v20 = vor.u32 %v1719_v18, %v1716_v31  ;;  %v1725_v41 = vrot.slane %v1723_v28, 5  ;;  %v1729_v60 = vrot.slane %v1727_v14, 4  ;;  %1210 = vst.msk [vmem:[#allocation2 + $0x88] sm:$0xf] %vm192_vm1, %v679_v43  ;;  %1213 = vst [vmem:[#allocation2 + $0x8c] sm:$0x1] %v1212_v11  ;;  %16101 = vmatmul.mubr.msk.bf16.gmra.mrb[8].mxu0 %vm2339_vm13, %v18172_v34 }
 0x14c   :  { %v682_v9 = vshrl.u32 %v450_v45, 16  ;;  %v359_v47 = vld [vmem:[#allocation2 + $0xa4] sm:$0x1]  ;;  %v1712_v19 = vsel %vm17881_vm14, %v1707_v1, %v1711_v59  ;;  %v1735_v13 = vrot.slane %v1733_v23, 5  ;;  %v685_v62 = vshll.u32 %v450_v45, 16  ;;  %16104 = vmatprep.mubr.msk.bf16.mxu0 %vm2339_vm13, %v18203_v0 }
 0x14d   :  { %v690_v16 = vshrl.u32 %v451_v37, 16  ;;  %v18241_v6 = vcombine.low %v1702_v7, %v1712_v19  ;;  %v1721_v49 = vrot.slane %v1720_v20, 4  ;;  %v1730_v27 = vor.u32 %v1729_v60, %v1725_v41  ;;  %v452_v57 = vld [vmem:[#allocation7 + $0x60] sm:$0xf]  ;;  %v453_v11 = vld [vmem:[#allocation7 + $0x64] sm:$0xf] }
 0x14e   :  { %v684_v29 = vrot.slane %v682_v9, 7  ;;  %v1394_v15 = vld [vmem:[#allocation2 + $0x84] sm:$0xf]  ;;  %v693_v52 = vshll.u32 %v451_v37, 16  ;;  %v250_v59 = vsel %vm17769_vm5, 0, %v249_v50  ;;  %v360_v45 = vsel %vm17795_vm9, 0, %v359_v47 }
 0x14f   :  { %21940 = vst [vmem:[#allocation45_spill] sm:$0xff] %v18241_v6  ;;  %v692_v40 = vrot.slane %v690_v16, 7  ;;  %15845 = vmatmul.mubr.msk.bf16.gmra.mrb[16].mxu1 %vm2339_vm13, %v18241_v6  ;;  %v1726_v7 = vsel %vm17881_vm14, %v1721_v49, %v1725_v41  ;;  %v1731_v36 = vrot.slane %v1730_v27, 4  ;;  %v1738_v35 = vshrl.u32 %v1394_v15, 16  ;;  %v1214_v63 = vld [vmem:[#allocation2 + $0x90] sm:$0xf] }
 0x150   :  { %v1741_v30 = vshll.u32 %v1394_v15, 16  ;;  %251 = vst [vmem:[#allocation2 + $0x9c] sm:$0x1] %v250_v59  ;;  %361 = vst [vmem:[#allocation2 + $0xa4] sm:$0x1] %v360_v45  ;;  %v687_v37 = vor.u32 %v685_v62, %v684_v29  ;;  %v688_v31 = vrot.slane %v684_v29, 4 }
 0x151   :  { %v695_v18 = vor.u32 %v693_v52, %v692_v40  ;;  %v697_v28 = vrot.slane %v692_v40, 4  ;;  %v1218_v14 = vld [vmem:[#allocation2 + $0x98] sm:$0x1]  ;;  %v1736_v1 = vsel %vm17881_vm14, %v1731_v36, %v1735_v13  ;;  %v1740_v23 = vrot.slane %v1738_v35, 4  ;;  %v252_v62 = vld [vmem:[#allocation2 + $0xa8] sm:$0x1] }
 0x152   :  { %v1743_v43 = vrot.slane %v1741_v30, 5  ;;  %v699_v50 = vshrl.u32 %v452_v57, 16  ;;  %v18257_v20 = vcombine.low %v1726_v7, %v1736_v1  ;;  %v1395_v41 = vld [vmem:[#allocation2 + $0x88] sm:$0xf]  ;;  %v1396_v60 = vld [vmem:[#allocation2 + $0x8c] sm:$0x1]  ;;  %v1215_v47 = vsel %vm17805_vm10, %v687_v37, %v1214_v63 }
 0x153   :  { %v696_v9 = vsel %vm17786_vm8, %v688_v31, %v695_v18  ;;  %v1219_v19 = vsel %vm17769_vm5, %v697_v28, %v1218_v14  ;;  %v1747_v13 = vshll.u32 %v1395_v41, 16  ;;  %v1751_v49 = vshrl.u32 %v1395_v41, 16  ;;  %1216 = vst [vmem:[#allocation2 + $0x90] sm:$0xf] %v1215_v47  ;;  %v362_v29 = vld [vmem:[#allocation2 + $0xb0] sm:$0x1]  ;;  %16105 = vmatmul.mubr.msk.bf16.gmra.mrb[12].mxu0 %vm2339_vm13, %v18218_v5 }
 0x154   :  { %21941 = vst [vmem:[#allocation46_spill] sm:$0xff] %v18257_v20  ;;  %v1744_v16 = vor.u32 %v1743_v43, %v1740_v23  ;;  %v1757_v27 = vshll.u32 %v1396_v60, 16  ;;  %1217 = vst.msk [vmem:[#allocation2 + $0x94] sm:$0xf] %vm192_vm1, %v696_v9  ;;  %15848 = vmatprep.mubr.msk.bf16.mxu1 %vm2339_vm13, %v18257_v20  ;;  %v701_v15 = vrot.slane %v699_v50, 7  ;;  %v702_v40 = vshll.u32 %v452_v57, 16  ;;  %16108 = vmatprep.mubr.msk.bf16.mxu0 %vm2339_vm13, %v18241_v6 }
 0x155   :  { %1220 = vst [vmem:[#allocation2 + $0x98] sm:$0x1] %v1219_v19  ;;  %v707_v52 = vshrl.u32 %v453_v11, 16  ;;  %v710_v59 = vshll.u32 %v453_v11, 16  ;;  %v454_v45 = vld [vmem:[#allocation7 + $0x68] sm:$0xf] }
 0x156   :  { %v18268_v7 = vld [vmem:[#allocation2 + $0x1c] sm:$0xf]  ;;  %v1745_v35 = vrot.slane %v1744_v16, 4  ;;  %v1749_v30 = vrot.slane %v1747_v13, 5  ;;  %v1753_v63 = vrot.slane %v1751_v49, 4  ;;  %v1759_v31 = vrot.slane %v1757_v27, 5 }
 0x157   :  { %v21826_v36 = vrot.slane %v18268_v7, 5  ;;  %v455_v37 = vld [vmem:[#allocation7 + $0x6c] sm:$0xf]  ;;  %v704_v18 = vor.u32 %v702_v40, %v701_v15  ;;  %v705_v28 = vrot.slane %v701_v15, 4  ;;  %v709_v14 = vrot.slane %v707_v52, 7 }
 0x158   :  { %v1221_v1 = vld [vmem:[#allocation2 + $0x9c] sm:$0xf]  ;;  %v1750_v57 = vsel %vm17881_vm14, %v1745_v35, %v1749_v30  ;;  %v1754_v23 = vor.u32 %v1753_v63, %v1749_v30  ;;  %v1225_v43 = vld [vmem:[#allocation2 + $0xa4] sm:$0x1]  ;;  %v253_v11 = vsel %vm17769_vm5, 0, %v252_v62  ;;  %v363_v50 = vsel %vm17795_vm9, 0, %v362_v29 }
 0x159   :  { %v712_v41 = vor.u32 %v710_v59, %v709_v14  ;;  %v714_v60 = vrot.slane %v709_v14, 4  ;;  %v1222_v9 = vsel %vm17805_vm10, %v704_v18, %v1221_v1  ;;  %254 = vst [vmem:[#allocation2 + $0xa8] sm:$0x1] %v253_v11  ;;  %364 = vst [vmem:[#allocation2 + $0xb0] sm:$0x1] %v363_v50  ;;  %v716_v47 = vshrl.u32 %v454_v45, 16 }
 0x15a   :  { %v1755_v19 = vrot.slane %v1754_v23, 4  ;;  %1223 = vst [vmem:[#allocation2 + $0x9c] sm:$0xf] %v1222_v9  ;;  %v719_v16 = vshll.u32 %v454_v45, 16  ;;  %v724_v13 = vshrl.u32 %v455_v37, 16  ;;  %v727_v49 = vshll.u32 %v455_v37, 16 }
 0x15b   :  { %v1397_v27 = vld [vmem:[#allocation2 + $0x90] sm:$0xf]  ;;  %v1398_v15 = vld [vmem:[#allocation2 + $0x94] sm:$0xf]  ;;  %v713_v62 = vsel %vm17786_vm8, %v705_v28, %v712_v41  ;;  %v1226_v29 = vsel %vm17769_vm5, %v714_v60, %v1225_v43  ;;  %v718_v14 = vrot.slane %v716_v47, 7  ;;  %16109 = vmatmul.mubr.msk.bf16.gmra.mrb[16].mxu0 %vm2339_vm13, %v18257_v20  ;;  %vm3312_vm15 = vcmask 1042432  }
 0x15c   :  { %v1399_v40 = vld [vmem:[#allocation2 + $0x98] sm:$0x1]  ;;  %v1760_v52 = vsel %vm17881_vm14, %v1755_v19, %v1759_v31  ;;  %v1762_v59 = vshrl.u32 %v1397_v27, 16  ;;  %v1765_v35 = vshll.u32 %v1397_v27, 16  ;;  %v1771_v30 = vshll.u32 %v1398_v15, 16 }
 0x15d   :  { %1224 = vst.msk [vmem:[#allocation2 + $0xa0] sm:$0xf] %vm192_vm1, %v713_v62  ;;  %1227 = vst [vmem:[#allocation2 + $0xa4] sm:$0x1] %v1226_v29  ;;  %v255_v45 = vld [vmem:[#allocation2 + $0xb4] sm:$0x1]  ;;  %v18290_v63 = vcombine.low %v1750_v57, %v1760_v52  ;;  %v721_v60 = vor.u32 %v719_v16, %v718_v14 }
 0x15e   :  { %v1775_v37 = vshrl.u32 %v1398_v15, 16  ;;  %v1781_v18 = vshll.u32 %v1399_v40, 16  ;;  %v365_v1 = vld [vmem:[#allocation2 + $0xbc] sm:$0x1]  ;;  %v1764_v28 = vrot.slane %v1762_v59, 4  ;;  %v1767_v23 = vrot.slane %v1765_v35, 5 }
 0x15f   :  { %21942 = vst [vmem:[#allocation47_spill] sm:$0xff] %v18290_v63  ;;  %v1773_v11 = vrot.slane %v1771_v30, 5  ;;  %v726_v43 = vrot.slane %v724_v13, 7  ;;  %v456_v50 = vld [vmem:[#allocation7 + $0x70] sm:$0xf]  ;;  %15849 = vmatmul.mubr.msk.bf16.gmra.mrb[20].mxu1 %vm2339_vm13, %v18290_v63  ;;  %v722_v57 = vrot.slane %v718_v14, 4  ;;  %16112 = vmatprep.mubr.msk.bf16.mxu0 %vm2339_vm13, %v18290_v63 }
 0x160   :  { %v1777_v31 = vrot.slane %v1775_v37, 4  ;;  %v1783_v41 = vrot.slane %v1781_v18, 5  ;;  %v1768_v9 = vor.u32 %v1767_v23, %v1764_v28  ;;  %v1228_v27 = vld [vmem:[#allocation2 + $0xa8] sm:$0xf]  ;;  %v1232_v15 = vld [vmem:[#allocation2 + $0xb0] sm:$0x1] }
 0x161   :  { %v729_v47 = vor.u32 %v727_v49, %v726_v43  ;;  %v731_v19 = vrot.slane %v726_v43, 4  ;;  %v256_v13 = vsel %vm17769_vm5, 0, %v255_v45  ;;  %v1400_v62 = vld [vmem:[#allocation2 + $0x9c] sm:$0xf]  ;;  %v1229_v29 = vsel %vm17805_vm10, %v721_v60, %v1228_v27  ;;  %v457_v37 = vld [vmem:[#allocation7 + $0x74] sm:$0xf] }
 0x162   :  { %v1778_v40 = vor.u32 %v1777_v31, %v1773_v11  ;;  %257 = vst [vmem:[#allocation2 + $0xb4] sm:$0x1] %v256_v13  ;;  %v366_v16 = vsel %vm17795_vm9, 0, %v365_v1  ;;  %v733_v52 = vshrl.u32 %v456_v50, 16  ;;  %v1769_v59 = vrot.slane %v1768_v9, 4 }
 0x163   :  { %v1786_v35 = vshrl.u32 %v1400_v62, 16  ;;  %v1789_v30 = vshll.u32 %v1400_v62, 16  ;;  %v730_v49 = vsel %vm17786_vm8, %v722_v57, %v729_v47  ;;  %1230 = vst [vmem:[#allocation2 + $0xa8] sm:$0xf] %v1229_v29  ;;  %367 = vst [vmem:[#allocation2 + $0xbc] sm:$0x1] %v366_v16  ;;  %v1233_v28 = vsel %vm17769_vm5, %v731_v19, %v1232_v15 }
 0x164   :  { %v1779_v45 = vrot.slane %v1778_v40, 4  ;;  %v1401_v18 = vld [vmem:[#allocation2 + $0xa0] sm:$0xf]  ;;  %v1402_v14 = vld [vmem:[#allocation2 + $0xa4] sm:$0x1]  ;;  %v735_v23 = vrot.slane %v733_v52, 7  ;;  %v1774_v1 = vsel %vm17881_vm14, %v1769_v59, %v1773_v11 }
 0x165   :  { %1231 = vst.msk [vmem:[#allocation2 + $0xac] sm:$0xf] %vm192_vm1, %v730_v49  ;;  %v1788_v43 = vrot.slane %v1786_v35, 4  ;;  %v1791_v31 = vrot.slane %v1789_v30, 5  ;;  %v1795_v60 = vshll.u32 %v1401_v18, 16  ;;  %v1799_v47 = vshrl.u32 %v1401_v18, 16 }
 0x166   :  { %1234 = vst [vmem:[#allocation2 + $0xb0] sm:$0x1] %v1233_v28  ;;  %v264_v57 = vld [vmem:[#allocation2 + $0xd8] sm:$0x1]  ;;  %v1784_v9 = vsel %vm17881_vm14, %v1779_v45, %v1783_v41  ;;  %v1805_v27 = vshll.u32 %v1402_v14, 16  ;;  %v736_v13 = vshll.u32 %v456_v50, 16 }
 0x167   :  { %v374_v40 = vld [vmem:[#allocation2 + $0xe0] sm:$0x1]  ;;  %v18313_v62 = vcombine.low %v1774_v1, %v1784_v9  ;;  %v1792_v29 = vor.u32 %v1791_v31, %v1788_v43  ;;  %v1797_v19 = vrot.slane %v1795_v60, 5  ;;  %v739_v15 = vrot.slane %v735_v23, 4  ;;  %v1416_v16 = vld [vmem:[#allocation2 + $0xdc] sm:$0xf] }
 0x168   :  { %v1801_v52 = vrot.slane %v1799_v47, 4  ;;  %v1807_v11 = vrot.slane %v1805_v27, 5  ;;  %v738_v59 = vor.u32 %v736_v13, %v735_v23  ;;  %v741_v35 = vshrl.u32 %v457_v37, 16  ;;  %v463_v12 = vld [vmem:[#allocation7 + $0x8c] sm:$0xf] }
 0x169   :  { %21943 = vst [vmem:[#allocation48_spill] sm:$0xff] %v18313_v62  ;;  %15852 = vmatprep.mubr.msk.bf16.mxu1 %vm2339_vm13, %v18313_v62  ;;  %v1793_v30 = vrot.slane %v1792_v29, 4  ;;  %v744_v49 = vshll.u32 %v457_v37, 16  ;;  %v1235_v41 = vld [vmem:[#allocation2 + $0xb4] sm:$0xf]  ;;  %v265_v50 = vsel %vm17769_vm5, 0, %v264_v57  ;;  %16113 = vmatmul.mubr.msk.bf16.gmra.mrb[20].mxu0 %vm2339_vm13, %v18313_v62 }
 0x16a   :  { %v375_v45 = vsel %vm17795_vm9, 0, %v374_v40  ;;  %v1802_v18 = vor.u32 %v1801_v52, %v1797_v19  ;;  %v1403_v14 = vld [vmem:[#allocation2 + $0xa8] sm:$0xf]  ;;  %v743_v28 = vrot.slane %v741_v35, 7  ;;  %v1236_v23 = vsel %vm17805_vm10, %v738_v59, %v1235_v41  ;;  %v1239_v1 = vld [vmem:[#allocation2 + $0xbc] sm:$0x1] }
 0x16b   :  { %266 = vst [vmem:[#allocation2 + $0xd8] sm:$0x1] %v265_v50  ;;  %376 = vst [vmem:[#allocation2 + $0xe0] sm:$0x1] %v375_v45  ;;  %v1867_v37 = vshll.u32 %v1416_v16, 16  ;;  %v1798_v43 = vsel %vm17881_vm14, %v1793_v30, %v1797_v19  ;;  %v1810_v60 = vshrl.u32 %v1403_v14, 16 }
 0x16c   :  { %v1404_v31 = vld [vmem:[#allocation2 + $0xac] sm:$0xf]  ;;  %v1813_v57 = vshll.u32 %v1403_v14, 16  ;;  %1237 = vst [vmem:[#allocation2 + $0xb4] sm:$0xf] %v1236_v23  ;;  %v1871_v9 = vshrl.u32 %v1416_v16, 16  ;;  %v746_v29 = vor.u32 %v744_v49, %v743_v28 }
 0x16d   :  { %v1803_v47 = vrot.slane %v1802_v18, 4  ;;  %v1405_v27 = vld [vmem:[#allocation2 + $0xb0] sm:$0x1]  ;;  %v1819_v13 = vshll.u32 %v1404_v31, 16  ;;  %v1823_v40 = vshrl.u32 %v1404_v31, 16  ;;  %v1812_v52 = vrot.slane %v1810_v60, 4 }
 0x16e   :  { %v1815_v35 = vrot.slane %v1813_v57, 5  ;;  %v1829_v59 = vshll.u32 %v1405_v27, 16  ;;  %v748_v41 = vrot.slane %v743_v28, 4  ;;  %v267_v50 = vld [vmem:[#allocation2 + $0xe4] sm:$0x1]  ;;  %v747_v30 = vsel %vm17786_vm8, %v739_v15, %v746_v29 }
 0x16f   :  { %v1808_v45 = vsel %vm17881_vm14, %v1803_v47, %v1807_v11  ;;  %v1821_v2 = vrot.slane %v1819_v13, 5  ;;  %v1825_v19 = vrot.slane %v1823_v40, 4  ;;  %v377_v14 = vld [vmem:[#allocation2 + $0xec] sm:$0x1]  ;;  %1238 = vst.msk [vmem:[#allocation2 + $0xb8] sm:$0xf] %vm192_vm1, %v747_v30 }
 0x170   :  { %v18331_v16 = vcombine.low %v1798_v43, %v1808_v45  ;;  %v1816_v18 = vor.u32 %v1815_v35, %v1812_v52  ;;  %v1831_v23 = vrot.slane %v1829_v59, 5  ;;  %v1240_v49 = vsel %vm17769_vm5, %v748_v41, %v1239_v1  ;;  %v460_v27 = vld [vmem:[#allocation7 + $0x80] sm:$0xf]  ;;  %v461_v41 = vld [vmem:[#allocation7 + $0x84] sm:$0xf] }
 0x171   :  { %v1826_v28 = vor.u32 %v1825_v19, %v1821_v2  ;;  %1241 = vst [vmem:[#allocation2 + $0xbc] sm:$0x1] %v1240_v49  ;;  %v1869_v31 = vrot.slane %v1867_v37, 5  ;;  %v1873_v60 = vrot.slane %v1871_v9, 4  ;;  %v268_v11 = vsel %vm17769_vm5, 0, %v267_v50 }
 0x172   :  { %21944 = vst [vmem:[#allocation49_spill] sm:$0xff] %v18331_v16  ;;  %15853 = vmatmul.mubr.msk.bf16.gmra.mrb[24].mxu1 %vm2339_vm13, %v18331_v16  ;;  %v1817_v15 = vrot.slane %v1816_v18, 4  ;;  %v1415_v43 = vld [vmem:[#allocation2 + $0xd8] sm:$0xf]  ;;  %v1417_v57 = vld [vmem:[#allocation2 + $0xe0] sm:$0x1]  ;;  %16116 = vmatprep.mubr.msk.bf16.mxu0 %vm2339_vm13, %v18331_v16 }
 0x173   :  { %269 = vst [vmem:[#allocation2 + $0xe4] sm:$0x1] %v268_v11  ;;  %v378_v47 = vsel %vm17795_vm9, 0, %v377_v14  ;;  %v1827_v1 = vrot.slane %v1826_v28, 4  ;;  %v1406_v37 = vld [vmem:[#allocation2 + $0xb4] sm:$0xf]  ;;  %v1874_v40 = vor.u32 %v1873_v60, %v1869_v31 }
 0x174   :  { %v1858_v9 = vshrl.u32 %v1415_v43, 16  ;;  %v1861_v13 = vshll.u32 %v1415_v43, 16  ;;  %379 = vst [vmem:[#allocation2 + $0xec] sm:$0x1] %v378_v47  ;;  %v1822_v29 = vsel %vm17881_vm14, %v1817_v15, %v1821_v2  ;;  %v1834_v52 = vshrl.u32 %v1406_v37, 16 }
 0x175   :  { %v1837_v35 = vshll.u32 %v1406_v37, 16  ;;  %v1877_v59 = vshll.u32 %v1417_v57, 16  ;;  %v1832_v50 = vsel %vm17881_vm14, %v1827_v1, %v1831_v23  ;;  %v1875_v30 = vrot.slane %v1874_v40, 4  ;;  %v258_v62 = vld [vmem:[#allocation2 + $0xc0] sm:$0x1] }
 0x176   :  { %v1860_v45 = vrot.slane %v1858_v9, 4  ;;  %v1863_v19 = vrot.slane %v1861_v13, 5  ;;  %v18348_v14 = vcombine.low %v1822_v29, %v1832_v50  ;;  %v1836_v18 = vrot.slane %v1834_v52, 4  ;;  %v1407_v60 = vld [vmem:[#allocation2 + $0xb8] sm:$0xf] }
 0x177   :  { %v1839_v49 = vrot.slane %v1837_v35, 5  ;;  %v1879_v28 = vrot.slane %v1877_v59, 5  ;;  %v767_v43 = vshrl.u32 %v460_v27, 16  ;;  %v770_v47 = vshll.u32 %v460_v27, 16  ;;  %v270_v9 = vld [vmem:[#allocation2 + $0xf0] sm:$0x1] }
 0x178   :  { %21945 = vst [vmem:[#allocation50_spill] sm:$0xff] %v18348_v14  ;;  %v1864_v11 = vor.u32 %v1863_v19, %v1860_v45  ;;  %v775_v2 = vshrl.u32 %v461_v41, 16  ;;  %15856 = vmatprep.mubr.msk.bf16.mxu1 %vm2339_vm13, %v18348_v14  ;;  %v1408_v15 = vld [vmem:[#allocation2 + $0xbc] sm:$0x1]  ;;  %v1843_v37 = vshll.u32 %v1407_v60, 16  ;;  %v1847_v23 = vshrl.u32 %v1407_v60, 16  ;;  %16117 = vmatmul.mubr.msk.bf16.gmra.mrb[24].mxu0 %vm2339_vm13, %v18348_v14 }
 0x179   :  { %v1840_v57 = vor.u32 %v1839_v49, %v1836_v18  ;;  %v1880_v1 = vsel %vm17881_vm14, %v1875_v30, %v1879_v28  ;;  %v1853_v13 = vshll.u32 %v1408_v15, 16  ;;  %v769_v29 = vrot.slane %v767_v43, 7  ;;  %v380_v27 = vld [vmem:[#allocation2 + $0xf8] sm:$0x1]  ;;  %v17135_v10 = vld [vmem:[#allocation2 + $0xa8] sm:$0xf] }
 0x17a   :  { %v1865_v40 = vrot.slane %v1864_v11, 4  ;;  %v777_v52 = vrot.slane %v775_v2, 7  ;;  %v1845_v59 = vrot.slane %v1843_v37, 5  ;;  %v1849_v50 = vrot.slane %v1847_v23, 4  ;;  %v1249_v19 = vld [vmem:[#allocation2 + $0xe4] sm:$0xf] }
 0x17b   :  { %v1841_v35 = vrot.slane %v1840_v57, 4  ;;  %v778_v45 = vshll.u32 %v461_v41, 16  ;;  %v1855_v18 = vrot.slane %v1853_v13, 5  ;;  %v772_v60 = vor.u32 %v770_v47, %v769_v29  ;;  %v462_v28 = vld [vmem:[#allocation7 + $0x88] sm:$0xf] }
 0x17c   :  { %v1870_v49 = vsel %vm17881_vm14, %v1865_v40, %v1869_v31  ;;  %v773_v30 = vrot.slane %v769_v29, 4  ;;  %v1850_v11 = vor.u32 %v1849_v50, %v1845_v59  ;;  %v1253_v54 = vld [vmem:[#allocation2 + $0xec] sm:$0x1]  ;;  %v273_v57 = vld [vmem:[#allocation2 + $0xfc] sm:$0x1]  ;;  %v782_v23 = vrot.slane %v777_v52, 4 }
 0x17d   :  { %v1846_v15 = vsel %vm17881_vm14, %v1841_v35, %v1845_v59  ;;  %v14115_v43 = vcombine.low %v1870_v49, %v1880_v1  ;;  %v780_v2 = vor.u32 %v778_v45, %v777_v52  ;;  %v383_v37 = vld [vmem:[#allocation2 + $0x104] sm:$0x1]  ;;  %v1250_v41 = vsel %vm17805_vm10, %v772_v60, %v1249_v19  ;;  %v464_v13 = vld [vmem:[#allocation7 + $0x90] sm:$0xf]  ;;  %v276_v45 = vld [vmem:[#allocation2 + $0x108] sm:$0x1] }
 0x17e   :  { %v271_v31 = vsel %vm17769_vm5, 0, %v270_v9  ;;  %v381_v47 = vsel %vm17795_vm9, 0, %v380_v27  ;;  %v1851_v40 = vrot.slane %v1850_v11, 4  ;;  %1251 = vst [vmem:[#allocation2 + $0xe4] sm:$0xf] %v1250_v41  ;;  %v784_v1 = vshrl.u32 %v462_v28, 16 }
 0x17f   :  { %v781_v29 = vsel %vm17786_vm8, %v773_v30, %v780_v2  ;;  %272 = vst [vmem:[#allocation2 + $0xf0] sm:$0x1] %v271_v31  ;;  %382 = vst [vmem:[#allocation2 + $0xf8] sm:$0x1] %v381_v47  ;;  %v787_v35 = vshll.u32 %v462_v28, 16  ;;  %v1254_v59 = vsel %vm17769_vm5, %v782_v23, %v1253_v54  ;;  %v792_v9 = vshrl.u32 %v463_v12, 16 }
 0x180   :  { %v465_v52 = vld [vmem:[#allocation7 + $0x94] sm:$0xf]  ;;  %1252 = vst.msk [vmem:[#allocation2 + $0xe8] sm:$0xf] %vm192_vm1, %v781_v29  ;;  %v795_v50 = vshll.u32 %v463_v12, 16  ;;  %v274_v27 = vsel %vm17769_vm5, 0, %v273_v57  ;;  %v1856_v19 = vsel %vm17881_vm14, %v1851_v40, %v1855_v18 }
 0x181   :  { %1255 = vst [vmem:[#allocation2 + $0xec] sm:$0x1] %v1254_v59  ;;  %v786_v49 = vrot.slane %v784_v1, 7  ;;  %275 = vst [vmem:[#allocation2 + $0xfc] sm:$0x1] %v274_v27  ;;  %v384_v60 = vsel %vm17795_vm9, 0, %v383_v37  ;;  %v18377_v11 = vcombine.low %v1846_v15, %v1856_v19 }
 0x182   :  { %v801_v30 = vshrl.u32 %v464_v13, 16  ;;  %v386_v28 = vld [vmem:[#allocation2 + $0x110] sm:$0x1]  ;;  %v794_v54 = vrot.slane %v792_v9, 7  ;;  %385 = vst [vmem:[#allocation2 + $0x104] sm:$0x1] %v384_v60 }
 0x183   :  { %21946 = vst [vmem:[#allocation51_spill] sm:$0xff] %v18377_v11  ;;  %v804_v12 = vshll.u32 %v464_v13, 16  ;;  %v809_v2 = vshrl.u32 %v465_v52, 16  ;;  %v466_v23 = vld [vmem:[#allocation7 + $0x98] sm:$0xf]  ;;  %v789_v57 = vor.u32 %v787_v35, %v786_v49  ;;  %v790_v41 = vrot.slane %v786_v49, 4  ;;  %15857 = vmatmul.mubr.msk.bf16.gmra.mrb[28].mxu1 %vm2339_vm13, %v18377_v11  ;;  %16120 = vmatprep.mubr.msk.bf16.mxu0 %vm2339_vm13, %v18377_v11 }
 0x184   :  { %v803_v31 = vrot.slane %v801_v30, 7  ;;  %v812_v47 = vshll.u32 %v465_v52, 16  ;;  %v797_v18 = vor.u32 %v795_v50, %v794_v54  ;;  %v799_v40 = vrot.slane %v794_v54, 4  ;;  %15860 = vmatprep.mubr.msk.bf16.mxu1 %vm2339_vm13, %v14115_v43  ;;  %v469_v11 = vld [vmem:[#allocation7 + $0xa4] sm:$0xf] }
 0x185   :  { %v811_v29 = vrot.slane %v809_v2, 7  ;;  %v277_v37 = vsel %vm17769_vm5, 0, %v276_v45  ;;  %v18387_v15 = vrot.slane %v21826_v36, 4  ;;  %v387_v1 = vsel %vm17795_vm9, 0, %v386_v28  ;;  %v1418_v52 = vld [vmem:[#allocation2 + $0xe4] sm:$0xf] }
 0x186   :  { %v807_v13 = vrot.slane %v803_v31, 4  ;;  %278 = vst [vmem:[#allocation2 + $0x108] sm:$0x1] %v277_v37  ;;  %v818_v35 = vshrl.u32 %v466_v23, 16  ;;  %v798_v59 = vsel %vm17786_vm8, %v790_v41, %v797_v18  ;;  %v1256_v9 = vld [vmem:[#allocation2 + $0xf0] sm:$0xf]  ;;  %v806_v27 = vor.u32 %v804_v12, %v803_v31 }
 0x187   :  { %v1260_v50 = vld [vmem:[#allocation2 + $0xf8] sm:$0x1]  ;;  %v814_v45 = vor.u32 %v812_v47, %v811_v29  ;;  %388 = vst [vmem:[#allocation2 + $0x110] sm:$0x1] %v387_v1  ;;  %v1419_v19 = vld [vmem:[#allocation2 + $0xe8] sm:$0xf]  ;;  %v1257_v43 = vsel %vm17805_vm10, %v789_v57, %v1256_v9 }
 0x188   :  { %v1882_v49 = vshrl.u32 %v1418_v52, 16  ;;  %v1885_v60 = vshll.u32 %v1418_v52, 16  ;;  %1259 = vst.msk [vmem:[#allocation2 + $0xf4] sm:$0xf] %vm192_vm1, %v798_v59  ;;  %v1261_v30 = vsel %vm17769_vm5, %v799_v40, %v1260_v50  ;;  %v18399_v28 = vld [vmem:[#allocation7 + $0x9c] sm:$0xf] }
 0x189   :  { %v1420_v54 = vld [vmem:[#allocation2 + $0xec] sm:$0x1]  ;;  %v1891_v2 = vshll.u32 %v1419_v19, 16  ;;  %v1895_v41 = vshrl.u32 %v1419_v19, 16  ;;  %1258 = vst [vmem:[#allocation2 + $0xf0] sm:$0xf] %v1257_v43  ;;  %v815_v12 = vsel %vm17786_vm8, %v807_v13, %v814_v45 }
 0x18a   :  { %1262 = vst [vmem:[#allocation2 + $0xf8] sm:$0x1] %v1261_v30  ;;  %v816_v31 = vrot.slane %v811_v29, 4  ;;  %v279_v47 = vld [vmem:[#allocation2 + $0x114] sm:$0x1]  ;;  %v1884_v57 = vrot.slane %v1882_v49, 4 }
 0x18b   :  { %v389_v18 = vld [vmem:[#allocation2 + $0x11c] sm:$0x1]  ;;  %v18403_v37 = vld [vmem:[#allocation7 + $0xa0] sm:$0xf]  ;;  %v1887_v1 = vrot.slane %v1885_v60, 5  ;;  %v1901_v52 = vshll.u32 %v1420_v54, 16 }
 0x18c   :  { %v1263_v59 = vld [vmem:[#allocation2 + $0xfc] sm:$0xf]  ;;  %1266 = vst.msk [vmem:[#allocation2 + $0x100] sm:$0xf] %vm192_vm1, %v815_v12  ;;  %v18406_v40 = vrot.slane %v818_v35, 7  ;;  %v1893_v9 = vrot.slane %v1891_v2, 5 }
 0x18d   :  { %v1897_v50 = vrot.slane %v1895_v41, 4  ;;  %v1264_v19 = vsel %vm17805_vm10, %v806_v27, %v1263_v59  ;;  %v1267_v43 = vld [vmem:[#allocation2 + $0x104] sm:$0x1]  ;;  %v821_v13 = vshll.u32 %v466_v23, 16  ;;  %v1888_v29 = vor.u32 %v1887_v1, %v1884_v57  ;;  %v1469_v30 = vld [vmem:[#allocation10] sm:$0x3] }
 0x18e   :  { %v1903_v45 = vrot.slane %v1901_v52, 5  ;;  %1265 = vst [vmem:[#allocation2 + $0xfc] sm:$0xf] %v1264_v19  ;;  %v1268_v49 = vsel %vm17769_vm5, %v816_v31, %v1267_v43  ;;  %v824_v60 = vrot.slane %v18406_v40, 4  ;;  %v826_v2 = vshrl.u32 %v18399_v28, 16 }
 0x18f   :  { %v1898_v54 = vor.u32 %v1897_v50, %v1893_v9  ;;  %1269 = vst [vmem:[#allocation2 + $0x104] sm:$0x1] %v1268_v49  ;;  %v823_v35 = vor.u32 %v821_v13, %v18406_v40  ;;  %v829_v41 = vshll.u32 %v18399_v28, 16  ;;  %v1270_v27 = vld [vmem:[#allocation2 + $0x108] sm:$0xf]  ;;  %v1889_v12 = vrot.slane %v1888_v29, 4 }
 0x190   :  { %v280_v23 = vsel %vm17769_vm5, 0, %v279_v47  ;;  %v390_v57 = vsel %vm17795_vm9, 0, %v389_v18  ;;  %v1422_v52 = vld [vmem:[#allocation2 + $0xf4] sm:$0xf]  ;;  %v828_v59 = vrot.slane %v826_v2, 7  ;;  %v2989_v18 = vand.u32 %v17765_v3, %v1469_v30 }
 0x191   :  { %v1899_v1 = vrot.slane %v1898_v54, 4  ;;  %v1271_v40 = vsel %vm17805_vm10, %v823_v35, %v1270_v27  ;;  %281 = vst [vmem:[#allocation2 + $0x114] sm:$0x1] %v280_v23  ;;  %391 = vst [vmem:[#allocation2 + $0x11c] sm:$0x1] %v390_v57  ;;  %v1894_v50 = vsel %vm17881_vm14, %v1889_v12, %v1893_v9  ;;  %v1915_v43 = vshll.u32 %v1422_v52, 16 }
 0x192   :  { %v1421_v19 = vld [vmem:[#allocation2 + $0xf0] sm:$0xf]  ;;  %v1423_v47 = vld [vmem:[#allocation2 + $0xf8] sm:$0x1]  ;;  %v1919_v13 = vshrl.u32 %v1422_v52, 16  ;;  %15892 = vmatprep.subr.bf16.mxu1 %v2989_v18  ;;  %vm3313_vm2 = vcmask 1046532  }
 0x193   :  { %1272 = vst [vmem:[#allocation2 + $0x108] sm:$0xf] %v1271_v40  ;;  %v1904_v29 = vsel %vm17881_vm14, %v1899_v1, %v1903_v45  ;;  %v1906_v49 = vshrl.u32 %v1421_v19, 16  ;;  %v1909_v54 = vshll.u32 %v1421_v19, 16  ;;  %v1925_v35 = vshll.u32 %v1423_v47, 16  ;;  %15893 = vmatpush3.bf16.msra.mxu1 %v2989_v18  ;;  %vm18783_vm3 = vmor %vm3312_vm15, %vm3313_vm2 }
 0x194   :  { %v1425_v2 = vld [vmem:[#allocation2 + $0x100] sm:$0xf]  ;;  %v18429_v27 = vcombine.low %v1894_v50, %v1904_v29  ;;  %v1917_v23 = vrot.slane %v1915_v43, 5  ;;  %v1921_v57 = vrot.slane %v1919_v13, 4  ;;  %v1274_v28 = vld [vmem:[#allocation2 + $0x110] sm:$0x1]  ;;  %v831_v29 = vor.u32 %v829_v41, %v828_v59 }
 0x195   :  { %v1939_v36 = vshll.u32 %v1425_v2, 16  ;;  %v1908_v9 = vrot.slane %v1906_v49, 4  ;;  %v1911_v12 = vrot.slane %v1909_v54, 5  ;;  %v1927_v33 = vrot.slane %v1925_v35, 5  ;;  %v1424_v52 = vld [vmem:[#allocation2 + $0xfc] sm:$0xf] }
 0x196   :  { %v1943_v40 = vshrl.u32 %v1425_v2, 16  ;;  %15861 = vmatmul.mubr.msk.bf16.gmra.mrb[32].mxu1 %vm2339_vm13, %v18429_v27  ;;  %v1922_v45 = vor.u32 %v1921_v57, %v1917_v23  ;;  %v1426_v30 = vld [vmem:[#allocation2 + $0x104] sm:$0x1]  ;;  %v1930_v1 = vshrl.u32 %v1424_v52, 16  ;;  %v1933_v19 = vshll.u32 %v1424_v52, 16 }
 0x197   :  { %v1941_v50 = vrot.slane %v1939_v36, 5  ;;  %v1912_v47 = vor.u32 %v1911_v12, %v1908_v9  ;;  %v1949_v13 = vshll.u32 %v1426_v30, 16  ;;  %v833_v35 = vrot.slane %v828_v59, 4  ;;  %v368_v52 = vld [vmem:[#allocation2 + $0xc8] sm:$0x1] }
 0x198   :  { %v1945_v43 = vrot.slane %v1943_v40, 4  ;;  %v1923_v31 = vrot.slane %v1922_v45, 4  ;;  %v1932_v49 = vrot.slane %v1930_v1, 4  ;;  %v1935_v54 = vrot.slane %v1933_v19, 5  ;;  %v1277_v59 = vld [vmem:[#allocation2 + $0x114] sm:$0xf] }
 0x199   :  { %v1913_v2 = vrot.slane %v1912_v47, 4  ;;  %v1951_v18 = vrot.slane %v1949_v13, 5  ;;  %v832_v16 = vsel %vm17786_vm8, %v824_v60, %v831_v29  ;;  %v1275_v41 = vsel %vm17769_vm5, %v833_v35, %v1274_v28  ;;  %v458_v19 = vld [vmem:[#allocation7 + $0x78] sm:$0xf]  ;;  %v282_v28 = vld [vmem:[#allocation2 + $0x120] sm:$0x1] }
 0x19a   :  { %v1946_v14 = vor.u32 %v1945_v43, %v1941_v50  ;;  %v1427_v57 = vld [vmem:[#allocation2 + $0x108] sm:$0xf]  ;;  %v1928_v36 = vsel %vm17881_vm14, %v1923_v31, %v1927_v33  ;;  %v1936_v9 = vor.u32 %v1935_v54, %v1932_v49  ;;  %1273 = vst.msk [vmem:[#allocation2 + $0x10c] sm:$0xf] %vm192_vm1, %v832_v16  ;;  %1276 = vst [vmem:[#allocation2 + $0x110] sm:$0x1] %v1275_v41 }
 0x19b   :  { %v1954_v12 = vshrl.u32 %v1427_v57, 16  ;;  %v1918_v40 = vsel %vm17881_vm14, %v1913_v2, %v1917_v23  ;;  %v1957_v60 = vshll.u32 %v1427_v57, 16  ;;  %v21947_v30 = vshrl.u32 %v18403_v37, 16  ;;  %v459_v43 = vld [vmem:[#allocation7 + $0x7c] sm:$0xf] }
 0x19c   :  { %v1947_v45 = vrot.slane %v1946_v14, 4  ;;  %v18444_v33 = vcombine.low %v1918_v40, %v1928_v36  ;;  %v1937_v31 = vrot.slane %v1936_v9, 4  ;;  %v843_v47 = vshrl.u32 %v469_v11, 16  ;;  %v1281_v54 = vld [vmem:[#allocation2 + $0x11c] sm:$0x1] }
 0x19d   :  { %v837_v1 = vrot.slane %v21947_v30, 7  ;;  %v1956_v16 = vrot.slane %v1954_v12, 4  ;;  %v1959_v29 = vrot.slane %v1957_v60, 5  ;;  %v21949_v23 = vshll.u32 %v18403_v37, 16  ;;  %v392_v9 = vld [vmem:[#allocation2 + $0x128] sm:$0x1] }
 0x19e   :  { %21948 = vst [vmem:[#allocation52_spill] sm:$0xff] %v18444_v33  ;;  %v1952_v13 = vsel %vm17881_vm14, %v1947_v45, %v1951_v18  ;;  %15864 = vmatprep.mubr.msk.bf16.mxu1 %vm2339_vm13, %v18444_v33  ;;  %v1942_v35 = vsel %vm17881_vm14, %v1937_v31, %v1941_v50  ;;  %v845_v2 = vrot.slane %v843_v47, 7  ;;  %v846_v57 = vshll.u32 %v469_v11, 16  ;;  %v470_v40 = vld [vmem:[#allocation7 + $0xa8] sm:$0xf] }
 0x19f   :  { %v840_v14 = vor.u32 %v21949_v23, %v837_v1  ;;  %v841_v49 = vrot.slane %v837_v1, 4  ;;  %v259_v36 = vsel %vm17769_vm5, 0, %v258_v62  ;;  %v18456_v41 = vcombine.low %v1942_v35, %v1952_v13  ;;  %v17136_v32 = vld [vmem:[#allocation2 + $0xac] sm:$0xf] }
 0x1a0   :  { %v1960_v18 = vor.u32 %v1959_v29, %v1956_v16  ;;  %260 = vst [vmem:[#allocation2 + $0xc0] sm:$0x1] %v259_v36  ;;  %v369_v12 = vsel %vm17795_vm9, 0, %v368_v52  ;;  %v848_v45 = vor.u32 %v846_v57, %v845_v2  ;;  %v850_v60 = vrot.slane %v845_v2, 4 }
 0x1a1   :  { %21950 = vst [vmem:[#allocation53_spill] sm:$0xff] %v18456_v41  ;;  %v1278_v37 = vsel %vm17805_vm10, %v840_v14, %v1277_v59  ;;  %370 = vst [vmem:[#allocation2 + $0xc8] sm:$0x1] %v369_v12  ;;  %v750_v11 = vshrl.u32 %v458_v19, 16  ;;  %v753_v50 = vshll.u32 %v458_v19, 16  ;;  %15865 = vmatmul.mubr.msk.bf16.gmra.mrb[36].mxu1 %vm2339_vm13, %v18456_v41  ;;  %v758_v1 = vshrl.u32 %v459_v43, 16 }
 0x1a2   :  { %1279 = vst [vmem:[#allocation2 + $0x114] sm:$0xf] %v1278_v37  ;;  %v1428_v62 = vld [vmem:[#allocation2 + $0x10c] sm:$0xf]  ;;  %v1961_v30 = vrot.slane %v1960_v18, 4  ;;  %v761_v31 = vshll.u32 %v459_v43, 16  ;;  %v849_v13 = vsel %vm17786_vm8, %v841_v49, %v848_v45  ;;  %v1282_v29 = vsel %vm17769_vm5, %v850_v60, %v1281_v54 }
 0x1a3   :  { %v283_v59 = vsel %vm17769_vm5, 0, %v282_v28  ;;  %v1429_v16 = vld [vmem:[#allocation2 + $0x110] sm:$0x1]  ;;  %v1963_v47 = vshll.u32 %v1428_v62, 16  ;;  %v1967_v52 = vshrl.u32 %v1428_v62, 16  ;;  %v752_v14 = vrot.slane %v750_v11, 7 }
 0x1a4   :  { %284 = vst [vmem:[#allocation2 + $0x120] sm:$0x1] %v283_v59  ;;  %v471_v19 = vld [vmem:[#allocation7 + $0xac] sm:$0xf]  ;;  %v1973_v23 = vshll.u32 %v1429_v16, 16  ;;  %v760_v43 = vrot.slane %v758_v1, 7 }
 0x1a5   :  { %1280 = vst.msk [vmem:[#allocation2 + $0x118] sm:$0xf] %vm192_vm1, %v849_v13  ;;  %1283 = vst [vmem:[#allocation2 + $0x11c] sm:$0x1] %v1282_v29  ;;  %v393_v28 = vsel %vm17795_vm9, 0, %v392_v9  ;;  %v1965_v35 = vrot.slane %v1963_v47, 5  ;;  %v755_v37 = vor.u32 %v753_v50, %v752_v14 }
 0x1a6   :  { %v1969_v2 = vrot.slane %v1967_v52, 4  ;;  %394 = vst [vmem:[#allocation2 + $0x128] sm:$0x1] %v393_v28  ;;  %v852_v57 = vshrl.u32 %v470_v40, 16  ;;  %v855_v36 = vshll.u32 %v470_v40, 16  ;;  %v1975_v18 = vrot.slane %v1973_v23, 5 }
 0x1a7   :  { %v285_v49 = vld [vmem:[#allocation2 + $0x12c] sm:$0x1]  ;;  %v756_v54 = vrot.slane %v752_v14, 4  ;;  %v763_v12 = vor.u32 %v761_v31, %v760_v43  ;;  %v1966_v45 = vsel %vm17881_vm14, %v1961_v30, %v1965_v35  ;;  %v765_v62 = vrot.slane %v760_v43, 4  ;;  %v1242_v11 = vld [vmem:[#allocation2 + $0xc0] sm:$0xf] }
 0x1a8   :  { %v1970_v60 = vor.u32 %v1969_v2, %v1965_v35  ;;  %v854_v1 = vrot.slane %v852_v57, 7  ;;  %v1243_v16 = vsel %vm17805_vm10, %v755_v37, %v1242_v11  ;;  %v1246_v40 = vld [vmem:[#allocation2 + $0xc8] sm:$0x1]  ;;  %v860_v47 = vshrl.u32 %v471_v19, 16  ;;  %v395_v29 = vld [vmem:[#allocation2 + $0x134] sm:$0x1] }
 0x1a9   :  { %v1430_v59 = vld [vmem:[#allocation2 + $0x114] sm:$0xf]  ;;  %v764_v9 = vsel %vm17786_vm8, %v756_v54, %v763_v12  ;;  %v863_v52 = vshll.u32 %v471_v19, 16  ;;  %1244 = vst [vmem:[#allocation2 + $0xc0] sm:$0xf] %v1243_v16  ;;  %v1247_v30 = vsel %vm17769_vm5, %v765_v62, %v1246_v40  ;;  %v286_v35 = vsel %vm17769_vm5, 0, %v285_v49 }
 0x1aa   :  { %v1971_v50 = vrot.slane %v1970_v60, 4  ;;  %v1978_v13 = vshrl.u32 %v1430_v59, 16  ;;  %v1981_v31 = vshll.u32 %v1430_v59, 16  ;;  %1245 = vst.msk [vmem:[#allocation2 + $0xc4] sm:$0xf] %vm192_vm1, %v764_v9  ;;  %v857_v23 = vor.u32 %v855_v36, %v854_v1 }
 0x1ab   :  { %1248 = vst [vmem:[#allocation2 + $0xc8] sm:$0x1] %v1247_v30  ;;  %v858_v14 = vrot.slane %v854_v1, 4  ;;  %v862_v43 = vrot.slane %v860_v47, 7  ;;  %v1284_v28 = vld [vmem:[#allocation2 + $0x120] sm:$0xf] }
 0x1ac   :  { %v472_v2 = vld [vmem:[#allocation7 + $0xb0] sm:$0xf]  ;;  %v1976_v19 = vsel %vm17881_vm14, %v1971_v50, %v1975_v18  ;;  %v1431_v57 = vld [vmem:[#allocation2 + $0x118] sm:$0xf]  ;;  %v1432_v37 = vld [vmem:[#allocation2 + $0x11c] sm:$0x1]  ;;  %v1285_v40 = vsel %vm17805_vm10, %v857_v23, %v1284_v28 }
 0x1ad   :  { %v1980_v54 = vrot.slane %v1978_v13, 4  ;;  %v1983_v12 = vrot.slane %v1981_v31, 5  ;;  %287 = vst [vmem:[#allocation2 + $0x12c] sm:$0x1] %v286_v35  ;;  %v18486_v60 = vld [vmem:[#allocation7 + $0xb4] sm:$0xf]  ;;  %v18488_v62 = vcombine.low %v1966_v45, %v1976_v19  ;;  %v865_v16 = vor.u32 %v863_v52, %v862_v43 }
 0x1ae   :  { %v1987_v36 = vshll.u32 %v1431_v57, 16  ;;  %v1991_v11 = vshrl.u32 %v1431_v57, 16  ;;  %v1997_v1 = vshll.u32 %v1432_v37, 16  ;;  %v1288_v59 = vld [vmem:[#allocation2 + $0x128] sm:$0x1]  ;;  %v867_v49 = vrot.slane %v862_v43, 4 }
 0x1af   :  { %21951 = vst [vmem:[#allocation54_spill] sm:$0xff] %v18488_v62  ;;  %v1984_v9 = vor.u32 %v1983_v12, %v1980_v54  ;;  %v5268_v18 = vld [vmem:[#allocation10 + $0xc] sm:$0x3]  ;;  %15868 = vmatprep.mubr.msk.bf16.mxu1 %vm2339_vm13, %v18488_v62  ;;  %1286 = vst [vmem:[#allocation2 + $0x120] sm:$0xf] %v1285_v40  ;;  %v396_v45 = vsel %vm17795_vm9, 0, %v395_v29  ;;  %v866_v30 = vsel %vm17786_vm8, %v858_v14, %v865_v16 }
 0x1b0   :  { %v1989_v47 = vrot.slane %v1987_v36, 5  ;;  %v1993_v50 = vrot.slane %v1991_v11, 4  ;;  %v1999_v13 = vrot.slane %v1997_v1, 5  ;;  %v1289_v52 = vsel %vm17769_vm5, %v867_v49, %v1288_v59  ;;  %397 = vst [vmem:[#allocation2 + $0x134] sm:$0x1] %v396_v45 }
 0x1b1   :  { %v1985_v31 = vrot.slane %v1984_v9, 4  ;;  %v869_v23 = vshrl.u32 %v472_v2, 16  ;;  %v1409_v28 = vld [vmem:[#allocation2 + $0xc0] sm:$0xf]  ;;  %v1410_v35 = vld [vmem:[#allocation2 + $0xc4] sm:$0xf]  ;;  %v18503_v29 = vand.u32 %v5268_v18, %v17765_v3 }
 0x1b2   :  { %v1994_v43 = vor.u32 %v1993_v50, %v1989_v47  ;;  %1287 = vst.msk [vmem:[#allocation2 + $0x124] sm:$0xf] %vm192_vm1, %v866_v30  ;;  %1290 = vst [vmem:[#allocation2 + $0x128] sm:$0x1] %v1289_v52  ;;  %v872_v19 = vshll.u32 %v472_v2, 16  ;;  %v877_v57 = vshrl.u32 %v18486_v60, 16 }
 0x1b3   :  { %v1990_v14 = vsel %vm17881_vm14, %v1985_v31, %v1989_v47  ;;  %v1411_v37 = vld [vmem:[#allocation2 + $0xc8] sm:$0x1]  ;;  %v4464_v54 = vshrl.u32 %v1409_v28, 16  ;;  %v4467_v12 = vshll.u32 %v1409_v28, 16  ;;  %v4473_v36 = vshll.u32 %v1410_v35, 16  ;;  %16222 = vmatprep.subr.bf16.mxu0 %v18503_v29 }
 0x1b4   :  { %v1995_v11 = vrot.slane %v1994_v43, 4  ;;  %v4477_v1 = vshrl.u32 %v1410_v35, 16  ;;  %v4483_v59 = vshll.u32 %v1411_v37, 16  ;;  %v871_v9 = vrot.slane %v869_v23, 7  ;;  %v1291_v16 = vld [vmem:[#allocation2 + $0x12c] sm:$0xf] }
 0x1b5   :  { %v288_v49 = vld [vmem:[#allocation2 + $0x138] sm:$0x1]  ;;  %v4466_v2 = vrot.slane %v4464_v54, 4  ;;  %v4469_v40 = vrot.slane %v4467_v12, 5  ;;  %v4475_v50 = vrot.slane %v4473_v36, 5  ;;  %v879_v18 = vrot.slane %v877_v57, 7 }
 0x1b6   :  { %v2000_v45 = vsel %vm17881_vm14, %v1995_v11, %v1999_v13  ;;  %v4479_v47 = vrot.slane %v4477_v1, 4  ;;  %v4485_v31 = vrot.slane %v4483_v59, 5  ;;  %v874_v30 = vor.u32 %v872_v19, %v871_v9  ;;  %v1433_v28 = vld [vmem:[#allocation2 + $0x120] sm:$0xf]  ;;  %v475_v59 = vld [vmem:[#allocation7 + $0xbc] sm:$0xf] }
 0x1b7   :  { %v18510_v52 = vcombine.low %v1990_v14, %v2000_v45  ;;  %v4470_v43 = vor.u32 %v4469_v40, %v4466_v2  ;;  %v875_v35 = vrot.slane %v871_v9, 4  ;;  %v880_v23 = vshll.u32 %v18486_v60, 16  ;;  %v1295_v12 = vld [vmem:[#allocation2 + $0x134] sm:$0x1]  ;;  %v398_v36 = vld [vmem:[#allocation2 + $0x140] sm:$0x1] }
 0x1b8   :  { %v4480_v37 = vor.u32 %v4479_v47, %v4475_v50  ;;  %v2002_v63 = vshrl.u32 %v1433_v28, 16  ;;  %v2005_v20 = vshll.u32 %v1433_v28, 16  ;;  %v884_v54 = vrot.slane %v879_v18, 4  ;;  %v474_v60 = vld [vmem:[#allocation7 + $0xb8] sm:$0xf] }
 0x1b9   :  { %21952 = vst [vmem:[#allocation55_spill] sm:$0xff] %v18510_v52  ;;  %15869 = vmatmul.mubr.msk.bf16.gmra.mrb[40].mxu1 %vm2339_vm13, %v18510_v52  ;;  %v4471_v13 = vrot.slane %v4470_v43, 4  ;;  %v1434_v57 = vld [vmem:[#allocation2 + $0x124] sm:$0xf]  ;;  %v1435_v11 = vld [vmem:[#allocation2 + $0x128] sm:$0x1]  ;;  %v882_v19 = vor.u32 %v880_v23, %v879_v18  ;;  %v1292_v14 = vsel %vm17805_vm10, %v874_v30, %v1291_v16 }
 0x1ba   :  { %v289_v1 = vsel %vm17769_vm5, 0, %v288_v49  ;;  %v4481_v9 = vrot.slane %v4480_v37, 4  ;;  %v2004_v2 = vrot.slane %v2002_v63, 4  ;;  %v2007_v40 = vrot.slane %v2005_v20, 5  ;;  %1293 = vst [vmem:[#allocation2 + $0x12c] sm:$0xf] %v1292_v14 }
 0x1bb   :  { %v2011_v45 = vshll.u32 %v1434_v57, 16  ;;  %290 = vst [vmem:[#allocation2 + $0x138] sm:$0x1] %v289_v1  ;;  %v291_v47 = vld [vmem:[#allocation2 + $0x144] sm:$0x1]  ;;  %v4476_v43 = vsel %vm17881_vm14, %v4471_v13, %v4475_v50  ;;  %v2015_v18 = vshrl.u32 %v1434_v57, 16  ;;  %v883_v16 = vsel %vm17786_vm8, %v875_v35, %v882_v19 }
 0x1bc   :  { %v401_v28 = vld [vmem:[#allocation2 + $0x14c] sm:$0x1]  ;;  %v2021_v23 = vshll.u32 %v1435_v11, 16  ;;  %v18523_v30 = vld [vmem:[#allocation7 + $0xc0] sm:$0xf]  ;;  %v4486_v49 = vsel %vm17881_vm14, %v4481_v9, %v4485_v31  ;;  %v2008_v63 = vor.u32 %v2007_v40, %v2004_v2  ;;  %v1296_v37 = vsel %vm17769_vm5, %v884_v54, %v1295_v12 }
 0x1bd   :  { %v2013_v20 = vrot.slane %v2011_v45, 5  ;;  %1294 = vst.msk [vmem:[#allocation2 + $0x130] sm:$0xf] %vm192_vm1, %v883_v16  ;;  %v18530_v14 = vcombine.low %v4476_v43, %v4486_v49  ;;  %v2017_v50 = vrot.slane %v2015_v18, 4  ;;  %1297 = vst [vmem:[#allocation2 + $0x134] sm:$0x1] %v1296_v37 }
 0x1be   :  { %v2023_v13 = vrot.slane %v2021_v23, 5  ;;  %v399_v35 = vsel %vm17795_vm9, 0, %v398_v36  ;;  %v2009_v57 = vrot.slane %v2008_v63, 4  ;;  %v886_v11 = vshrl.u32 %v474_v60, 16  ;;  %v18540_v2 = vld [vmem:[#allocation2 + $0x20] sm:$0x1] }
 0x1bf   :  { %21953 = vst [vmem:[#allocation56_spill] sm:$0xff] %v18530_v14  ;;  %400 = vst [vmem:[#allocation2 + $0x140] sm:$0x1] %v399_v35  ;;  %v889_v19 = vshll.u32 %v474_v60, 16  ;;  %v894_v31 = vshrl.u32 %v475_v59, 16  ;;  %16121 = vmatmul.mubr.msk.bf16.gmra.mrb[28].mxu0 %vm2339_vm13, %v18530_v14  ;;  %v2018_v1 = vor.u32 %v2017_v50, %v2013_v20  ;;  %v897_v9 = vshll.u32 %v475_v59, 16 }
 0x1c0   :  { %v292_v54 = vsel %vm17769_vm5, 0, %v291_v47  ;;  %v402_v12 = vsel %vm17795_vm9, 0, %v401_v28  ;;  %16124 = vmatprep.mubr.msk.bf16.mxu0 %vm2339_vm13, %v18429_v27  ;;  %v888_v60 = vrot.slane %v886_v11, 7  ;;  %v903_v45 = vshrl.u32 %v18523_v30, 16  ;;  %v477_v37 = vld [vmem:[#allocation7 + $0xc4] sm:$0xf] }
 0x1c1   :  { %v896_v40 = vrot.slane %v894_v31, 7  ;;  %293 = vst [vmem:[#allocation2 + $0x144] sm:$0x1] %v292_v54  ;;  %403 = vst [vmem:[#allocation2 + $0x14c] sm:$0x1] %v402_v12  ;;  %v2014_v59 = vsel %vm17881_vm14, %v2009_v57, %v2013_v20  ;;  %v2019_v47 = vrot.slane %v2018_v1, 4 }
 0x1c2   :  { %v1436_v43 = vld [vmem:[#allocation2 + $0x12c] sm:$0xf]  ;;  %v1298_v18 = vld [vmem:[#allocation2 + $0x138] sm:$0xf]  ;;  %v906_v28 = vshll.u32 %v18523_v30, 16  ;;  %v891_v49 = vor.u32 %v889_v19, %v888_v60  ;;  %v892_v63 = vrot.slane %v888_v60, 4 }
 0x1c3   :  { %v2026_v23 = vshrl.u32 %v1436_v43, 16  ;;  %v2029_v16 = vshll.u32 %v1436_v43, 16  ;;  %v2024_v27 = vsel %vm17881_vm14, %v2019_v47, %v2023_v13  ;;  %v899_v35 = vor.u32 %v897_v9, %v896_v40  ;;  %v294_v54 = vld [vmem:[#allocation2 + $0x150] sm:$0x1]  ;;  %v404_v30 = vld [vmem:[#allocation2 + $0x158] sm:$0x1] }
 0x1c4   :  { %v1437_v50 = vld [vmem:[#allocation2 + $0x130] sm:$0xf]  ;;  %v901_v11 = vrot.slane %v896_v40, 4  ;;  %v905_v31 = vrot.slane %v903_v45, 7  ;;  %v18551_v12 = vcombine.low %v2014_v59, %v2024_v27  ;;  %v1438_v20 = vld [vmem:[#allocation2 + $0x134] sm:$0x1]  ;;  %v1299_v13 = vsel %vm17805_vm10, %v891_v49, %v1298_v18 }
 0x1c5   :  { %v2028_v57 = vrot.slane %v2026_v23, 4  ;;  %v2031_v1 = vrot.slane %v2029_v16, 5  ;;  %v2035_v36 = vshll.u32 %v1437_v50, 16  ;;  %v478_v14 = vld [vmem:[#allocation7 + $0xc8] sm:$0xf]  ;;  %v2039_v43 = vshrl.u32 %v1437_v50, 16 }
 0x1c6   :  { %21954 = vst [vmem:[#allocation57_spill] sm:$0xff] %v18551_v12  ;;  %v2045_v19 = vshll.u32 %v1438_v20, 16  ;;  %v900_v60 = vsel %vm17786_vm8, %v892_v63, %v899_v35  ;;  %v1302_v9 = vld [vmem:[#allocation2 + $0x140] sm:$0x1]  ;;  %v18557_v40 = vld [vmem:[#allocation7 + $0xcc] sm:$0xf]  ;;  %15872 = vmatprep.mubr.msk.bf16.mxu1 %vm2339_vm13, %v18551_v12  ;;  %v908_v23 = vor.u32 %v906_v28, %v905_v31 }
 0x1c7   :  { %v2032_v45 = vor.u32 %v2031_v1, %v2028_v57  ;;  %v2037_v59 = vrot.slane %v2035_v36, 5  ;;  %1300 = vst [vmem:[#allocation2 + $0x138] sm:$0xf] %v1299_v13  ;;  %1301 = vst.msk [vmem:[#allocation2 + $0x13c] sm:$0xf] %vm192_vm1, %v900_v60  ;;  %v1303_v47 = vsel %vm17769_vm5, %v901_v11, %v1302_v9  ;;  %v2041_v16 = vrot.slane %v2039_v43, 4  ;;  %16125 = vmatmul.mubr.msk.bf16.gmra.mrb[32].mxu0 %vm2339_vm13, %v18444_v33 }
 0x1c8   :  { %v2047_v63 = vrot.slane %v2045_v19, 5  ;;  %1304 = vst [vmem:[#allocation2 + $0x140] sm:$0x1] %v1303_v47  ;;  %v909_v18 = vrot.slane %v905_v31, 4  ;;  %v911_v49 = vshrl.u32 %v477_v37, 16  ;;  %16128 = vmatprep.mubr.msk.bf16.mxu0 %vm2339_vm13, %v18456_v41  ;;  %v914_v57 = vshll.u32 %v477_v37, 16 }
 0x1c9   :  { %v1305_v27 = vld [vmem:[#allocation2 + $0x144] sm:$0xf]  ;;  %v297_v50 = vld [vmem:[#allocation2 + $0x15c] sm:$0x1]  ;;  %v18566_v20 = vld [vmem:[#allocation7 + $0xd0] sm:$0xf]  ;;  %v2042_v43 = vor.u32 %v2041_v16, %v2037_v59 }
 0x1ca   :  { %v407_v35 = vld [vmem:[#allocation2 + $0x164] sm:$0x1]  ;;  %v2033_v36 = vrot.slane %v2032_v45, 4  ;;  %v1306_v28 = vsel %vm17805_vm10, %v908_v23, %v1305_v27  ;;  %v1309_v11 = vld [vmem:[#allocation2 + $0x14c] sm:$0x1]  ;;  %v295_v1 = vsel %vm17769_vm5, 0, %v294_v54 }
 0x1cb   :  { %v913_v31 = vrot.slane %v911_v49, 7  ;;  %1307 = vst [vmem:[#allocation2 + $0x144] sm:$0xf] %v1306_v28  ;;  %296 = vst [vmem:[#allocation2 + $0x150] sm:$0x1] %v295_v1  ;;  %v405_v19 = vsel %vm17795_vm9, 0, %v404_v30 }
 0x1cc   :  { %v920_v60 = vshrl.u32 %v478_v14, 16  ;;  %v2038_v13 = vsel %vm17881_vm14, %v2033_v36, %v2037_v59  ;;  %406 = vst [vmem:[#allocation2 + $0x158] sm:$0x1] %v405_v19  ;;  %v923_v37 = vshll.u32 %v478_v14, 16  ;;  %v928_v9 = vshrl.u32 %v18557_v40, 16 }
 0x1cd   :  { %v931_v45 = vshll.u32 %v18557_v40, 16  ;;  %v2043_v47 = vrot.slane %v2042_v43, 4  ;;  %v916_v23 = vor.u32 %v914_v57, %v913_v31  ;;  %v918_v54 = vrot.slane %v913_v31, 4 }
 0x1ce   :  { %v922_v16 = vrot.slane %v920_v60, 7  ;;  %v930_v49 = vrot.slane %v928_v9, 7  ;;  %v298_v27 = vsel %vm17769_vm5, 0, %v297_v50  ;;  %v408_v30 = vsel %vm17795_vm9, 0, %v407_v35  ;;  %v1439_v59 = vld [vmem:[#allocation2 + $0x138] sm:$0xf] }
 0x1cf   :  { %v937_v28 = vshrl.u32 %v18566_v20, 16  ;;  %v2048_v14 = vsel %vm17881_vm14, %v2043_v47, %v2047_v63  ;;  %v1440_v36 = vld [vmem:[#allocation2 + $0x13c] sm:$0xf]  ;;  %v917_v40 = vsel %vm17786_vm8, %v909_v18, %v916_v23  ;;  %v1310_v57 = vsel %vm17769_vm5, %v918_v54, %v1309_v11  ;;  %299 = vst [vmem:[#allocation2 + $0x15c] sm:$0x1] %v298_v27  ;;  %16129 = vmatmul.mubr.msk.bf16.gmra.mrb[36].mxu0 %vm2339_vm13, %v18488_v62 }
 0x1d0   :  { %v925_v1 = vor.u32 %v923_v37, %v922_v16  ;;  %409 = vst [vmem:[#allocation2 + $0x164] sm:$0x1] %v408_v30  ;;  %v18591_v50 = vcombine.low %v2038_v13, %v2048_v14  ;;  %v1441_v43 = vld [vmem:[#allocation2 + $0x140] sm:$0x1]  ;;  %v2050_v35 = vshrl.u32 %v1439_v59, 16  ;;  %v2053_v31 = vshll.u32 %v1439_v59, 16  ;;  %16132 = vmatprep.mubr.msk.bf16.mxu0 %vm2339_vm13, %v18510_v52 }
 0x1d1   :  { %v2059_v19 = vshll.u32 %v1440_v36, 16  ;;  %1308 = vst.msk [vmem:[#allocation2 + $0x148] sm:$0xf] %vm192_vm1, %v917_v40  ;;  %1311 = vst [vmem:[#allocation2 + $0x14c] sm:$0x1] %v1310_v57  ;;  %v2063_v63 = vshrl.u32 %v1440_v36, 16  ;;  %v933_v9 = vor.u32 %v931_v45, %v930_v49 }
 0x1d2   :  { %21955 = vst [vmem:[#allocation58_spill] sm:$0xff] %v18591_v50  ;;  %v2069_v60 = vshll.u32 %v1441_v43, 16  ;;  %v926_v18 = vrot.slane %v922_v16, 4  ;;  %v481_v11 = vld [vmem:[#allocation7 + $0xd4] sm:$0xf]  ;;  %15873 = vmatmul.mubr.msk.bf16.gmra.mrb[44].mxu1 %vm2339_vm13, %v18591_v50  ;;  %v2052_v13 = vrot.slane %v2050_v35, 4 }
 0x1d3   :  { %v2055_v37 = vrot.slane %v2053_v31, 5  ;;  %v2061_v47 = vrot.slane %v2059_v19, 5  ;;  %v1442_v23 = vld [vmem:[#allocation2 + $0x144] sm:$0xf]  ;;  %v935_v54 = vrot.slane %v930_v49, 4  ;;  %v2065_v27 = vrot.slane %v2063_v63, 4 }
 0x1d4   :  { %v2071_v30 = vrot.slane %v2069_v60, 5  ;;  %v2074_v14 = vshrl.u32 %v1442_v23, 16  ;;  %v2077_v59 = vshll.u32 %v1442_v23, 16  ;;  %v1312_v36 = vld [vmem:[#allocation2 + $0x150] sm:$0xf]  ;;  %v934_v45 = vsel %vm17786_vm8, %v926_v18, %v933_v9 }
 0x1d5   :  { %v2056_v40 = vor.u32 %v2055_v37, %v2052_v13  ;;  %v1313_v16 = vsel %vm17805_vm10, %v925_v1, %v1312_v36  ;;  %v1316_v57 = vld [vmem:[#allocation2 + $0x158] sm:$0x1]  ;;  %v939_v43 = vrot.slane %v937_v28, 7  ;;  %v2066_v35 = vor.u32 %v2065_v27, %v2061_v47  ;;  %1315 = vst.msk [vmem:[#allocation2 + $0x154] sm:$0xf] %vm192_vm1, %v934_v45 }
 0x1d6   :  { %v2076_v31 = vrot.slane %v2074_v14, 4  ;;  %v2079_v49 = vrot.slane %v2077_v59, 5  ;;  %1314 = vst [vmem:[#allocation2 + $0x150] sm:$0xf] %v1313_v16  ;;  %v1317_v19 = vsel %vm17769_vm5, %v935_v54, %v1316_v57  ;;  %v940_v60 = vshll.u32 %v18566_v20, 16 }
 0x1d7   :  { %v2057_v63 = vrot.slane %v2056_v40, 4  ;;  %1318 = vst [vmem:[#allocation2 + $0x158] sm:$0x1] %v1317_v19  ;;  %v943_v13 = vrot.slane %v939_v43, 4  ;;  %v945_v18 = vshrl.u32 %v481_v11, 16  ;;  %v2067_v37 = vrot.slane %v2066_v35, 4  ;;  %16133 = vmatmul.mubr.msk.bf16.gmra.mrb[40].mxu0 %vm2339_vm13, %v18551_v12 }
 0x1d8   :  { %v300_v9 = vld [vmem:[#allocation2 + $0x168] sm:$0x1]  ;;  %v1444_v23 = vld [vmem:[#allocation2 + $0x14c] sm:$0x1]  ;;  %v2080_v28 = vor.u32 %v2079_v49, %v2076_v31  ;;  %v948_v27 = vshll.u32 %v481_v11, 16  ;;  %v942_v19 = vor.u32 %v940_v60, %v939_v43  ;;  %16136 = vmatprep.mubr.msk.bf16.mxu0 %vm2339_vm13, %v18591_v50  ;;  %v21966_v25 = vrot.slane %v17837_v17, 5 }
 0x1d9   :  { %v1443_v1 = vld [vmem:[#allocation2 + $0x148] sm:$0xf]  ;;  %v410_v14 = vld [vmem:[#allocation2 + $0x170] sm:$0x1]  ;;  %v2062_v36 = vsel %vm17881_vm14, %v2057_v63, %v2061_v47  ;;  %v2093_v54 = vshll.u32 %v1444_v23, 16  ;;  %v2072_v20 = vsel %vm17881_vm14, %v2067_v37, %v2071_v30  ;;  %v947_v52 = vrot.slane %v945_v18, 7 }
 0x1da   :  { %v482_v59 = vld [vmem:[#allocation7 + $0xd8] sm:$0xf]  ;;  %v2083_v45 = vshll.u32 %v1443_v1, 16  ;;  %v2087_v16 = vshrl.u32 %v1443_v1, 16  ;;  %v1319_v40 = vld [vmem:[#allocation2 + $0x15c] sm:$0xf]  ;;  %v18614_v11 = vcombine.low %v2062_v36, %v2072_v20 }
 0x1db   :  { %v2081_v57 = vrot.slane %v2080_v28, 4  ;;  %v1323_v35 = vld [vmem:[#allocation2 + $0x164] sm:$0x1]  ;;  %v2095_v62 = vrot.slane %v2093_v54, 5  ;;  %v950_v47 = vor.u32 %v948_v27, %v947_v52  ;;  %v952_v63 = vrot.slane %v947_v52, 4 }
 0x1dc   :  { %21956 = vst [vmem:[#allocation59_spill] sm:$0xff] %v18614_v11  ;;  %v2085_v31 = vrot.slane %v2083_v45, 5  ;;  %v2089_v49 = vrot.slane %v2087_v16, 4  ;;  %v1320_v30 = vsel %vm17805_vm10, %v942_v19, %v1319_v40  ;;  %v301_v43 = vsel %vm17769_vm5, 0, %v300_v9  ;;  %15876 = vmatprep.mubr.msk.bf16.mxu1 %vm2339_vm13, %v18614_v11  ;;  %v1446_v1 = vld [vmem:[#allocation2 + $0x154] sm:$0xf] }
 0x1dd   :  { %v1445_v37 = vld [vmem:[#allocation2 + $0x150] sm:$0xf]  ;;  %1321 = vst [vmem:[#allocation2 + $0x15c] sm:$0xf] %v1320_v30  ;;  %302 = vst [vmem:[#allocation2 + $0x168] sm:$0x1] %v301_v43  ;;  %v1324_v19 = vsel %vm17769_vm5, %v952_v63, %v1323_v35 }
 0x1de   :  { %v2086_v60 = vsel %vm17881_vm14, %v2081_v57, %v2085_v31  ;;  %v2090_v18 = vor.u32 %v2089_v49, %v2085_v31  ;;  %v411_v52 = vsel %vm17795_vm9, 0, %v410_v14  ;;  %v483_v23 = vld [vmem:[#allocation7 + $0xdc] sm:$0xf]  ;;  %v954_v28 = vshrl.u32 %v482_v59, 16  ;;  %v1447_v27 = vld [vmem:[#allocation2 + $0x158] sm:$0x1] }
 0x1df   :  { %v2098_v36 = vshrl.u32 %v1445_v37, 16  ;;  %v2101_v45 = vshll.u32 %v1445_v37, 16  ;;  %v2107_v9 = vshll.u32 %v1446_v1, 16  ;;  %v2111_v16 = vshrl.u32 %v1446_v1, 16  ;;  %412 = vst [vmem:[#allocation2 + $0x170] sm:$0x1] %v411_v52  ;;  %16137 = vmatmul.mubr.msk.bf16.gmra.mrb[44].mxu0 %vm2339_vm13, %v18614_v11 }
 0x1e0   :  { %v303_v54 = vld [vmem:[#allocation2 + $0x174] sm:$0x1]  ;;  %v2091_v40 = vrot.slane %v2090_v18, 4  ;;  %v2117_v20 = vshll.u32 %v1447_v27, 16  ;;  %v951_v57 = vsel %vm17786_vm8, %v943_v13, %v950_v47  ;;  %v413_v31 = vld [vmem:[#allocation2 + $0x17c] sm:$0x1] }
 0x1e1   :  { %v2100_v49 = vrot.slane %v2098_v36, 4  ;;  %v2103_v14 = vrot.slane %v2101_v45, 5  ;;  %v2109_v30 = vrot.slane %v2107_v9, 5  ;;  %v2113_v43 = vrot.slane %v2111_v16, 4  ;;  %1322 = vst.msk [vmem:[#allocation2 + $0x160] sm:$0xf] %vm192_vm1, %v951_v57 }
 0x1e2   :  { %1325 = vst [vmem:[#allocation2 + $0x164] sm:$0x1] %v1324_v19  ;;  %v2096_v37 = vsel %vm17881_vm14, %v2091_v40, %v2095_v62  ;;  %v2119_v1 = vrot.slane %v2117_v20, 5  ;;  %v956_v18 = vrot.slane %v954_v28, 7  ;;  %v957_v52 = vshll.u32 %v482_v59, 16 }
 0x1e3   :  { %v18635_v27 = vcombine.low %v2086_v60, %v2096_v37  ;;  %v2104_v13 = vor.u32 %v2103_v14, %v2100_v49  ;;  %v2114_v47 = vor.u32 %v2113_v43, %v2109_v30  ;;  %v962_v50 = vshrl.u32 %v483_v23, 16  ;;  %v484_v16 = vld [vmem:[#allocation7 + $0xe0] sm:$0xf]  ;;  %v306_v43 = vld [vmem:[#allocation2 + $0x180] sm:$0x1] }
 0x1e4   :  { %v959_v35 = vor.u32 %v957_v52, %v956_v18  ;;  %v960_v63 = vrot.slane %v956_v18, 4  ;;  %v965_v36 = vshll.u32 %v483_v23, 16  ;;  %v304_v45 = vsel %vm17769_vm5, 0, %v303_v54  ;;  %v1448_v59 = vld [vmem:[#allocation2 + $0x15c] sm:$0xf] }
 0x1e5   :  { %21957 = vst [vmem:[#allocation60_spill] sm:$0xff] %v18635_v27  ;;  %15877 = vmatmul.mubr.msk.bf16.gmra.mrb[48].mxu1 %vm2339_vm13, %v18635_v27  ;;  %v2105_v62 = vrot.slane %v2104_v13, 4  ;;  %v2115_v28 = vrot.slane %v2114_v47, 4  ;;  %v964_v60 = vrot.slane %v962_v50, 7  ;;  %305 = vst [vmem:[#allocation2 + $0x174] sm:$0x1] %v304_v45  ;;  %16140 = vmatprep.mubr.msk.bf16.mxu0 %vm2339_vm13, %v18635_v27 }
 0x1e6   :  { %v414_v9 = vsel %vm17795_vm9, 0, %v413_v31  ;;  %v2122_v40 = vshrl.u32 %v1448_v59, 16  ;;  %v2125_v23 = vshll.u32 %v1448_v59, 16  ;;  %v1326_v20 = vld [vmem:[#allocation2 + $0x168] sm:$0xf]  ;;  %v21967_v61 = vrot.slane %v17846_v21, 9 }
 0x1e7   :  { %v1330_v57 = vld [vmem:[#allocation2 + $0x170] sm:$0x1]  ;;  %415 = vst [vmem:[#allocation2 + $0x17c] sm:$0x1] %v414_v9  ;;  %v485_v54 = vld [vmem:[#allocation7 + $0xe4] sm:$0xf]  ;;  %v2110_v19 = vsel %vm17881_vm14, %v2105_v62, %v2109_v30  ;;  %v2120_v50 = vsel %vm17881_vm14, %v2115_v28, %v2119_v1  ;;  %v967_v49 = vor.u32 %v965_v36, %v964_v60  ;;  %v1327_v47 = vsel %vm17805_vm10, %v959_v35, %v1326_v20 }
 0x1e8   :  { %v969_v14 = vrot.slane %v964_v60, 4  ;;  %v18651_v31 = vcombine.low %v2110_v19, %v2120_v50  ;;  %v1449_v37 = vld [vmem:[#allocation2 + $0x160] sm:$0xf]  ;;  %v2124_v52 = vrot.slane %v2122_v40, 4  ;;  %v2127_v13 = vrot.slane %v2125_v23, 5 }
 0x1e9   :  { %v1450_v18 = vld [vmem:[#allocation2 + $0x164] sm:$0x1]  ;;  %v416_v45 = vld [vmem:[#allocation2 + $0x188] sm:$0x1]  ;;  %v18655_v59 = vld [vmem:[#allocation7 + $0xe8] sm:$0xf]  ;;  %v968_v1 = vsel %vm17786_vm8, %v960_v63, %v967_v49 }
 0x1ea   :  { %21958 = vst [vmem:[#allocation61_spill] sm:$0xff] %v18651_v31  ;;  %v2131_v9 = vshll.u32 %v1449_v37, 16  ;;  %v2135_v30 = vshrl.u32 %v1449_v37, 16  ;;  %v2141_v62 = vshll.u32 %v1450_v18, 16  ;;  %1328 = vst [vmem:[#allocation2 + $0x168] sm:$0xf] %v1327_v47  ;;  %15880 = vmatprep.mubr.msk.bf16.mxu1 %vm2339_vm13, %v18651_v31  ;;  %v2128_v36 = vor.u32 %v2127_v13, %v2124_v52  ;;  %16141 = vmatmul.mubr.msk.bf16.gmra.mrb[48].mxu0 %vm2339_vm13, %v18651_v31 }
 0x1eb   :  { %1329 = vst.msk [vmem:[#allocation2 + $0x16c] sm:$0xf] %vm192_vm1, %v968_v1  ;;  %v1331_v28 = vsel %vm17769_vm5, %v969_v14, %v1330_v57  ;;  %v971_v35 = vshrl.u32 %v484_v16, 16  ;;  %v974_v60 = vshll.u32 %v484_v16, 16  ;;  %v979_v19 = vshrl.u32 %v485_v54, 16 }
 0x1ec   :  { %v2133_v40 = vrot.slane %v2131_v9, 5  ;;  %v2137_v23 = vrot.slane %v2135_v30, 4  ;;  %v2143_v20 = vrot.slane %v2141_v62, 5  ;;  %1332 = vst [vmem:[#allocation2 + $0x170] sm:$0x1] %v1331_v28  ;;  %v2129_v49 = vrot.slane %v2128_v36, 4 }
 0x1ed   :  { %v18664_v50 = vld [vmem:[#allocation7 + $0xec] sm:$0xf]  ;;  %v309_v63 = vld [vmem:[#allocation2 + $0x18c] sm:$0x1]  ;;  %v973_v37 = vrot.slane %v971_v35, 7  ;;  %v982_v18 = vshll.u32 %v485_v54, 16 }
 0x1ee   :  { %v1333_v52 = vld [vmem:[#allocation2 + $0x174] sm:$0xf]  ;;  %v307_v57 = vsel %vm17769_vm5, 0, %v306_v43  ;;  %v2138_v14 = vor.u32 %v2137_v23, %v2133_v40  ;;  %v981_v16 = vrot.slane %v979_v19, 7  ;;  %v1337_v13 = vld [vmem:[#allocation2 + $0x17c] sm:$0x1]  ;;  %v2134_v30 = vsel %vm17881_vm14, %v2129_v49, %v2133_v40 }
 0x1ef   :  { %308 = vst [vmem:[#allocation2 + $0x180] sm:$0x1] %v307_v57  ;;  %v417_v47 = vsel %vm17795_vm9, 0, %v416_v45  ;;  %v988_v9 = vshrl.u32 %v18655_v59, 16  ;;  %v976_v62 = vor.u32 %v974_v60, %v973_v37  ;;  %v977_v1 = vrot.slane %v973_v37, 4 }
 0x1f0   :  { %418 = vst [vmem:[#allocation2 + $0x188] sm:$0x1] %v417_v47  ;;  %v991_v54 = vshll.u32 %v18655_v59, 16  ;;  %v2139_v36 = vrot.slane %v2138_v14, 4  ;;  %v984_v28 = vor.u32 %v982_v18, %v981_v16  ;;  %v986_v43 = vrot.slane %v981_v16, 4 }
 0x1f1   :  { %v990_v35 = vrot.slane %v988_v9, 7  ;;  %v18676_v23 = vld [vmem:[#allocation2 + $0x168] sm:$0xf]  ;;  %v1334_v19 = vsel %vm17805_vm10, %v976_v62, %v1333_v52  ;;  %v996_v45 = vshrl.u32 %v18664_v50, 16  ;;  %v999_v57 = vshll.u32 %v18664_v50, 16 }
 0x1f2   :  { %v310_v60 = vsel %vm17769_vm5, 0, %v309_v63  ;;  %v419_v40 = vld [vmem:[#allocation2 + $0x194] sm:$0x1]  ;;  %v2144_v59 = vsel %vm17881_vm14, %v2139_v36, %v2143_v20  ;;  %v18686_v49 = vld [vmem:[#allocation2 + $0x16c] sm:$0xf]  ;;  %v2146_v37 = vshrl.u32 %v18676_v23, 16  ;;  %v985_v52 = vsel %vm17786_vm8, %v977_v1, %v984_v28 }
 0x1f3   :  { %v2149_v18 = vshll.u32 %v18676_v23, 16  ;;  %1335 = vst [vmem:[#allocation2 + $0x174] sm:$0xf] %v1334_v19  ;;  %311 = vst [vmem:[#allocation2 + $0x18c] sm:$0x1] %v310_v60  ;;  %v18692_v50 = vcombine.low %v2134_v30, %v2144_v59  ;;  %v2155_v63 = vshll.u32 %v18686_v49, 16  ;;  %v1338_v47 = vsel %vm17769_vm5, %v986_v43, %v1337_v13 }
 0x1f4   :  { %v488_v14 = vld [vmem:[#allocation7 + $0xf0] sm:$0xf]  ;;  %v18694_v16 = vld [vmem:[#allocation2 + $0x170] sm:$0x1]  ;;  %v2159_v20 = vshrl.u32 %v18686_v49, 16  ;;  %v2148_v62 = vrot.slane %v2146_v37, 4  ;;  %v993_v28 = vor.u32 %v991_v54, %v990_v35 }
 0x1f5   :  { %21959 = vst [vmem:[#allocation62_spill] sm:$0xff] %v18692_v50  ;;  %1336 = vst.msk [vmem:[#allocation2 + $0x178] sm:$0xf] %vm192_vm1, %v985_v52  ;;  %v489_v9 = vld [vmem:[#allocation7 + $0xf4] sm:$0xf]  ;;  %v2151_v36 = vrot.slane %v2149_v18, 5  ;;  %15881 = vmatmul.mubr.msk.bf16.gmra.mrb[52].mxu1 %vm2339_vm13, %v18692_v50  ;;  %16144 = vmatprep.mubr.msk.bf16.mxu0 %vm2339_vm13, %v18692_v50 }
 0x1f6   :  { %v2165_v1 = vshll.u32 %v18694_v16, 16  ;;  %1339 = vst [vmem:[#allocation2 + $0x17c] sm:$0x1] %v1338_v47  ;;  %v2157_v30 = vrot.slane %v2155_v63, 5  ;;  %v2161_v19 = vrot.slane %v2159_v20, 4  ;;  %v994_v60 = vrot.slane %v990_v35, 4 }
 0x1f7   :  { %v998_v59 = vrot.slane %v996_v45, 7  ;;  %v1340_v31 = vld [vmem:[#allocation2 + $0x180] sm:$0xf]  ;;  %v2152_v52 = vor.u32 %v2151_v36, %v2148_v62  ;;  %v1344_v37 = vld [vmem:[#allocation2 + $0x188] sm:$0x1]  ;;  %v420_v54 = vsel %vm17795_vm9, 0, %v419_v40 }
 0x1f8   :  { %v2167_v13 = vrot.slane %v2165_v1, 5  ;;  %v1341_v43 = vsel %vm17805_vm10, %v993_v28, %v1340_v31  ;;  %v2162_v18 = vor.u32 %v2161_v19, %v2157_v30  ;;  %421 = vst [vmem:[#allocation2 + $0x194] sm:$0x1] %v420_v54  ;;  %v1005_v35 = vshrl.u32 %v488_v14, 16 }
 0x1f9   :  { %v1001_v47 = vor.u32 %v999_v57, %v998_v59  ;;  %v1003_v27 = vrot.slane %v998_v59, 4  ;;  %1342 = vst [vmem:[#allocation2 + $0x180] sm:$0xf] %v1341_v43  ;;  %v2153_v45 = vrot.slane %v2152_v52, 4  ;;  %v1008_v63 = vshll.u32 %v488_v14, 16 }
 0x1fa   :  { %v1013_v20 = vshrl.u32 %v489_v9, 16  ;;  %v1016_v11 = vshll.u32 %v489_v9, 16  ;;  %v2163_v50 = vrot.slane %v2162_v18, 4  ;;  %v18710_v62 = vld [vmem:[#allocation2 + $0x174] sm:$0xf]  ;;  %v1007_v40 = vrot.slane %v1005_v35, 7 }
 0x1fb   :  { %v1002_v31 = vsel %vm17786_vm8, %v994_v60, %v1001_v47  ;;  %v1345_v36 = vsel %vm17769_vm5, %v1003_v27, %v1344_v37  ;;  %v1347_v1 = vld [vmem:[#allocation2 + $0x18c] sm:$0xf]  ;;  %v2158_v57 = vsel %vm17881_vm14, %v2153_v45, %v2157_v30  ;;  %v2170_v14 = vshrl.u32 %v18710_v62, 16  ;;  %v312_v43 = vld [vmem:[#allocation2 + $0x198] sm:$0x1] }
 0x1fc   :  { %v18718_v28 = vld [vmem:[#allocation2 + $0x178] sm:$0xf]  ;;  %v2173_v9 = vshll.u32 %v18710_v62, 16  ;;  %1343 = vst.msk [vmem:[#allocation2 + $0x184] sm:$0xf] %vm192_vm1, %v1002_v31  ;;  %v1015_v19 = vrot.slane %v1013_v20, 7  ;;  %v2168_v60 = vsel %vm17881_vm14, %v2163_v50, %v2167_v13  ;;  %v1010_v30 = vor.u32 %v1008_v63, %v1007_v40 }
 0x1fd   :  { %1346 = vst [vmem:[#allocation2 + $0x188] sm:$0x1] %v1345_v36  ;;  %v18725_v59 = vld [vmem:[#allocation2 + $0x17c] sm:$0x1]  ;;  %v2179_v27 = vshll.u32 %v18718_v28, 16  ;;  %v2183_v52 = vshrl.u32 %v18718_v28, 16  ;;  %v18729_v54 = vcombine.low %v2158_v57, %v2168_v60 }
 0x1fe   :  { %v422_v37 = vld [vmem:[#allocation2 + $0x1a0] sm:$0x1]  ;;  %v2172_v18 = vrot.slane %v2170_v14, 4  ;;  %v2175_v47 = vrot.slane %v2173_v9, 5  ;;  %v2189_v35 = vshll.u32 %v18725_v59, 16  ;;  %v1011_v31 = vrot.slane %v1007_v40, 4 }
 0x1ff   :  { %21960 = vst [vmem:[#allocation63_spill] sm:$0xff] %v18729_v54  ;;  %v2181_v45 = vrot.slane %v2179_v27, 5  ;;  %v2185_v20 = vrot.slane %v2183_v52, 4  ;;  %v1018_v36 = vor.u32 %v1016_v11, %v1015_v19  ;;  %15884 = vmatprep.mubr.msk.bf16.mxu1 %vm2339_vm13, %v18729_v54  ;;  %v1020_v63 = vrot.slane %v1015_v19, 4  ;;  %v1351_v60 = vld [vmem:[#allocation2 + $0x194] sm:$0x1]  ;;  %16145 = vmatmul.mubr.msk.bf16.gmra.mrb[52].mxu0 %vm2339_vm13, %v18729_v54 }
 0x200   :  { %v2176_v50 = vor.u32 %v2175_v47, %v2172_v18  ;;  %v2191_v13 = vrot.slane %v2189_v35, 5  ;;  %v18734_v12 = vld [vmem:[#allocation2 + $0x180] sm:$0xf]  ;;  %v1348_v57 = vsel %vm17805_vm10, %v1010_v30, %v1347_v1  ;;  %v490_v14 = vld [vmem:[#allocation7 + $0xf8] sm:$0xf]  ;;  %v313_v19 = vsel %vm17769_vm5, 0, %v312_v43 }
 0x201   :  { %v2186_v9 = vor.u32 %v2185_v20, %v2181_v45  ;;  %v2194_v40 = vshrl.u32 %v18734_v12, 16  ;;  %v2197_v11 = vshll.u32 %v18734_v12, 16  ;;  %v1019_v27 = vsel %vm17786_vm8, %v1011_v31, %v1018_v36  ;;  %1349 = vst [vmem:[#allocation2 + $0x18c] sm:$0xf] %v1348_v57  ;;  %v491_v18 = vld [vmem:[#allocation7 + $0xfc] sm:$0xf] }
 0x202   :  { %v2177_v52 = vrot.slane %v2176_v50, 4  ;;  %1350 = vst.msk [vmem:[#allocation2 + $0x190] sm:$0xf] %vm192_vm1, %v1019_v27  ;;  %v1352_v1 = vsel %vm17769_vm5, %v1020_v63, %v1351_v60  ;;  %v423_v30 = vsel %vm17795_vm9, 0, %v422_v37  ;;  %314 = vst [vmem:[#allocation2 + $0x198] sm:$0x1] %v313_v19 }
 0x203   :  { %v2187_v47 = vrot.slane %v2186_v9, 4  ;;  %v18751_v35 = vld [vmem:[#allocation2 + $0x184] sm:$0xf]  ;;  %v2196_v31 = vrot.slane %v2194_v40, 4  ;;  %1353 = vst [vmem:[#allocation2 + $0x194] sm:$0x1] %v1352_v1 }
 0x204   :  { %v18753_v20 = vld [vmem:[#allocation2 + $0x188] sm:$0x1]  ;;  %424 = vst [vmem:[#allocation2 + $0x1a0] sm:$0x1] %v423_v30  ;;  %v2182_v36 = vsel %vm17881_vm14, %v2177_v52, %v2181_v45  ;;  %v2199_v50 = vrot.slane %v2197_v11, 5  ;;  %v2203_v63 = vshll.u32 %v18751_v35, 16 }
 0x205   :  { %v2207_v43 = vshrl.u32 %v18751_v35, 16  ;;  %v2192_v37 = vsel %vm17881_vm14, %v2187_v47, %v2191_v13  ;;  %v2213_v57 = vshll.u32 %v18753_v20, 16  ;;  %v1022_v60 = vshrl.u32 %v490_v14, 16 }
 0x206   :  { %v1025_v9 = vshll.u32 %v490_v14, 16  ;;  %v18762_v27 = vcombine.low %v2182_v36, %v2192_v37  ;;  %v2200_v40 = vor.u32 %v2199_v50, %v2196_v31  ;;  %v2205_v1 = vrot.slane %v2203_v63, 5 }
 0x207   :  { %v2209_v19 = vrot.slane %v2207_v43, 4  ;;  %v2215_v30 = vrot.slane %v2213_v57, 5  ;;  %v1024_v54 = vrot.slane %v1022_v60, 7  ;;  %v1030_v45 = vshrl.u32 %v491_v18, 16 }
 0x208   :  { %21961 = vst [vmem:[#allocation64_spill] sm:$0xff] %v18762_v27  ;;  %v1033_v11 = vshll.u32 %v491_v18, 16  ;;  %15885 = vmatmul.mubr.msk.bf16.gmra.mrb[56].mxu1 %vm2339_vm13, %v18762_v27  ;;  %v2201_v52 = vrot.slane %v2200_v40, 4  ;;  %v18766_v33 = vld [vmem:[#allocation2 + $0x18c] sm:$0xf]  ;;  %16148 = vmatprep.mubr.msk.bf16.mxu0 %vm2339_vm13, %v18762_v27  ;;  %v21969_v17 = vrot.slane %v17863_v44, 9 }
 0x209   :  { %v2210_v41 = vor.u32 %v2209_v19, %v2205_v1  ;;  %v18770_v13 = vld [vmem:[#allocation2 + $0x190] sm:$0xf]  ;;  %v2218_v14 = vshrl.u32 %v18766_v33, 16  ;;  %v2221_v47 = vshll.u32 %v18766_v33, 16  ;;  %v1027_v31 = vor.u32 %v1025_v9, %v1024_v54  ;;  %v1354_v27 = vld [vmem:[#allocation2 + $0x198] sm:$0xf] }
 0x20a   :  { %v1028_v18 = vrot.slane %v1024_v54, 4  ;;  %v2206_v36 = vsel %vm17881_vm14, %v2201_v52, %v2205_v1  ;;  %v18776_v63 = vld [vmem:[#allocation2 + $0x194] sm:$0x1]  ;;  %v2227_v43 = vshll.u32 %v18770_v13, 16  ;;  %v2231_v37 = vshrl.u32 %v18770_v13, 16 }
 0x20b   :  { %v2211_v50 = vrot.slane %v2210_v41, 4  ;;  %v2220_v57 = vrot.slane %v2218_v14, 4  ;;  %v2223_v60 = vrot.slane %v2221_v47, 5  ;;  %v2237_v40 = vshll.u32 %v18776_v63, 16  ;;  %v1358_v14 = vld [vmem:[#allocation2 + $0x1a0] sm:$0x1] }
 0x20c   :  { %v1032_v19 = vrot.slane %v1030_v45, 7  ;;  %v21962_v54 = vmov 0  ;;  %v2229_v9 = vrot.slane %v2227_v43, 5  ;;  %v2233_v1 = vrot.slane %v2231_v37, 4 }
 0x20d   :  { %v21963_v54 = vsel %vm18783_vm3, 4294967295, %v21962_v54  ;;  %v2216_v41 = vsel %vm17881_vm14, %v2211_v50, %v2215_v30  ;;  %v1355_v52 = vsel %vm17805_vm10, %v1027_v31, %v1354_v27  ;;  %v2224_v6 = vor.u32 %v2223_v60, %v2220_v57  ;;  %v17099_v50 = vld [vmem:[#allocation2 + $0x14] sm:$0x1]  ;;  %v18832_v31 = vld [vmem:[#allocation2] sm:$0xf] }
 0x20e   :  { %21964 = vst [vmem:[#allocation65_spill] sm:$0xff] %v21963_v54  ;;  %v18791_v47 = vcombine.low %v2206_v36, %v2216_v41  ;;  %v2239_v45 = vrot.slane %v2237_v40, 5  ;;  %v1035_v5 = vor.u32 %v1033_v11, %v1032_v19  ;;  %1356 = vst [vmem:[#allocation2 + $0x198] sm:$0xf] %v1355_v52  ;;  %v2234_v0 = vor.u32 %v2233_v1, %v2229_v9 }
 0x20f   :  { %v1037_v34 = vrot.slane %v1032_v19, 4  ;;  %v3325_v30 = vsel %vm18783_vm3, %v21967_v61, %v21966_v25  ;;  %v3327_v43 = vrot.slane %v17099_v50, 5  ;;  %v2225_v39 = vrot.slane %v2224_v6, 4 }
 0x210   :  { %21965 = vst [vmem:[#allocation66_spill] sm:$0xff] %v18791_v47  ;;  %15888 = vmatprep.mubr.msk.bf16.mxu1 %vm2339_vm13, %v18791_v47  ;;  %16149 = vmatmul.mubr.msk.bf16.gmra.mrb[56].mxu0 %vm2339_vm13, %v18791_v47  ;;  %v1036_v27 = vsel %vm17786_vm8, %v1028_v18, %v1035_v5  ;;  %v21968_v11 = vrot.slane %v18268_v7, 5  ;;  %v21970_v61 = vrot.slane %v18540_v2, 5  ;;  %v2235_v6 = vrot.slane %v2234_v0, 4  ;;  %v17130_v47 = vld [vmem:[#allocation2 + $0x94] sm:$0xf] }
 0x211   :  { %1357 = vst.msk [vmem:[#allocation2 + $0x19c] sm:$0xf] %vm192_vm1, %v1036_v27  ;;  %v1359_v26 = vsel %vm17769_vm5, %v1037_v34, %v1358_v14  ;;  %v3328_v5 = vsel %vm18783_vm3, %v17887_v58, %v3327_v43  ;;  %v2230_v7 = vsel %vm17881_vm14, %v2225_v39, %v2229_v9  ;;  %v17102_v39 = vld [vmem:[#allocation2 + $0x28] sm:$0xf]  ;;  %vm9213_vm1 = vcmask 253952  }
 0x212   :  { %v3332_v21 = vsel %vm18783_vm3, %v21969_v17, %v21968_v11  ;;  %v3335_v25 = vsel %vm18783_vm3, %v18387_v15, %v21970_v61  ;;  %1360 = vst [vmem:[#allocation2 + $0x1a0] sm:$0x1] %v1359_v26  ;;  %v18826_v2 = vcombine.low %v3325_v30, %v3328_v5  ;;  %v2240_v0 = vsel %vm17881_vm14, %v2235_v6, %v2239_v45  ;;  %v18830_v15 = vld [vmem:[#allocation2 + $0x4] sm:$0xf]  ;;  %v17104_v5 = vld [vmem:[#allocation2 + $0x2c] sm:$0x1]  ;;  %vm19725_vm8 = vmand %vm9213_vm1, %vm208_vm4 }
 0x213   :  { %v18822_v44 = vcombine.low %v3332_v21, %v3335_v25  ;;  %v14163_v34 = vcombine.low %v18832_v31, %v18830_v15  ;;  %v18836_v18 = vcombine.low %v2230_v7, %v2240_v0  ;;  %v3338_v27 = vrot.slane %v17102_v39, 5  ;;  %v17103_v61 = vld [vmem:[#allocation2 + $0x24] sm:$0xf] }
 0x214   :  { %v14230_v25 = vrot.slane %v17103_v61, 9  ;;  %v3341_v7 = vrot.slane %v17104_v5, 5  ;;  %vm9211_vm7 = vcmask 257024   ;;  %vm9990_vm10 = vcmask 1043459  }
 0x215   :  { %21971 = vst [vmem:[#allocation67_spill] sm:$0xff] %v18836_v18  ;;  %v18838_v58 = vld [vmem:[#allocation2 + $0x198] sm:$0xf]  ;;  %15889 = vmatmul.mubr.msk.bf16.gmra.mrb[60].mxu1 %vm2339_vm13, %v18836_v18  ;;  %16152 = vmatprep.mubr.msk.bf16.mxu0 %vm2339_vm13, %v18836_v18  ;;  %v3340_v26 = vrot.slane %v3338_v27, 4  ;;  %v17129_v18 = vld [vmem:[#allocation2 + $0x90] sm:$0xf]  ;;  %vm19886_vm2 = vmand %vm9211_vm7, %vm318_vm6 }
 0x216   :  { %v4488_v36 = vshrl.u32 %v18838_v58, 16  ;;  %v4491_v37 = vshll.u32 %v18838_v58, 16  ;;  %15894 = vmatprep.mubr.msk.bf16.mxu1 %vm2339_vm13, %v14163_v34  ;;  %v3339_v34 = vsel %vm18783_vm3, %v14230_v25, %v3338_v27  ;;  %v17112_v25 = vld [vmem:[#allocation2 + $0x58] sm:$0xf]  ;;  %v18945_v56 = vcombine.low %v17129_v18, %v17130_v47 }
 0x217   :  { %vm9993_vm11 = vcmask 1044484   ;;  %vm9996_vm12 = vcmask 1045509   ;;  %vm10002_vm15 = vcmask 1047559  }
 0x218   :  { %v18847_v57 = vld [vmem:[#allocation2 + $0x19c] sm:$0xf]  ;;  %v4490_v60 = vrot.slane %v4488_v36, 4  ;;  %v4493_v40 = vrot.slane %v4491_v37, 5  ;;  %v3342_v36 = vsel %vm18783_vm3, %v3340_v26, %v3341_v7  ;;  %v17106_v37 = vld [vmem:[#allocation2 + $0x40] sm:$0xf] }
 0x219   :  { %v18849_v19 = vld [vmem:[#allocation2 + $0x1a0] sm:$0x1]  ;;  %v4497_v41 = vshll.u32 %v18847_v57, 16  ;;  %v4501_v9 = vshrl.u32 %v18847_v57, 16  ;;  %v3366_v26 = vrot.slane %v17112_v25, 5  ;;  %21976 = vst [vmem:[#allocation72_spill] sm:$0xff] %v18945_v56 }
 0x21a   :  { %v4494_v1 = vor.u32 %v4493_v40, %v4490_v60  ;;  %v4507_v52 = vshll.u32 %v18849_v19, 16  ;;  %v3352_v60 = vrot.slane %v17106_v37, 5  ;;  %v18876_v40 = vcombine.low %v3339_v34, %v3342_v36  ;;  %v17114_v36 = vld [vmem:[#allocation2 + $0x50] sm:$0x1] }
 0x21b   :  { %v4499_v14 = vrot.slane %v4497_v41, 5  ;;  %v4503_v45 = vrot.slane %v4501_v9, 4  ;;  %v17107_v41 = vld [vmem:[#allocation2 + $0x30] sm:$0xf]  ;;  %v3362_v37 = vrot.slane %v17114_v36, 5 }
 0x21c   :  { %v4495_v30 = vrot.slane %v4494_v1, 4  ;;  %v4509_v43 = vrot.slane %v4507_v52, 5  ;;  %v14231_v9 = vrot.slane %v17107_v41, 9  ;;  %v17108_v52 = vld [vmem:[#allocation2 + $0x38] sm:$0x1] }
 0x21d   :  { %v4504_v50 = vor.u32 %v4503_v45, %v4499_v14  ;;  %15895 = vmatmul.mubr.msk.bf16.vlgmr.msra.gmra.mrb[0].mxu1 %vm2339_vm13, %v17860_v42  ;;  %v17105_v42 = vld [vmem:[#allocation2 + $0x34] sm:$0xf]  ;;  %v17109_v45 = vld [vmem:[#allocation2 + $0x3c] sm:$0xf] }
 0x21e   :  { %15898 = vmatprep.mubr.msk.bf16.mxu1 %vm2339_vm13, %v17877_v55  ;;  %v4500_v11 = vsel %vm17881_vm14, %v4495_v30, %v4499_v14  ;;  %v3345_v0 = vrot.slane %v17105_v42, 5  ;;  %v3348_v14 = vrot.slane %v17108_v52, 5  ;;  %v14232_v30 = vrot.slane %v17109_v45, 9  ;;  %v17113_v42 = vld [vmem:[#allocation2 + $0x48] sm:$0xf] }
 0x21f   :  { %v4505_v17 = vrot.slane %v4504_v50, 4  ;;  %v3354_v50 = vrot.slane %v3352_v60, 4  ;;  %v17115_v41 = vld [vmem:[#allocation2 + $0x54] sm:$0xf] }
 0x220   :  { %v3347_v1 = vrot.slane %v3345_v0, 4  ;;  %v3346_v27 = vsel %vm18783_vm3, %v14231_v9, %v3345_v0  ;;  %v3353_v61 = vsel %vm18783_vm3, %v14232_v30, %v3352_v60  ;;  %v14233_v0 = vrot.slane %v17113_v42, 9  ;;  %v17117_v30 = vld [vmem:[#allocation2 + $0x64] sm:$0xf]  ;;  %v17120_v42 = vld [vmem:[#allocation2 + $0x68] sm:$0x1] }
 0x221   :  { %v4510_v21 = vsel %vm17881_vm14, %v4505_v17, %v4509_v43  ;;  %v17110_v43 = vld [vmem:[#allocation2 + $0x44] sm:$0x1]  ;;  %v17111_v17 = vld [vmem:[#allocation2 + $0x4c] sm:$0xf]  ;;  %v14234_v9 = vrot.slane %v17115_v41, 9  ;;  %v3368_v60 = vrot.slane %v3366_v26, 4 }
 0x222   :  { %v18862_v6 = vcombine.low %v4500_v11, %v4510_v21  ;;  %v3355_v39 = vrot.slane %v17110_v43, 5  ;;  %v3349_v11 = vsel %vm18783_vm3, %v3347_v1, %v3348_v14  ;;  %v3359_v21 = vrot.slane %v17111_v17, 5  ;;  %v17116_v1 = vld [vmem:[#allocation2 + $0x5c] sm:$0x1]  ;;  %v17122_v41 = vld [vmem:[#allocation2 + $0x74] sm:$0x1] }
 0x223   :  { %v18895_v5 = vcombine.low %v3346_v27, %v3349_v11  ;;  %v3369_v52 = vrot.slane %v17116_v1, 5  ;;  %v3367_v43 = vsel %vm18783_vm3, %v14234_v9, %v3366_v26  ;;  %v17118_v27 = vld [vmem:[#allocation2 + $0x70] sm:$0xf]  ;;  %v3383_v9 = vrot.slane %v17122_v41, 5  ;;  %v17124_v1 = vld [vmem:[#allocation2 + $0x7c] sm:$0xf] }
 0x224   :  { %21972 = vst [vmem:[#allocation68_spill] sm:$0xff] %v18862_v6  ;;  %16153 = vmatmul.mubr.msk.bf16.gmra.mrb[60].mxu0 %vm2339_vm13, %v18862_v6  ;;  %v3361_v34 = vrot.slane %v3359_v21, 4  ;;  %v3360_v14 = vsel %vm18783_vm3, %v14233_v0, %v3359_v21  ;;  %v3380_v11 = vrot.slane %v17118_v27, 5  ;;  %v3376_v0 = vrot.slane %v17120_v42, 5 }
 0x225   :  { %16158 = vmatprep.mubr.msk.bf16.mxu0 %vm2339_vm13, %v18826_v2  ;;  %15899 = vmatmul.mubr.msk.bf16.gmra.mrb[4].mxu1 %vm2339_vm13, %v17917_v24 }
 0x226   :  { %15902 = vmatprep.mubr.msk.bf16.mxu1 %vm2339_vm13, %v17969_v48  ;;  %v3363_v45 = vsel %vm18783_vm3, %v3361_v34, %v3362_v37  ;;  %v17121_v34 = vld [vmem:[#allocation2 + $0x6c] sm:$0xf]  ;;  %v3382_v37 = vrot.slane %v3380_v11, 4 }
 0x227   :  { %v18915_v17 = vcombine.low %v3360_v14, %v3363_v45  ;;  %v18919_v36 = vcombine.low %v17121_v34, %v17118_v27  ;;  %v14236_v26 = vrot.slane %v17121_v34, 9  ;;  %v17125_v27 = vld [vmem:[#allocation2 + $0x88] sm:$0xf]  ;;  %v17126_v34 = vld [vmem:[#allocation2 + $0x80] sm:$0x1] }
 0x228   :  { %v3390_v41 = vrot.slane %v17126_v34, 5 }
 0x229   :  { %21973 = vst [vmem:[#allocation69_spill] sm:$0xff] %v18919_v36 }
 0x22c   :  { %16159 = vmatmul.mubr.msk.bf16.vlgmr.msra.gmra.mrb[0].mxu0 %vm2339_vm13, %v18822_v44 }
 0x22d   :  { %16223 = vmatpush3.bf16.msra.mxu0 %v18503_v29  ;;  %16162 = vmatprep.mubr.msk.bf16.mxu0 %vm2339_vm13, %v18876_v40  ;;  %v3356_v29 = vsel %vm18783_vm3, %v3354_v50, %v3355_v39  ;;  %v3373_v50 = vrot.slane %v17117_v30, 5  ;;  %v3370_v39 = vsel %vm18783_vm3, %v3368_v60, %v3369_v52  ;;  %v17123_v60 = vld [vmem:[#allocation2 + $0x78] sm:$0xf]  ;;  %v3387_v30 = vrot.slane %v17124_v1, 5 }
 0x22e   :  { %15903 = vmatmul.mubr.msk.bf16.gmra.mrb[8].mxu1 %vm2339_vm13, %v18006_v38  ;;  %v18897_v7 = vcombine.low %v3353_v61, %v3356_v29  ;;  %v18917_v21 = vcombine.low %v3367_v43, %v3370_v39  ;;  %v17119_v61 = vld [vmem:[#allocation2 + $0x60] sm:$0xf]  ;;  %v18921_v52 = vcombine.low %v17123_v60, %v17124_v1  ;;  %v3381_v43 = vsel %vm18783_vm3, %v14236_v26, %v3380_v11  ;;  %v17127_v1 = vld [vmem:[#allocation2 + $0x84] sm:$0xf] }
 0x22f   :  { %15906 = vmatprep.mubr.msk.bf16.mxu1 %vm2339_vm13, %v18052_v53  ;;  %v14235_v29 = vrot.slane %v17119_v61, 9  ;;  %v3375_v25 = vrot.slane %v3373_v50, 4  ;;  %v3384_v39 = vsel %vm18783_vm3, %v3382_v37, %v3383_v9  ;;  %v3394_v61 = vrot.slane %v17125_v27, 5  ;;  %v17128_v37 = vld [vmem:[#allocation2 + $0x8c] sm:$0x1] }
 0x230   :  { %21974 = vst [vmem:[#allocation70_spill] sm:$0xff] %v18921_v52  ;;  %v18943_v6 = vcombine.low %v17127_v1, %v17125_v27  ;;  %v14238_v11 = vrot.slane %v17127_v1, 9  ;;  %v3397_v9 = vrot.slane %v17128_v37, 5 }
 0x231   :  { %v3374_v14 = vsel %vm18783_vm3, %v14235_v29, %v3373_v50  ;;  %v3377_v45 = vsel %vm18783_vm3, %v3375_v25, %v3376_v0  ;;  %v3540_v50 = vld [vmem:[#allocation10 + $0x4] sm:$0x3]  ;;  %v18941_v29 = vcombine.low %v3381_v43, %v3384_v39  ;;  %v14237_v25 = vrot.slane %v17123_v60, 9 }
 0x232   :  { %v18939_v42 = vcombine.low %v3374_v14, %v3377_v45  ;;  %v3389_v0 = vrot.slane %v3387_v30, 4  ;;  %21975 = vst [vmem:[#allocation71_spill] sm:$0xff] %v18943_v6  ;;  %v3396_v26 = vrot.slane %v3394_v61, 4  ;;  %v3734_v14 = vand.u32 %v3540_v50, %v17765_v3  ;;  %v17131_v50 = vld [vmem:[#allocation2 + $0xa0] sm:$0xf] }
 0x233   :  { %v3388_v60 = vsel %vm18783_vm3, %v14237_v25, %v3387_v30  ;;  %v3401_v43 = vrot.slane %v17130_v47, 5  ;;  %v3395_v39 = vsel %vm18783_vm3, %v14238_v11, %v3394_v61  ;;  %v3408_v34 = vrot.slane %v17131_v50, 5  ;;  %v17133_v61 = vld [vmem:[#allocation2 + $0x9c] sm:$0xf] }
 0x234   :  { %16163 = vmatmul.mubr.msk.bf16.gmra.mrb[4].mxu0 %vm2339_vm13, %v18895_v5  ;;  %v3391_v45 = vsel %vm18783_vm3, %v3389_v0, %v3390_v41  ;;  %15958 = vmatprep.subr.bf16.mxu1 %v3734_v14  ;;  %v3398_v27 = vsel %vm18783_vm3, %v3396_v26, %v3397_v9  ;;  %v14239_v25 = vrot.slane %v17129_v18, 9  ;;  %v17132_v41 = vld [vmem:[#allocation2 + $0x98] sm:$0x1]  ;;  %v18969_v11 = vcombine.low %v17133_v61, %v17131_v50  ;;  %v17134_v9 = vld [vmem:[#allocation2 + $0xa4] sm:$0x1] }
 0x235   :  { %16166 = vmatprep.mubr.msk.bf16.mxu0 %vm2339_vm13, %v18897_v7  ;;  %15959 = vmatpush3.bf16.msra.mxu1 %v3734_v14  ;;  %v18964_v30 = vcombine.low %v3388_v60, %v3391_v45  ;;  %v18967_v47 = vcombine.low %v3395_v39, %v3398_v27  ;;  %v3403_v0 = vrot.slane %v3401_v43, 4  ;;  %v3404_v1 = vrot.slane %v17132_v41, 5  ;;  %v5690_v60 = vld [vmem:[#allocation10 + $0xe] sm:$0x3]  ;;  %v17137_v41 = vld [vmem:[#allocation2 + $0xb8] sm:$0xf] }
 0x236   :  { %15907 = vmatmul.mubr.msk.bf16.gmra.mrb[12].mxu1 %vm2339_vm13, %v18099_v51  ;;  %16472 = vmatprep.subr.bf16.mxu1 %v17774_v8  ;;  %21978 = vst [vmem:[#allocation74_spill] sm:$0xff] %v18969_v11  ;;  %v14240_v26 = vrot.slane %v17133_v61, 9  ;;  %v3410_v37 = vrot.slane %v3408_v34, 4  ;;  %v3411_v46 = vrot.slane %v17134_v9, 5  ;;  %v18971_v14 = vcombine.low %v17135_v10, %v17136_v32  ;;  %v17138_v9 = vld [vmem:[#allocation2 + $0xb0] sm:$0x1] }
 0x237   :  { %15910 = vmatprep.mubr.msk.bf16.mxu1 %vm2339_vm13, %v18139_v22  ;;  %21977 = vst [vmem:[#allocation73_spill] sm:$0xff] %v18967_v47  ;;  %v3402_v18 = vsel %vm18783_vm3, %v14239_v25, %v3401_v43  ;;  %v3405_v45 = vsel %vm18783_vm3, %v3403_v0, %v3404_v1  ;;  %v3415_v39 = vrot.slane %v17136_v32, 5  ;;  %v3422_v61 = vrot.slane %v17137_v41, 5 }
 0x238   :  { %21979 = vst [vmem:[#allocation75_spill] sm:$0xff] %v18971_v14  ;;  %v3409_v27 = vsel %vm18783_vm3, %v14240_v26, %v3408_v34  ;;  %v3412_v50 = vsel %vm18783_vm3, %v3410_v37, %v3411_v46  ;;  %v18990_v43 = vand.u32 %v5690_v60, %v17765_v3  ;;  %v18992_v25 = vcombine.low %v3402_v18, %v3405_v45  ;;  %v17139_v34 = vld [vmem:[#allocation2 + $0xb4] sm:$0xf]  ;;  %v19001_v60 = vld [vmem:[#allocation2 + $0xd8] sm:$0xf] }
 0x239   :  { %v18994_v32 = vcombine.low %v3409_v27, %v3412_v50  ;;  %v14241_v0 = vrot.slane %v17135_v10, 9  ;;  %v3417_v1 = vrot.slane %v3415_v39, 4  ;;  %v18997_v46 = vcombine.low %v17139_v34, %v17137_v41  ;;  %21984 = vst [vmem:[#allocation80_spill] sm:$0xff] %v19001_v60 }
 0x23a   :  { %21980 = vst [vmem:[#allocation76_spill] sm:$0xff] %v18992_v25  ;;  %16288 = vmatprep.subr.bf16.mxu0 %v18990_v43  ;;  %v14242_v26 = vrot.slane %v17139_v34, 9  ;;  %v3424_v37 = vrot.slane %v3422_v61, 4 }
 0x23b   :  { %21981 = vst [vmem:[#allocation77_spill] sm:$0xff] %v18994_v32  ;;  %21982 = vst [vmem:[#allocation78_spill] sm:$0xff] %v18997_v46  ;;  %v3416_v10 = vsel %vm18783_vm3, %v14241_v0, %v3415_v39  ;;  %v19027_v0 = vld [vmem:[#allocation2 + $0xc0] sm:$0xf] }
 0x23c   :  { %16167 = vmatmul.mubr.msk.bf16.gmra.mrb[8].mxu0 %vm2339_vm13, %v18915_v17  ;;  %v3423_v50 = vsel %vm18783_vm3, %v14242_v26, %v3422_v61  ;;  %21988 = vst [vmem:[#allocation84_spill] sm:$0xff] %v19027_v0 }
 0x23d   :  { %16170 = vmatprep.mubr.msk.bf16.mxu0 %vm2339_vm13, %v18917_v21 }
 0x23e   :  { %15911 = vmatmul.mubr.msk.bf16.gmra.mrb[16].mxu1 %vm2339_vm13, %v18919_v36 }
 0x23f   :  { %15914 = vmatprep.mubr.msk.bf16.mxu1 %vm2339_vm13, %v18921_v52  ;;  %v17156_v52 = vld [vmem:[#allocation2 + $0x10c] sm:$0xf] }
 0x244   :  { %16171 = vmatmul.mubr.msk.bf16.gmra.mrb[12].mxu0 %vm2339_vm13, %v18939_v42 }
 0x245   :  { %16174 = vmatprep.mubr.msk.bf16.mxu0 %vm2339_vm13, %v18941_v29 }
 0x246   :  { %15915 = vmatmul.mubr.msk.bf16.gmra.mrb[20].mxu1 %vm2339_vm13, %v18943_v6  ;;  %v18999_v6 = vld [vmem:[#allocation2 + $0xdc] sm:$0xf] }
 0x247   :  { %15918 = vmatprep.mubr.msk.bf16.mxu1 %vm2339_vm13, %v18945_v56  ;;  %v17140_v56 = vld [vmem:[#allocation2 + $0xbc] sm:$0x1]  ;;  %21983 = vst [vmem:[#allocation79_spill] sm:$0xff] %v18999_v6  ;;  %v14179_v18 = vcombine.low %v19001_v60, %v18999_v6  ;;  %v17147_v60 = vld [vmem:[#allocation2 + $0xe4] sm:$0xf] }
 0x248   :  { %v14244_v26 = vrot.slane %v17147_v60, 9 }
 0x24c   :  { %16175 = vmatmul.mubr.msk.bf16.gmra.mrb[16].mxu0 %vm2339_vm13, %v18964_v30 }
 0x24d   :  { %16178 = vmatprep.mubr.msk.bf16.mxu0 %vm2339_vm13, %v18967_v47  ;;  %v17155_v47 = vld [vmem:[#allocation2 + $0x108] sm:$0xf] }
 0x24e   :  { %15919 = vmatmul.mubr.msk.bf16.gmra.mrb[24].mxu1 %vm2339_vm13, %v18969_v11  ;;  %v3418_v11 = vrot.slane %v17138_v9, 5  ;;  %v17144_v9 = vld [vmem:[#allocation2 + $0xe8] sm:$0xf]  ;;  %v19056_v36 = vcombine.low %v17155_v47, %v17156_v52 }
 0x24f   :  { %15922 = vmatprep.mubr.msk.bf16.mxu1 %vm2339_vm13, %v18971_v14  ;;  %v3425_v14 = vrot.slane %v17140_v56, 5  ;;  %v19013_v56 = vld [vmem:[#allocation2 + $0xc4] sm:$0xf]  ;;  %v3436_v34 = vrot.slane %v17144_v9, 5  ;;  %v19030_v61 = vcombine.low %v17147_v60, %v17144_v9  ;;  %v17151_v9 = vld [vmem:[#allocation2 + $0x100] sm:$0xf] }
 0x250   :  { %v3419_v45 = vsel %vm18783_vm3, %v3417_v1, %v3418_v11  ;;  %21985 = vst [vmem:[#allocation81_spill] sm:$0xff] %v19013_v56  ;;  %v4885_v27 = vrot.slane %v19013_v56, 5  ;;  %v14391_v1 = vrot.slane %v19027_v0, 9  ;;  %21993 = vst [vmem:[#allocation89_spill] sm:$0xff] %v19056_v36 }
 0x251   :  { %v3426_v41 = vsel %vm18783_vm3, %v3424_v37, %v3425_v14  ;;  %v19023_v39 = vcombine.low %v3416_v10, %v3419_v45  ;;  %21989 = vst [vmem:[#allocation85_spill] sm:$0xff] %v19030_v61  ;;  %v3438_v14 = vrot.slane %v3436_v34, 4  ;;  %v17148_v37 = vld [vmem:[#allocation2 + $0xec] sm:$0x1] }
 0x252   :  { %v19025_v11 = vcombine.low %v3423_v50, %v3426_v41  ;;  %v4887_v56 = vrot.slane %v4885_v27, 4  ;;  %v3439_v6 = vrot.slane %v17148_v37, 5  ;;  %v3437_v50 = vsel %vm18783_vm3, %v14244_v26, %v3436_v34 }
 0x253   :  { %21986 = vst [vmem:[#allocation82_spill] sm:$0xff] %v19023_v39  ;;  %v3450_v37 = vrot.slane %v17151_v9, 5 }
 0x254   :  { %16179 = vmatmul.mubr.msk.bf16.gmra.mrb[20].mxu0 %vm2339_vm13, %v18992_v25  ;;  %21987 = vst [vmem:[#allocation83_spill] sm:$0xff] %v19025_v11  ;;  %v17149_v25 = vld [vmem:[#allocation2 + $0xf4] sm:$0xf]  ;;  %v3440_v41 = vsel %vm18783_vm3, %v3438_v14, %v3439_v6  ;;  %v261_v14 = vld [vmem:[#allocation2 + $0xcc] sm:$0x1] }
 0x255   :  { %16182 = vmatprep.mubr.msk.bf16.mxu0 %vm2339_vm13, %v18994_v32  ;;  %v3443_v60 = vrot.slane %v17149_v25, 5  ;;  %v3452_v26 = vrot.slane %v3450_v37, 4 }
 0x256   :  { %15923 = vmatmul.mubr.msk.bf16.gmra.mrb[28].mxu1 %vm2339_vm13, %v18997_v46  ;;  %v17146_v46 = vld [vmem:[#allocation2 + $0xc8] sm:$0x1] }
 0x257   :  { %15926 = vmatprep.mubr.msk.bf16.mxu1 %vm2339_vm13, %v14179_v18  ;;  %v4888_v32 = vrot.slane %v17146_v46, 5  ;;  %v17150_v18 = vld [vmem:[#allocation2 + $0xf0] sm:$0xf]  ;;  %v4886_v46 = vsel %vm18783_vm3, %v14391_v1, %v4885_v27  ;;  %v19052_v27 = vcombine.low %v3437_v50, %v3440_v41  ;;  %v17157_v41 = vld [vmem:[#allocation2 + $0x118] sm:$0xf] }
 0x258   :  { %v19032_v10 = vcombine.low %v17150_v18, %v17149_v25  ;;  %v3445_v25 = vrot.slane %v3443_v60, 4 }
 0x259   :  { %v4889_v45 = vsel %vm18783_vm3, %v4887_v56, %v4888_v32  ;;  %v14245_v32 = vrot.slane %v17150_v18, 9  ;;  %v17152_v56 = vld [vmem:[#allocation2 + $0xf8] sm:$0x1]  ;;  %v3457_v18 = vrot.slane %v17156_v52, 5 }
 0x25a   :  { %21990 = vst [vmem:[#allocation86_spill] sm:$0xff] %v19032_v10  ;;  %v19050_v0 = vcombine.low %v4886_v46, %v4889_v45  ;;  %v3446_v1 = vrot.slane %v17152_v56, 5  ;;  %v262_v46 = vsel %vm17769_vm5, 0, %v261_v14  ;;  %v17159_v14 = vld [vmem:[#allocation2 + $0x114] sm:$0xf] }
 0x25b   :  { %263 = vst [vmem:[#allocation2 + $0xcc] sm:$0x1] %v262_v46  ;;  %v3459_v52 = vrot.slane %v3457_v18, 4  ;;  %v19080_v46 = vcombine.low %v17159_v14, %v17157_v41 }
 0x25c   :  { %16183 = vmatmul.mubr.msk.bf16.gmra.mrb[24].mxu0 %vm2339_vm13, %v19023_v39  ;;  %21991 = vst [vmem:[#allocation87_spill] sm:$0xff] %v19050_v0  ;;  %v17154_v39 = vld [vmem:[#allocation2 + $0x104] sm:$0x1] }
 0x25d   :  { %16186 = vmatprep.mubr.msk.bf16.mxu0 %vm2339_vm13, %v19025_v11  ;;  %v3453_v6 = vrot.slane %v17154_v39, 5  ;;  %v3447_v39 = vsel %vm18783_vm3, %v3445_v25, %v3446_v1  ;;  %v17158_v25 = vld [vmem:[#allocation2 + $0x110] sm:$0x1]  ;;  %21996 = vst [vmem:[#allocation92_spill] sm:$0xff] %v19080_v46 }
 0x25e   :  { %15927 = vmatmul.mubr.msk.bf16.gmra.mrb[32].mxu1 %vm2339_vm13, %v19030_v61  ;;  %v17153_v61 = vld [vmem:[#allocation2 + $0xfc] sm:$0xf]  ;;  %v3460_v1 = vrot.slane %v17158_v25, 5 }
 0x25f   :  { %15930 = vmatprep.mubr.msk.bf16.mxu1 %vm2339_vm13, %v19032_v10  ;;  %v19054_v11 = vcombine.low %v17153_v61, %v17151_v9  ;;  %v14246_v34 = vrot.slane %v17153_v61, 9  ;;  %v3444_v61 = vsel %vm18783_vm3, %v14245_v32, %v3443_v60  ;;  %v3454_v50 = vsel %vm18783_vm3, %v3452_v26, %v3453_v6  ;;  %v17161_v6 = vld [vmem:[#allocation2 + $0x120] sm:$0xf] }
 0x260   :  { %v3464_v9 = vrot.slane %v17157_v41, 5  ;;  %v19076_v56 = vcombine.low %v3444_v61, %v3447_v39  ;;  %v14247_v32 = vrot.slane %v17155_v47, 9  ;;  %v3461_v61 = vsel %vm18783_vm3, %v3459_v52, %v3460_v1  ;;  %v17164_v52 = vld [vmem:[#allocation2 + $0x128] sm:$0x1] }
 0x261   :  { %21992 = vst [vmem:[#allocation88_spill] sm:$0xff] %v19054_v11  ;;  %v3451_v45 = vsel %vm18783_vm3, %v14246_v34, %v3450_v37  ;;  %v14248_v37 = vrot.slane %v17159_v14, 9  ;;  %v3474_v1 = vrot.slane %v17164_v52, 5  ;;  %v17165_v14 = vld [vmem:[#allocation2 + $0x12c] sm:$0xf] }
 0x262   :  { %21994 = vst [vmem:[#allocation90_spill] sm:$0xff] %v19076_v56  ;;  %v19078_v60 = vcombine.low %v3451_v45, %v3454_v50  ;;  %v3466_v34 = vrot.slane %v3464_v9, 4  ;;  %v3458_v47 = vsel %vm18783_vm3, %v14247_v32, %v3457_v18  ;;  %v17163_v50 = vld [vmem:[#allocation2 + $0x130] sm:$0xf]  ;;  %v14249_v32 = vrot.slane %v17161_v6, 9 }
 0x263   :  { %v3478_v41 = vrot.slane %v17163_v50, 5  ;;  %v19100_v25 = vcombine.low %v3458_v47, %v3461_v61 }
 0x264   :  { %16187 = vmatmul.mubr.msk.bf16.gmra.mrb[28].mxu0 %vm2339_vm13, %v19050_v0  ;;  %21995 = vst [vmem:[#allocation91_spill] sm:$0xff] %v19078_v60  ;;  %v17160_v0 = vld [vmem:[#allocation2 + $0x11c] sm:$0x1] }
 0x265   :  { %16190 = vmatprep.mubr.msk.bf16.mxu0 %vm2339_vm13, %v19052_v27  ;;  %v3467_v26 = vrot.slane %v17160_v0, 5  ;;  %v3465_v0 = vsel %vm18783_vm3, %v14248_v37, %v3464_v9  ;;  %21998 = vst [vmem:[#allocation94_spill] sm:$0xff] %v19100_v25  ;;  %v14250_v9 = vrot.slane %v17165_v14, 9  ;;  %v3480_v37 = vrot.slane %v3478_v41, 4 }
 0x266   :  { %15931 = vmatmul.mubr.msk.bf16.gmra.mrb[36].mxu1 %vm2339_vm13, %v19054_v11  ;;  %v17162_v11 = vld [vmem:[#allocation2 + $0x124] sm:$0xf] }
 0x267   :  { %15934 = vmatprep.mubr.msk.bf16.mxu1 %vm2339_vm13, %v19056_v36  ;;  %v19082_v10 = vcombine.low %v17161_v6, %v17162_v11  ;;  %v3471_v39 = vrot.slane %v17162_v11, 5  ;;  %v3468_v45 = vsel %vm18783_vm3, %v3466_v34, %v3467_v26  ;;  %v17166_v36 = vld [vmem:[#allocation2 + $0x134] sm:$0x1]  ;;  %v17167_v26 = vld [vmem:[#allocation2 + $0x138] sm:$0xf] }
 0x268   :  { %v19102_v18 = vcombine.low %v3465_v0, %v3468_v45  ;;  %v3481_v34 = vrot.slane %v17166_v36, 5  ;;  %v3479_v36 = vsel %vm18783_vm3, %v14250_v9, %v3478_v41  ;;  %v17169_v45 = vld [vmem:[#allocation2 + $0x148] sm:$0xf] }
 0x269   :  { %21997 = vst [vmem:[#allocation93_spill] sm:$0xff] %v19082_v10  ;;  %v3473_v11 = vrot.slane %v3471_v39, 4  ;;  %v3472_v6 = vsel %vm18783_vm3, %v14249_v32, %v3471_v39  ;;  %v14251_v32 = vrot.slane %v17167_v26, 9 }
 0x26a   :  { %21999 = vst [vmem:[#allocation95_spill] sm:$0xff] %v19102_v18  ;;  %v3482_v0 = vsel %vm18783_vm3, %v3480_v37, %v3481_v34  ;;  %v17173_v34 = vld [vmem:[#allocation2 + $0x150] sm:$0xf] }
 0x26b   :  { %v3475_v47 = vsel %vm18783_vm3, %v3473_v11, %v3474_v1  ;;  %v19126_v39 = vcombine.low %v3479_v36, %v3482_v0  ;;  %v17170_v11 = vld [vmem:[#allocation2 + $0x140] sm:$0x1] }
 0x26c   :  { %16191 = vmatmul.mubr.msk.bf16.gmra.mrb[32].mxu0 %vm2339_vm13, %v19076_v56  ;;  %v19124_v52 = vcombine.low %v3472_v6, %v3475_v47  ;;  %v3488_v1 = vrot.slane %v17170_v11, 5  ;;  %v17175_v0 = vld [vmem:[#allocation2 + $0x160] sm:$0xf] }
 0x26d   :  { %16194 = vmatprep.mubr.msk.bf16.mxu0 %vm2339_vm13, %v19078_v60  ;;  %v17168_v60 = vld [vmem:[#allocation2 + $0x13c] sm:$0xf] }
 0x26e   :  { %15935 = vmatmul.mubr.msk.bf16.gmra.mrb[40].mxu1 %vm2339_vm13, %v19080_v46  ;;  %v19104_v46 = vcombine.low %v17165_v14, %v17163_v50  ;;  %v19106_v56 = vcombine.low %v17167_v26, %v17168_v60  ;;  %v3485_v61 = vrot.slane %v17168_v60, 5  ;;  %v3492_v50 = vrot.slane %v17169_v45, 5  ;;  %v17171_v14 = vld [vmem:[#allocation2 + $0x144] sm:$0xf] }
 0x26f   :  { %15938 = vmatprep.mubr.msk.bf16.mxu1 %vm2339_vm13, %v19082_v10  ;;  %v14252_v41 = vrot.slane %v17171_v14, 9  ;;  %v17172_v10 = vld [vmem:[#allocation2 + $0x14c] sm:$0x1] }
 0x270   :  { %22000 = vst [vmem:[#allocation96_spill] sm:$0xff] %v19104_v46  ;;  %22001 = vst [vmem:[#allocation97_spill] sm:$0xff] %v19106_v56  ;;  %v3487_v60 = vrot.slane %v3485_v61, 4  ;;  %v3494_v9 = vrot.slane %v3492_v50, 4  ;;  %v3495_v37 = vrot.slane %v17172_v10, 5  ;;  %v3486_v26 = vsel %vm18783_vm3, %v14251_v32, %v3485_v61 }
 0x271   :  { %v3493_v10 = vsel %vm18783_vm3, %v14252_v41, %v3492_v50  ;;  %v14253_v32 = vrot.slane %v17173_v34, 9 }
 0x272   :  { %v3489_v6 = vsel %vm18783_vm3, %v3487_v60, %v3488_v1  ;;  %v3496_v36 = vsel %vm18783_vm3, %v3494_v9, %v3495_v37  ;;  %v17176_v60 = vld [vmem:[#allocation2 + $0x158] sm:$0x1]  ;;  %v19156_v37 = vcombine.low %v18676_v23, %v18686_v49 }
 0x273   :  { %v19148_v11 = vcombine.low %v3486_v26, %v3489_v6  ;;  %v19150_v61 = vcombine.low %v3493_v10, %v3496_v36  ;;  %v3502_v1 = vrot.slane %v17176_v60, 5  ;;  %v3513_v6 = vrot.slane %v18686_v49, 5 }
 0x274   :  { %16195 = vmatmul.mubr.msk.bf16.gmra.mrb[36].mxu0 %vm2339_vm13, %v19100_v25  ;;  %v3520_v36 = vrot.slane %v18718_v28, 5  ;;  %v14255_v49 = vrot.slane %v18676_v23, 9  ;;  %v3516_v60 = vrot.slane %v18694_v16, 5  ;;  %v14227_v23 = vrot.slane %v18832_v31, 9 }
 0x275   :  { %16198 = vmatprep.mubr.msk.bf16.mxu0 %vm2339_vm13, %v19102_v18  ;;  %v17174_v18 = vld [vmem:[#allocation2 + $0x154] sm:$0xf] }
 0x276   :  { %15939 = vmatmul.mubr.msk.bf16.gmra.mrb[44].mxu1 %vm2339_vm13, %v19104_v46  ;;  %v19128_v46 = vcombine.low %v17171_v14, %v17169_v45  ;;  %v19130_v25 = vcombine.low %v17173_v34, %v17174_v18  ;;  %v3499_v47 = vrot.slane %v17174_v18, 5  ;;  %v3506_v45 = vrot.slane %v17175_v0, 5  ;;  %v17177_v14 = vld [vmem:[#allocation2 + $0x15c] sm:$0xf] }
 0x277   :  { %15942 = vmatprep.mubr.msk.bf16.mxu1 %vm2339_vm13, %v19106_v56  ;;  %v14254_v50 = vrot.slane %v17177_v14, 9  ;;  %v17178_v56 = vld [vmem:[#allocation2 + $0x164] sm:$0x1] }
 0x278   :  { %22002 = vst [vmem:[#allocation98_spill] sm:$0xff] %v19128_v46  ;;  %v3501_v18 = vrot.slane %v3499_v47, 4  ;;  %v3508_v41 = vrot.slane %v3506_v45, 4  ;;  %v3509_v9 = vrot.slane %v17178_v56, 5  ;;  %v3500_v34 = vsel %vm18783_vm3, %v14253_v32, %v3499_v47 }
 0x279   :  { %v3507_v56 = vsel %vm18783_vm3, %v14254_v50, %v3506_v45  ;;  %v19185_v45 = vcombine.low %v18710_v62, %v18718_v28  ;;  %v3523_v50 = vrot.slane %v18725_v59, 5  ;;  %v3527_v59 = vrot.slane %v18751_v35, 5 }
 0x27a   :  { %v3503_v26 = vsel %vm18783_vm3, %v3501_v18, %v3502_v1  ;;  %v3510_v10 = vsel %vm18783_vm3, %v3508_v41, %v3509_v9  ;;  %v3515_v18 = vrot.slane %v3513_v6, 4  ;;  %v14256_v1 = vrot.slane %v18710_v62, 9 }
 0x27b   :  { %v19176_v47 = vcombine.low %v3500_v34, %v3503_v26  ;;  %v19179_v32 = vcombine.low %v3507_v56, %v3510_v10  ;;  %v19191_v41 = vcombine.low %v18734_v12, %v18751_v35  ;;  %v3514_v62 = vsel %vm18783_vm3, %v14255_v49, %v3513_v6 }
 0x27c   :  { %16199 = vmatmul.mubr.msk.bf16.gmra.mrb[40].mxu0 %vm2339_vm13, %v19124_v52  ;;  %v3517_v28 = vsel %vm18783_vm3, %v3515_v18, %v3516_v60  ;;  %v3521_v34 = vsel %vm18783_vm3, %v14256_v1, %v3520_v36  ;;  %v3534_v26 = vrot.slane %v18770_v13, 5  ;;  %v3529_v49 = vrot.slane %v3527_v59, 4 }
 0x27d   :  { %16202 = vmatprep.mubr.msk.bf16.mxu0 %vm2339_vm13, %v19126_v39  ;;  %v19216_v56 = vcombine.low %v3514_v62, %v3517_v28  ;;  %v3530_v18 = vrot.slane %v18753_v20, 5  ;;  %v19224_v60 = vcombine.low %v18766_v33, %v18770_v13  ;;  %v14258_v1 = vrot.slane %v18766_v33, 9 }
 0x27e   :  { %15943 = vmatmul.mubr.msk.bf16.gmra.mrb[48].mxu1 %vm2339_vm13, %v19128_v46  ;;  %v19152_v46 = vcombine.low %v17177_v14, %v17175_v0  ;;  %v3317_v0 = vrot.slane %v18830_v15, 5  ;;  %v3522_v14 = vrot.slane %v3520_v36, 4  ;;  %v17179_v15 = vld [vmem:[#allocation2 + $0x8] sm:$0x1]  ;;  %v14257_v36 = vrot.slane %v18734_v12, 9 }
 0x27f   :  { %15946 = vmatprep.mubr.msk.bf16.mxu1 %vm2339_vm13, %v19130_v25  ;;  %v3320_v9 = vrot.slane %v17179_v15, 5  ;;  %v3531_v20 = vsel %vm18783_vm3, %v3529_v49, %v3530_v18  ;;  %v4892_v13 = vrot.slane %v18847_v57, 5  ;;  %v3535_v33 = vsel %vm18783_vm3, %v14258_v1, %v3534_v26  ;;  %v22012_v49 = vld [vmem:[#allocation82_spill] sm:$0xff] }
 0x280   :  { %v3319_v16 = vrot.slane %v3317_v0, 4  ;;  %v3524_v31 = vsel %vm18783_vm3, %v3522_v14, %v3523_v50  ;;  %v3318_v6 = vsel %vm18783_vm3, %v14227_v23, %v3317_v0  ;;  %v3536_v14 = vrot.slane %v3534_v26, 4  ;;  %v17180_v26 = vld [vmem:[#allocation2 + $0xe0] sm:$0x1] }
 0x281   :  { %v19218_v10 = vcombine.low %v3521_v34, %v3524_v31  ;;  %v3537_v0 = vrot.slane %v18776_v63, 5  ;;  %v3528_v12 = vsel %vm18783_vm3, %v14257_v36, %v3527_v59  ;;  %v14392_v23 = vrot.slane %v18838_v58, 9  ;;  %v315_v34 = vld [vmem:[#allocation2 + $0x1a4] sm:$0x1]  ;;  %v22011_v36 = vld [vmem:[#allocation77_spill] sm:$0xff] }
 0x282   :  { %v3321_v35 = vsel %vm18783_vm3, %v3319_v16, %v3320_v9  ;;  %v19244_v15 = vcombine.low %v3528_v12, %v3531_v20  ;;  %v4894_v16 = vrot.slane %v4892_v13, 4  ;;  %v4895_v62 = vrot.slane %v18849_v19, 5  ;;  %v22015_v12 = vld [vmem:[#allocation83_spill] sm:$0xff]  ;;  %v22016_v20 = vld [vmem:[#allocation81_spill] sm:$0xff] }
 0x283   :  { %v14259_v50 = vcombine.low %v3318_v6, %v3321_v35  ;;  %v3538_v63 = vsel %vm18783_vm3, %v3536_v14, %v3537_v0  ;;  %v4893_v28 = vsel %vm18783_vm3, %v14392_v23, %v4892_v13  ;;  %v316_v31 = vsel %vm17769_vm5, 0, %v315_v34  ;;  %v22010_v35 = vld [vmem:[#allocation72_spill] sm:$0xff]  ;;  %v22013_v0 = vld [vmem:[#allocation74_spill] sm:$0xff]  ;;  %v19338_v23 = vld [vmem:[#allocation2 + $0xcc] sm:$0xf] }
 0x284   :  { %16203 = vmatmul.mubr.msk.bf16.gmra.mrb[44].mxu0 %vm2339_vm13, %v19148_v11  ;;  %v19246_v9 = vcombine.low %v3535_v33, %v3538_v63  ;;  %v4896_v59 = vsel %vm18783_vm3, %v4894_v16, %v4895_v62  ;;  %317 = vst [vmem:[#allocation2 + $0x1a4] sm:$0x1] %v316_v31  ;;  %v3432_v6 = vrot.slane %v17180_v26, 5  ;;  %v22017_v13 = vld [vmem:[#allocation84_spill] sm:$0xff]  ;;  %v22018_v63 = vld [vmem:[#allocation78_spill] sm:$0xff]  ;;  %v22028_v26 = vld [vmem:[#allocation93_spill] sm:$0xff] }
 0x285   :  { %16206 = vmatprep.mubr.msk.bf16.mxu0 %vm2339_vm13, %v19150_v61  ;;  %v19263_v19 = vcombine.low %v4893_v28, %v4896_v59  ;;  %v14323_v33 = vcombine.low %v22017_v13, %v22016_v20  ;;  %v19340_v16 = vld [vmem:[#allocation2 + $0xd0] sm:$0xf]  ;;  %v371_v62 = vld [vmem:[#allocation2 + $0xd4] sm:$0x1]  ;;  %v19415_v13 = vld [vmem:[#allocation2 + $0x1a8] sm:$0xf] }
 0x286   :  { %15947 = vmatmul.mubr.msk.bf16.gmra.mrb[52].mxu1 %vm2339_vm13, %v19152_v46  ;;  %v372_v59 = vsel %vm17795_vm9, 0, %v371_v62  ;;  %v22020_v34 = vld [vmem:[#allocation90_spill] sm:$0xff]  ;;  %v14427_v31 = vcombine.low %v19338_v23, %v19340_v16  ;;  %v425_v62 = vld [vmem:[#allocation2 + $0x1ac] sm:$0x1]  ;;  %vm19697_vm5 = vmand %vm9213_vm1, %vm318_vm6  ;;  %vm10450_vm6 = vcmask 261120  }
 0x287   :  { %15950 = vmatprep.mubr.msk.bf16.mxu1 %vm2339_vm13, %v19156_v37  ;;  %373 = vst [vmem:[#allocation2 + $0xd4] sm:$0x1] %v372_v59  ;;  %v22035_v28 = vld [vmem:[#allocation41_spill] sm:$0xff]  ;;  %v22039_v59 = vld [vmem:[#allocation44_spill] sm:$0xff] }
 0x28b   :  { %v19413_v20 = vld [vmem:[#allocation2 + $0x1a4] sm:$0xf] }
 0x28c   :  { %16207 = vmatmul.mubr.msk.bf16.gmra.mrb[48].mxu0 %vm2339_vm13, %v19176_v47 }
 0x28d   :  { %16210 = vmatprep.mubr.msk.bf16.mxu0 %vm2339_vm13, %v19179_v32 }
 0x28e   :  { %15951 = vmatmul.mubr.msk.bf16.gmra.mrb[56].mxu1 %vm2339_vm13, %v19185_v45 }
 0x28f   :  { %15954 = vmatprep.mubr.msk.bf16.mxu1 %vm2339_vm13, %v19191_v41 }
 0x294   :  { %16211 = vmatmul.mubr.msk.bf16.gmra.mrb[52].mxu0 %vm2339_vm13, %v19216_v56 }
 0x295   :  { %16214 = vmatprep.mubr.msk.bf16.mxu0 %vm2339_vm13, %v19218_v10 }
 0x296   :  { %15955 = vmatmul.mubr.msk.bf16.gmra.mrb[60].mxu1 %vm2339_vm13, %v19224_v60 }
 0x297   :  { %15960 = vmatprep.mubr.msk.bf16.mxu1 %vm2339_vm13, %v14259_v50  ;;  %v22014_v50 = vld [vmem:[#allocation75_spill] sm:$0xff] }
 0x29c   :  { %16215 = vmatmul.mubr.msk.bf16.gmra.mrb[56].mxu0 %vm2339_vm13, %v19244_v15 }
 0x29d   :  { %16218 = vmatprep.mubr.msk.bf16.mxu0 %vm2339_vm13, %v19246_v9 }
 0x29e   :  { %15961 = vmatmul.mubr.msk.bf16.vlgmr.msra.gmra.mrb[0].mxu1 %vm2339_vm13, %v18826_v2 }
 0x29f   :  { %15964 = vmatprep.mubr.msk.bf16.mxu1 %vm2339_vm13, %v18822_v44  ;;  %16473 = vmatpush3.bf16.msra.mxu1 %v17774_v8  ;;  %v19293_v8 = vand.u32 %v6076_v4, %v17765_v3  ;;  %v22005_v3 = vld [vmem:[#allocation73_spill] sm:$0xff]  ;;  %v22021_v4 = vld [vmem:[#allocation86_spill] sm:$0xff] }
 0x2a4   :  { %16219 = vmatmul.mubr.msk.bf16.gmra.mrb[60].mxu0 %vm2339_vm13, %v19263_v19 }
 0x2a5   :  { %16224 = vmatprep.mubr.msk.bf16.mxu0 %vm2339_vm13, %v17877_v55  ;;  %v22003_v55 = vld [vmem:[#allocation69_spill] sm:$0xff] }
 0x2a6   :  { %15965 = vmatmul.mubr.msk.bf16.gmra.mrb[4].mxu1 %vm2339_vm13, %v18876_v40 }
 0x2a7   :  { %15968 = vmatprep.mubr.msk.bf16.mxu1 %vm2339_vm13, %v18895_v5 }
 0x2ac   :  { %16225 = vmatmul.mubr.msk.bf16.vlgmr.msra.gmra.mrb[0].mxu0 %vm2339_vm13, %v17917_v24  ;;  %v22004_v24 = vld [vmem:[#allocation70_spill] sm:$0xff] }
 0x2ad   :  { %16289 = vmatpush3.bf16.msra.mxu0 %v18990_v43  ;;  %16228 = vmatprep.mubr.msk.bf16.mxu0 %vm2339_vm13, %v17969_v48  ;;  %v22006_v48 = vld [vmem:[#allocation76_spill] sm:$0xff] }
 0x2ae   :  { %15969 = vmatmul.mubr.msk.bf16.gmra.mrb[8].mxu1 %vm2339_vm13, %v18897_v7  ;;  %16354 = vmatprep.subr.bf16.mxu0 %v19293_v8 }
 0x2af   :  { %15972 = vmatprep.mubr.msk.bf16.mxu1 %vm2339_vm13, %v18915_v17 }
 0x2b4   :  { %16229 = vmatmul.mubr.msk.bf16.gmra.mrb[4].mxu0 %vm2339_vm13, %v18006_v38  ;;  %v22007_v38 = vld [vmem:[#allocation79_spill] sm:$0xff] }
 0x2b5   :  { %16232 = vmatprep.mubr.msk.bf16.mxu0 %vm2339_vm13, %v18052_v53  ;;  %v3429_v53 = vrot.slane %v22007_v38, 5  ;;  %v22022_v38 = vld [vmem:[#allocation91_spill] sm:$0xff] }
 0x2b6   :  { %15973 = vmatmul.mubr.msk.bf16.gmra.mrb[12].mxu1 %vm2339_vm13, %v18917_v21 }
 0x2b7   :  { %15976 = vmatprep.mubr.msk.bf16.mxu1 %vm2339_vm13, %v18939_v42  ;;  %v3431_v43 = vrot.slane %v3429_v53, 4 }
 0x2b9   :  { %v3433_v1 = vsel %vm18783_vm3, %v3431_v43, %v3432_v6  ;;  %v22027_v43 = vld [vmem:[#allocation92_spill] sm:$0xff] }
 0x2ba   :  { %v22029_v6 = vld [vmem:[#allocation96_spill] sm:$0xff] }
 0x2bc   :  { %16233 = vmatmul.mubr.msk.bf16.gmra.mrb[8].mxu0 %vm2339_vm13, %v18099_v51  ;;  %v22008_v51 = vld [vmem:[#allocation71_spill] sm:$0xff] }
 0x2bd   :  { %16236 = vmatprep.mubr.msk.bf16.mxu0 %vm2339_vm13, %v18139_v22  ;;  %v22009_v22 = vld [vmem:[#allocation80_spill] sm:$0xff] }
 0x2be   :  { %15977 = vmatmul.mubr.msk.bf16.gmra.mrb[16].mxu1 %vm2339_vm13, %v18941_v29  ;;  %v14243_v2 = vrot.slane %v22009_v22, 9  ;;  %v22025_v22 = vld [vmem:[#allocation89_spill] sm:$0xff] }
 0x2bf   :  { %15980 = vmatprep.mubr.msk.bf16.mxu1 %vm2339_vm13, %v18964_v30 }
 0x2c0   :  { %v3430_v18 = vsel %vm18783_vm3, %v14243_v2, %v3429_v53  ;;  %v22023_v53 = vld [vmem:[#allocation94_spill] sm:$0xff]  ;;  %v22026_v2 = vld [vmem:[#allocation95_spill] sm:$0xff] }
 0x2c1   :  { %v14275_v14 = vcombine.low %v3430_v18, %v3433_v1  ;;  %v22030_v18 = vld [vmem:[#allocation97_spill] sm:$0xff]  ;;  %v22031_v1 = vld [vmem:[#allocation98_spill] sm:$0xff] }
 0x2c4   :  { %16237 = vmatmul.mubr.msk.bf16.gmra.mrb[12].mxu0 %vm2339_vm13, %v22003_v55 }
 0x2c5   :  { %16240 = vmatprep.mubr.msk.bf16.mxu0 %vm2339_vm13, %v22004_v24 }
 0x2c6   :  { %15981 = vmatmul.mubr.msk.bf16.gmra.mrb[20].mxu1 %vm2339_vm13, %v22005_v3 }
 0x2c7   :  { %15984 = vmatprep.mubr.msk.bf16.mxu1 %vm2339_vm13, %v22006_v48 }
 0x2cc   :  { %16241 = vmatmul.mubr.msk.bf16.gmra.mrb[16].mxu0 %vm2339_vm13, %v22008_v51 }
 0x2cd   :  { %16244 = vmatprep.mubr.msk.bf16.mxu0 %vm2339_vm13, %v22010_v35 }
 0x2ce   :  { %15985 = vmatmul.mubr.msk.bf16.gmra.mrb[24].mxu1 %vm2339_vm13, %v22011_v36 }
 0x2cf   :  { %15988 = vmatprep.mubr.msk.bf16.mxu1 %vm2339_vm13, %v22012_v49 }
 0x2d4   :  { %16245 = vmatmul.mubr.msk.bf16.gmra.mrb[20].mxu0 %vm2339_vm13, %v22013_v0 }
 0x2d5   :  { %16248 = vmatprep.mubr.msk.bf16.mxu0 %vm2339_vm13, %v22014_v50 }
 0x2d6   :  { %15989 = vmatmul.mubr.msk.bf16.gmra.mrb[28].mxu1 %vm2339_vm13, %v22015_v12 }
 0x2d7   :  { %15992 = vmatprep.mubr.msk.bf16.mxu1 %vm2339_vm13, %v14275_v14  ;;  %v19407_v14 = vcombine.low %v18838_v58, %v18847_v57  ;;  %v14428_v58 = vcombine.low %v19413_v20, %v19415_v13  ;;  %v22032_v57 = vld [vmem:[#allocation38_spill] sm:$0xff] }
 0x2dc   :  { %16249 = vmatmul.mubr.msk.bf16.gmra.mrb[24].mxu0 %vm2339_vm13, %v22018_v63 }
 0x2dd   :  { %16252 = vmatprep.mubr.msk.bf16.mxu0 %vm2339_vm13, %v14323_v33 }
 0x2de   :  { %15993 = vmatmul.mubr.msk.bf16.gmra.mrb[32].mxu1 %vm2339_vm13, %v19052_v27  ;;  %v22024_v27 = vld [vmem:[#allocation88_spill] sm:$0xff] }
 0x2df   :  { %15996 = vmatprep.mubr.msk.bf16.mxu1 %vm2339_vm13, %v22020_v34 }
 0x2e4   :  { %16253 = vmatmul.mubr.msk.bf16.gmra.mrb[28].mxu0 %vm2339_vm13, %v14427_v31  ;;  %v5642_v31 = vshrl.u32 %v19338_v23, 16 }
 0x2e5   :  { %16256 = vmatprep.mubr.msk.bf16.mxu0 %vm2339_vm13, %v22021_v4 }
 0x2e6   :  { %15997 = vmatmul.mubr.msk.bf16.gmra.mrb[36].mxu1 %vm2339_vm13, %v22022_v38 }
 0x2e7   :  { %16000 = vmatprep.mubr.msk.bf16.mxu1 %vm2339_vm13, %v22023_v53 }
 0x2ec   :  { %16257 = vmatmul.mubr.msk.bf16.gmra.mrb[32].mxu0 %vm2339_vm13, %v22024_v27 }
 0x2ed   :  { %16260 = vmatprep.mubr.msk.bf16.mxu0 %vm2339_vm13, %v22025_v22 }
 0x2ee   :  { %16001 = vmatmul.mubr.msk.bf16.gmra.mrb[40].mxu1 %vm2339_vm13, %v22026_v2 }
 0x2ef   :  { %16004 = vmatprep.mubr.msk.bf16.mxu1 %vm2339_vm13, %v19124_v52 }
 0x2f4   :  { %16261 = vmatmul.mubr.msk.bf16.gmra.mrb[36].mxu0 %vm2339_vm13, %v22027_v43 }
 0x2f5   :  { %16264 = vmatprep.mubr.msk.bf16.mxu0 %vm2339_vm13, %v22028_v26 }
 0x2f6   :  { %16005 = vmatmul.mubr.msk.bf16.gmra.mrb[44].mxu1 %vm2339_vm13, %v19126_v39 }
 0x2f7   :  { %16008 = vmatprep.mubr.msk.bf16.mxu1 %vm2339_vm13, %v19148_v11 }
 0x2fc   :  { %16265 = vmatmul.mubr.msk.bf16.gmra.mrb[40].mxu0 %vm2339_vm13, %v22029_v6 }
 0x2fd   :  { %16268 = vmatprep.mubr.msk.bf16.mxu0 %vm2339_vm13, %v22030_v18 }
 0x2fe   :  { %16009 = vmatmul.mubr.msk.bf16.gmra.mrb[48].mxu1 %vm2339_vm13, %v19150_v61 }
 0x2ff   :  { %16012 = vmatprep.mubr.msk.bf16.mxu1 %vm2339_vm13, %v19176_v47 }
 0x304   :  { %16269 = vmatmul.mubr.msk.bf16.gmra.mrb[44].mxu0 %vm2339_vm13, %v22031_v1 }
 0x305   :  { %16272 = vmatprep.mubr.msk.bf16.mxu0 %vm2339_vm13, %v19130_v25 }
 0x306   :  { %16013 = vmatmul.mubr.msk.bf16.gmra.mrb[52].mxu1 %vm2339_vm13, %v19179_v32 }
 0x307   :  { %16016 = vmatprep.mubr.msk.bf16.mxu1 %vm2339_vm13, %v19216_v56 }
 0x30c   :  { %16273 = vmatmul.mubr.msk.bf16.gmra.mrb[48].mxu0 %vm2339_vm13, %v19152_v46 }
 0x30d   :  { %16276 = vmatprep.mubr.msk.bf16.mxu0 %vm2339_vm13, %v19156_v37 }
 0x30e   :  { %16017 = vmatmul.mubr.msk.bf16.gmra.mrb[56].mxu1 %vm2339_vm13, %v19218_v10 }
 0x30f   :  { %16020 = vmatprep.mubr.msk.bf16.mxu1 %vm2339_vm13, %v19244_v15 }
 0x314   :  { %16277 = vmatmul.mubr.msk.bf16.gmra.mrb[52].mxu0 %vm2339_vm13, %v19185_v45 }
 0x315   :  { %16280 = vmatprep.mubr.msk.bf16.mxu0 %vm2339_vm13, %v19191_v41 }
 0x316   :  { %16021 = vmatmul.mubr.msk.bf16.gmra.mrb[60].mxu1 %vm2339_vm13, %v19246_v9 }
 0x317   :  { %16042 = vmatprep.mubr.msk.bf16.mxu1 %vm2339_vm13, %v22003_v55  ;;  %v426_v55 = vsel %vm17795_vm9, 0, %v425_v62  ;;  %v22043_v62 = vld [vmem:[#allocation48_spill] sm:$0xff]  ;;  %vm9987_vm9 = vcmask 1042434  }
 0x318   :  { %427 = vst [vmem:[#allocation2 + $0x1ac] sm:$0x1] %v426_v55  ;;  %v5651_v55 = vshll.u32 %v19340_v16, 16 }
 0x31c   :  { %16281 = vmatmul.mubr.msk.bf16.gmra.mrb[56].mxu0 %vm2339_vm13, %v19224_v60 }
 0x31d   :  { %16284 = vmatprep.mubr.msk.bf16.mxu0 %vm2339_vm13, %v19407_v14 }
 0x31e   :  { %16043 = vmatmul.mubr.msk.bf16.vlgmr.msra.gmra.mrb[16].mxu1 %vm2339_vm13, %v22004_v24  ;;  %v22033_v24 = vld [vmem:[#allocation39_spill] sm:$0xff] }
 0x31f   :  { %16046 = vmatprep.mubr.msk.bf16.mxu1 %vm2339_vm13, %v22008_v51  ;;  %v22034_v51 = vld [vmem:[#allocation40_spill] sm:$0xff] }
 0x324   :  { %16285 = vmatmul.mubr.msk.bf16.gmra.mrb[60].mxu0 %vm2339_vm13, %v14428_v58  ;;  %v5653_v58 = vrot.slane %v5651_v55, 5 }
 0x325   :  { %16290 = vmatprep.mubr.msk.bf16.mxu0 %vm2339_vm13, %v22032_v57 }
 0x326   :  { %16047 = vmatmul.mubr.msk.bf16.gmra.mrb[20].mxu1 %vm2339_vm13, %v22010_v35  ;;  %v22036_v35 = vld [vmem:[#allocation42_spill] sm:$0xff] }
 0x327   :  { %16050 = vmatprep.mubr.msk.bf16.mxu1 %vm2339_vm13, %v22013_v0  ;;  %v22037_v0 = vld [vmem:[#allocation85_spill] sm:$0xff] }
 0x32c   :  { %16291 = vmatmul.mubr.msk.bf16.vlgmr.msra.gmra.mrb[0].mxu0 %vm2339_vm13, %v22033_v24  ;;  %v19476_v24 = vld [vmem:[#allocation2 + $0xd4] sm:$0x1] }
 0x32d   :  { %16355 = vmatpush3.bf16.msra.mxu0 %v19293_v8  ;;  %16294 = vmatprep.mubr.msk.bf16.mxu0 %vm2339_vm13, %v22034_v51  ;;  %v22038_v8 = vld [vmem:[#allocation43_spill] sm:$0xff]  ;;  %v22044_v51 = vld [vmem:[#allocation49_spill] sm:$0xff] }
 0x32e   :  { %16051 = vmatmul.mubr.msk.bf16.gmra.mrb[24].mxu1 %vm2339_vm13, %v22014_v50  ;;  %v22040_v50 = vld [vmem:[#allocation45_spill] sm:$0xff] }
 0x32f   :  { %16054 = vmatprep.mubr.msk.bf16.mxu1 %vm2339_vm13, %v22018_v63  ;;  %v22041_v63 = vld [vmem:[#allocation46_spill] sm:$0xff] }
 0x334   :  { %16295 = vmatmul.mubr.msk.bf16.gmra.mrb[4].mxu0 %vm2339_vm13, %v22035_v28  ;;  %v22045_v28 = vld [vmem:[#allocation50_spill] sm:$0xff] }
 0x335   :  { %16298 = vmatprep.mubr.msk.bf16.mxu0 %vm2339_vm13, %v22036_v35 }
 0x336   :  { %16055 = vmatmul.mubr.msk.bf16.gmra.mrb[28].mxu1 %vm2339_vm13, %v14323_v33  ;;  %v22042_v33 = vld [vmem:[#allocation47_spill] sm:$0xff] }
 0x337   :  { %16058 = vmatprep.mubr.msk.bf16.mxu1 %vm2339_vm13, %v22037_v0 }
 0x33c   :  { %16299 = vmatmul.mubr.msk.bf16.gmra.mrb[8].mxu0 %vm2339_vm13, %v22038_v8  ;;  %v5661_v8 = vshll.u32 %v19476_v24, 16 }
 0x33d   :  { %16302 = vmatprep.mubr.msk.bf16.mxu0 %vm2339_vm13, %v22039_v59 }
 0x33e   :  { %16059 = vmatmul.mubr.msk.bf16.gmra.mrb[32].mxu1 %vm2339_vm13, %v22021_v4  ;;  %v5645_v4 = vshll.u32 %v19338_v23, 16  ;;  %v5663_v59 = vrot.slane %v5661_v8, 5  ;;  %v22058_v8 = vld [vmem:[#allocation60_spill] sm:$0xff] }
 0x33f   :  { %16062 = vmatprep.mubr.msk.bf16.mxu1 %vm2339_vm13, %v22024_v27  ;;  %v5655_v27 = vshrl.u32 %v19340_v16, 16 }
 0x341   :  { %v5657_v57 = vrot.slane %v5655_v27, 4  ;;  %v22050_v27 = vld [vmem:[#allocation53_spill] sm:$0xff] }
 0x343   :  { %v5658_v0 = vor.u32 %v5657_v57, %v5653_v58  ;;  %v22054_v57 = vld [vmem:[#allocation58_spill] sm:$0xff] }
 0x344   :  { %16303 = vmatmul.mubr.msk.bf16.gmra.mrb[12].mxu0 %vm2339_vm13, %v22040_v50  ;;  %v22046_v50 = vld [vmem:[#allocation51_spill] sm:$0xff] }
 0x345   :  { %16306 = vmatprep.mubr.msk.bf16.mxu0 %vm2339_vm13, %v22041_v63  ;;  %v22047_v63 = vld [vmem:[#allocation56_spill] sm:$0xff] }
 0x346   :  { %16063 = vmatmul.mubr.msk.bf16.gmra.mrb[36].mxu1 %vm2339_vm13, %v22025_v22  ;;  %v5644_v22 = vrot.slane %v5642_v31, 4 }
 0x347   :  { %16066 = vmatprep.mubr.msk.bf16.mxu1 %vm2339_vm13, %v22027_v43  ;;  %v5647_v43 = vrot.slane %v5645_v4, 5 }
 0x349   :  { %v5648_v35 = vor.u32 %v5647_v43, %v5644_v22  ;;  %v22053_v22 = vld [vmem:[#allocation57_spill] sm:$0xff] }
 0x34c   :  { %16307 = vmatmul.mubr.msk.bf16.gmra.mrb[16].mxu0 %vm2339_vm13, %v22042_v33 }
 0x34d   :  { %16310 = vmatprep.mubr.msk.bf16.mxu0 %vm2339_vm13, %v22043_v62  ;;  %v22051_v62 = vld [vmem:[#allocation54_spill] sm:$0xff] }
 0x34e   :  { %16067 = vmatmul.mubr.msk.bf16.gmra.mrb[40].mxu1 %vm2339_vm13, %v22028_v26  ;;  %v5649_v26 = vrot.slane %v5648_v35, 4 }
 0x34f   :  { %16070 = vmatprep.mubr.msk.bf16.mxu1 %vm2339_vm13, %v22029_v6  ;;  %v5659_v6 = vrot.slane %v5658_v0, 4 }
 0x350   :  { %v5654_v31 = vsel %vm17881_vm14, %v5649_v26, %v5653_v58  ;;  %v22059_v26 = vld [vmem:[#allocation61_spill] sm:$0xff] }
 0x351   :  { %v5664_v4 = vsel %vm17881_vm14, %v5659_v6, %v5663_v59 }
 0x354   :  { %16311 = vmatmul.mubr.msk.bf16.gmra.mrb[20].mxu0 %vm2339_vm13, %v22044_v51  ;;  %v22055_v51 = vld [vmem:[#allocation59_spill] sm:$0xff] }
 0x355   :  { %16314 = vmatprep.mubr.msk.bf16.mxu0 %vm2339_vm13, %v22045_v28 }
 0x356   :  { %16071 = vmatmul.mubr.msk.bf16.gmra.mrb[44].mxu1 %vm2339_vm13, %v22030_v18  ;;  %v14461_v18 = vcombine.low %v5654_v31, %v5664_v4  ;;  %v22064_v31 = vld [vmem:[#allocation62_spill] sm:$0xff]  ;;  %v5666_v4 = vshrl.u32 %v19413_v20, 16 }
 0x357   :  { %16074 = vmatprep.mubr.msk.bf16.mxu1 %vm2339_vm13, %v22031_v1  ;;  %v22049_v1 = vld [vmem:[#allocation52_spill] sm:$0xff] }
 0x35c   :  { %16315 = vmatmul.mubr.msk.bf16.gmra.mrb[24].mxu0 %vm2339_vm13, %v22046_v50 }
 0x35d   :  { %16318 = vmatprep.mubr.msk.bf16.mxu0 %vm2339_vm13, %v22047_v63 }
 0x35e   :  { %16075 = vmatmul.mubr.msk.bf16.gmra.mrb[48].mxu1 %vm2339_vm13, %v19130_v25 }
 0x35f   :  { %16078 = vmatprep.mubr.msk.bf16.mxu1 %vm2339_vm13, %v19152_v46 }
 0x364   :  { %16319 = vmatmul.mubr.msk.bf16.gmra.mrb[28].mxu0 %vm2339_vm13, %v14461_v18  ;;  %v5669_v18 = vshll.u32 %v19413_v20, 16 }
 0x365   :  { %16322 = vmatprep.mubr.msk.bf16.mxu0 %vm2339_vm13, %v22049_v1  ;;  %v5679_v1 = vshrl.u32 %v19415_v13, 16 }
 0x366   :  { %16079 = vmatmul.mubr.msk.bf16.gmra.mrb[52].mxu1 %vm2339_vm13, %v19156_v37 }
 0x367   :  { %16082 = vmatprep.mubr.msk.bf16.mxu1 %vm2339_vm13, %v19185_v45  ;;  %v22052_v45 = vld [vmem:[#allocation55_spill] sm:$0xff] }
 0x36c   :  { %16323 = vmatmul.mubr.msk.bf16.gmra.mrb[32].mxu0 %vm2339_vm13, %v22050_v27  ;;  %v22065_v27 = vld [vmem:[#allocation63_spill] sm:$0xff] }
 0x36d   :  { %16326 = vmatprep.mubr.msk.bf16.mxu0 %vm2339_vm13, %v22051_v62  ;;  %v5675_v62 = vshll.u32 %v19415_v13, 16 }
 0x36e   :  { %16083 = vmatmul.mubr.msk.bf16.gmra.mrb[56].mxu1 %vm2339_vm13, %v19191_v41 }
 0x36f   :  { %16086 = vmatprep.mubr.msk.bf16.mxu1 %vm2339_vm13, %v19224_v60 }
 0x371   :  { %v19514_v46 = vpop.f32.mrb[0].mxu1 }
 0x372   :  { %v19516_v25 = vpop.f32.mrb[1].mxu1 }
 0x373   :  { %v19518_v37 = vpop.f32.mrb[2].mxu1 }
 0x374   :  { %v19520_v55 = vpop.f32.mrb[3].mxu1  ;;  %16327 = vmatmul.mubr.msk.bf16.gmra.mrb[36].mxu0 %vm2339_vm13, %v22052_v45  ;;  %v5668_v45 = vrot.slane %v5666_v4, 4  ;;  %v22069_v4 = vld [vmem:[#allocation68_spill] sm:$0xff] }
 0x375   :  { %16330 = vmatprep.mubr.msk.bf16.mxu0 %vm2339_vm13, %v22053_v22  ;;  %v5671_v22 = vrot.slane %v5669_v18, 5 }
 0x376   :  { %16087 = vmatmul.mubr.msk.bf16.gmra.mrb[60].mxu1 %vm2339_vm13, %v19407_v14 }
 0x379   :  { %v19528_v41 = vpop.f32.mrb[4].mxu1 }
 0x37a   :  { %v19530_v60 = vpop.f32.mrb[5].mxu1 }
 0x37b   :  { %v19532_v43 = vpop.f32.mrb[6].mxu1 }
 0x37c   :  { %v19534_v58 = vpop.f32.mrb[7].mxu1  ;;  %16331 = vmatmul.mubr.msk.bf16.gmra.mrb[40].mxu0 %vm2339_vm13, %v22054_v57  ;;  %v5677_v57 = vrot.slane %v5675_v62, 5 }
 0x37d   :  { %16334 = vmatprep.mubr.msk.bf16.mxu0 %vm2339_vm13, %v22055_v51  ;;  %v5681_v51 = vrot.slane %v5679_v1, 4 }
 0x381   :  { %v19540_v28 = vpop.f32.mrb[8].mxu1 }
 0x382   :  { %v19542_v35 = vpop.f32.mrb[9].mxu1 }
 0x383   :  { %v19544_v0 = vpop.f32.mrb[10].mxu1 }
 0x384   :  { %22056 = vst [vmem:[#allocation69_spill] sm:$0xff] %v19544_v0  ;;  %v19546_v14 = vpop.f32.mrb[11].mxu1  ;;  %16335 = vmatmul.mubr.msk.bf16.gmra.mrb[44].mxu0 %vm2339_vm13, %v22058_v8  ;;  %v19568_v8 = vld [vmem:[#allocation2 + $0x1ac] sm:$0x1]  ;;  %v22068_v0 = vld [vmem:[#allocation67_spill] sm:$0xff] }
 0x385   :  { %22057 = vst [vmem:[#allocation70_spill] sm:$0xff] %v19546_v14  ;;  %16338 = vmatprep.mubr.msk.bf16.mxu0 %vm2339_vm13, %v22059_v26  ;;  %v22066_v26 = vld [vmem:[#allocation64_spill] sm:$0xff] }
 0x389   :  { %v19552_v6 = vpop.f32.mrb[12].mxu1 }
 0x38a   :  { %22060 = vst [vmem:[#allocation73_spill] sm:$0xff] %v19552_v6  ;;  %v19554_v59 = vpop.f32.mrb[13].mxu1 }
 0x38b   :  { %22061 = vst [vmem:[#allocation76_spill] sm:$0xff] %v19554_v59  ;;  %v19556_v50 = vpop.f32.mrb[14].mxu1  ;;  %v5685_v59 = vshll.u32 %v19568_v8, 16 }
 0x38c   :  { %22062 = vst [vmem:[#allocation79_spill] sm:$0xff] %v19556_v50  ;;  %v19558_v63 = vpop.f32.mrb[15].mxu1  ;;  %16339 = vmatmul.mubr.msk.bf16.gmra.mrb[48].mxu0 %vm2339_vm13, %v22064_v31  ;;  %v22067_v31 = vld [vmem:[#allocation66_spill] sm:$0xff]  ;;  %v5682_v50 = vor.u32 %v5681_v51, %v5677_v57 }
 0x38d   :  { %22063 = vst [vmem:[#allocation71_spill] sm:$0xff] %v19558_v63  ;;  %16342 = vmatprep.mubr.msk.bf16.mxu0 %vm2339_vm13, %v22065_v27  ;;  %v5672_v63 = vor.u32 %v5671_v22, %v5668_v45  ;;  %v5687_v14 = vrot.slane %v5685_v59, 5 }
 0x38e   :  { %v5683_v27 = vrot.slane %v5682_v50, 4  ;;  %v6073_v50 = vrot.slane %v19568_v8, 5 }
 0x38f   :  { %v5673_v6 = vrot.slane %v5672_v63, 4 }
 0x390   :  { %v5688_v1 = vsel %vm17881_vm14, %v5683_v27, %v5687_v14 }
 0x391   :  { %v5678_v18 = vsel %vm17881_vm14, %v5673_v6, %v5677_v57  ;;  %v6070_v6 = vrot.slane %v19415_v13, 5 }
 0x392   :  { %v14462_v62 = vcombine.low %v5678_v18, %v5688_v1 }
 0x393   :  { %v6072_v59 = vrot.slane %v6070_v6, 4 }
 0x394   :  { %16343 = vmatmul.mubr.msk.bf16.gmra.mrb[52].mxu0 %vm2339_vm13, %v22066_v26  ;;  %v9227_v26 = vld [vmem:[#allocation3 + $0x8] sm:$0x1] }
 0x395   :  { %16346 = vmatprep.mubr.msk.bf16.mxu0 %vm2339_vm13, %v22067_v31  ;;  %v6074_v51 = vsel %vm18783_vm3, %v6072_v59, %v6073_v50  ;;  %v9230_v59 = vld [vmem:[#allocation3 + $0x10] sm:$0x1] }
 0x39c   :  { %16347 = vmatmul.mubr.msk.bf16.gmra.mrb[56].mxu0 %vm2339_vm13, %v22068_v0 }
 0x39d   :  { %16350 = vmatprep.mubr.msk.bf16.mxu0 %vm2339_vm13, %v22069_v4 }
 0x3a4   :  { %16351 = vmatmul.mubr.msk.bf16.gmra.mrb[60].mxu0 %vm2339_vm13, %v14462_v62 }
 0x3a5   :  { %16356 = vmatprep.mubr.msk.bf16.mxu0 %vm2339_vm13, %v18822_v44  ;;  %v6063_v44 = vrot.slane %v19340_v16, 5 }
 0x3ac   :  { %16357 = vmatmul.mubr.msk.bf16.vlgmr.msra.gmra.mrb[0].mxu0 %vm2339_vm13, %v18876_v40  ;;  %v14495_v40 = vrot.slane %v19338_v23, 9 }
 0x3ad   :  { %16360 = vmatprep.mubr.msk.bf16.mxu0 %vm2339_vm13, %v18895_v5  ;;  %v6065_v5 = vrot.slane %v6063_v44, 4 }
 0x3b4   :  { %16361 = vmatmul.mubr.msk.bf16.gmra.mrb[4].mxu0 %vm2339_vm13, %v18897_v7  ;;  %v6066_v7 = vrot.slane %v19476_v24, 5 }
 0x3b5   :  { %16364 = vmatprep.mubr.msk.bf16.mxu0 %vm2339_vm13, %v18915_v17  ;;  %v22070_v17 = vld [vmem:[#allocation87_spill] sm:$0xff] }
 0x3bc   :  { %16365 = vmatmul.mubr.msk.bf16.gmra.mrb[8].mxu0 %vm2339_vm13, %v18917_v21  ;;  %v6064_v21 = vsel %vm18783_vm3, %v14495_v40, %v6063_v44 }
 0x3bd   :  { %16368 = vmatprep.mubr.msk.bf16.mxu0 %vm2339_vm13, %v18939_v42  ;;  %v6067_v42 = vsel %vm18783_vm3, %v6065_v5, %v6066_v7 }
 0x3c4   :  { %16369 = vmatmul.mubr.msk.bf16.gmra.mrb[12].mxu0 %vm2339_vm13, %v18941_v29  ;;  %v14497_v29 = vcombine.low %v6064_v21, %v6067_v42  ;;  %v9291_v42 = vld [vmem:[#allocation3 + $0x14] sm:$0x1] }
 0x3c5   :  { %16372 = vmatprep.mubr.msk.bf16.mxu0 %vm2339_vm13, %v18964_v30 }
 0x3cc   :  { %16373 = vmatmul.mubr.msk.bf16.gmra.mrb[16].mxu0 %vm2339_vm13, %v22005_v3 }
 0x3cd   :  { %16376 = vmatprep.mubr.msk.bf16.mxu0 %vm2339_vm13, %v22006_v48 }
 0x3d4   :  { %16377 = vmatmul.mubr.msk.bf16.gmra.mrb[20].mxu0 %vm2339_vm13, %v22011_v36 }
 0x3d5   :  { %16380 = vmatprep.mubr.msk.bf16.mxu0 %vm2339_vm13, %v22012_v49 }
 0x3dc   :  { %16381 = vmatmul.mubr.msk.bf16.gmra.mrb[24].mxu0 %vm2339_vm13, %v22015_v12 }
 0x3dd   :  { %16384 = vmatprep.mubr.msk.bf16.mxu0 %vm2339_vm13, %v22070_v17 }
 0x3e4   :  { %16385 = vmatmul.mubr.msk.bf16.gmra.mrb[28].mxu0 %vm2339_vm13, %v14497_v29  ;;  %v9292_v29 = vsel %vm19697_vm5, 0, %v9291_v42 }
 0x3e5   :  { %16388 = vmatprep.mubr.msk.bf16.mxu0 %vm2339_vm13, %v22020_v34  ;;  %9293 = vst [vmem:[#allocation3 + $0x14] sm:$0x1] %v9292_v29 }
 0x3ec   :  { %16389 = vmatmul.mubr.msk.bf16.gmra.mrb[32].mxu0 %vm2339_vm13, %v22022_v38 }
 0x3ed   :  { %16392 = vmatprep.mubr.msk.bf16.mxu0 %vm2339_vm13, %v22023_v53 }
 0x3f1   :  { %v19628_v30 = vpop.f32.mrb[16].mxu1 }
 0x3f2   :  { %v19630_v3 = vpop.f32.mrb[17].mxu1 }
 0x3f3   :  { %v19632_v48 = vpop.f32.mrb[18].mxu1 }
 0x3f4   :  { %v19634_v36 = vpop.f32.mrb[19].mxu1  ;;  %16393 = vmatmul.mubr.msk.bf16.gmra.mrb[36].mxu0 %vm2339_vm13, %v22026_v2 }
 0x3f5   :  { %16396 = vmatprep.mubr.msk.bf16.mxu0 %vm2339_vm13, %v19124_v52 }
 0x3f9   :  { %v19640_v49 = vpop.f32.mrb[20].mxu1 }
 0x3fa   :  { %v19642_v12 = vpop.f32.mrb[21].mxu1 }
 0x3fb   :  { %v19644_v23 = vpop.f32.mrb[22].mxu1 }
 0x3fc   :  { %v19646_v16 = vpop.f32.mrb[23].mxu1  ;;  %16397 = vmatmul.mubr.msk.bf16.gmra.mrb[40].mxu0 %vm2339_vm13, %v19126_v39 }
 0x3fd   :  { %16400 = vmatprep.mubr.msk.bf16.mxu0 %vm2339_vm13, %v19148_v11 }
 0x401   :  { %v19652_v34 = vpop.f32.mrb[24].mxu1 }
 0x402   :  { %v19654_v38 = vpop.f32.mrb[25].mxu1 }
 0x403   :  { %v19656_v53 = vpop.f32.mrb[26].mxu1 }
 0x404   :  { %v19658_v52 = vpop.f32.mrb[27].mxu1  ;;  %16401 = vmatmul.mubr.msk.bf16.gmra.mrb[44].mxu0 %vm2339_vm13, %v19150_v61 }
 0x405   :  { %22071 = vst [vmem:[#allocation80_spill] sm:$0xff] %v19658_v52  ;;  %16404 = vmatprep.mubr.msk.bf16.mxu0 %vm2339_vm13, %v19176_v47 }
 0x409   :  { %v19664_v2 = vpop.f32.mrb[28].mxu1 }
 0x40a   :  { %22072 = vst [vmem:[#allocation72_spill] sm:$0xff] %v19664_v2  ;;  %v19666_v39 = vpop.f32.mrb[29].mxu1 }
 0x40b   :  { %22073 = vst [vmem:[#allocation77_spill] sm:$0xff] %v19666_v39  ;;  %v19668_v24 = vpop.f32.mrb[30].mxu1 }
 0x40c   :  { %22074 = vst [vmem:[#allocation82_spill] sm:$0xff] %v19668_v24  ;;  %v19670_v11 = vpop.f32.mrb[31].mxu1  ;;  %16405 = vmatmul.mubr.msk.bf16.gmra.mrb[48].mxu0 %vm2339_vm13, %v19179_v32 }
 0x40d   :  { %22075 = vst [vmem:[#allocation74_spill] sm:$0xff] %v19670_v11  ;;  %16408 = vmatprep.mubr.msk.bf16.mxu0 %vm2339_vm13, %v19216_v56  ;;  %v14496_v56 = vrot.slane %v19413_v20, 9 }
 0x40f   :  { %v6071_v57 = vsel %vm18783_vm3, %v14496_v56, %v6070_v6 }
 0x411   :  { %v19676_v0 = vpop.f32.mrb[32].mxu1 }
 0x412   :  { %22076 = vst [vmem:[#allocation75_spill] sm:$0xff] %v19676_v0  ;;  %v19678_v61 = vpop.f32.mrb[33].mxu1 }
 0x413   :  { %22077 = vst [vmem:[#allocation83_spill] sm:$0xff] %v19678_v61  ;;  %v19680_v14 = vpop.f32.mrb[34].mxu1 }
 0x414   :  { %22078 = vst [vmem:[#allocation81_spill] sm:$0xff] %v19680_v14  ;;  %v19682_v47 = vpop.f32.mrb[35].mxu1  ;;  %16409 = vmatmul.mubr.msk.bf16.gmra.mrb[52].mxu0 %vm2339_vm13, %v19218_v10  ;;  %v9288_v10 = vld [vmem:[#allocation3 + $0xc] sm:$0x1] }
 0x415   :  { %22079 = vst [vmem:[#allocation84_spill] sm:$0xff] %v19682_v47  ;;  %16412 = vmatprep.mubr.msk.bf16.mxu0 %vm2339_vm13, %v19244_v15  ;;  %v22084_v15 = vmov 0   ;;  %v9289_v13 = vsel %vm19697_vm5, 0, %v9288_v10  ;;  %v9231_v10 = vsel %vm19725_vm8, 0, %v9230_v59  ;;  %v9294_v59 = vld [vmem:[#allocation3 + $0x1c] sm:$0x1] }
 0x416   :  { %9214 = vst.msk [vmem:[#allocation3 + $0x4] sm:$0x1] %vm9213_vm1, %v22084_v15  ;;  %9216 = vst.msk [vmem:[#allocation3 + $0x54] sm:$0x1] %vm9213_vm1, %v22084_v15 }
 0x417   :  { %9219 = vst.msk [vmem:[#allocation3 + $0x4c] sm:$0x1] %vm9213_vm1, %v22084_v15  ;;  %9221 = vst.msk [vmem:[#allocation3 + $0x9c] sm:$0x1] %vm9213_vm1, %v22084_v15  ;;  %vm10731_vm1 = vcmask 523520  }
 0x418   :  { %9290 = vst [vmem:[#allocation3 + $0xc] sm:$0x1] %v9289_v13  ;;  %9212 = vst.msk [vmem:[#allocation3] sm:$0xf] %vm9211_vm7, %v22084_v15 }
 0x419   :  { %v19689_v32 = vpop.f32.mrb[36].mxu1  ;;  %9215 = vst.msk [vmem:[#allocation3 + $0x50] sm:$0xf] %vm9211_vm7, %v22084_v15  ;;  %9218 = vst.msk [vmem:[#allocation3 + $0x48] sm:$0xf] %vm9211_vm7, %v22084_v15 }
 0x41a   :  { %22080 = vst [vmem:[#allocation78_spill] sm:$0xff] %v19689_v32  ;;  %v19693_v63 = vpop.f32.mrb[37].mxu1  ;;  %9220 = vst.msk [vmem:[#allocation3 + $0x98] sm:$0xf] %vm9211_vm7, %v22084_v15  ;;  %vm10868_vm7 = vcmask 785920  }
 0x41b   :  { %22081 = vst [vmem:[#allocation36_spill] sm:$0xff] %v19693_v63  ;;  %v19709_v20 = vpop.f32.mrb[38].mxu1  ;;  %9232 = vst [vmem:[#allocation3 + $0x10] sm:$0x1] %v9231_v10  ;;  %v9295_v10 = vsel %vm19697_vm5, 0, %v9294_v59 }
 0x41c   :  { %22085 = vst [vmem:[#allocation90_spill] sm:$0xff] %v19709_v20  ;;  %v19713_v22 = vpop.f32.mrb[39].mxu1  ;;  %16413 = vmatmul.mubr.msk.bf16.gmra.mrb[56].mxu0 %vm2339_vm13, %v19246_v9  ;;  %v9228_v9 = vsel %vm19725_vm8, 0, %v9227_v26  ;;  %9296 = vst [vmem:[#allocation3 + $0x1c] sm:$0x1] %v9295_v10 }
 0x41d   :  { %22086 = vst [vmem:[#allocation86_spill] sm:$0xff] %v19713_v22  ;;  %16416 = vmatprep.mubr.msk.bf16.mxu0 %vm2339_vm13, %v19263_v19  ;;  %v14498_v19 = vcombine.low %v6071_v57, %v6074_v51  ;;  %9229 = vst [vmem:[#allocation3 + $0x8] sm:$0x1] %v9228_v9  ;;  %v19800_v10 = vld [vmem:[#allocation12] ss:$0 sm:$0xff] }
 0x421   :  { %v19739_v31 = vpop.f32.mrb[40].mxu1 }
 0x422   :  { %22089 = vst [vmem:[#allocation91_spill] sm:$0xff] %v19739_v31  ;;  %v19741_v27 = vpop.f32.mrb[41].mxu1 }
 0x423   :  { %22090 = vst [vmem:[#allocation94_spill] sm:$0xff] %v19741_v27  ;;  %v19743_v4 = vpop.f32.mrb[42].mxu1 }
 0x424   :  { %22091 = vst [vmem:[#allocation88_spill] sm:$0xff] %v19743_v4  ;;  %v19745_v18 = vpop.f32.mrb[43].mxu1  ;;  %16417 = vmatmul.mubr.msk.bf16.gmra.mrb[60].mxu0 %vm2339_vm13, %v14498_v19  ;;  %vm9999_vm13 = vcmask 1046534  }
 0x425   :  { %22092 = vst [vmem:[#allocation89_spill] sm:$0xff] %v19745_v18 }
 0x429   :  { %v19748_v1 = vpop.f32.mrb[44].mxu1 }
 0x42a   :  { %22093 = vst [vmem:[#allocation95_spill] sm:$0xff] %v19748_v1  ;;  %v19750_v62 = vpop.f32.mrb[45].mxu1 }
 0x42b   :  { %22094 = vst [vmem:[#allocation92_spill] sm:$0xff] %v19750_v62  ;;  %v19752_v44 = vpop.f32.mrb[46].mxu1 }
 0x42c   :  { %22095 = vst [vmem:[#allocation93_spill] sm:$0xff] %v19752_v44  ;;  %v19754_v40 = vpop.f32.mrb[47].mxu1 }
 0x42d   :  { %22096 = vst [vmem:[#allocation96_spill] sm:$0xff] %v19754_v40 }
 0x431   :  { %v19756_v5 = vpop.f32.mrb[48].mxu1 }
 0x432   :  { %22097 = vst [vmem:[#allocation97_spill] sm:$0xff] %v19756_v5  ;;  %v19758_v7 = vpop.f32.mrb[49].mxu1 }
 0x433   :  { %22098 = vst [vmem:[#allocation98_spill] sm:$0xff] %v19758_v7  ;;  %v19760_v17 = vpop.f32.mrb[50].mxu1 }
 0x434   :  { %22099 = vst [vmem:[#allocation38_spill] sm:$0xff] %v19760_v17  ;;  %v19762_v21 = vpop.f32.mrb[51].mxu1 }
 0x435   :  { %22100 = vst [vmem:[#allocation39_spill] sm:$0xff] %v19762_v21 }
 0x439   :  { %v19766_v6 = vpop.f32.mrb[52].mxu1 }
 0x43a   :  { %22101 = vst [vmem:[#allocation40_spill] sm:$0xff] %v19766_v6  ;;  %v19768_v56 = vpop.f32.mrb[53].mxu1  ;;  %v19805_v6 = vld [vmem:[#allocation13] ss:$0 sm:$0xff] }
 0x43b   :  { %22102 = vst [vmem:[#allocation41_spill] sm:$0xff] %v19768_v56  ;;  %v19770_v50 = vpop.f32.mrb[54].mxu1 }
 0x43c   :  { %22103 = vst [vmem:[#allocation42_spill] sm:$0xff] %v19770_v50  ;;  %v19774_v13 = vpop.f32.mrb[55].mxu1 }
 0x43d   :  { %22104 = vst [vmem:[#allocation85_spill] sm:$0xff] %v19774_v13  ;;  %v6719_v13 = vlaneseq }
 0x441   :  { %v19776_v57 = vpop.f32.mrb[56].mxu1 }
 0x442   :  { %22105 = vst [vmem:[#allocation43_spill] sm:$0xff] %v19776_v57  ;;  %v19778_v51 = vpop.f32.mrb[57].mxu1  ;;  %v9233_v57 = vld [vmem:[#allocation3 + $0x18] sm:$0x1] }
 0x443   :  { %22106 = vst [vmem:[#allocation44_spill] sm:$0xff] %v19778_v51  ;;  %v19780_v26 = vpop.f32.mrb[58].mxu1  ;;  %v9234_v51 = vsel %vm19725_vm8, 0, %v9233_v57 }
 0x444   :  { %22107 = vst [vmem:[#allocation45_spill] sm:$0xff] %v19780_v26  ;;  %v19782_v9 = vpop.f32.mrb[59].mxu1  ;;  %9235 = vst [vmem:[#allocation3 + $0x18] sm:$0x1] %v9234_v51  ;;  %v9297_v26 = vld [vmem:[#allocation3 + $0x24] sm:$0x1] }
 0x445   :  { %22108 = vst [vmem:[#allocation46_spill] sm:$0xff] %v19782_v9  ;;  %v19803_v51 = vshrl.u32 %v6719_v13, 7 }
 0x447   :  { %22113 = vst [vmem:[#allocation51_spill] sm:$0xff] %v19803_v51 }
 0x449   :  { %v19784_v19 = vpop.f32.mrb[60].mxu1 }
 0x44a   :  { %22109 = vst [vmem:[#allocation47_spill] sm:$0xff] %v19784_v19  ;;  %v19786_v42 = vpop.f32.mrb[61].mxu1  ;;  %v9298_v19 = vsel %vm19697_vm5, 0, %v9297_v26 }
 0x44b   :  { %22110 = vst [vmem:[#allocation48_spill] sm:$0xff] %v19786_v42  ;;  %v19788_v29 = vpop.f32.mrb[62].mxu1  ;;  %9299 = vst [vmem:[#allocation3 + $0x24] sm:$0x1] %v9298_v19  ;;  %v9236_v42 = vld [vmem:[#allocation3 + $0x20] sm:$0x1] }
 0x44c   :  { %22111 = vst [vmem:[#allocation49_spill] sm:$0xff] %v19788_v29  ;;  %v19790_v15 = vpop.f32.mrb[63].mxu1  ;;  %v9237_v29 = vsel %vm19725_vm8, 0, %v9236_v42 }
 0x44d   :  { %22112 = vst [vmem:[#allocation50_spill] sm:$0xff] %v19790_v15  ;;  %9238 = vst [vmem:[#allocation3 + $0x20] sm:$0x1] %v9237_v29  ;;  %v17511_v15 = vmov 1983009808  }
 0x44e   :  { %v6717_v9 = vunpack.c.l.s4 %v17511_v15 }
 0x450   :  { %v6718_v57 = vunpack.c.0.s8 %v6717_v9 }
 0x452   :  { %v19814_v13 = vsub.s32 %v6718_v57, %v19803_v51 }
 0x47f   :  { %v16358_v59 = vpop.f32.mrb[0].mxu0 }
 0x480   :  { %v16474_v50 = vadd.f32 %v16358_v59, %v19514_v46  ;;  %v6126_v56 = vpop.f32.mrb[1].mxu0 }
 0x481   :  { %v16475_v26 = vadd.f32 %v6126_v56, %v19516_v25  ;;  %v16359_v19 = vpop.f32.mrb[2].mxu0 }
 0x482   :  { %v6454_v42 = vmul.f32 %v16474_v50, %v19800_v10  ;;  %v16476_v29 = vadd.f32 %v16359_v19, %v19518_v37  ;;  %v6129_v15 = vpop.f32.mrb[3].mxu0 }
 0x483   :  { %v6452_v21 = vmul.f32 %v16475_v26, %v19800_v10  ;;  %v16477_v17 = vadd.f32 %v6129_v15, %v19520_v55 }
 0x484   :  { %v6525_v46 = vadd.f32 %v19805_v6, %v6454_v42  ;;  %v6455_v9 = vmul.f32 %v16476_v29, %v19800_v10 }
 0x485   :  { %v6523_v59 = vadd.f32 %v19805_v6, %v6452_v21  ;;  %v6453_v25 = vmul.f32 %v16477_v17, %v19800_v10 }
 0x486   :  { %v6589_v56 = vmax.f32 %v6525_v46, 0.0  ;;  %v6526_v50 = vadd.f32 %v19805_v6, %v6455_v9 }
 0x487   :  { %v6587_v37 = vmax.f32 %v6523_v59, 0.0  ;;  %v6524_v19 = vadd.f32 %v19805_v6, %v6453_v25  ;;  %v16362_v26 = vpop.f32.mrb[4].mxu0 }
 0x488   :  { %v6749_v7 = vcombine.high %v6589_v56, %v6589_v56  ;;  %v6756_v55 = vrot.slane %v6589_v56, %v19814_v13  ;;  %v6590_v42 = vmax.f32 %v6526_v50, 0.0  ;;  %v19823_v57 = vadd.f32 %v16362_v26, %v19528_v41  ;;  %v6142_v15 = vpop.f32.mrb[5].mxu0 }
 0x489   :  { %v6715_v29 = vcombine.high %v6587_v37, %v6587_v37  ;;  %v6722_v21 = vrot.slane %v6587_v37, %v19814_v13  ;;  %v6588_v51 = vmax.f32 %v6524_v19, 0.0  ;;  %v16479_v17 = vadd.f32 %v6142_v15, %v19530_v60  ;;  %v19827_v46 = vpop.f32.mrb[6].mxu0 }
 0x48a   :  { %v6763_v9 = vrot.slane %v6749_v7, %v19814_v13  ;;  %v6764_v59 = vcombine.high %v6756_v55, %v6756_v55  ;;  %v14541_v25 = vrot.slane %v6756_v55, 9  ;;  %v6766_v5 = vcombine.high %v6590_v42, %v6590_v42  ;;  %v19830_v40 = vpop.f32.mrb[7].mxu0 }
 0x48b   :  { %v6729_v56 = vrot.slane %v6715_v29, %v19814_v13  ;;  %v6730_v41 = vcombine.high %v6722_v21, %v6722_v21  ;;  %v14533_v50 = vrot.slane %v6722_v21, 9  ;;  %v6773_v26 = vrot.slane %v6590_v42, %v19814_v13 }
 0x48c   :  { %v6765_v44 = vcombine.high %v6763_v9, %v6763_v9  ;;  %v14542_v37 = vrot.slane %v6764_v59, 9  ;;  %v14543_v19 = vrot.slane %v6763_v9, 9  ;;  %v8835_v62 = vmax.f32 %v6756_v55, %v14541_v25 }
 0x48d   :  { %v6731_v60 = vcombine.high %v6729_v56, %v6729_v56  ;;  %v14534_v15 = vrot.slane %v6730_v41, 9  ;;  %v14535_v1 = vrot.slane %v6729_v56, 9  ;;  %v8827_v18 = vmax.f32 %v6722_v21, %v14533_v50 }
 0x48e   :  { %v14544_v7 = vrot.slane %v6765_v44, 9  ;;  %v8836_v4 = vmax.f32 %v6764_v59, %v14542_v37  ;;  %v8837_v27 = vmax.f32 %v6763_v9, %v14543_v19  ;;  %v6780_v31 = vrot.slane %v6766_v5, %v19814_v13 }
 0x48f   :  { %v14536_v22 = vrot.slane %v6731_v60, 9  ;;  %v8828_v29 = vmax.f32 %v6730_v41, %v14534_v15  ;;  %v8829_v20 = vmax.f32 %v6729_v56, %v14535_v1  ;;  %v9083_v63 = vmax.f32 %v8827_v18, %v8835_v62  ;;  %v19835_v42 = vpop.f32.mrb[8].mxu0 }
 0x490   :  { %v8838_v32 = vmax.f32 %v6765_v44, %v14544_v7  ;;  %v6781_v55 = vcombine.high %v6773_v26, %v6773_v26  ;;  %v6782_v25 = vcombine.high %v6780_v31, %v6780_v31  ;;  %v14545_v47 = vrot.slane %v6773_v26, 9  ;;  %v19837_v14 = vpop.f32.mrb[9].mxu0 }
 0x491   :  { %v8830_v21 = vmax.f32 %v6731_v60, %v14536_v22  ;;  %v9084_v50 = vmax.f32 %v8828_v29, %v8836_v4  ;;  %v9085_v59 = vmax.f32 %v8829_v20, %v8837_v27  ;;  %v15208_v9 = vpack.c.bf16 %v9083_v63, %v9083_v63  ;;  %v19839_v37 = vpop.f32.mrb[10].mxu0 }
 0x492   :  { %v14546_v5 = vrot.slane %v6781_v55, 9  ;;  %v14547_v41 = vrot.slane %v6780_v31, 9  ;;  %v14548_v1 = vrot.slane %v6782_v25, 9  ;;  %v8839_v18 = vmax.f32 %v6773_v26, %v14545_v47  ;;  %v19841_v62 = vpop.f32.mrb[11].mxu0 }
 0x493   :  { %v9086_v56 = vmax.f32 %v8830_v21, %v8838_v32  ;;  %v15209_v19 = vpack.c.bf16 %v9084_v50, %v9084_v50  ;;  %v15210_v44 = vpack.c.bf16 %v9085_v59, %v9085_v59  ;;  %v9857_v15 = vunpack.c.l.b16 %v15208_v9 }
 0x494   :  { %v8840_v7 = vmax.f32 %v6781_v55, %v14546_v5  ;;  %v8841_v61 = vmax.f32 %v6780_v31, %v14547_v41  ;;  %v8842_v0 = vmax.f32 %v6782_v25, %v14548_v1  ;;  %v6732_v11 = vcombine.high %v6588_v51, %v6588_v51 }
 0x495   :  { %v15211_v22 = vpack.c.bf16 %v9086_v56, %v9086_v56  ;;  %v9858_v4 = vunpack.c.l.b16 %v15209_v19  ;;  %v9859_v20 = vunpack.c.l.b16 %v15210_v44  ;;  %v9985_v63 = vrot.slane %v9857_v15, 7 }
 0x496   :  { %v6739_v27 = vrot.slane %v6588_v51, %v19814_v13  ;;  %v6746_v60 = vrot.slane %v6732_v11, %v19814_v13  ;;  %v6458_v47 = vmul.f32 %v19823_v57, %v19800_v10  ;;  %v6456_v32 = vmul.f32 %v16479_v17, %v19800_v10 }
 0x497   :  { %v9860_v26 = vunpack.c.l.b16 %v15211_v22  ;;  %v9986_v29 = vrot.slane %v9858_v4, 6  ;;  %v9989_v21 = vrot.slane %v9859_v20, 5  ;;  %v16480_v31 = vadd.f32 %v19827_v46, %v19532_v43  ;;  %v19850_v55 = vpop.f32.mrb[12].mxu0 }
 0x498   :  { %v6747_v25 = vcombine.high %v6739_v27, %v6739_v27  ;;  %v6748_v50 = vcombine.high %v6746_v60, %v6746_v60  ;;  %v14537_v59 = vrot.slane %v6739_v27, 9  ;;  %v14539_v9 = vrot.slane %v6746_v60, 9  ;;  %v19852_v51 = vpop.f32.mrb[13].mxu0 }
 0x499   :  { %v9988_v11 = vsel %vm9987_vm9, %v9986_v29, %v9985_v63  ;;  %v9992_v5 = vrot.slane %v9860_v26, 4  ;;  %v6529_v57 = vadd.f32 %v19805_v6, %v6458_v47  ;;  %v6527_v17 = vadd.f32 %v19805_v6, %v6456_v32  ;;  %v19857_v41 = vpop.f32.mrb[14].mxu0 }
 0x49a   :  { %v9991_v43 = vsel %vm9990_vm10, %v9989_v21, %v9988_v11  ;;  %v14538_v46 = vrot.slane %v6747_v25, 9  ;;  %v14540_v1 = vrot.slane %v6748_v50, 9  ;;  %v8831_v56 = vmax.f32 %v6739_v27, %v14537_v59  ;;  %v19860_v19 = vpop.f32.mrb[15].mxu0 }
 0x49b   :  { %v8833_v44 = vmax.f32 %v6746_v60, %v14539_v9  ;;  %v9994_v15 = vsel %vm9993_vm11, %v9992_v5, %v9991_v43  ;;  %v6593_v22 = vmax.f32 %v6529_v57, 0.0  ;;  %v6591_v4 = vmax.f32 %v6527_v17, 0.0  ;;  %v10269_v5 = vld [vmem:[#allocation3 + $0xc] sm:$0x1] }
 0x49c   :  { %v8832_v20 = vmax.f32 %v6747_v25, %v14538_v46  ;;  %v8834_v63 = vmax.f32 %v6748_v50, %v14540_v1  ;;  %v9087_v47 = vmax.f32 %v8831_v56, %v8839_v18  ;;  %v6459_v32 = vmul.f32 %v16480_v31, %v19800_v10 }
 0x49d   :  { %v9089_v26 = vmax.f32 %v8833_v44, %v8841_v61  ;;  %v6817_v29 = vcombine.high %v6593_v22, %v6593_v22  ;;  %v6824_v21 = vrot.slane %v6593_v22, %v19814_v13  ;;  %v6783_v11 = vcombine.high %v6591_v4, %v6591_v4 }
 0x49e   :  { %v9088_v27 = vmax.f32 %v8832_v20, %v8840_v7  ;;  %v9090_v59 = vmax.f32 %v8834_v63, %v8842_v0  ;;  %v15212_v24 = vpack.c.bf16 %v9087_v47, %v9087_v47  ;;  %v6790_v60 = vrot.slane %v6591_v4, %v19814_v13 }
 0x49f   :  { %v15214_v9 = vpack.c.bf16 %v9089_v26, %v9089_v26  ;;  %v6831_v57 = vrot.slane %v6817_v29, %v19814_v13  ;;  %v6832_v25 = vcombine.high %v6824_v21, %v6824_v21  ;;  %v14557_v50 = vrot.slane %v6824_v21, 9  ;;  %v19867_v18 = vpop.f32.mrb[16].mxu0 }
 0x4a0   :  { %v15213_v17 = vpack.c.bf16 %v9088_v27, %v9088_v27  ;;  %v9861_v31 = vunpack.c.l.b16 %v15212_v24  ;;  %v15336_v61 = vpack.c.bf16 %v9090_v59, %v9090_v59  ;;  %v6797_v43 = vrot.slane %v6783_v11, %v19814_v13  ;;  %v19870_v46 = vpop.f32.mrb[17].mxu0 }
 0x4a1   :  { %v9863_v7 = vunpack.c.l.b16 %v15214_v9  ;;  %v6833_v0 = vcombine.high %v6831_v57, %v6831_v57  ;;  %v14558_v1 = vrot.slane %v6832_v25, 9  ;;  %v14559_v56 = vrot.slane %v6831_v57, 9  ;;  %v19872_v44 = vpop.f32.mrb[18].mxu0 }
 0x4a2   :  { %v9862_v22 = vunpack.c.l.b16 %v15213_v17  ;;  %v9995_v4 = vrot.slane %v9861_v31, 3  ;;  %v10270_v20 = vsel %vm19725_vm8, %v15336_v61, %v10269_v5  ;;  %v8851_v63 = vmax.f32 %v6824_v21, %v14557_v50  ;;  %v19876_v47 = vpop.f32.mrb[19].mxu0 }
 0x4a3   :  { %v10001_v24 = vrot.slane %v9863_v7, 1  ;;  %10271 = vst [vmem:[#allocation3 + $0xc] sm:$0x1] %v10270_v20  ;;  %v14560_v26 = vrot.slane %v6833_v0, 9  ;;  %v8852_v29 = vmax.f32 %v6832_v25, %v14558_v1  ;;  %v8853_v11 = vmax.f32 %v6831_v57, %v14559_v56  ;;  %v10266_v57 = vld [vmem:[#allocation3 + $0x8] sm:$0xf] }
 0x4a4   :  { %v9997_v27 = vsel %vm9996_vm12, %v9995_v4, %v9994_v15  ;;  %v9998_v59 = vrot.slane %v9862_v22, 2  ;;  %v6798_v9 = vcombine.high %v6790_v60, %v6790_v60  ;;  %v6799_v39 = vcombine.high %v6797_v43, %v6797_v43 }
 0x4a5   :  { %v8854_v2 = vmax.f32 %v6833_v0, %v14560_v26  ;;  %v14549_v33 = vrot.slane %v6790_v60, 9  ;;  %v14551_v17 = vrot.slane %v6797_v43, 9  ;;  %v6530_v31 = vadd.f32 %v19805_v6, %v6459_v32 }
 0x4a6   :  { %v10000_v5 = vsel %vm9999_vm13, %v9998_v59, %v9997_v27  ;;  %v14550_v21 = vrot.slane %v6798_v9, 9  ;;  %v14552_v50 = vrot.slane %v6799_v39, 9  ;;  %v16481_v61 = vadd.f32 %v19830_v40, %v19534_v58 }
 0x4a7   :  { %v10003_v25 = vsel %vm10002_vm15, %v10001_v24, %v10000_v5  ;;  %v8843_v7 = vmax.f32 %v6790_v60, %v14549_v33  ;;  %v8845_v0 = vmax.f32 %v6797_v43, %v14551_v17  ;;  %v6594_v1 = vmax.f32 %v6530_v31, 0.0  ;;  %v19890_v32 = vpop.f32.mrb[20].mxu0 }
 0x4a8   :  { %v10199_v56 = vpack.c.b16 %v10003_v25, %v10003_v25  ;;  %v8844_v22 = vmax.f32 %v6798_v9, %v14550_v21  ;;  %v8846_v4 = vmax.f32 %v6799_v39, %v14552_v50  ;;  %v6457_v20 = vmul.f32 %v16481_v61, %v19800_v10  ;;  %v19893_v58 = vpop.f32.mrb[21].mxu0 }
 0x4a9   :  { %v9091_v40 = vmax.f32 %v8843_v7, %v8851_v63  ;;  %v9093_v24 = vmax.f32 %v8845_v0, %v8853_v11  ;;  %v6834_v26 = vcombine.high %v6594_v1, %v6594_v1  ;;  %v6841_v27 = vrot.slane %v6594_v1, %v19814_v13  ;;  %v19896_v59 = vpop.f32.mrb[22].mxu0 }
 0x4aa   :  { %v10267_v33 = vsel %vm19886_vm2, %v10199_v56, %v10266_v57  ;;  %v9092_v60 = vmax.f32 %v8844_v22, %v8852_v29  ;;  %v9094_v43 = vmax.f32 %v8846_v4, %v8854_v2  ;;  %v6528_v17 = vadd.f32 %v19805_v6, %v6457_v20  ;;  %v19901_v9 = vpop.f32.mrb[23].mxu0 }
 0x4ab   :  { %10268 = vst [vmem:[#allocation3 + $0x8] sm:$0xf] %v10267_v33  ;;  %v15216_v39 = vpack.c.bf16 %v9091_v40, %v9091_v40  ;;  %v15218_v31 = vpack.c.bf16 %v9093_v24, %v9093_v24  ;;  %v6848_v63 = vrot.slane %v6834_v26, %v19814_v13  ;;  %v6849_v11 = vcombine.high %v6841_v27, %v6841_v27 }
 0x4ac   :  { %v15217_v5 = vpack.c.bf16 %v9092_v60, %v9092_v60  ;;  %v15219_v21 = vpack.c.bf16 %v9094_v43, %v9094_v43  ;;  %v14561_v50 = vrot.slane %v6841_v27, 9  ;;  %v6592_v61 = vmax.f32 %v6528_v17, 0.0 }
 0x4ad   :  { %v9865_v25 = vunpack.c.l.b16 %v15216_v39  ;;  %v9867_v7 = vunpack.c.l.b16 %v15218_v31  ;;  %v6850_v0 = vcombine.high %v6848_v63, %v6848_v63  ;;  %v14562_v57 = vrot.slane %v6849_v11, 9 }
 0x4ae   :  { %v9866_v29 = vunpack.c.l.b16 %v15217_v5  ;;  %v9868_v2 = vunpack.c.l.b16 %v15219_v21  ;;  %v14563_v1 = vrot.slane %v6848_v63, 9  ;;  %v8855_v56 = vmax.f32 %v6841_v27, %v14561_v50  ;;  %v22116_v21 = vld [vmem:[#allocation69_spill] sm:$0xff] }
 0x4af   :  { %v10004_v22 = vrot.slane %v9865_v25, 7  ;;  %v10007_v4 = vrot.slane %v9867_v7, 5  ;;  %v14564_v20 = vrot.slane %v6850_v0, 9  ;;  %v8856_v40 = vmax.f32 %v6849_v11, %v14562_v57  ;;  %v19904_v24 = vpop.f32.mrb[24].mxu0 }
 0x4b0   :  { %v10005_v26 = vrot.slane %v9866_v29, 6  ;;  %v10009_v33 = vrot.slane %v9868_v2, 4  ;;  %v8857_v60 = vmax.f32 %v6848_v63, %v14563_v1  ;;  %v6800_v43 = vcombine.high %v6592_v61, %v6592_v61  ;;  %v19911_v27 = vpop.f32.mrb[25].mxu0  ;;  %v22117_v63 = vld [vmem:[#allocation70_spill] sm:$0xff] }
 0x4b1   :  { %v8858_v52 = vmax.f32 %v6850_v0, %v14564_v20  ;;  %v6807_v17 = vrot.slane %v6592_v61, %v19814_v13  ;;  %v16482_v39 = vadd.f32 %v19835_v42, %v19540_v28  ;;  %v16483_v31 = vadd.f32 %v19837_v14, %v19542_v35  ;;  %v19919_v7 = vpop.f32.mrb[26].mxu0 }
 0x4b2   :  { %v10006_v5 = vsel %vm9987_vm9, %v10005_v26, %v10004_v22  ;;  %v6814_v11 = vrot.slane %v6800_v43, %v19814_v13  ;;  %v16484_v50 = vadd.f32 %v19839_v37, %v22116_v21  ;;  %v16485_v25 = vadd.f32 %v19841_v62, %v22117_v63  ;;  %v19923_v14 = vpop.f32.mrb[27].mxu0 }
 0x4b3   :  { %v10008_v61 = vsel %vm9990_vm10, %v10007_v4, %v10006_v5  ;;  %v6815_v28 = vcombine.high %v6807_v17, %v6807_v17  ;;  %v14553_v42 = vrot.slane %v6807_v17, 9  ;;  %v6462_v35 = vmul.f32 %v16482_v39, %v19800_v10  ;;  %22118 = vst [vmem:[#allocation56_spill] sm:$0xff] %v19923_v14 }
 0x4b4   :  { %v6816_v0 = vcombine.high %v6814_v11, %v6814_v11  ;;  %v14555_v57 = vrot.slane %v6814_v11, 9  ;;  %v10010_v29 = vsel %vm9993_vm11, %v10009_v33, %v10008_v61  ;;  %v6460_v2 = vmul.f32 %v16483_v31, %v19800_v10 }
 0x4b5   :  { %v14554_v37 = vrot.slane %v6815_v28, 9  ;;  %v8847_v1 = vmax.f32 %v6807_v17, %v14553_v42  ;;  %v6533_v62 = vadd.f32 %v19805_v6, %v6462_v35  ;;  %v6463_v22 = vmul.f32 %v16484_v50, %v19800_v10 }
 0x4b6   :  { %v14556_v20 = vrot.slane %v6816_v0, 9  ;;  %v8849_v4 = vmax.f32 %v6814_v11, %v14555_v57  ;;  %v6531_v26 = vadd.f32 %v19805_v6, %v6460_v2  ;;  %v6461_v43 = vmul.f32 %v16485_v25, %v19800_v10 }
 0x4b7   :  { %v8848_v39 = vmax.f32 %v6815_v28, %v14554_v37  ;;  %v9095_v5 = vmax.f32 %v8847_v1, %v8855_v56  ;;  %v6597_v21 = vmax.f32 %v6533_v62, 0.0  ;;  %v6534_v63 = vadd.f32 %v19805_v6, %v6463_v22  ;;  %v10275_v37 = vld [vmem:[#allocation3 + $0x14] sm:$0x1] }
 0x4b8   :  { %v8850_v33 = vmax.f32 %v6816_v0, %v14556_v20  ;;  %v9097_v61 = vmax.f32 %v8849_v4, %v8857_v60  ;;  %v6595_v31 = vmax.f32 %v6531_v26, 0.0  ;;  %v6532_v17 = vadd.f32 %v19805_v6, %v6461_v43 }
 0x4b9   :  { %v9096_v42 = vmax.f32 %v8848_v39, %v8856_v40  ;;  %v15220_v35 = vpack.c.bf16 %v9095_v5, %v9095_v5  ;;  %v6885_v14 = vcombine.high %v6597_v21, %v6597_v21  ;;  %v6892_v50 = vrot.slane %v6597_v21, %v19814_v13 }
 0x4ba   :  { %v9098_v11 = vmax.f32 %v8850_v33, %v8858_v52  ;;  %v15222_v57 = vpack.c.bf16 %v9097_v61, %v9097_v61  ;;  %v6851_v2 = vcombine.high %v6595_v31, %v6595_v31  ;;  %v6858_v25 = vrot.slane %v6595_v31, %v19814_v13 }
 0x4bb   :  { %v15221_v28 = vpack.c.bf16 %v9096_v42, %v9096_v42  ;;  %v9869_v56 = vunpack.c.l.b16 %v15220_v35  ;;  %v6899_v1 = vrot.slane %v6885_v14, %v19814_v13  ;;  %v6900_v0 = vcombine.high %v6892_v50, %v6892_v50 }
 0x4bc   :  { %v9871_v60 = vunpack.c.l.b16 %v15222_v57  ;;  %v15337_v62 = vpack.c.bf16 %v9098_v11, %v9098_v11  ;;  %v14573_v22 = vrot.slane %v6892_v50, 9  ;;  %v6865_v40 = vrot.slane %v6851_v2, %v19814_v13 }
 0x4bd   :  { %v9870_v20 = vunpack.c.l.b16 %v15221_v28  ;;  %v10011_v4 = vrot.slane %v9869_v56, 3  ;;  %v6901_v26 = vcombine.high %v6899_v1, %v6899_v1  ;;  %v14574_v43 = vrot.slane %v6900_v0, 9 }
 0x4be   :  { %v10015_v52 = vrot.slane %v9871_v60, 1  ;;  %v10276_v39 = vsel %vm19725_vm8, %v15337_v62, %v10275_v37  ;;  %v14575_v5 = vrot.slane %v6899_v1, 9  ;;  %v8867_v21 = vmax.f32 %v6892_v50, %v14573_v22  ;;  %v10272_v37 = vld [vmem:[#allocation3 + $0x10] sm:$0xf] }
 0x4bf   :  { %v10012_v33 = vsel %vm9996_vm12, %v10011_v4, %v10010_v29  ;;  %v10013_v61 = vrot.slane %v9870_v20, 2  ;;  %10277 = vst [vmem:[#allocation3 + $0x14] sm:$0x1] %v10276_v39  ;;  %v14576_v14 = vrot.slane %v6901_v26, 9  ;;  %v8868_v31 = vmax.f32 %v6900_v0, %v14574_v43 }
 0x4c0   :  { %v8869_v42 = vmax.f32 %v6899_v1, %v14575_v5  ;;  %v6866_v35 = vcombine.high %v6858_v25, %v6858_v25  ;;  %v6867_v11 = vcombine.high %v6865_v40, %v6865_v40  ;;  %v14565_v57 = vrot.slane %v6858_v25, 9 }
 0x4c1   :  { %v10014_v2 = vsel %vm9999_vm13, %v10013_v61, %v10012_v33  ;;  %v8870_v28 = vmax.f32 %v6901_v26, %v14576_v14  ;;  %v14567_v56 = vrot.slane %v6865_v40, 9  ;;  %v6598_v60 = vmax.f32 %v6534_v63, 0.0 }
 0x4c2   :  { %v10016_v54 = vsel %vm10002_vm15, %v10015_v52, %v10014_v2  ;;  %v14566_v62 = vrot.slane %v6866_v35, 9  ;;  %v14568_v50 = vrot.slane %v6867_v11, 9  ;;  %v8859_v22 = vmax.f32 %v6858_v25, %v14565_v57 }
 0x4c3   :  { %v10201_v29 = vpack.c.b16 %v10016_v54, %v10016_v54  ;;  %v8861_v20 = vmax.f32 %v6865_v40, %v14567_v56  ;;  %v6902_v4 = vcombine.high %v6598_v60, %v6598_v60  ;;  %v6909_v0 = vrot.slane %v6598_v60, %v19814_v13 }
 0x4c4   :  { %v8860_v1 = vmax.f32 %v6866_v35, %v14566_v62  ;;  %v8862_v43 = vmax.f32 %v6867_v11, %v14568_v50  ;;  %v9099_v39 = vmax.f32 %v8859_v22, %v8867_v21  ;;  %v6596_v5 = vmax.f32 %v6532_v17, 0.0 }
 0x4c5   :  { %v10273_v26 = vsel %vm19886_vm2, %v10201_v29, %v10272_v37  ;;  %v9101_v33 = vmax.f32 %v8861_v20, %v8869_v42  ;;  %v6916_v63 = vrot.slane %v6902_v4, %v19814_v13  ;;  %v6917_v52 = vcombine.high %v6909_v0, %v6909_v0 }
 0x4c6   :  { %10274 = vst [vmem:[#allocation3 + $0x10] sm:$0xf] %v10273_v26  ;;  %v9100_v61 = vmax.f32 %v8860_v1, %v8868_v31  ;;  %v9102_v14 = vmax.f32 %v8862_v43, %v8870_v28  ;;  %v15224_v25 = vpack.c.bf16 %v9099_v39, %v9099_v39  ;;  %v14577_v54 = vrot.slane %v6909_v0, 9  ;;  %v22119_v1 = vld [vmem:[#allocation73_spill] sm:$0xff] }
 0x4c7   :  { %v15226_v40 = vpack.c.bf16 %v9101_v33, %v9101_v33  ;;  %v6918_v57 = vcombine.high %v6916_v63, %v6916_v63  ;;  %v14578_v2 = vrot.slane %v6917_v52, 9  ;;  %v14579_v56 = vrot.slane %v6916_v63, 9 }
 0x4c8   :  { %v15225_v35 = vpack.c.bf16 %v9100_v61, %v9100_v61  ;;  %v15227_v11 = vpack.c.bf16 %v9102_v14, %v9102_v14  ;;  %v9873_v21 = vunpack.c.l.b16 %v15224_v25  ;;  %v8871_v17 = vmax.f32 %v6909_v0, %v14577_v54  ;;  %v22120_v0 = vld [vmem:[#allocation76_spill] sm:$0xff]  ;;  %v22121_v25 = vld [vmem:[#allocation79_spill] sm:$0xff] }
 0x4c9   :  { %v9875_v60 = vunpack.c.l.b16 %v15226_v40  ;;  %v14580_v62 = vrot.slane %v6918_v57, 9  ;;  %v8872_v37 = vmax.f32 %v6917_v52, %v14578_v2  ;;  %v8873_v42 = vmax.f32 %v6916_v63, %v14579_v56 }
 0x4ca   :  { %v9874_v50 = vunpack.c.l.b16 %v15225_v35  ;;  %v9876_v22 = vunpack.c.l.b16 %v15227_v11  ;;  %v10017_v29 = vrot.slane %v9873_v21, 7  ;;  %v6868_v20 = vcombine.high %v6596_v5, %v6596_v5 }
 0x4cb   :  { %v10020_v31 = vrot.slane %v9875_v60, 5  ;;  %v8874_v28 = vmax.f32 %v6918_v57, %v14580_v62  ;;  %v6875_v4 = vrot.slane %v6596_v5, %v19814_v13  ;;  %v16486_v43 = vadd.f32 %v19850_v55, %v22119_v1 }
 0x4cc   :  { %v10018_v39 = vrot.slane %v9874_v50, 6  ;;  %v10022_v26 = vrot.slane %v9876_v22, 4  ;;  %v6882_v33 = vrot.slane %v6868_v20, %v19814_v13  ;;  %v16487_v61 = vadd.f32 %v19852_v51, %v22120_v0  ;;  %v19962_v20 = vpop.f32.mrb[28].mxu0 }
 0x4cd   :  { %v6883_v52 = vcombine.high %v6875_v4, %v6875_v4  ;;  %v14569_v63 = vrot.slane %v6875_v4, 9  ;;  %v6466_v14 = vmul.f32 %v16486_v43, %v19800_v10  ;;  %v16488_v54 = vadd.f32 %v19857_v41, %v22121_v25 }
 0x4ce   :  { %v10019_v40 = vsel %vm9987_vm9, %v10018_v39, %v10017_v29  ;;  %v6884_v5 = vcombine.high %v6882_v33, %v6882_v33  ;;  %v14571_v57 = vrot.slane %v6882_v33, 9  ;;  %v6464_v55 = vmul.f32 %v16487_v61, %v19800_v10  ;;  %v22122_v39 = vld [vmem:[#allocation71_spill] sm:$0xff] }
 0x4cf   :  { %v10021_v2 = vsel %vm9990_vm10, %v10020_v31, %v10019_v40  ;;  %v14570_v56 = vrot.slane %v6883_v52, 9  ;;  %v8863_v35 = vmax.f32 %v6875_v4, %v14569_v63  ;;  %v6537_v11 = vadd.f32 %v19805_v6, %v6466_v14  ;;  %v10281_v40 = vld [vmem:[#allocation3 + $0x1c] sm:$0x1] }
 0x4d0   :  { %v14572_v51 = vrot.slane %v6884_v5, 9  ;;  %v8865_v21 = vmax.f32 %v6882_v33, %v14571_v57  ;;  %v10023_v60 = vsel %vm9993_vm11, %v10022_v26, %v10021_v2  ;;  %v6535_v62 = vadd.f32 %v19805_v6, %v6464_v55 }
 0x4d1   :  { %v8864_v50 = vmax.f32 %v6883_v52, %v14570_v56  ;;  %v9103_v41 = vmax.f32 %v8863_v35, %v8871_v17  ;;  %v6601_v22 = vmax.f32 %v6537_v11, 0.0  ;;  %v6467_v29 = vmul.f32 %v16488_v54, %v19800_v10 }
 0x4d2   :  { %v8866_v1 = vmax.f32 %v6884_v5, %v14572_v51  ;;  %v9105_v43 = vmax.f32 %v8865_v21, %v8873_v42  ;;  %v6599_v31 = vmax.f32 %v6535_v62, 0.0  ;;  %v16489_v4 = vadd.f32 %v19860_v19, %v22122_v39 }
 0x4d3   :  { %v9104_v0 = vmax.f32 %v8864_v50, %v8872_v37  ;;  %v15228_v61 = vpack.c.bf16 %v9103_v41, %v9103_v41  ;;  %v6953_v33 = vcombine.high %v6601_v22, %v6601_v22  ;;  %v6960_v26 = vrot.slane %v6601_v22, %v19814_v13  ;;  %v19972_v50 = vpop.f32.mrb[29].mxu0 }
 0x4d4   :  { %v9106_v63 = vmax.f32 %v8866_v1, %v8874_v28  ;;  %v15230_v14 = vpack.c.bf16 %v9105_v43, %v9105_v43  ;;  %v6919_v52 = vcombine.high %v6599_v31, %v6599_v31  ;;  %v6926_v17 = vrot.slane %v6599_v31, %v19814_v13  ;;  %v19975_v31 = vpop.f32.mrb[30].mxu0 }
 0x4d5   :  { %v15229_v25 = vpack.c.bf16 %v9104_v0, %v9104_v0  ;;  %v9877_v54 = vunpack.c.l.b16 %v15228_v61  ;;  %v6967_v5 = vrot.slane %v6953_v33, %v19814_v13  ;;  %v6968_v42 = vcombine.high %v6960_v26, %v6960_v26 }
 0x4d6   :  { %v9879_v57 = vunpack.c.l.b16 %v15230_v14  ;;  %v15338_v55 = vpack.c.bf16 %v9106_v63, %v9106_v63  ;;  %v14589_v2 = vrot.slane %v6960_v26, 9  ;;  %v6933_v19 = vrot.slane %v6919_v52, %v19814_v13 }
 0x4d7   :  { %v9878_v37 = vunpack.c.l.b16 %v15229_v25  ;;  %v10024_v56 = vrot.slane %v9877_v54, 3  ;;  %v6969_v35 = vcombine.high %v6967_v5, %v6967_v5  ;;  %v14590_v11 = vrot.slane %v6968_v42, 9  ;;  %v10278_v54 = vld [vmem:[#allocation3 + $0x18] sm:$0xf] }
 0x4d8   :  { %v10028_v28 = vrot.slane %v9879_v57, 1  ;;  %v10282_v51 = vsel %vm19725_vm8, %v15338_v55, %v10281_v40  ;;  %v14591_v21 = vrot.slane %v6967_v5, 9  ;;  %v8883_v62 = vmax.f32 %v6960_v26, %v14589_v2  ;;  %v19980_v55 = vpop.f32.mrb[31].mxu0 }
 0x4d9   :  { %v10025_v41 = vsel %vm9996_vm12, %v10024_v56, %v10023_v60  ;;  %v10026_v22 = vrot.slane %v9878_v37, 2  ;;  %10283 = vst [vmem:[#allocation3 + $0x1c] sm:$0x1] %v10282_v51  ;;  %v14592_v1 = vrot.slane %v6969_v35, 9  ;;  %v8884_v43 = vmax.f32 %v6968_v42, %v14590_v11 }
 0x4da   :  { %v8885_v39 = vmax.f32 %v6967_v5, %v14591_v21  ;;  %v6934_v0 = vcombine.high %v6926_v17, %v6926_v17  ;;  %v6935_v61 = vcombine.high %v6933_v19, %v6933_v19  ;;  %v14581_v33 = vrot.slane %v6926_v17, 9 }
 0x4db   :  { %v10027_v63 = vsel %vm9999_vm13, %v10026_v22, %v10025_v41  ;;  %v8886_v14 = vmax.f32 %v6969_v35, %v14592_v1  ;;  %v14583_v52 = vrot.slane %v6933_v19, 9  ;;  %v6538_v26 = vadd.f32 %v19805_v6, %v6467_v29 }
 0x4dc   :  { %v10029_v25 = vsel %vm10002_vm15, %v10028_v28, %v10027_v63  ;;  %v14582_v60 = vrot.slane %v6934_v0, 9  ;;  %v14584_v40 = vrot.slane %v6935_v61, 9  ;;  %v8875_v57 = vmax.f32 %v6926_v17, %v14581_v33 }
 0x4dd   :  { %v10203_v42 = vpack.c.b16 %v10029_v25, %v10029_v25  ;;  %v8877_v2 = vmax.f32 %v6933_v19, %v14583_v52  ;;  %v6602_v5 = vmax.f32 %v6538_v26, 0.0  ;;  %v6465_v37 = vmul.f32 %v16489_v4, %v19800_v10 }
 0x4de   :  { %v8876_v56 = vmax.f32 %v6934_v0, %v14582_v60  ;;  %v8878_v11 = vmax.f32 %v6935_v61, %v14584_v40  ;;  %v9107_v51 = vmax.f32 %v8875_v57, %v8883_v62  ;;  %v16490_v35 = vadd.f32 %v19867_v18, %v19628_v30 }
 0x4df   :  { %v10279_v29 = vsel %vm19886_vm2, %v10203_v42, %v10278_v54  ;;  %v9109_v28 = vmax.f32 %v8877_v2, %v8885_v39  ;;  %v6970_v21 = vcombine.high %v6602_v5, %v6602_v5  ;;  %v6977_v17 = vrot.slane %v6602_v5, %v19814_v13  ;;  %v19990_v54 = vpop.f32.mrb[32].mxu0 }
 0x4e0   :  { %10280 = vst [vmem:[#allocation3 + $0x18] sm:$0xf] %v10279_v29  ;;  %v9108_v41 = vmax.f32 %v8876_v56, %v8884_v43  ;;  %v9110_v22 = vmax.f32 %v8878_v11, %v8886_v14  ;;  %v15232_v19 = vpack.c.bf16 %v9107_v51, %v9107_v51  ;;  %v6536_v1 = vadd.f32 %v19805_v6, %v6465_v37  ;;  %v19992_v57 = vpop.f32.mrb[33].mxu0 }
 0x4e1   :  { %v15234_v4 = vpack.c.bf16 %v9109_v28, %v9109_v28  ;;  %v6984_v0 = vrot.slane %v6970_v21, %v19814_v13  ;;  %v6985_v62 = vcombine.high %v6977_v17, %v6977_v17  ;;  %v14593_v61 = vrot.slane %v6977_v17, 9 }
 0x4e2   :  { %v15233_v33 = vpack.c.bf16 %v9108_v41, %v9108_v41  ;;  %v15235_v30 = vpack.c.bf16 %v9110_v22, %v9110_v22  ;;  %v9881_v18 = vunpack.c.l.b16 %v15232_v19  ;;  %v6600_v63 = vmax.f32 %v6536_v1, 0.0 }
 0x4e3   :  { %v9883_v52 = vunpack.c.l.b16 %v15234_v4  ;;  %v6986_v39 = vcombine.high %v6984_v0, %v6984_v0  ;;  %v14594_v26 = vrot.slane %v6985_v62, 9  ;;  %v14595_v25 = vrot.slane %v6984_v0, 9 }
 0x4e4   :  { %v9882_v43 = vunpack.c.l.b16 %v15233_v33  ;;  %v9884_v14 = vunpack.c.l.b16 %v15235_v30  ;;  %v10030_v60 = vrot.slane %v9881_v18, 7  ;;  %v8887_v40 = vmax.f32 %v6977_v17, %v14593_v61 }
 0x4e5   :  { %v10033_v42 = vrot.slane %v9883_v52, 5  ;;  %v14596_v2 = vrot.slane %v6986_v39, 9  ;;  %v8888_v5 = vmax.f32 %v6985_v62, %v14594_v26  ;;  %v8889_v37 = vmax.f32 %v6984_v0, %v14595_v25 }
 0x4e6   :  { %v10031_v56 = vrot.slane %v9882_v43, 6  ;;  %v10035_v11 = vrot.slane %v9884_v14, 4  ;;  %v6936_v51 = vcombine.high %v6600_v63, %v6600_v63  ;;  %v6943_v29 = vrot.slane %v6600_v63, %v19814_v13 }
 0x4e7   :  { %v8890_v28 = vmax.f32 %v6986_v39, %v14596_v2  ;;  %v6470_v21 = vmul.f32 %v16490_v35, %v19800_v10  ;;  %v16491_v41 = vadd.f32 %v19870_v46, %v19630_v3  ;;  %v16492_v17 = vadd.f32 %v19872_v44, %v19632_v48 }
 0x4e8   :  { %v10032_v22 = vsel %vm9987_vm9, %v10031_v56, %v10030_v60  ;;  %v6950_v19 = vrot.slane %v6936_v51, %v19814_v13  ;;  %v6951_v1 = vcombine.high %v6943_v29, %v6943_v29  ;;  %v14585_v4 = vrot.slane %v6943_v29, 9 }
 0x4e9   :  { %v10034_v0 = vsel %vm9990_vm10, %v10033_v42, %v10032_v22  ;;  %v6541_v62 = vadd.f32 %v19805_v6, %v6470_v21  ;;  %v6468_v61 = vmul.f32 %v16491_v41, %v19800_v10  ;;  %v6471_v35 = vmul.f32 %v16492_v17, %v19800_v10 }
 0x4ea   :  { %v6952_v33 = vcombine.high %v6950_v19, %v6950_v19  ;;  %v14586_v30 = vrot.slane %v6951_v1, 9  ;;  %v14587_v3 = vrot.slane %v6950_v19, 9  ;;  %v8879_v46 = vmax.f32 %v6943_v29, %v14585_v4 }
 0x4eb   :  { %v10036_v48 = vsel %vm9993_vm11, %v10035_v11, %v10034_v0  ;;  %v6605_v44 = vmax.f32 %v6541_v62, 0.0  ;;  %v6539_v18 = vadd.f32 %v19805_v6, %v6468_v61  ;;  %v6542_v63 = vadd.f32 %v19805_v6, %v6471_v35 }
 0x4ec   :  { %v14588_v52 = vrot.slane %v6952_v33, 9  ;;  %v8880_v39 = vmax.f32 %v6951_v1, %v14586_v30  ;;  %v8881_v26 = vmax.f32 %v6950_v19, %v14587_v3  ;;  %v9111_v25 = vmax.f32 %v8879_v46, %v8887_v40  ;;  %v10287_v19 = vld [vmem:[#allocation3 + $0x24] sm:$0x1] }
 0x4ed   :  { %v7021_v43 = vcombine.high %v6605_v44, %v6605_v44  ;;  %v7028_v14 = vrot.slane %v6605_v44, %v19814_v13  ;;  %v6603_v60 = vmax.f32 %v6539_v18, 0.0  ;;  %v6606_v10 = vmax.f32 %v6542_v63, 0.0 }
 0x4ee   :  { %v8882_v42 = vmax.f32 %v6952_v33, %v14588_v52  ;;  %v9112_v2 = vmax.f32 %v8880_v39, %v8888_v5  ;;  %v9113_v56 = vmax.f32 %v8881_v26, %v8889_v37  ;;  %v15236_v51 = vpack.c.bf16 %v9111_v25, %v9111_v25 }
 0x4ef   :  { %v7035_v11 = vrot.slane %v7021_v43, %v19814_v13  ;;  %v7036_v29 = vcombine.high %v7028_v14, %v7028_v14  ;;  %v14605_v21 = vrot.slane %v7028_v14, 9  ;;  %v6987_v41 = vcombine.high %v6603_v60, %v6603_v60  ;;  %v20016_v43 = vpop.f32.mrb[34].mxu0 }
 0x4f0   :  { %v9114_v17 = vmax.f32 %v8882_v42, %v8890_v28  ;;  %v15237_v6 = vpack.c.bf16 %v9112_v2, %v9112_v2  ;;  %v15238_v22 = vpack.c.bf16 %v9113_v56, %v9113_v56  ;;  %v9885_v1 = vunpack.c.l.b16 %v15236_v51  ;;  %v20022_v2 = vpop.f32.mrb[35].mxu0  ;;  %v10284_v51 = vld [vmem:[#allocation3 + $0x20] sm:$0xf] }
 0x4f1   :  { %v7037_v40 = vcombine.high %v7035_v11, %v7035_v11  ;;  %v14606_v4 = vrot.slane %v7036_v29, 9  ;;  %v14607_v0 = vrot.slane %v7035_v11, 9  ;;  %v8899_v62 = vmax.f32 %v7028_v14, %v14605_v21 }
 0x4f2   :  { %v9886_v61 = vunpack.c.l.b16 %v15237_v6  ;;  %v9887_v35 = vunpack.c.l.b16 %v15238_v22  ;;  %v10037_v33 = vrot.slane %v9885_v1, 3  ;;  %v15339_v5 = vpack.c.bf16 %v9114_v17, %v9114_v17 }
 0x4f3   :  { %v14608_v37 = vrot.slane %v7037_v40, 9  ;;  %v8900_v30 = vmax.f32 %v7036_v29, %v14606_v4  ;;  %v8901_v3 = vmax.f32 %v7035_v11, %v14607_v0  ;;  %v6994_v46 = vrot.slane %v6603_v60, %v19814_v13 }
 0x4f4   :  { %v10038_v44 = vsel %vm9996_vm12, %v10037_v33, %v10036_v48  ;;  %v10039_v28 = vrot.slane %v9886_v61, 2  ;;  %v10041_v18 = vrot.slane %v9887_v35, 1  ;;  %v10288_v63 = vsel %vm19725_vm8, %v15339_v5, %v10287_v19 }
 0x4f5   :  { %10289 = vst [vmem:[#allocation3 + $0x24] sm:$0x1] %v10288_v63  ;;  %v8902_v52 = vmax.f32 %v7037_v40, %v14608_v37  ;;  %v7001_v39 = vrot.slane %v6987_v41, %v19814_v13  ;;  %v7002_v26 = vcombine.high %v6994_v46, %v6994_v46  ;;  %v14597_v25 = vrot.slane %v6994_v46, 9  ;;  %v9239_v37 = vld [vmem:[#allocation3 + $0x28] sm:$0x1] }
 0x4f6   :  { %v10040_v14 = vsel %vm9999_vm13, %v10039_v28, %v10038_v44  ;;  %v7038_v42 = vcombine.high %v6606_v10, %v6606_v10  ;;  %v7045_v60 = vrot.slane %v6606_v10, %v19814_v13  ;;  %v16493_v48 = vadd.f32 %v19876_v47, %v19634_v36  ;;  %v9300_v63 = vld [vmem:[#allocation3 + $0x2c] sm:$0x1] }
 0x4f7   :  { %v10042_v56 = vsel %vm10002_vm15, %v10041_v18, %v10040_v14  ;;  %v7003_v11 = vcombine.high %v7001_v39, %v7001_v39  ;;  %v14598_v29 = vrot.slane %v7002_v26, 9  ;;  %v14599_v21 = vrot.slane %v7001_v39, 9 }
 0x4f8   :  { %v10205_v41 = vpack.c.b16 %v10042_v56, %v10042_v56  ;;  %v8891_v17 = vmax.f32 %v6994_v46, %v14597_v25  ;;  %v7052_v6 = vrot.slane %v7038_v42, %v19814_v13  ;;  %v7053_v22 = vcombine.high %v7045_v60, %v7045_v60  ;;  %v20036_v56 = vld [vmem:[#allocation12] ss:$0 sm:$0xff] }
 0x4f9   :  { %v14600_v1 = vrot.slane %v7003_v11, 9  ;;  %v8892_v19 = vmax.f32 %v7002_v26, %v14598_v29  ;;  %v8893_v40 = vmax.f32 %v7001_v39, %v14599_v21  ;;  %v14609_v10 = vrot.slane %v7045_v60, 9  ;;  %v20043_v21 = vld [vmem:[#allocation13] ss:$0 sm:$0xff] }
 0x4fa   :  { %v10285_v36 = vsel %vm19886_vm2, %v10205_v41, %v10284_v51  ;;  %v9115_v47 = vmax.f32 %v8891_v17, %v8899_v62  ;;  %v7054_v4 = vcombine.high %v7052_v6, %v7052_v6  ;;  %v14610_v0 = vrot.slane %v7053_v22, 9 }
 0x4fb   :  { %10286 = vst [vmem:[#allocation3 + $0x20] sm:$0xf] %v10285_v36  ;;  %v8894_v61 = vmax.f32 %v7003_v11, %v14600_v1  ;;  %v9116_v35 = vmax.f32 %v8892_v19, %v8900_v30  ;;  %v9117_v33 = vmax.f32 %v8893_v40, %v8901_v3  ;;  %v14611_v5 = vrot.slane %v7052_v6, 9 }
 0x4fc   :  { %v15240_v46 = vpack.c.bf16 %v9115_v47, %v9115_v47  ;;  %v14612_v44 = vrot.slane %v7054_v4, 9  ;;  %v20028_v28 = vmax.f32 %v7045_v60, %v14609_v10  ;;  %v20030_v18 = vmax.f32 %v7053_v22, %v14610_v0 }
 0x4fd   :  { %v9118_v39 = vmax.f32 %v8894_v61, %v8902_v52  ;;  %v15241_v26 = vpack.c.bf16 %v9116_v35, %v9116_v35  ;;  %v15242_v25 = vpack.c.bf16 %v9117_v33, %v9117_v33  ;;  %v20032_v14 = vmax.f32 %v7052_v6, %v14611_v5  ;;  %v9242_v6 = vld [vmem:[#allocation3 + $0x30] sm:$0x1]  ;;  %v9303_v35 = vld [vmem:[#allocation3 + $0x34] sm:$0x1] }
 0x4fe   :  { %v9889_v62 = vunpack.c.l.b16 %v15240_v46  ;;  %v20034_v42 = vmax.f32 %v7054_v4, %v14612_v44  ;;  %v6469_v30 = vmul.f32 %v20036_v56, %v16493_v48  ;;  %v9240_v3 = vsel %vm19725_vm8, 0, %v9239_v37 }
 0x4ff   :  { %v15243_v60 = vpack.c.bf16 %v9118_v39, %v9118_v39  ;;  %v9890_v51 = vunpack.c.l.b16 %v15241_v26  ;;  %v9891_v11 = vunpack.c.l.b16 %v15242_v25  ;;  %9241 = vst [vmem:[#allocation3 + $0x28] sm:$0x1] %v9240_v3  ;;  %v9301_v52 = vsel %vm19697_vm5, 0, %v9300_v63 }
 0x500   :  { %v10043_v29 = vrot.slane %v9889_v62, 7  ;;  %v6540_v41 = vadd.f32 %v20043_v21, %v6469_v30  ;;  %9302 = vst [vmem:[#allocation3 + $0x2c] sm:$0x1] %v9301_v52  ;;  %v16494_v17 = vadd.f32 %v19890_v32, %v19640_v49  ;;  %v16495_v48 = vadd.f32 %v19893_v58, %v19642_v12 }
 0x501   :  { %v9892_v22 = vunpack.c.l.b16 %v15243_v60  ;;  %v10044_v1 = vrot.slane %v9890_v51, 6  ;;  %v10046_v19 = vrot.slane %v9891_v11, 5  ;;  %v16496_v40 = vadd.f32 %v19896_v59, %v19644_v23 }
 0x502   :  { %v6604_v10 = vmax.f32 %v6540_v41, 0.0  ;;  %v6474_v36 = vmul.f32 %v20036_v56, %v16494_v17  ;;  %v6472_v47 = vmul.f32 %v20036_v56, %v16495_v48  ;;  %v16497_v4 = vadd.f32 %v19901_v9, %v19646_v16 }
 0x503   :  { %v10045_v49 = vsel %vm9987_vm9, %v10044_v1, %v10043_v29  ;;  %v10048_v32 = vrot.slane %v9892_v22, 4  ;;  %v6475_v12 = vmul.f32 %v20036_v56, %v16496_v40  ;;  %v9243_v58 = vsel %vm19725_vm8, 0, %v9242_v6 }
 0x504   :  { %v10047_v0 = vsel %vm9990_vm10, %v10046_v19, %v10045_v49  ;;  %v7004_v61 = vcombine.high %v6604_v10, %v6604_v10  ;;  %v7011_v23 = vrot.slane %v6604_v10, %v19814_v13  ;;  %v6545_v59 = vadd.f32 %v20043_v21, %v6474_v36  ;;  %9244 = vst [vmem:[#allocation3 + $0x30] sm:$0x1] %v9243_v58 }
 0x505   :  { %v10049_v33 = vsel %vm9993_vm11, %v10048_v32, %v10047_v0  ;;  %v6543_v16 = vadd.f32 %v20043_v21, %v6472_v47  ;;  %v6546_v9 = vadd.f32 %v20043_v21, %v6475_v12  ;;  %v6473_v5 = vmul.f32 %v20036_v56, %v16497_v4 }
 0x506   :  { %v7018_v37 = vrot.slane %v7004_v61, %v19814_v13  ;;  %v7019_v46 = vcombine.high %v7011_v23, %v7011_v23  ;;  %v14601_v44 = vrot.slane %v7011_v23, 9  ;;  %v6609_v63 = vmax.f32 %v6545_v59, 0.0 }
 0x507   :  { %v6607_v39 = vmax.f32 %v6543_v16, 0.0  ;;  %v20068_v26 = vmax.f32 %v6546_v9, 0.0  ;;  %v6544_v25 = vadd.f32 %v20043_v21, %v6473_v5  ;;  %v9304_v62 = vsel %vm19697_vm5, 0, %v9303_v35  ;;  %v10293_v35 = vld [vmem:[#allocation3 + $0x2c] sm:$0x1] }
 0x508   :  { %v7020_v30 = vcombine.high %v7018_v37, %v7018_v37  ;;  %v14602_v3 = vrot.slane %v7019_v46, 9  ;;  %v14603_v60 = vrot.slane %v7018_v37, 9  ;;  %v8895_v51 = vmax.f32 %v7011_v23, %v14601_v44  ;;  %9305 = vst [vmem:[#allocation3 + $0x34] sm:$0x1] %v9304_v62 }
 0x509   :  { %v7089_v11 = vcombine.high %v6609_v63, %v6609_v63  ;;  %v7096_v52 = vrot.slane %v6609_v63, %v19814_v13  ;;  %v7055_v29 = vcombine.high %v6607_v39, %v6607_v39  ;;  %v7062_v41 = vrot.slane %v6607_v39, %v19814_v13 }
 0x50a   :  { %v14604_v17 = vrot.slane %v7020_v30, 9  ;;  %v8896_v48 = vmax.f32 %v7019_v46, %v14602_v3  ;;  %v8897_v6 = vmax.f32 %v7018_v37, %v14603_v60  ;;  %v9119_v22 = vmax.f32 %v8895_v51, %v20028_v28  ;;  %v20081_v46 = vpop.f32.mrb[36].mxu0 }
 0x50b   :  { %v7103_v1 = vrot.slane %v7089_v11, %v19814_v13  ;;  %v7104_v19 = vcombine.high %v7096_v52, %v7096_v52  ;;  %v14621_v40 = vrot.slane %v7096_v52, 9  ;;  %v7069_v10 = vrot.slane %v7055_v29, %v19814_v13  ;;  %v20083_v60 = vpop.f32.mrb[37].mxu0 }
 0x50c   :  { %v8898_v36 = vmax.f32 %v7020_v30, %v14604_v17  ;;  %v9120_v47 = vmax.f32 %v8896_v48, %v20030_v18  ;;  %v9121_v4 = vmax.f32 %v8897_v6, %v20032_v14  ;;  %v15244_v49 = vpack.c.bf16 %v9119_v22, %v9119_v22 }
 0x50d   :  { %v7105_v32 = vcombine.high %v7103_v1, %v7103_v1  ;;  %v14622_v12 = vrot.slane %v7104_v19, 9  ;;  %v14623_v58 = vrot.slane %v7103_v1, 9  ;;  %v8915_v0 = vmax.f32 %v7096_v52, %v14621_v40 }
 0x50e   :  { %v9122_v61 = vmax.f32 %v8898_v36, %v20034_v42  ;;  %v15245_v23 = vpack.c.bf16 %v9120_v47, %v9120_v47  ;;  %v15246_v28 = vpack.c.bf16 %v9121_v4, %v9121_v4  ;;  %v9893_v59 = vunpack.c.l.b16 %v15244_v49  ;;  %v10290_v47 = vld [vmem:[#allocation3 + $0x28] sm:$0xf] }
 0x50f   :  { %v14624_v16 = vrot.slane %v7105_v32, 9  ;;  %v8916_v9 = vmax.f32 %v7104_v19, %v14622_v12  ;;  %v8917_v5 = vmax.f32 %v7103_v1, %v14623_v58  ;;  %v7070_v37 = vcombine.high %v7062_v41, %v7062_v41 }
 0x510   :  { %v9894_v18 = vunpack.c.l.b16 %v15245_v23  ;;  %v9895_v44 = vunpack.c.l.b16 %v15246_v28  ;;  %v10050_v14 = vrot.slane %v9893_v59, 3  ;;  %v15340_v63 = vpack.c.bf16 %v9122_v61, %v9122_v61 }
 0x511   :  { %v8918_v39 = vmax.f32 %v7105_v32, %v14624_v16  ;;  %v7071_v62 = vcombine.high %v7069_v10, %v7069_v10  ;;  %v14613_v30 = vrot.slane %v7062_v41, 9  ;;  %v14614_v3 = vrot.slane %v7070_v37, 9 }
 0x512   :  { %v10051_v42 = vsel %vm9996_vm12, %v10050_v14, %v10049_v33  ;;  %v10052_v51 = vrot.slane %v9894_v18, 2  ;;  %v10054_v11 = vrot.slane %v9895_v44, 1  ;;  %v10294_v52 = vsel %vm19725_vm8, %v15340_v63, %v10293_v35  ;;  %v20093_v33 = vpop.f32.mrb[38].mxu0 }
 0x513   :  { %10295 = vst [vmem:[#allocation3 + $0x2c] sm:$0x1] %v10294_v52  ;;  %v14615_v29 = vrot.slane %v7069_v10, 9  ;;  %v14616_v17 = vrot.slane %v7071_v62, 9  ;;  %v8907_v48 = vmax.f32 %v7062_v41, %v14613_v30  ;;  %v8908_v6 = vmax.f32 %v7070_v37, %v14614_v3 }
 0x514   :  { %v10053_v22 = vsel %vm9999_vm13, %v10052_v51, %v10051_v42  ;;  %v7106_v1 = vcombine.high %v20068_v26, %v20068_v26  ;;  %v7113_v19 = vrot.slane %v20068_v26, %v19814_v13  ;;  %v6608_v40 = vmax.f32 %v6544_v25, 0.0  ;;  %v20099_v42 = vpop.f32.mrb[39].mxu0 }
 0x515   :  { %v10055_v36 = vsel %vm10002_vm15, %v10054_v11, %v10053_v22  ;;  %v8909_v4 = vmax.f32 %v7069_v10, %v14615_v29  ;;  %v8910_v49 = vmax.f32 %v7071_v62, %v14616_v17  ;;  %v9123_v32 = vmax.f32 %v8907_v48, %v8915_v0  ;;  %v9224_v62 = vld [vmem:[#allocation3] sm:$0x1]  ;;  %v9285_v17 = vld [vmem:[#allocation3 + $0x4] sm:$0x1] }
 0x516   :  { %v10207_v12 = vpack.c.b16 %v10055_v36, %v10055_v36  ;;  %v9124_v41 = vmax.f32 %v8908_v6, %v8916_v9  ;;  %v7120_v58 = vrot.slane %v7106_v1, %v19814_v13  ;;  %v7121_v61 = vcombine.high %v7113_v19, %v7113_v19 }
 0x517   :  { %v9125_v23 = vmax.f32 %v8909_v4, %v8917_v5  ;;  %v9126_v28 = vmax.f32 %v8910_v49, %v8918_v39  ;;  %v15248_v59 = vpack.c.bf16 %v9123_v32, %v9123_v32  ;;  %v14625_v35 = vrot.slane %v7113_v19, 9  ;;  %v20108_v49 = vld [vmem:[#allocation3 + $0x8] sm:$0xf] }
 0x518   :  { %v10291_v26 = vsel %vm19886_vm2, %v10207_v12, %v10290_v47  ;;  %v15249_v25 = vpack.c.bf16 %v9124_v41, %v9124_v41  ;;  %v7122_v16 = vcombine.high %v7120_v58, %v7120_v58  ;;  %v14626_v37 = vrot.slane %v7121_v61, 9 }
 0x519   :  { %10292 = vst [vmem:[#allocation3 + $0x28] sm:$0xf] %v10291_v26  ;;  %v15250_v18 = vpack.c.bf16 %v9125_v23, %v9125_v23  ;;  %v15251_v10 = vpack.c.bf16 %v9126_v28, %v9126_v28  ;;  %v9897_v44 = vunpack.c.l.b16 %v15248_v59  ;;  %v14627_v0 = vrot.slane %v7120_v58, 9  ;;  %v20114_v23 = vld [vmem:[#allocation3 + $0xc] sm:$0x1] }
 0x51a   :  { %v9898_v14 = vunpack.c.l.b16 %v15249_v25  ;;  %v14628_v9 = vrot.slane %v7122_v16, 9  ;;  %v8919_v63 = vmax.f32 %v7113_v19, %v14625_v35  ;;  %v8920_v3 = vmax.f32 %v7121_v61, %v14626_v37 }
 0x51b   :  { %v9899_v30 = vunpack.c.l.b16 %v15250_v18  ;;  %v9900_v5 = vunpack.c.l.b16 %v15251_v10  ;;  %v10056_v39 = vrot.slane %v9897_v44, 7  ;;  %v8921_v11 = vmax.f32 %v7120_v58, %v14627_v0 }
 0x51c   :  { %v10057_v51 = vrot.slane %v9898_v14, 6  ;;  %v7072_v52 = vcombine.high %v6608_v40, %v6608_v40  ;;  %v7079_v29 = vrot.slane %v6608_v40, %v19814_v13  ;;  %v16498_v22 = vadd.f32 %v19904_v24, %v19652_v34 }
 0x51d   :  { %v10059_v48 = vrot.slane %v9899_v30, 5  ;;  %v10061_v6 = vrot.slane %v9900_v5, 4  ;;  %v9225_v1 = vsel %vm19725_vm8, 0, %v9224_v62  ;;  %v8922_v32 = vmax.f32 %v7122_v16, %v14628_v9 }
 0x51e   :  { %v10058_v19 = vsel %vm9987_vm9, %v10057_v51, %v10056_v39  ;;  %v7086_v36 = vrot.slane %v7072_v52, %v19814_v13  ;;  %v7087_v47 = vcombine.high %v7079_v29, %v7079_v29  ;;  %v14617_v4 = vrot.slane %v7079_v29, 9  ;;  %9226 = vst [vmem:[#allocation3] sm:$0x1] %v9225_v1 }
 0x51f   :  { %v10060_v40 = vsel %vm9990_vm10, %v10059_v48, %v10058_v19  ;;  %v6478_v12 = vmul.f32 %v20036_v56, %v16498_v22  ;;  %v9286_v34 = vsel %vm19697_vm5, 0, %v9285_v17  ;;  %v14950_v35 = vrot.slane %v20108_v49, 9 }
 0x520   :  { %v7088_v24 = vcombine.high %v7086_v36, %v7086_v36  ;;  %v14618_v41 = vrot.slane %v7087_v47, 9  ;;  %v14619_v58 = vrot.slane %v7086_v36, 9  ;;  %v8911_v61 = vmax.f32 %v7079_v29, %v14617_v4  ;;  %9287 = vst [vmem:[#allocation3 + $0x4] sm:$0x1] %v9286_v34 }
 0x521   :  { %v10062_v28 = vsel %vm9993_vm11, %v10061_v6, %v10060_v40  ;;  %v6549_v59 = vadd.f32 %v20043_v21, %v6478_v12  ;;  %v16499_v26 = vadd.f32 %v19911_v27, %v19654_v38  ;;  %v10762_v44 = vrot.slane %v20114_v23, 5 }
 0x522   :  { %v14620_v25 = vrot.slane %v7088_v24, 9  ;;  %v8912_v16 = vmax.f32 %v7087_v47, %v14618_v41  ;;  %v8913_v37 = vmax.f32 %v7086_v36, %v14619_v58  ;;  %v9127_v18 = vmax.f32 %v8911_v61, %v8919_v63 }
 0x523   :  { %v6613_v10 = vmax.f32 %v6549_v59, 0.0  ;;  %v6476_v0 = vmul.f32 %v20036_v56, %v16499_v26  ;;  %v16500_v14 = vadd.f32 %v19919_v7, %v19656_v53  ;;  %v20128_v27 = vsel %vm18783_vm3, %v14950_v35, %v10762_v44  ;;  %v10299_v53 = vld [vmem:[#allocation3 + $0x34] sm:$0x1]  ;;  %v9245_v59 = vld [vmem:[#allocation3 + $0x38] sm:$0x1] }
 0x524   :  { %v8914_v9 = vmax.f32 %v7088_v24, %v14620_v25  ;;  %v9128_v62 = vmax.f32 %v8912_v16, %v8920_v3  ;;  %v9129_v30 = vmax.f32 %v8913_v37, %v8921_v11  ;;  %v15252_v5 = vpack.c.bf16 %v9127_v18, %v9127_v18  ;;  %v22124_v44 = vld [vmem:[#allocation80_spill] sm:$0xff] }
 0x525   :  { %v7157_v39 = vcombine.high %v6613_v10, %v6613_v10  ;;  %v7164_v51 = vrot.slane %v6613_v10, %v19814_v13  ;;  %v6547_v63 = vadd.f32 %v20043_v21, %v6476_v0  ;;  %v20131_v6 = vld [vmem:[#allocation3] sm:$0xf]  ;;  %v6479_v22 = vmul.f32 %v20036_v56, %v16500_v14  ;;  %v22125_v0 = vld [vmem:[#allocation56_spill] sm:$0xff]  ;;  %v9306_v14 = vld [vmem:[#allocation3 + $0x3c] sm:$0x1] }
 0x526   :  { %v9130_v52 = vmax.f32 %v8914_v9, %v8922_v32  ;;  %v15253_v29 = vpack.c.bf16 %v9128_v62, %v9128_v62  ;;  %v15254_v17 = vpack.c.bf16 %v9129_v30, %v9129_v30  ;;  %v9901_v48 = vunpack.c.l.b16 %v15252_v5  ;;  %v20146_v9 = vld [vmem:[#allocation3 + $0x10] sm:$0xf]  ;;  %v20148_v62 = vpop.f32.mrb[40].mxu0 }
 0x527   :  { %v7171_v7 = vrot.slane %v7157_v39, %v19814_v13  ;;  %v7172_v3 = vcombine.high %v7164_v51, %v7164_v51  ;;  %v14637_v11 = vrot.slane %v7164_v51, 9  ;;  %v20135_v4 = vld [vmem:[#allocation3 + $0x4] sm:$0x1]  ;;  %v14949_v34 = vrot.slane %v20131_v6, 9  ;;  %v10296_v5 = vld [vmem:[#allocation3 + $0x30] sm:$0xf] }
 0x528   :  { %v9902_v1 = vunpack.c.l.b16 %v15253_v29  ;;  %v9903_v19 = vunpack.c.l.b16 %v15254_v17  ;;  %v10063_v36 = vrot.slane %v9901_v48, 3  ;;  %v15341_v47 = vpack.c.bf16 %v9130_v52, %v9130_v52  ;;  %v20155_v52 = vpop.f32.mrb[41].mxu0 }
 0x529   :  { %v7173_v40 = vcombine.high %v7171_v7, %v7171_v7  ;;  %v14638_v32 = vrot.slane %v7172_v3, 9  ;;  %v14639_v12 = vrot.slane %v7171_v7, 9  ;;  %v8931_v61 = vmax.f32 %v7164_v51, %v14637_v11 }
 0x52a   :  { %v10064_v24 = vsel %vm9996_vm12, %v10063_v36, %v10062_v28  ;;  %v10065_v41 = vrot.slane %v9902_v1, 2  ;;  %v10300_v58 = vsel %vm19725_vm8, %v15341_v47, %v10299_v53  ;;  %v10067_v35 = vrot.slane %v9903_v19, 1 }
 0x52b   :  { %10301 = vst [vmem:[#allocation3 + $0x34] sm:$0x1] %v10300_v58  ;;  %v14640_v26 = vrot.slane %v7173_v40, 9  ;;  %v8932_v25 = vmax.f32 %v7172_v3, %v14638_v32  ;;  %v10758_v16 = vrot.slane %v20135_v4, 5  ;;  %v6611_v18 = vmax.f32 %v6547_v63, 0.0  ;;  %v20159_v3 = vpop.f32.mrb[42].mxu0 }
 0x52c   :  { %v10066_v37 = vsel %vm9999_vm13, %v10065_v41, %v10064_v24  ;;  %v6550_v10 = vadd.f32 %v20043_v21, %v6479_v22  ;;  %v16501_v28 = vadd.f32 %v22125_v0, %v22124_v44  ;;  %v8933_v39 = vmax.f32 %v7171_v7, %v14639_v12  ;;  %v20166_v19 = vpop.f32.mrb[43].mxu0 }
 0x52d   :  { %v10068_v30 = vsel %vm10002_vm15, %v10067_v35, %v10066_v37  ;;  %v10759_v51 = vsel %vm18783_vm3, %v14949_v34, %v10758_v16  ;;  %v9246_v63 = vsel %vm19725_vm8, 0, %v9245_v59  ;;  %v7123_v48 = vcombine.high %v6611_v18, %v6611_v18 }
 0x52e   :  { %v10209_v29 = vpack.c.b16 %v10068_v30, %v10068_v30  ;;  %v14965_v17 = vcombine.low %v10759_v51, %v20128_v27  ;;  %v7130_v53 = vrot.slane %v6611_v18, %v19814_v13  ;;  %9247 = vst [vmem:[#allocation3 + $0x38] sm:$0x1] %v9246_v63  ;;  %v6614_v11 = vmax.f32 %v6550_v10, 0.0 }
 0x52f   :  { %v6477_v7 = vmul.f32 %v20036_v56, %v16501_v28  ;;  %v9307_v22 = vsel %vm19697_vm5, 0, %v9306_v14  ;;  %v14973_v1 = vcombine.low %v20108_v49, %v20146_v9  ;;  %v7137_v47 = vrot.slane %v7123_v48, %v19814_v13 }
 0x530   :  { %v10297_v36 = vsel %vm19886_vm2, %v10209_v29, %v10296_v5  ;;  %10844 = vrot.lane.b32.xlu1 %v14965_v17, %s17500_s20  ;;  %v7138_v32 = vcombine.high %v7130_v53, %v7130_v53  ;;  %v14629_v12 = vrot.slane %v7130_v53, 9  ;;  %9308 = vst [vmem:[#allocation3 + $0x3c] sm:$0x1] %v9307_v22  ;;  %v8934_v34 = vmax.f32 %v7173_v40, %v14640_v26 }
 0x531   :  { %10298 = vst [vmem:[#allocation3 + $0x30] sm:$0xf] %v10297_v36  ;;  %v7174_v24 = vcombine.high %v6614_v11, %v6614_v11  ;;  %v7181_v41 = vrot.slane %v6614_v11, %v19814_v13  ;;  %v6548_v58 = vadd.f32 %v20043_v21, %v6477_v7  ;;  %v7139_v59 = vcombine.high %v7137_v47, %v7137_v47 }
 0x532   :  { %v14630_v35 = vrot.slane %v7138_v32, 9  ;;  %v14631_v16 = vrot.slane %v7137_v47, 9  ;;  %v8923_v37 = vmax.f32 %v7130_v53, %v14629_v12 }
 0x533   :  { %v7188_v18 = vrot.slane %v7174_v24, %v19814_v13  ;;  %v7189_v10 = vcombine.high %v7181_v41, %v7181_v41  ;;  %v14641_v44 = vrot.slane %v7181_v41, 9  ;;  %v6612_v0 = vmax.f32 %v6548_v58, 0.0 }
 0x534   :  { %v14632_v28 = vrot.slane %v7139_v59, 9  ;;  %v8924_v14 = vmax.f32 %v7138_v32, %v14630_v35  ;;  %v8925_v30 = vmax.f32 %v7137_v47, %v14631_v16  ;;  %v9131_v5 = vmax.f32 %v8923_v37, %v8931_v61  ;;  %10889 = vrot.lane.b32.xlu1 %v14973_v1, %s17512_s11 }
 0x535   :  { %v7190_v40 = vcombine.high %v7188_v18, %v7188_v18  ;;  %v14642_v26 = vrot.slane %v7189_v10, 9  ;;  %v14643_v51 = vrot.slane %v7188_v18, 9  ;;  %v8935_v63 = vmax.f32 %v7181_v41, %v14641_v44 }
 0x536   :  { %v8926_v29 = vmax.f32 %v7139_v59, %v14632_v28  ;;  %v9132_v17 = vmax.f32 %v8924_v14, %v8932_v25  ;;  %v9133_v48 = vmax.f32 %v8925_v30, %v8933_v39  ;;  %v15256_v53 = vpack.c.bf16 %v9131_v5, %v9131_v5 }
 0x537   :  { %v14644_v11 = vrot.slane %v7190_v40, 9  ;;  %v8936_v7 = vmax.f32 %v7189_v10, %v14642_v26  ;;  %v8937_v22 = vmax.f32 %v7188_v18, %v14643_v51  ;;  %v7140_v36 = vcombine.high %v6612_v0, %v6612_v0 }
 0x538   :  { %v9134_v12 = vmax.f32 %v8926_v29, %v8934_v34  ;;  %v15257_v24 = vpack.c.bf16 %v9132_v17, %v9132_v17  ;;  %v15258_v32 = vpack.c.bf16 %v9133_v48, %v9133_v48  ;;  %v9905_v47 = vunpack.c.l.b16 %v15256_v53 }
 0x539   :  { %v8938_v61 = vmax.f32 %v7190_v40, %v14644_v11  ;;  %v7147_v58 = vrot.slane %v6612_v0, %v19814_v13  ;;  %v7154_v1 = vrot.slane %v7140_v36, %v19814_v13  ;;  %v10460_v35 = vshrl.u32 %v20131_v6, 16 }
 0x53a   :  { %v15259_v41 = vpack.c.bf16 %v9134_v12, %v9134_v12  ;;  %v9906_v59 = vunpack.c.l.b16 %v15257_v24  ;;  %v9907_v25 = vunpack.c.l.b16 %v15258_v32  ;;  %v10069_v39 = vrot.slane %v9905_v47, 7 }
 0x53b   :  { %v7155_v16 = vcombine.high %v7147_v58, %v7147_v58  ;;  %v7156_v37 = vcombine.high %v7154_v1, %v7154_v1  ;;  %v14633_v10 = vrot.slane %v7147_v58, 9  ;;  %v14635_v18 = vrot.slane %v7154_v1, 9 }
 0x53c   :  { %v9908_v44 = vunpack.c.l.b16 %v15259_v41  ;;  %v10070_v34 = vrot.slane %v9906_v59, 6  ;;  %v10072_v28 = vrot.slane %v9907_v25, 5  ;;  %v10462_v14 = vrot.slane %v10460_v35, 4  ;;  %v10305_v25 = vld [vmem:[#allocation3 + $0x3c] sm:$0x1] }
 0x53d   :  { %v14634_v30 = vrot.slane %v7155_v16, 9  ;;  %v14636_v5 = vrot.slane %v7156_v37, 9  ;;  %v8927_v40 = vmax.f32 %v7147_v58, %v14633_v10  ;;  %v8929_v0 = vmax.f32 %v7154_v1, %v14635_v18 }
 0x53e   :  { %v10071_v26 = vsel %vm9987_vm9, %v10070_v34, %v10069_v39  ;;  %v10074_v51 = vrot.slane %v9908_v44, 4  ;;  %v10463_v29 = vshll.u32 %v20131_v6, 16  ;;  %v10469_v17 = vshll.u32 %v20135_v4, 16 }
 0x53f   :  { %v10073_v48 = vsel %vm9990_vm10, %v10072_v28, %v10071_v26  ;;  %v8928_v53 = vmax.f32 %v7155_v16, %v14634_v30  ;;  %v8930_v11 = vmax.f32 %v7156_v37, %v14636_v5  ;;  %v9135_v36 = vmax.f32 %v8927_v40, %v8935_v63 }
 0x540   :  { %v9137_v12 = vmax.f32 %v8929_v0, %v8937_v22  ;;  %v10075_v24 = vsel %vm9993_vm11, %v10074_v51, %v10073_v48  ;;  %v10465_v32 = vrot.slane %v10463_v29, 5  ;;  %v10471_v47 = vrot.slane %v10469_v17, 5 }
 0x541   :  { %v9136_v35 = vmax.f32 %v8928_v53, %v8936_v7  ;;  %v9138_v58 = vmax.f32 %v8930_v11, %v8938_v61  ;;  %v15260_v1 = vpack.c.bf16 %v9135_v36, %v9135_v36  ;;  %v10474_v41 = vshrl.u32 %v20108_v49, 16  ;;  %v10367_v7 = vld [vmem:[#allocation3 + $0x14] sm:$0x1] }
 0x542   :  { %v15262_v59 = vpack.c.bf16 %v9137_v12, %v9137_v12  ;;  %v10466_v6 = vor.u32 %v10465_v32, %v10462_v14  ;;  %v10477_v4 = vshll.u32 %v20108_v49, 16  ;;  %v10483_v39 = vshll.u32 %v20114_v23, 16  ;;  %v22127_v11 = vld [vmem:[#allocation72_spill] sm:$0xff]  ;;  %v22128_v12 = vld [vmem:[#allocation77_spill] sm:$0xff] }
 0x543   :  { %v15261_v16 = vpack.c.bf16 %v9136_v35, %v9136_v35  ;;  %v9909_v37 = vunpack.c.l.b16 %v15260_v1  ;;  %v15342_v63 = vpack.c.bf16 %v9138_v58, %v9138_v58  ;;  %v10476_v22 = vrot.slane %v10474_v41, 4  ;;  %v22129_v58 = vld [vmem:[#allocation82_spill] sm:$0xff] }
 0x544   :  { %v9911_v10 = vunpack.c.l.b16 %v15262_v59  ;;  %v10467_v18 = vrot.slane %v10466_v6, 4  ;;  %v10479_v44 = vrot.slane %v10477_v4, 5  ;;  %v10485_v34 = vrot.slane %v10483_v39, 5  ;;  %v10302_v59 = vld [vmem:[#allocation3 + $0x38] sm:$0xf] }
 0x545   :  { %v9910_v61 = vunpack.c.l.b16 %v15261_v16  ;;  %v10076_v28 = vrot.slane %v9909_v37, 3  ;;  %v10306_v30 = vsel %vm19725_vm8, %v15342_v63, %v10305_v25  ;;  %v10488_v14 = vshrl.u32 %v20146_v9, 16  ;;  %v9248_v4 = vld [vmem:[#allocation3 + $0x40] sm:$0x1] }
 0x546   :  { %v10080_v5 = vrot.slane %v9911_v10, 1  ;;  %10307 = vst [vmem:[#allocation3 + $0x3c] sm:$0x1] %v10306_v30  ;;  %v10472_v23 = vsel %vm17881_vm14, %v10467_v18, %v10471_v47  ;;  %v10480_v40 = vor.u32 %v10479_v44, %v10476_v22  ;;  %v10491_v0 = vshll.u32 %v20146_v9, 16  ;;  %v22130_v10 = vld [vmem:[#allocation74_spill] sm:$0xff]  ;;  %v20211_v44 = vpop.f32.mrb[44].mxu0 }
 0x547   :  { %v10077_v26 = vsel %vm9996_vm12, %v10076_v28, %v10075_v24  ;;  %v10078_v51 = vrot.slane %v9910_v61, 2  ;;  %v10490_v29 = vrot.slane %v10488_v14, 4  ;;  %v10497_v17 = vshll.u32 %v10367_v7, 16  ;;  %v9309_v14 = vld [vmem:[#allocation3 + $0x44] sm:$0x1] }
 0x548   :  { %v10481_v48 = vrot.slane %v10480_v40, 4  ;;  %v10493_v53 = vrot.slane %v10491_v0, 5  ;;  %v16502_v36 = vadd.f32 %v19962_v20, %v22127_v11  ;;  %v16503_v32 = vadd.f32 %v19972_v50, %v22128_v12  ;;  %v20229_v40 = vpop.f32.mrb[45].mxu0 }
 0x549   :  { %v10079_v35 = vsel %vm9999_vm13, %v10078_v51, %v10077_v26  ;;  %v10499_v47 = vrot.slane %v10497_v17, 5  ;;  %v16504_v1 = vadd.f32 %v19975_v31, %v22129_v58  ;;  %v14951_v24 = vrot.slane %v20146_v9, 9 }
 0x54a   :  { %v10081_v41 = vsel %vm10002_vm15, %v10080_v5, %v10079_v35  ;;  %v10486_v25 = vsel %vm17881_vm14, %v10481_v48, %v10485_v34  ;;  %v10494_v6 = vor.u32 %v10493_v53, %v10490_v29  ;;  %v6482_v20 = vmul.f32 %v20036_v56, %v16502_v36 }
 0x54b   :  { %v10211_v39 = vpack.c.b16 %v10081_v41, %v10081_v41  ;;  %v14941_v50 = vcombine.low %v10472_v23, %v10486_v25  ;;  %v6480_v16 = vmul.f32 %v20036_v56, %v16503_v32  ;;  %v6483_v37 = vmul.f32 %v20036_v56, %v16504_v1 }
 0x54c   :  { %v10495_v63 = vrot.slane %v10494_v6, 4  ;;  %v6553_v31 = vadd.f32 %v20043_v21, %v6482_v20  ;;  %v10766_v22 = vrot.slane %v10367_v7, 5  ;;  %v16505_v18 = vadd.f32 %v19980_v55, %v22130_v10 }
 0x54d   :  { %v10303_v34 = vsel %vm19886_vm2, %v10211_v39, %v10302_v59  ;;  %10707 = vrot.lane.b32.xlu0 %v14941_v50, %s17494_s13  ;;  %v6551_v61 = vadd.f32 %v20043_v21, %v6480_v16  ;;  %v6554_v28 = vadd.f32 %v20043_v21, %v6483_v37  ;;  %v9249_v30 = vsel %vm19725_vm8, 0, %v9248_v4 }
 0x54e   :  { %10304 = vst [vmem:[#allocation3 + $0x38] sm:$0xf] %v10303_v34  ;;  %v20222_v7 = vsel %vm17881_vm14, %v10495_v63, %v10499_v47  ;;  %v6617_v55 = vmax.f32 %v6553_v31, 0.0  ;;  %v20226_v5 = vsel %vm18783_vm3, %v14951_v24, %v10766_v22  ;;  %v6481_v23 = vmul.f32 %v20036_v56, %v16505_v18  ;;  %9250 = vst [vmem:[#allocation3 + $0x40] sm:$0x1] %v9249_v30  ;;  %v20245_v31 = vpop.f32.mrb[46].mxu0 }
 0x54f   :  { %v14981_v0 = vcombine.low %v10486_v25, %v20222_v7  ;;  %v6615_v26 = vmax.f32 %v6551_v61, 0.0  ;;  %v6618_v51 = vmax.f32 %v6554_v28, 0.0  ;;  %v14991_v29 = vcombine.low %v20128_v27, %v20226_v5 }
 0x550   :  { %v7225_v17 = vcombine.high %v6617_v55, %v6617_v55  ;;  %v7232_v48 = vrot.slane %v6617_v55, %v19814_v13  ;;  %v6552_v53 = vadd.f32 %v20043_v21, %v6481_v23  ;;  %v9310_v11 = vsel %vm19697_vm5, 0, %v9309_v14 }
 0x551   :  { %10968 = vst.msk [vmem:[#allocation5 + $0x8] sm:$0xff] %vm10450_vm6, %v14981_v0  ;;  %v7191_v36 = vcombine.high %v6615_v26, %v6615_v26  ;;  %v7198_v12 = vrot.slane %v6615_v26, %v19814_v13  ;;  %v7242_v32 = vcombine.high %v6618_v51, %v6618_v51  ;;  %v7249_v35 = vrot.slane %v6618_v51, %v19814_v13 }
 0x552   :  { %10996 = vrot.lane.b32.xlu0 %v14991_v29, %s17494_s13  ;;  %9311 = vst [vmem:[#allocation3 + $0x44] sm:$0x1] %v9310_v11  ;;  %v7239_v27 = vrot.slane %v7225_v17, %v19814_v13  ;;  %v7240_v47 = vcombine.high %v7232_v48, %v7232_v48  ;;  %v14653_v58 = vrot.slane %v7232_v48, 9  ;;  %v6616_v1 = vmax.f32 %v6552_v53, 0.0  ;;  %v20247_v53 = vpop.f32.mrb[47].mxu0 }
 0x553   :  { %v7205_v24 = vrot.slane %v7191_v36, %v19814_v13  ;;  %v7206_v41 = vcombine.high %v7198_v12, %v7198_v12  ;;  %v14645_v59 = vrot.slane %v7198_v12, 9  ;;  %v7256_v25 = vrot.slane %v7242_v32, %v19814_v13 }
 0x554   :  { %v7241_v6 = vcombine.high %v7239_v27, %v7239_v27  ;;  %v14654_v20 = vrot.slane %v7240_v47, 9  ;;  %v14655_v4 = vrot.slane %v7239_v27, 9  ;;  %v8947_v39 = vmax.f32 %v7232_v48, %v14653_v58 }
 0x555   :  { %v7207_v50 = vcombine.high %v7205_v24, %v7205_v24  ;;  %v14646_v16 = vrot.slane %v7206_v41, 9  ;;  %v14647_v37 = vrot.slane %v7205_v24, 9  ;;  %v8939_v63 = vmax.f32 %v7198_v12, %v14645_v59 }
 0x556   :  { %v14656_v22 = vrot.slane %v7241_v6, 9  ;;  %v8948_v10 = vmax.f32 %v7240_v47, %v14654_v20  ;;  %v8949_v18 = vmax.f32 %v7239_v27, %v14655_v4  ;;  %v7257_v34 = vcombine.high %v7249_v35, %v7249_v35 }
 0x557   :  { %v14648_v61 = vrot.slane %v7207_v50, 9  ;;  %v8940_v28 = vmax.f32 %v7206_v41, %v14646_v16  ;;  %v8941_v30 = vmax.f32 %v7205_v24, %v14647_v37  ;;  %v9139_v14 = vmax.f32 %v8939_v63, %v8947_v39  ;;  %v20249_v24 = vld [vmem:[#allocation3 + $0x18] sm:$0xf] }
 0x558   :  { %v8950_v55 = vmax.f32 %v7241_v6, %v14656_v22  ;;  %v7258_v23 = vcombine.high %v7256_v25, %v7256_v25  ;;  %v14657_v0 = vrot.slane %v7249_v35, 9  ;;  %v14658_v26 = vrot.slane %v7257_v34, 9 }
 0x559   :  { %v8942_v51 = vmax.f32 %v7207_v50, %v14648_v61  ;;  %v9140_v29 = vmax.f32 %v8940_v28, %v8948_v10  ;;  %v9141_v17 = vmax.f32 %v8941_v30, %v8949_v18  ;;  %v15264_v48 = vpack.c.bf16 %v9139_v14, %v9139_v14  ;;  %v22131_v28 = vld [vmem:[#allocation75_spill] sm:$0xff] }
 0x55a   :  { %v14659_v11 = vrot.slane %v7256_v25, 9  ;;  %v14660_v36 = vrot.slane %v7258_v23, 9  ;;  %v8951_v12 = vmax.f32 %v7249_v35, %v14657_v0  ;;  %v8952_v32 = vmax.f32 %v7257_v34, %v14658_v26 }
 0x55b   :  { %v9142_v27 = vmax.f32 %v8942_v51, %v8950_v55  ;;  %v15265_v47 = vpack.c.bf16 %v9140_v29, %v9140_v29  ;;  %v15266_v58 = vpack.c.bf16 %v9141_v17, %v9141_v17  ;;  %v9913_v41 = vunpack.c.l.b16 %v15264_v48 }
 0x55c   :  { %v8953_v59 = vmax.f32 %v7256_v25, %v14659_v11  ;;  %v8954_v6 = vmax.f32 %v7258_v23, %v14660_v36  ;;  %v7208_v20 = vcombine.high %v6616_v1, %v6616_v1  ;;  %v7215_v4 = vrot.slane %v6616_v1, %v19814_v13  ;;  %v20264_v11 = vld [vmem:[#allocation3 + $0x1c] sm:$0x1] }
 0x55d   :  { %v15267_v39 = vpack.c.bf16 %v9142_v27, %v9142_v27  ;;  %v9914_v50 = vunpack.c.l.b16 %v15265_v47  ;;  %v9915_v16 = vunpack.c.l.b16 %v15266_v58  ;;  %v10082_v37 = vrot.slane %v9913_v41, 7  ;;  %v20269_v41 = vpop.f32.mrb[48].mxu0 }
 0x55e   :  { %v7222_v63 = vrot.slane %v7208_v20, %v19814_v13  ;;  %v7223_v22 = vcombine.high %v7215_v4, %v7215_v4  ;;  %v14649_v35 = vrot.slane %v7215_v4, 9  ;;  %v14934_v10 = vcombine.low %v20146_v9, %v20249_v24  ;;  %v22132_v9 = vld [vmem:[#allocation83_spill] sm:$0xff] }
 0x55f   :  { %v9916_v18 = vunpack.c.l.b16 %v15267_v39  ;;  %v10083_v34 = vrot.slane %v9914_v50, 6  ;;  %v10085_v61 = vrot.slane %v9915_v16, 5  ;;  %v16506_v25 = vadd.f32 %v19990_v54, %v22131_v28 }
 0x560   :  { %v7224_v30 = vcombine.high %v7222_v63, %v7222_v63  ;;  %v14650_v14 = vrot.slane %v7223_v22, 9  ;;  %v14651_v1 = vrot.slane %v7222_v63, 9  ;;  %v8943_v55 = vmax.f32 %v7215_v4, %v14649_v35  ;;  %11034 = vrot.lane.b32.xlu1 %v14934_v10, %s17500_s20  ;;  %10452 = vst.msk [vmem:[#allocation5 + $0x18] sm:$0xff] %vm10450_vm6, %v14934_v10 }
 0x561   :  { %v10084_v23 = vsel %vm9987_vm9, %v10083_v34, %v10082_v37  ;;  %v10087_v0 = vrot.slane %v9916_v18, 4  ;;  %v6486_v26 = vmul.f32 %v20036_v56, %v16506_v25  ;;  %v16507_v51 = vadd.f32 %v19992_v57, %v22132_v9 }
 0x562   :  { %v10086_v29 = vsel %vm9990_vm10, %v10085_v61, %v10084_v23  ;;  %v14652_v17 = vrot.slane %v7224_v30, 9  ;;  %v8944_v54 = vmax.f32 %v7223_v22, %v14650_v14  ;;  %v8945_v48 = vmax.f32 %v7222_v63, %v14651_v1 }
 0x563   :  { %v9143_v36 = vmax.f32 %v8943_v55, %v8951_v12  ;;  %v10088_v27 = vsel %vm9993_vm11, %v10087_v0, %v10086_v29  ;;  %v6557_v47 = vadd.f32 %v20043_v21, %v6486_v26  ;;  %v6484_v58 = vmul.f32 %v20036_v56, %v16507_v51  ;;  %v10311_v56 = vld [vmem:[#allocation3 + $0x44] sm:$0x1] }
 0x564   :  { %v8946_v20 = vmax.f32 %v7224_v30, %v14652_v17  ;;  %v9144_v4 = vmax.f32 %v8944_v54, %v8952_v32  ;;  %v9145_v39 = vmax.f32 %v8945_v48, %v8953_v59  ;;  %v14952_v57 = vrot.slane %v20249_v24, 9 }
 0x565   :  { %v15268_v50 = vpack.c.bf16 %v9143_v36, %v9143_v36  ;;  %v6621_v16 = vmax.f32 %v6557_v47, 0.0  ;;  %v6555_v37 = vadd.f32 %v20043_v21, %v6484_v58  ;;  %v10770_v63 = vrot.slane %v20264_v11, 5  ;;  %v20280_v21 = vpop.f32.mrb[49].mxu0 }
 0x566   :  { %v9146_v12 = vmax.f32 %v8946_v20, %v8954_v6  ;;  %v15269_v22 = vpack.c.bf16 %v9144_v4, %v9144_v4  ;;  %v15270_v35 = vpack.c.bf16 %v9145_v39, %v9145_v39  ;;  %v10511_v10 = vshll.u32 %v20264_v11, 16  ;;  %v20283_v23 = vpop.f32.mrb[50].mxu0 }
 0x567   :  { %v9917_v18 = vunpack.c.l.b16 %v15268_v50  ;;  %v7293_v34 = vcombine.high %v6621_v16, %v6621_v16  ;;  %v7300_v61 = vrot.slane %v6621_v16, %v19814_v13  ;;  %v6619_v32 = vmax.f32 %v6555_v37, 0.0  ;;  %v20287_v29 = vpop.f32.mrb[51].mxu0 }
 0x568   :  { %v9918_v59 = vunpack.c.l.b16 %v15269_v22  ;;  %v9919_v28 = vunpack.c.l.b16 %v15270_v35  ;;  %v15343_v25 = vpack.c.bf16 %v9146_v12, %v9146_v12  ;;  %v20278_v30 = vsel %vm18783_vm3, %v14952_v57, %v10770_v63  ;;  %v10308_v57 = vld [vmem:[#allocation3 + $0x40] sm:$0xf]  ;;  %v9257_v35 = vld [vmem:[#allocation3 + $0x58] sm:$0x1] }
 0x569   :  { %v10089_v6 = vrot.slane %v9917_v18, 3  ;;  %v7307_v14 = vrot.slane %v7293_v34, %v19814_v13  ;;  %v7308_v1 = vcombine.high %v7300_v61, %v7300_v61  ;;  %v14669_v55 = vrot.slane %v7300_v61, 9 }
 0x56a   :  { %v10091_v0 = vrot.slane %v9918_v59, 2  ;;  %v10093_v26 = vrot.slane %v9919_v28, 1  ;;  %v10312_v9 = vsel %vm19725_vm8, %v15343_v25, %v10311_v56  ;;  %v7259_v51 = vcombine.high %v6619_v32, %v6619_v32  ;;  %v9318_v59 = vld [vmem:[#allocation3 + $0x5c] sm:$0x1] }
 0x56b   :  { %v10090_v17 = vsel %vm9996_vm12, %v10089_v6, %v10088_v27  ;;  %10313 = vst [vmem:[#allocation3 + $0x44] sm:$0x1] %v10312_v9  ;;  %v7309_v54 = vcombine.high %v7307_v14, %v7307_v14  ;;  %v14670_v48 = vrot.slane %v7308_v1, 9  ;;  %v14671_v36 = vrot.slane %v7307_v14, 9 }
 0x56c   :  { %v10092_v47 = vsel %vm9999_vm13, %v10091_v0, %v10090_v17  ;;  %v8963_v58 = vmax.f32 %v7300_v61, %v14669_v55  ;;  %v7266_v20 = vrot.slane %v6619_v32, %v19814_v13  ;;  %v7273_v4 = vrot.slane %v7259_v51, %v19814_v13  ;;  %v22133_v61 = vld [vmem:[#allocation81_spill] sm:$0xff]  ;;  %v20304_v0 = vld [vmem:[#allocation12] ss:$0 sm:$0xff] }
 0x56d   :  { %v10094_v39 = vsel %vm10002_vm15, %v10093_v26, %v10092_v47  ;;  %v14672_v50 = vrot.slane %v7309_v54, 9  ;;  %v8964_v16 = vmax.f32 %v7308_v1, %v14670_v48  ;;  %v8965_v37 = vmax.f32 %v7307_v14, %v14671_v36  ;;  %v20300_v1 = vld [vmem:[#allocation3 + $0x20] sm:$0xf]  ;;  %v20313_v47 = vld [vmem:[#allocation13] ss:$0 sm:$0xff] }
 0x56e   :  { %v10213_v63 = vpack.c.b16 %v10094_v39, %v10094_v39  ;;  %v7274_v12 = vcombine.high %v7266_v20, %v7266_v20  ;;  %v7275_v27 = vcombine.high %v7273_v4, %v7273_v4  ;;  %v14661_v22 = vrot.slane %v7266_v20, 9 }
 0x56f   :  { %v8966_v18 = vmax.f32 %v7309_v54, %v14672_v50  ;;  %v14663_v56 = vrot.slane %v7273_v4, 9  ;;  %v14966_v34 = vcombine.low %v20226_v5, %v20278_v30  ;;  %v16508_v32 = vadd.f32 %v20016_v43, %v22133_v61  ;;  %v22134_v43 = vld [vmem:[#allocation84_spill] sm:$0xff] }
 0x570   :  { %v10309_v28 = vsel %vm19886_vm2, %v10213_v63, %v10308_v57  ;;  %v14662_v25 = vrot.slane %v7274_v12, 9  ;;  %v14664_v6 = vrot.slane %v7275_v27, 9  ;;  %v8955_v14 = vmax.f32 %v7266_v20, %v14661_v22 }
 0x571   :  { %10310 = vst [vmem:[#allocation3 + $0x40] sm:$0xf] %v10309_v28  ;;  %v8957_v55 = vmax.f32 %v7273_v4, %v14663_v56  ;;  %10846 = vrot.lane.b32.xlu1 %v14966_v34, %s17500_s20  ;;  %11152 = vst.msk [vmem:[#allocation5 + $0x10] sm:$0xff] %vm10450_vm6, %v14966_v34  ;;  %v6487_v5 = vmul.f32 %v20304_v0, %v16508_v32  ;;  %v16509_v26 = vadd.f32 %v20022_v2, %v22134_v43 }
 0x572   :  { %v9258_v9 = vsel %vm19725_vm8, 0, %v9257_v35  ;;  %v8956_v51 = vmax.f32 %v7274_v12, %v14662_v25  ;;  %v8958_v17 = vmax.f32 %v7275_v27, %v14664_v6  ;;  %v9147_v54 = vmax.f32 %v8955_v14, %v8963_v58 }
 0x573   :  { %9259 = vst [vmem:[#allocation3 + $0x58] sm:$0x1] %v9258_v9  ;;  %v9319_v48 = vsel %vm19697_vm5, 0, %v9318_v59  ;;  %v9149_v36 = vmax.f32 %v8957_v55, %v8965_v37  ;;  %v6558_v20 = vadd.f32 %v20313_v47, %v6487_v5  ;;  %v6485_v4 = vmul.f32 %v20304_v0, %v16509_v26 }
 0x574   :  { %9320 = vst [vmem:[#allocation3 + $0x5c] sm:$0x1] %v9319_v48  ;;  %v14974_v2 = vcombine.low %v20249_v24, %v20300_v1  ;;  %v9148_v39 = vmax.f32 %v8956_v51, %v8964_v16  ;;  %v9150_v57 = vmax.f32 %v8958_v17, %v8966_v18  ;;  %v15272_v50 = vpack.c.bf16 %v9147_v54, %v9147_v54 }
 0x575   :  { %v10502_v58 = vshrl.u32 %v20249_v24, 16  ;;  %v15274_v63 = vpack.c.bf16 %v9149_v36, %v9149_v36  ;;  %v6622_v12 = vmax.f32 %v6558_v20, 0.0  ;;  %v6556_v27 = vadd.f32 %v20313_v47, %v6485_v4 }
 0x576   :  { %10891 = vrot.lane.b32.xlu1 %v14974_v2, %s17512_s11  ;;  %v10505_v37 = vshll.u32 %v20249_v24, 16  ;;  %v15273_v22 = vpack.c.bf16 %v9148_v39, %v9148_v39  ;;  %v15275_v35 = vpack.c.bf16 %v9150_v57, %v9150_v57  ;;  %v9921_v56 = vunpack.c.l.b16 %v15272_v50 }
 0x577   :  { %v10504_v34 = vrot.slane %v10502_v58, 4  ;;  %v9923_v61 = vunpack.c.l.b16 %v15274_v63  ;;  %v7310_v32 = vcombine.high %v6622_v12, %v6622_v12  ;;  %v7317_v16 = vrot.slane %v6622_v12, %v19814_v13 }
 0x578   :  { %v6620_v18 = vmax.f32 %v6556_v27, 0.0  ;;  %v9922_v59 = vunpack.c.l.b16 %v15273_v22  ;;  %v9924_v28 = vunpack.c.l.b16 %v15275_v35  ;;  %v10095_v25 = vrot.slane %v9921_v56, 7 }
 0x579   :  { %v10507_v6 = vrot.slane %v10505_v37, 5  ;;  %v10098_v14 = vrot.slane %v9923_v61, 5  ;;  %v7324_v55 = vrot.slane %v7310_v32, %v19814_v13  ;;  %v7325_v5 = vcombine.high %v7317_v16, %v7317_v16 }
 0x57a   :  { %v14673_v43 = vrot.slane %v7317_v16, 9  ;;  %v10096_v26 = vrot.slane %v9922_v59, 6  ;;  %v10100_v24 = vrot.slane %v9924_v28, 4  ;;  %v7276_v9 = vcombine.high %v6620_v18, %v6620_v18 }
 0x57b   :  { %v7283_v51 = vrot.slane %v6620_v18, %v19814_v13  ;;  %v7326_v17 = vcombine.high %v7324_v55, %v7324_v55  ;;  %v14674_v54 = vrot.slane %v7325_v5, 9  ;;  %v14675_v48 = vrot.slane %v7324_v55, 9 }
 0x57c   :  { %v8967_v36 = vmax.f32 %v7317_v16, %v14673_v43  ;;  %v10097_v20 = vsel %vm9987_vm9, %v10096_v26, %v10095_v25  ;;  %v7290_v4 = vrot.slane %v7276_v9, %v19814_v13  ;;  %v10508_v61 = vor.u32 %v10507_v6, %v10504_v34  ;;  %v22137_v26 = vld [vmem:[#allocation90_spill] sm:$0xff] }
 0x57d   :  { %v7291_v2 = vcombine.high %v7283_v51, %v7283_v51  ;;  %v14665_v39 = vrot.slane %v7283_v51, 9  ;;  %v10099_v57 = vsel %vm9990_vm10, %v10098_v14, %v10097_v20  ;;  %v14676_v50 = vrot.slane %v7326_v17, 9  ;;  %v22135_v14 = vld [vmem:[#allocation78_spill] sm:$0xff] }
 0x57e   :  { %v8968_v58 = vmax.f32 %v7325_v5, %v14674_v54  ;;  %v8969_v63 = vmax.f32 %v7324_v55, %v14675_v48  ;;  %v7292_v12 = vcombine.high %v7290_v4, %v7290_v4  ;;  %v14667_v37 = vrot.slane %v7290_v4, 9  ;;  %v22136_v55 = vld [vmem:[#allocation36_spill] sm:$0xff] }
 0x57f   :  { %v14666_v27 = vrot.slane %v7291_v2, 9  ;;  %v8959_v22 = vmax.f32 %v7283_v51, %v14665_v39  ;;  %v8970_v35 = vmax.f32 %v7326_v17, %v14676_v50  ;;  %v10101_v56 = vsel %vm9993_vm11, %v10100_v24, %v10099_v57  ;;  %v20338_v51 = vpop.f32.mrb[52].mxu0 }
 0x580   :  { %v10513_v32 = vrot.slane %v10511_v10, 5  ;;  %v14668_v16 = vrot.slane %v7292_v12, 9  ;;  %v8961_v59 = vmax.f32 %v7290_v4, %v14667_v37  ;;  %v10509_v25 = vrot.slane %v10508_v61, 4  ;;  %v20340_v24 = vpop.f32.mrb[53].mxu0  ;;  %v10317_v4 = vld [vmem:[#allocation3 + $0x5c] sm:$0x1] }
 0x581   :  { %v8960_v18 = vmax.f32 %v7291_v2, %v14666_v27  ;;  %v9151_v28 = vmax.f32 %v8959_v22, %v8967_v36  ;;  %v16510_v5 = vadd.f32 %v20081_v46, %v22135_v14  ;;  %v16511_v43 = vadd.f32 %v20083_v60, %v22136_v55  ;;  %v20356_v61 = vld [vmem:[#allocation3 + $0x24] sm:$0x1] }
 0x582   :  { %v16512_v9 = vadd.f32 %v20093_v33, %v22137_v26  ;;  %v8962_v34 = vmax.f32 %v7292_v12, %v14668_v16  ;;  %v9153_v11 = vmax.f32 %v8961_v59, %v8969_v63  ;;  %v20344_v17 = vsel %vm17881_vm14, %v10509_v25, %v10513_v32 }
 0x583   :  { %v9152_v6 = vmax.f32 %v8960_v18, %v8968_v58  ;;  %v15276_v10 = vpack.c.bf16 %v9151_v28, %v9151_v28  ;;  %v6490_v46 = vmul.f32 %v20304_v0, %v16510_v5  ;;  %v6488_v54 = vmul.f32 %v20304_v0, %v16511_v43 }
 0x584   :  { %v6491_v60 = vmul.f32 %v20304_v0, %v16512_v9  ;;  %v9154_v48 = vmax.f32 %v8962_v34, %v8970_v35  ;;  %v15278_v36 = vpack.c.bf16 %v9153_v11, %v9153_v11  ;;  %v14942_v2 = vcombine.low %v20222_v7, %v20344_v17  ;;  %v10314_v34 = vld [vmem:[#allocation3 + $0x58] sm:$0xf] }
 0x585   :  { %v15277_v33 = vpack.c.bf16 %v9152_v6, %v9152_v6  ;;  %v9925_v20 = vunpack.c.l.b16 %v15276_v10  ;;  %v6561_v39 = vadd.f32 %v20313_v47, %v6490_v46  ;;  %v6559_v57 = vadd.f32 %v20313_v47, %v6488_v54 }
 0x586   :  { %v6562_v50 = vadd.f32 %v20313_v47, %v6491_v60  ;;  %v9927_v63 = vunpack.c.l.b16 %v15278_v36  ;;  %v15344_v27 = vpack.c.bf16 %v9154_v48, %v9154_v48  ;;  %11098 = vrot.lane.b32.xlu0 %v14942_v2, %s17512_s11  ;;  %10709 = vrot.lane.b32.xlu1 %v14942_v2, %s17494_s13  ;;  %v14953_v7 = vrot.slane %v20300_v1, 9 }
 0x587   :  { %v9926_v58 = vunpack.c.l.b16 %v15277_v33  ;;  %v10102_v12 = vrot.slane %v9925_v20, 3  ;;  %v6625_v37 = vmax.f32 %v6561_v39, 0.0  ;;  %v6623_v22 = vmax.f32 %v6559_v57, 0.0 }
 0x588   :  { %v6626_v35 = vmax.f32 %v6562_v50, 0.0  ;;  %v10106_v18 = vrot.slane %v9927_v63, 1  ;;  %v10318_v59 = vsel %vm19725_vm8, %v15344_v27, %v10317_v4  ;;  %v10774_v9 = vrot.slane %v20356_v61, 5 }
 0x589   :  { %v10103_v32 = vsel %vm9996_vm12, %v10102_v12, %v10101_v56  ;;  %v10104_v16 = vrot.slane %v9926_v58, 2  ;;  %10319 = vst [vmem:[#allocation3 + $0x5c] sm:$0x1] %v10318_v59  ;;  %v7361_v28 = vcombine.high %v6625_v37, %v6625_v37  ;;  %v7368_v25 = vrot.slane %v6625_v37, %v19814_v13 }
 0x58a   :  { %v7327_v14 = vcombine.high %v6623_v22, %v6623_v22  ;;  %v7334_v5 = vrot.slane %v6623_v22, %v19814_v13  ;;  %v7378_v43 = vcombine.high %v6626_v35, %v6626_v35  ;;  %v7385_v26 = vrot.slane %v6626_v35, %v19814_v13 }
 0x58b   :  { %v10105_v55 = vsel %vm9999_vm13, %v10104_v16, %v10103_v32  ;;  %v7375_v6 = vrot.slane %v7361_v28, %v19814_v13  ;;  %v7376_v11 = vcombine.high %v7368_v25, %v7368_v25  ;;  %v14685_v10 = vrot.slane %v7368_v25, 9 }
 0x58c   :  { %v10107_v56 = vsel %vm10002_vm15, %v10106_v18, %v10105_v55  ;;  %v7341_v54 = vrot.slane %v7327_v14, %v19814_v13  ;;  %v7342_v60 = vcombine.high %v7334_v5, %v7334_v5  ;;  %v14677_v48 = vrot.slane %v7334_v5, 9 }
 0x58d   :  { %v10215_v46 = vpack.c.b16 %v10107_v56, %v10107_v56  ;;  %v7377_v33 = vcombine.high %v7375_v6, %v7375_v6  ;;  %v14686_v36 = vrot.slane %v7376_v11, 9  ;;  %v14687_v20 = vrot.slane %v7375_v6, 9 }
 0x58e   :  { %v8979_v4 = vmax.f32 %v7368_v25, %v14685_v10  ;;  %v7343_v39 = vcombine.high %v7341_v54, %v7341_v54  ;;  %v14678_v57 = vrot.slane %v7342_v60, 9  ;;  %v14679_v50 = vrot.slane %v7341_v54, 9 }
 0x58f   :  { %v10315_v2 = vsel %vm19886_vm2, %v10215_v46, %v10314_v34  ;;  %v14688_v58 = vrot.slane %v7377_v33, 9  ;;  %v8980_v63 = vmax.f32 %v7376_v11, %v14686_v36  ;;  %v8981_v12 = vmax.f32 %v7375_v6, %v14687_v20  ;;  %v9260_v36 = vld [vmem:[#allocation3 + $0x60] sm:$0x1] }
 0x590   :  { %10316 = vst [vmem:[#allocation3 + $0x58] sm:$0xf] %v10315_v2  ;;  %v8971_v27 = vmax.f32 %v7334_v5, %v14677_v48  ;;  %v14680_v37 = vrot.slane %v7343_v39, 9  ;;  %v8972_v22 = vmax.f32 %v7342_v60, %v14678_v57  ;;  %v8973_v35 = vmax.f32 %v7341_v54, %v14679_v50  ;;  %v20383_v50 = vld [vmem:[#allocation3 + $0x28] sm:$0xf] }
 0x591   :  { %v7392_v32 = vrot.slane %v7378_v43, %v19814_v13  ;;  %v8982_v16 = vmax.f32 %v7377_v33, %v14688_v58  ;;  %v7393_v59 = vcombine.high %v7385_v26, %v7385_v26  ;;  %v14689_v28 = vrot.slane %v7385_v26, 9  ;;  %v20385_v58 = vpop.f32.mrb[54].mxu0 }
 0x592   :  { %v9155_v18 = vmax.f32 %v8971_v27, %v8979_v4  ;;  %v8974_v25 = vmax.f32 %v7343_v39, %v14680_v37  ;;  %v9156_v14 = vmax.f32 %v8972_v22, %v8980_v63  ;;  %v9157_v55 = vmax.f32 %v8973_v35, %v8981_v12  ;;  %v22138_v37 = vld [vmem:[#allocation86_spill] sm:$0xff] }
 0x593   :  { %v7394_v56 = vcombine.high %v7392_v32, %v7392_v32  ;;  %v14690_v10 = vrot.slane %v7393_v59, 9  ;;  %v14691_v46 = vrot.slane %v7392_v32, 9  ;;  %v20373_v2 = vmax.f32 %v7385_v26, %v14689_v28  ;;  %v9321_v26 = vld [vmem:[#allocation3 + $0x64] sm:$0x1] }
 0x594   :  { %v15280_v34 = vpack.c.bf16 %v9155_v18, %v9155_v18  ;;  %v9158_v6 = vmax.f32 %v8974_v25, %v8982_v16  ;;  %v15281_v5 = vpack.c.bf16 %v9156_v14, %v9156_v14  ;;  %v15282_v11 = vpack.c.bf16 %v9157_v55, %v9157_v55 }
 0x595   :  { %v14692_v60 = vrot.slane %v7394_v56, 9  ;;  %v20375_v48 = vmax.f32 %v7393_v59, %v14690_v10  ;;  %v20377_v43 = vmax.f32 %v7392_v32, %v14691_v46  ;;  %v10775_v33 = vsel %vm18783_vm3, %v14953_v7, %v10774_v9  ;;  %v20391_v7 = vld [vmem:[#allocation3 + $0x2c] sm:$0x1] }
 0x596   :  { %v9929_v54 = vunpack.c.l.b16 %v15280_v34  ;;  %v15283_v20 = vpack.c.bf16 %v9158_v6, %v9158_v6  ;;  %v9930_v4 = vunpack.c.l.b16 %v15281_v5  ;;  %v9931_v39 = vunpack.c.l.b16 %v15282_v11  ;;  %v9263_v5 = vld [vmem:[#allocation3 + $0x68] sm:$0x1]  ;;  %v20411_v11 = vpop.f32.mrb[55].mxu0 }
 0x597   :  { %v20381_v57 = vmax.f32 %v7394_v56, %v14692_v60  ;;  %v14992_v12 = vcombine.low %v20278_v30, %v10775_v33  ;;  %v10525_v27 = vshll.u32 %v20356_v61, 16  ;;  %v16513_v22 = vadd.f32 %v20099_v42, %v22138_v37  ;;  %v22139_v42 = vld [vmem:[#allocation91_spill] sm:$0xff]  ;;  %v22142_v37 = vld [vmem:[#allocation89_spill] sm:$0xff] }
 0x598   :  { %v10108_v63 = vrot.slane %v9929_v54, 7  ;;  %v9932_v9 = vunpack.c.l.b16 %v15283_v20  ;;  %v10109_v35 = vrot.slane %v9930_v4, 6  ;;  %v10111_v32 = vrot.slane %v9931_v39, 5  ;;  %v22141_v4 = vld [vmem:[#allocation88_spill] sm:$0xff] }
 0x599   :  { %v9261_v16 = vsel %vm19725_vm8, 0, %v9260_v36  ;;  %10998 = vrot.lane.b32.xlu0 %v14992_v12, %s17494_s13  ;;  %v6489_v18 = vmul.f32 %v20304_v0, %v16513_v22  ;;  %v9322_v30 = vsel %vm19697_vm5, 0, %v9321_v26  ;;  %v14935_v59 = vcombine.low %v20300_v1, %v20383_v50  ;;  %v22140_v36 = vld [vmem:[#allocation94_spill] sm:$0xff] }
 0x59a   :  { %9262 = vst [vmem:[#allocation3 + $0x60] sm:$0x1] %v9261_v16  ;;  %v16514_v28 = vadd.f32 %v20148_v62, %v22139_v42  ;;  %v10110_v25 = vsel %vm9987_vm9, %v10109_v35, %v10108_v63  ;;  %v10113_v14 = vrot.slane %v9932_v9, 4  ;;  %9323 = vst [vmem:[#allocation3 + $0x64] sm:$0x1] %v9322_v30  ;;  %v14954_v55 = vrot.slane %v20383_v50, 9 }
 0x59b   :  { %v10778_v56 = vrot.slane %v20391_v7, 5  ;;  %v10112_v34 = vsel %vm9990_vm10, %v10111_v32, %v10110_v25  ;;  %v6560_v10 = vadd.f32 %v20313_v47, %v6489_v18  ;;  %10453 = vst.msk [vmem:[#allocation5 + $0x30] sm:$0xff] %vm10450_vm6, %v14935_v59  ;;  %v9324_v62 = vld [vmem:[#allocation3 + $0x6c] sm:$0x1]  ;;  %v16515_v20 = vadd.f32 %v20155_v52, %v22140_v36  ;;  %v20429_v9 = vld [vmem:[#allocation3 + $0x30] sm:$0xf] }
 0x59c   :  { %v6494_v46 = vmul.f32 %v20304_v0, %v16514_v28  ;;  %v20414_v60 = vsel %vm9993_vm11, %v10113_v14, %v10112_v34  ;;  %v16516_v39 = vadd.f32 %v20159_v3, %v22141_v4  ;;  %v16517_v22 = vadd.f32 %v20166_v19, %v22142_v37 }
 0x59d   :  { %v20418_v54 = vsel %vm18783_vm3, %v14954_v55, %v10778_v56  ;;  %v6624_v26 = vmax.f32 %v6560_v10, 0.0  ;;  %11036 = vrot.lane.b32.xlu0 %v14935_v59, %s17500_s20  ;;  %v6492_v35 = vmul.f32 %v20304_v0, %v16515_v20  ;;  %v9264_v52 = vsel %vm19725_vm8, 0, %v9263_v5 }
 0x59e   :  { %v6565_v63 = vadd.f32 %v20313_v47, %v6494_v46  ;;  %v14967_v12 = vcombine.low %v10775_v33, %v20418_v54  ;;  %v6495_v32 = vmul.f32 %v20304_v0, %v16516_v39  ;;  %v9325_v3 = vsel %vm19697_vm5, 0, %v9324_v62  ;;  %9265 = vst [vmem:[#allocation3 + $0x68] sm:$0x1] %v9264_v52 }
 0x59f   :  { %v7344_v16 = vcombine.high %v6624_v26, %v6624_v26  ;;  %v7351_v18 = vrot.slane %v6624_v26, %v19814_v13  ;;  %v6493_v19 = vmul.f32 %v20304_v0, %v16517_v22  ;;  %9326 = vst [vmem:[#allocation3 + $0x6c] sm:$0x1] %v9325_v3  ;;  %v6563_v33 = vadd.f32 %v20313_v47, %v6492_v35 }
 0x5a0   :  { %v6629_v30 = vmax.f32 %v6565_v63, 0.0  ;;  %10848 = vrot.lane.b32.xlu1 %v14967_v12, %s17500_s20  ;;  %11153 = vst.msk [vmem:[#allocation5 + $0x28] sm:$0xff] %vm10450_vm6, %v14967_v12  ;;  %v6566_v59 = vadd.f32 %v20313_v47, %v6495_v32  ;;  %v14975_v42 = vcombine.low %v20383_v50, %v20429_v9  ;;  %v10516_v28 = vshrl.u32 %v20300_v1, 16 }
 0x5a1   :  { %v7358_v25 = vrot.slane %v7344_v16, %v19814_v13  ;;  %v7359_v14 = vcombine.high %v7351_v18, %v7351_v18  ;;  %v14681_v55 = vrot.slane %v7351_v18, 9  ;;  %v6627_v10 = vmax.f32 %v6563_v33, 0.0 }
 0x5a2   :  { %v7429_v56 = vcombine.high %v6629_v30, %v6629_v30  ;;  %v7436_v34 = vrot.slane %v6629_v30, %v19814_v13  ;;  %v20448_v46 = vmax.f32 %v6566_v59, 0.0  ;;  %v6564_v5 = vadd.f32 %v20313_v47, %v6493_v19 }
 0x5a3   :  { %v7360_v62 = vcombine.high %v7358_v25, %v7358_v25  ;;  %v14682_v36 = vrot.slane %v7359_v14, 9  ;;  %v14683_v20 = vrot.slane %v7358_v25, 9  ;;  %v8975_v4 = vmax.f32 %v7351_v18, %v14681_v55 }
 0x5a4   :  { %10893 = vrot.lane.b32.xlu1 %v14975_v42, %s17512_s11  ;;  %v7443_v39 = vrot.slane %v7429_v56, %v19814_v13  ;;  %v7444_v26 = vcombine.high %v7436_v34, %v7436_v34  ;;  %v14701_v63 = vrot.slane %v7436_v34, 9  ;;  %v7395_v12 = vcombine.high %v6627_v10, %v6627_v10 }
 0x5a5   :  { %v14684_v37 = vrot.slane %v7360_v62, 9  ;;  %v8976_v22 = vmax.f32 %v7359_v14, %v14682_v36  ;;  %v8977_v35 = vmax.f32 %v7358_v25, %v14683_v20  ;;  %v9159_v32 = vmax.f32 %v8975_v4, %v20373_v2  ;;  %v20458_v20 = vpop.f32.mrb[56].mxu0  ;;  %v10323_v4 = vld [vmem:[#allocation3 + $0x64] sm:$0x1] }
 0x5a6   :  { %v7445_v52 = vcombine.high %v7443_v39, %v7443_v39  ;;  %v14702_v3 = vrot.slane %v7444_v26, 9  ;;  %v14703_v16 = vrot.slane %v7443_v39, 9  ;;  %v8995_v30 = vmax.f32 %v7436_v34, %v14701_v63 }
 0x5a7   :  { %v8978_v19 = vmax.f32 %v7360_v62, %v14684_v37  ;;  %v9160_v33 = vmax.f32 %v8976_v22, %v20375_v48  ;;  %v9161_v18 = vmax.f32 %v8977_v35, %v20377_v43  ;;  %v15284_v59 = vpack.c.bf16 %v9159_v32, %v9159_v32 }
 0x5a8   :  { %v14704_v42 = vrot.slane %v7445_v52, 9  ;;  %v8996_v55 = vmax.f32 %v7444_v26, %v14702_v3  ;;  %v8997_v56 = vmax.f32 %v7443_v39, %v14703_v16  ;;  %v7402_v6 = vrot.slane %v6627_v10, %v19814_v13 }
 0x5a9   :  { %v9162_v14 = vmax.f32 %v8978_v19, %v20381_v57  ;;  %v15285_v25 = vpack.c.bf16 %v9160_v33, %v9160_v33  ;;  %v15286_v36 = vpack.c.bf16 %v9161_v18, %v9161_v18  ;;  %v9933_v2 = vunpack.c.l.b16 %v15284_v59  ;;  %v20465_v19 = vpop.f32.mrb[57].mxu0 }
 0x5aa   :  { %v8998_v34 = vmax.f32 %v7445_v52, %v14704_v42  ;;  %v7409_v62 = vrot.slane %v7395_v12, %v19814_v13  ;;  %v7410_v48 = vcombine.high %v7402_v6, %v7402_v6  ;;  %v14693_v63 = vrot.slane %v7402_v6, 9 }
 0x5ab   :  { %v9934_v43 = vunpack.c.l.b16 %v15285_v25  ;;  %v9935_v37 = vunpack.c.l.b16 %v15286_v36  ;;  %v10115_v22 = vrot.slane %v9933_v2, 3  ;;  %v15345_v26 = vpack.c.bf16 %v9162_v14, %v9162_v14  ;;  %v10320_v36 = vld [vmem:[#allocation3 + $0x60] sm:$0xf] }
 0x5ac   :  { %v7411_v39 = vcombine.high %v7409_v62, %v7409_v62  ;;  %v14694_v35 = vrot.slane %v7410_v48, 9  ;;  %v14695_v10 = vrot.slane %v7409_v62, 9  ;;  %v8987_v32 = vmax.f32 %v7402_v6, %v14693_v63 }
 0x5ad   :  { %v10116_v57 = vsel %vm9996_vm12, %v10115_v22, %v20414_v60  ;;  %v10117_v3 = vrot.slane %v9934_v43, 2  ;;  %v10119_v16 = vrot.slane %v9935_v37, 1  ;;  %v10324_v52 = vsel %vm19725_vm8, %v15345_v26, %v10323_v4 }
 0x5ae   :  { %10325 = vst [vmem:[#allocation3 + $0x64] sm:$0x1] %v10324_v52  ;;  %v14696_v12 = vrot.slane %v7411_v39, 9  ;;  %v8988_v33 = vmax.f32 %v7410_v48, %v14694_v35  ;;  %v8989_v18 = vmax.f32 %v7409_v62, %v14695_v10  ;;  %v9163_v59 = vmax.f32 %v8987_v32, %v8995_v30 }
 0x5af   :  { %v10118_v42 = vsel %vm9999_vm13, %v10117_v3, %v10116_v57  ;;  %v7446_v6 = vcombine.high %v20448_v46, %v20448_v46  ;;  %v7453_v60 = vrot.slane %v20448_v46, %v19814_v13  ;;  %v6628_v14 = vmax.f32 %v6564_v5, 0.0 }
 0x5b0   :  { %v10120_v25 = vsel %vm10002_vm15, %v10119_v16, %v10118_v42  ;;  %v8990_v2 = vmax.f32 %v7411_v39, %v14696_v12  ;;  %v9164_v4 = vmax.f32 %v8988_v33, %v8996_v55  ;;  %v9165_v63 = vmax.f32 %v8989_v18, %v8997_v56 }
 0x5b1   :  { %v10217_v43 = vpack.c.b16 %v10120_v25, %v10120_v25  ;;  %v15288_v37 = vpack.c.bf16 %v9163_v59, %v9163_v59  ;;  %v7460_v62 = vrot.slane %v7446_v6, %v19814_v13  ;;  %v7461_v30 = vcombine.high %v7453_v60, %v7453_v60 }
 0x5b2   :  { %v9166_v48 = vmax.f32 %v8990_v2, %v8998_v34  ;;  %v15289_v22 = vpack.c.bf16 %v9164_v4, %v9164_v4  ;;  %v15290_v26 = vpack.c.bf16 %v9165_v63, %v9165_v63  ;;  %v14705_v35 = vrot.slane %v7453_v60, 9 }
 0x5b3   :  { %v10321_v10 = vsel %vm19886_vm2, %v10217_v43, %v10320_v36  ;;  %v9937_v46 = vunpack.c.l.b16 %v15288_v37  ;;  %v7462_v5 = vcombine.high %v7460_v62, %v7460_v62  ;;  %v14706_v32 = vrot.slane %v7461_v30, 9 }
 0x5b4   :  { %10322 = vst [vmem:[#allocation3 + $0x60] sm:$0xf] %v10321_v10  ;;  %v15291_v57 = vpack.c.bf16 %v9166_v48, %v9166_v48  ;;  %v9938_v39 = vunpack.c.l.b16 %v15289_v22  ;;  %v9939_v55 = vunpack.c.l.b16 %v15290_v26  ;;  %v14707_v56 = vrot.slane %v7460_v62, 9  ;;  %v20485_v48 = vpop.f32.mrb[58].mxu0 }
 0x5b5   :  { %v10121_v3 = vrot.slane %v9937_v46, 7  ;;  %v14708_v16 = vrot.slane %v7462_v5, 9  ;;  %v8999_v52 = vmax.f32 %v7453_v60, %v14705_v35  ;;  %v9000_v12 = vmax.f32 %v7461_v30, %v14706_v32  ;;  %v20490_v35 = vpop.f32.mrb[59].mxu0 }
 0x5b6   :  { %v9940_v33 = vunpack.c.l.b16 %v15291_v57  ;;  %v10122_v34 = vrot.slane %v9938_v39, 6  ;;  %v10124_v18 = vrot.slane %v9939_v55, 5  ;;  %v9001_v59 = vmax.f32 %v7460_v62, %v14707_v56 }
 0x5b7   :  { %v9002_v42 = vmax.f32 %v7462_v5, %v14708_v16  ;;  %v7412_v6 = vcombine.high %v6628_v14, %v6628_v14  ;;  %v7419_v25 = vrot.slane %v6628_v14, %v19814_v13  ;;  %v10518_v36 = vrot.slane %v10516_v28, 4 }
 0x5b8   :  { %v10123_v2 = vsel %vm9987_vm9, %v10122_v34, %v10121_v3  ;;  %v10126_v4 = vrot.slane %v9940_v33, 4  ;;  %v10519_v63 = vshll.u32 %v20300_v1, 16  ;;  %v10527_v60 = vrot.slane %v10525_v27, 5 }
 0x5b9   :  { %v10125_v43 = vsel %vm9990_vm10, %v10124_v18, %v10123_v2  ;;  %v7426_v37 = vrot.slane %v7412_v6, %v19814_v13  ;;  %v7427_v62 = vcombine.high %v7419_v25, %v7419_v25  ;;  %v14697_v30 = vrot.slane %v7419_v25, 9  ;;  %v22144_v18 = vld [vmem:[#allocation95_spill] sm:$0xff]  ;;  %v22145_v6 = vld [vmem:[#allocation92_spill] sm:$0xff] }
 0x5ba   :  { %v10127_v14 = vsel %vm9993_vm11, %v10126_v4, %v10125_v43  ;;  %v10521_v22 = vrot.slane %v10519_v63, 5  ;;  %v10530_v28 = vshrl.u32 %v20383_v50, 16  ;;  %v10533_v26 = vshll.u32 %v20383_v50, 16  ;;  %v20498_v43 = vpop.f32.mrb[60].mxu0 }
 0x5bb   :  { %v7428_v1 = vcombine.high %v7426_v37, %v7426_v37  ;;  %v14698_v61 = vrot.slane %v7427_v62, 9  ;;  %v14699_v27 = vrot.slane %v7426_v37, 9  ;;  %v8991_v10 = vmax.f32 %v7419_v25, %v14697_v30 }
 0x5bc   :  { %v10522_v46 = vor.u32 %v10521_v22, %v10518_v36  ;;  %v10532_v5 = vrot.slane %v10530_v28, 4  ;;  %v10535_v32 = vrot.slane %v10533_v26, 5  ;;  %v22143_v57 = vshll.u32 %v20391_v7, 16  ;;  %v10329_v26 = vld [vmem:[#allocation3 + $0x6c] sm:$0x1] }
 0x5bd   :  { %v14700_v55 = vrot.slane %v7428_v1, 9  ;;  %v8992_v56 = vmax.f32 %v7427_v62, %v14698_v61  ;;  %v8993_v3 = vmax.f32 %v7426_v37, %v14699_v27  ;;  %v9167_v16 = vmax.f32 %v8991_v10, %v8999_v52 }
 0x5be   :  { %v10541_v39 = vrot.slane %v22143_v57, 5  ;;  %v10523_v33 = vrot.slane %v10522_v46, 4  ;;  %v10536_v34 = vor.u32 %v10535_v32, %v10532_v5  ;;  %v16518_v50 = vadd.f32 %v20211_v44, %v22144_v18  ;;  %v22146_v32 = vld [vmem:[#allocation93_spill] sm:$0xff] }
 0x5bf   :  { %v16519_v2 = vadd.f32 %v20229_v40, %v22145_v6  ;;  %v8994_v4 = vmax.f32 %v7428_v1, %v14700_v55  ;;  %v9168_v25 = vmax.f32 %v8992_v56, %v9000_v12  ;;  %v9169_v36 = vmax.f32 %v8993_v3, %v9001_v59 }
 0x5c0   :  { %v15292_v63 = vpack.c.bf16 %v9167_v16, %v9167_v16  ;;  %v10528_v7 = vsel %vm17881_vm14, %v10523_v33, %v10527_v60  ;;  %v10537_v62 = vrot.slane %v10536_v34, 4  ;;  %v6498_v52 = vmul.f32 %v20304_v0, %v16518_v50 }
 0x5c1   :  { %v6496_v37 = vmul.f32 %v20304_v0, %v16519_v2  ;;  %v9170_v30 = vmax.f32 %v8994_v4, %v9002_v42  ;;  %v15293_v22 = vpack.c.bf16 %v9168_v25, %v9168_v25  ;;  %v15294_v44 = vpack.c.bf16 %v9169_v36, %v9169_v36  ;;  %v10326_v4 = vld [vmem:[#allocation3 + $0x68] sm:$0xf] }
 0x5c2   :  { %v9941_v28 = vunpack.c.l.b16 %v15292_v63  ;;  %v20506_v40 = vsel %vm17881_vm14, %v10537_v62, %v10541_v39  ;;  %v14982_v12 = vcombine.low %v20344_v17, %v10528_v7  ;;  %v6569_v59 = vadd.f32 %v20313_v47, %v6498_v52  ;;  %v20515_v39 = vld [vmem:[#allocation3 + $0x34] sm:$0x1] }
 0x5c3   :  { %v6567_v60 = vadd.f32 %v20313_v47, %v6496_v37  ;;  %v9942_v1 = vunpack.c.l.b16 %v15293_v22  ;;  %v9943_v61 = vunpack.c.l.b16 %v15294_v44  ;;  %v15346_v10 = vpack.c.bf16 %v9170_v30, %v9170_v30 }
 0x5c4   :  { %v10128_v27 = vrot.slane %v9941_v28, 3  ;;  %v14943_v42 = vcombine.low %v10528_v7, %v20506_v40  ;;  %10969 = vst.msk [vmem:[#allocation5 + $0x20] sm:$0xff] %vm10450_vm6, %v14982_v12  ;;  %v6633_v46 = vmax.f32 %v6569_v59, 0.0  ;;  %v16520_v57 = vadd.f32 %v20245_v31, %v22146_v32 }
 0x5c5   :  { %v6631_v5 = vmax.f32 %v6567_v60, 0.0  ;;  %v10130_v55 = vrot.slane %v9942_v1, 2  ;;  %v10132_v56 = vrot.slane %v9943_v61, 1  ;;  %v10330_v3 = vsel %vm19725_vm8, %v15346_v10, %v10329_v26 }
 0x5c6   :  { %v10129_v17 = vsel %vm9996_vm12, %v10128_v27, %v10127_v14  ;;  %10331 = vst [vmem:[#allocation3 + $0x6c] sm:$0x1] %v10330_v3  ;;  %11100 = vrot.lane.b32.xlu0 %v14943_v42, %s17512_s11  ;;  %v7497_v16 = vcombine.high %v6633_v46, %v6633_v46  ;;  %v7504_v33 = vrot.slane %v6633_v46, %v19814_v13  ;;  %v14955_v50 = vrot.slane %v20429_v9, 9 }
 0x5c7   :  { %v7463_v34 = vcombine.high %v6631_v5, %v6631_v5  ;;  %v7470_v18 = vrot.slane %v6631_v5, %v19814_v13  ;;  %v10131_v31 = vsel %vm9999_vm13, %v10130_v55, %v10129_v17  ;;  %10711 = vrot.lane.b32.xlu1 %v14943_v42, %s17494_s13  ;;  %v6499_v14 = vmul.f32 %v20304_v0, %v16520_v57  ;;  %v9266_v57 = vld [vmem:[#allocation3 + $0x70] sm:$0x1]  ;;  %v20534_v17 = vpop.f32.mrb[61].mxu0 }
 0x5c8   :  { %v10782_v6 = vrot.slane %v20515_v39, 5  ;;  %v10133_v2 = vsel %vm10002_vm15, %v10132_v56, %v10131_v31  ;;  %v7511_v25 = vrot.slane %v7497_v16, %v19814_v13  ;;  %v7512_v36 = vcombine.high %v7504_v33, %v7504_v33 }
 0x5c9   :  { %v14717_v63 = vrot.slane %v7504_v33, 9  ;;  %v10219_v7 = vpack.c.b16 %v10133_v2, %v10133_v2  ;;  %v7477_v62 = vrot.slane %v7463_v34, %v19814_v13  ;;  %v7478_v52 = vcombine.high %v7470_v18, %v7470_v18  ;;  %v9327_v2 = vld [vmem:[#allocation3 + $0x74] sm:$0x1] }
 0x5ca   :  { %v14709_v37 = vrot.slane %v7470_v18, 9  ;;  %v7513_v30 = vcombine.high %v7511_v25, %v7511_v25  ;;  %v14718_v22 = vrot.slane %v7512_v36, 9  ;;  %v14719_v44 = vrot.slane %v7511_v25, 9 }
 0x5cb   :  { %v9011_v28 = vmax.f32 %v7504_v33, %v14717_v63  ;;  %v10327_v26 = vsel %vm19886_vm2, %v10219_v7, %v10326_v4  ;;  %v7479_v12 = vcombine.high %v7477_v62, %v7477_v62  ;;  %v14710_v59 = vrot.slane %v7478_v52, 9 }
 0x5cc   :  { %v14711_v60 = vrot.slane %v7477_v62, 9  ;;  %10328 = vst [vmem:[#allocation3 + $0x68] sm:$0xf] %v10327_v26  ;;  %v14720_v1 = vrot.slane %v7513_v30, 9  ;;  %v9012_v61 = vmax.f32 %v7512_v36, %v14718_v22  ;;  %v9013_v27 = vmax.f32 %v7511_v25, %v14719_v44  ;;  %v22147_v25 = vld [vmem:[#allocation96_spill] sm:$0xff] }
 0x5cd   :  { %v9003_v10 = vmax.f32 %v7470_v18, %v14709_v37  ;;  %v14712_v42 = vrot.slane %v7479_v12, 9  ;;  %v9004_v46 = vmax.f32 %v7478_v52, %v14710_v59  ;;  %v6570_v32 = vadd.f32 %v20313_v47, %v6499_v14 }
 0x5ce   :  { %v9005_v5 = vmax.f32 %v7477_v62, %v14711_v60  ;;  %v9014_v55 = vmax.f32 %v7513_v30, %v14720_v1  ;;  %v20538_v3 = vsel %vm18783_vm3, %v14955_v50, %v10782_v6  ;;  %v10553_v16 = vshll.u32 %v20515_v39, 16  ;;  %v20554_v1 = vld [vmem:[#allocation3 + $0x38] sm:$0xf] }
 0x5cf   :  { %v9171_v56 = vmax.f32 %v9003_v10, %v9011_v28  ;;  %v9006_v33 = vmax.f32 %v7479_v12, %v14712_v42  ;;  %v9172_v34 = vmax.f32 %v9004_v46, %v9012_v61  ;;  %v6634_v18 = vmax.f32 %v6570_v32, 0.0 }
 0x5d0   :  { %v9173_v31 = vmax.f32 %v9005_v5, %v9013_v27  ;;  %v14993_v14 = vcombine.low %v20418_v54, %v20538_v3  ;;  %v16521_v36 = vadd.f32 %v20247_v53, %v22147_v25  ;;  %v9267_v63 = vsel %vm19725_vm8, 0, %v9266_v57 }
 0x5d1   :  { %v15296_v4 = vpack.c.bf16 %v9171_v56, %v9171_v56  ;;  %v9174_v7 = vmax.f32 %v9006_v33, %v9014_v55  ;;  %v15297_v50 = vpack.c.bf16 %v9172_v34, %v9172_v34  ;;  %v7514_v62 = vcombine.high %v6634_v18, %v6634_v18  ;;  %9268 = vst [vmem:[#allocation3 + $0x70] sm:$0x1] %v9267_v63 }
 0x5d2   :  { %v15298_v6 = vpack.c.bf16 %v9173_v31, %v9173_v31  ;;  %v7521_v37 = vrot.slane %v6634_v18, %v19814_v13  ;;  %11000 = vrot.lane.b32.xlu0 %v14993_v14, %s17494_s13  ;;  %v6497_v30 = vmul.f32 %v20304_v0, %v16521_v36  ;;  %v9328_v54 = vsel %vm19697_vm5, 0, %v9327_v2  ;;  %v20559_v31 = vld [vmem:[#allocation3 + $0x3c] sm:$0x1] }
 0x5d3   :  { %v9945_v52 = vunpack.c.l.b16 %v15296_v4  ;;  %v15299_v22 = vpack.c.bf16 %v9174_v7, %v9174_v7  ;;  %v9946_v53 = vunpack.c.l.b16 %v15297_v50  ;;  %v7528_v28 = vrot.slane %v7514_v62, %v19814_v13  ;;  %9329 = vst [vmem:[#allocation3 + $0x74] sm:$0x1] %v9328_v54  ;;  %v22148_v7 = vld [vmem:[#allocation97_spill] sm:$0xff] }
 0x5d4   :  { %v9947_v44 = vunpack.c.l.b16 %v15298_v6  ;;  %v7529_v12 = vcombine.high %v7521_v37, %v7521_v37  ;;  %v14721_v59 = vrot.slane %v7521_v37, 9  ;;  %v6568_v60 = vadd.f32 %v20313_v47, %v6497_v30 }
 0x5d5   :  { %v10134_v26 = vrot.slane %v9945_v52, 7  ;;  %v9948_v61 = vunpack.c.l.b16 %v15299_v22  ;;  %v10135_v27 = vrot.slane %v9946_v53, 6  ;;  %v7530_v42 = vcombine.high %v7528_v28, %v7528_v28  ;;  %v22149_v53 = vld [vmem:[#allocation98_spill] sm:$0xff] }
 0x5d6   :  { %v10137_v10 = vrot.slane %v9947_v44, 5  ;;  %v14722_v46 = vrot.slane %v7529_v12, 9  ;;  %v14723_v5 = vrot.slane %v7528_v28, 9  ;;  %v9015_v32 = vmax.f32 %v7521_v37, %v14721_v59 }
 0x5d7   :  { %v6632_v57 = vmax.f32 %v6568_v60, 0.0  ;;  %v10136_v55 = vsel %vm9987_vm9, %v10135_v27, %v10134_v26  ;;  %v10139_v56 = vrot.slane %v9948_v61, 4  ;;  %v14724_v33 = vrot.slane %v7530_v42, 9 }
 0x5d8   :  { %v14936_v34 = vcombine.low %v20429_v9, %v20554_v1  ;;  %v10138_v18 = vsel %vm9990_vm10, %v10137_v10, %v10136_v55  ;;  %v9016_v2 = vmax.f32 %v7529_v12, %v14722_v46  ;;  %v9017_v4 = vmax.f32 %v7528_v28, %v14723_v5  ;;  %v22150_v12 = vld [vmem:[#allocation38_spill] sm:$0xff] }
 0x5d9   :  { %v7480_v14 = vcombine.high %v6632_v57, %v6632_v57  ;;  %v9018_v25 = vmax.f32 %v7530_v42, %v14724_v33  ;;  %v7487_v36 = vrot.slane %v6632_v57, %v19814_v13  ;;  %v10140_v63 = vsel %vm9993_vm11, %v10139_v56, %v10138_v18  ;;  %v20586_v57 = vpop.f32.mrb[62].mxu0 }
 0x5da   :  { %11038 = vrot.lane.b32.xlu0 %v14936_v34, %s17500_s20  ;;  %10454 = vst.msk [vmem:[#allocation5 + $0x48] sm:$0xff] %vm10450_vm6, %v14936_v34  ;;  %v16522_v50 = vadd.f32 %v20269_v41, %v22148_v7  ;;  %v14956_v62 = vrot.slane %v20554_v1, 9  ;;  %v10786_v52 = vrot.slane %v20559_v31, 5  ;;  %v10567_v37 = vshll.u32 %v20559_v31, 16 }
 0x5db   :  { %v7494_v6 = vrot.slane %v7480_v14, %v19814_v13  ;;  %v7495_v30 = vcombine.high %v7487_v36, %v7487_v36  ;;  %v14713_v54 = vrot.slane %v7487_v36, 9  ;;  %v16523_v44 = vadd.f32 %v20280_v21, %v22149_v53  ;;  %v10335_v53 = vld [vmem:[#allocation3 + $0x74] sm:$0x1] }
 0x5dc   :  { %v6502_v22 = vmul.f32 %v20304_v0, %v16522_v50  ;;  %v20577_v41 = vsel %vm18783_vm3, %v14956_v62, %v10786_v52  ;;  %v16524_v59 = vadd.f32 %v20283_v23, %v22150_v12  ;;  %v22151_v23 = vld [vmem:[#allocation39_spill] sm:$0xff] }
 0x5dd   :  { %v7496_v28 = vcombine.high %v7494_v6, %v7494_v6  ;;  %v14715_v26 = vrot.slane %v7494_v6, 9  ;;  %v14714_v60 = vrot.slane %v7495_v30, 9  ;;  %v9007_v61 = vmax.f32 %v7487_v36, %v14713_v54 }
 0x5de   :  { %v6573_v27 = vadd.f32 %v20313_v47, %v6502_v22  ;;  %v14968_v10 = vcombine.low %v20538_v3, %v20577_v41  ;;  %v6500_v21 = vmul.f32 %v20304_v0, %v16523_v44  ;;  %v6503_v5 = vmul.f32 %v20304_v0, %v16524_v59 }
 0x5df   :  { %v14716_v42 = vrot.slane %v7496_v28, 9  ;;  %v9009_v46 = vmax.f32 %v7494_v6, %v14715_v26  ;;  %v9008_v55 = vmax.f32 %v7495_v30, %v14714_v60  ;;  %v9175_v56 = vmax.f32 %v9007_v61, %v9015_v32  ;;  %v20596_v61 = vpop.f32.mrb[63].mxu0 }
 0x5e0   :  { %v6637_v33 = vmax.f32 %v6573_v27, 0.0  ;;  %10850 = vrot.lane.b32.xlu1 %v14968_v10, %s17500_s20  ;;  %11154 = vst.msk [vmem:[#allocation5 + $0x40] sm:$0xff] %vm10450_vm6, %v14968_v10  ;;  %v16525_v34 = vadd.f32 %v20287_v29, %v22151_v23  ;;  %v6571_v14 = vadd.f32 %v20313_v47, %v6500_v21  ;;  %v6574_v36 = vadd.f32 %v20313_v47, %v6503_v5 }
 0x5e1   :  { %v9010_v18 = vmax.f32 %v7496_v28, %v14716_v42  ;;  %v9177_v3 = vmax.f32 %v9009_v46, %v9017_v4  ;;  %v9176_v7 = vmax.f32 %v9008_v55, %v9016_v2  ;;  %v15300_v0 = vpack.c.bf16 %v9175_v56, %v9175_v56 }
 0x5e2   :  { %v7565_v50 = vcombine.high %v6637_v33, %v6637_v33  ;;  %v7572_v6 = vrot.slane %v6637_v33, %v19814_v13  ;;  %v6635_v52 = vmax.f32 %v6571_v14, 0.0  ;;  %v6638_v30 = vmax.f32 %v6574_v36, 0.0 }
 0x5e3   :  { %v9178_v32 = vmax.f32 %v9010_v18, %v9018_v25  ;;  %v15302_v62 = vpack.c.bf16 %v9177_v3, %v9177_v3  ;;  %v15301_v54 = vpack.c.bf16 %v9176_v7, %v9176_v7  ;;  %v9949_v22 = vunpack.c.l.b16 %v15300_v0  ;;  %v20605_v7 = vld [vmem:[#allocation12] ss:$0 sm:$0xff] }
 0x5e4   :  { %v7579_v29 = vrot.slane %v7565_v50, %v19814_v13  ;;  %v7580_v44 = vcombine.high %v7572_v6, %v7572_v6  ;;  %v14733_v26 = vrot.slane %v7572_v6, 9  ;;  %v7531_v12 = vcombine.high %v6635_v52, %v6635_v52  ;;  %v10332_v50 = vld [vmem:[#allocation3 + $0x70] sm:$0xf] }
 0x5e5   :  { %v9951_v4 = vunpack.c.l.b16 %v15302_v62  ;;  %v15347_v28 = vpack.c.bf16 %v9178_v32, %v9178_v32  ;;  %v9950_v47 = vunpack.c.l.b16 %v15301_v54  ;;  %v10141_v2 = vrot.slane %v9949_v22, 3 }
 0x5e6   :  { %v7581_v59 = vcombine.high %v7579_v29, %v7579_v29  ;;  %v14734_v60 = vrot.slane %v7580_v44, 9  ;;  %v14735_v10 = vrot.slane %v7579_v29, 9  ;;  %v9027_v42 = vmax.f32 %v7572_v6, %v14733_v26 }
 0x5e7   :  { %v10145_v25 = vrot.slane %v9951_v4, 1  ;;  %v10336_v27 = vsel %vm19725_vm8, %v15347_v28, %v10335_v53  ;;  %v10142_v46 = vsel %vm9996_vm12, %v10141_v2, %v10140_v63  ;;  %v10143_v21 = vrot.slane %v9950_v47, 2 }
 0x5e8   :  { %10337 = vst [vmem:[#allocation3 + $0x74] sm:$0x1] %v10336_v27  ;;  %v14736_v5 = vrot.slane %v7581_v59, 9  ;;  %v9028_v55 = vmax.f32 %v7580_v44, %v14734_v60  ;;  %v9029_v56 = vmax.f32 %v7579_v29, %v14735_v10  ;;  %v7538_v33 = vrot.slane %v6635_v52, %v19814_v13 }
 0x5e9   :  { %v7545_v23 = vrot.slane %v7531_v12, %v19814_v13  ;;  %v7582_v18 = vcombine.high %v6638_v30, %v6638_v30  ;;  %v10144_v3 = vsel %vm9999_vm13, %v10143_v21, %v10142_v46  ;;  %v7589_v36 = vrot.slane %v6638_v30, %v19814_v13 }
 0x5ea   :  { %v9030_v14 = vmax.f32 %v7581_v59, %v14736_v5  ;;  %v6501_v0 = vmul.f32 %v20605_v7, %v16525_v34  ;;  %v10146_v63 = vsel %vm10002_vm15, %v10145_v25, %v10144_v3  ;;  %v7546_v6 = vcombine.high %v7538_v33, %v7538_v33  ;;  %v9269_v25 = vld [vmem:[#allocation3 + $0x78] sm:$0x1]  ;;  %v9330_v5 = vld [vmem:[#allocation3 + $0x7c] sm:$0x1] }
 0x5eb   :  { %v7547_v32 = vcombine.high %v7545_v23, %v7545_v23  ;;  %v14725_v62 = vrot.slane %v7538_v33, 9  ;;  %v10221_v54 = vpack.c.b16 %v10146_v63, %v10146_v63  ;;  %v14727_v52 = vrot.slane %v7545_v23, 9 }
 0x5ec   :  { %v7596_v22 = vrot.slane %v7582_v18, %v19814_v13  ;;  %v7597_v53 = vcombine.high %v7589_v36, %v7589_v36  ;;  %v14726_v29 = vrot.slane %v7546_v6, 9  ;;  %v14737_v28 = vrot.slane %v7589_v36, 9 }
 0x5ed   :  { %v14728_v44 = vrot.slane %v7547_v32, 9  ;;  %v9019_v4 = vmax.f32 %v7538_v33, %v14725_v62  ;;  %v10333_v30 = vsel %vm19886_vm2, %v10221_v54, %v10332_v50  ;;  %v9021_v26 = vmax.f32 %v7545_v23, %v14727_v52  ;;  %v9251_v23 = vld [vmem:[#allocation3 + $0x48] sm:$0x1]  ;;  %v20618_v50 = vld [vmem:[#allocation3 + $0x40] sm:$0xf] }
 0x5ee   :  { %v7598_v34 = vcombine.high %v7596_v22, %v7596_v22  ;;  %v14738_v12 = vrot.slane %v7597_v53, 9  ;;  %10334 = vst [vmem:[#allocation3 + $0x70] sm:$0xf] %v10333_v30  ;;  %v9020_v47 = vmax.f32 %v7546_v6, %v14726_v29  ;;  %v14739_v60 = vrot.slane %v7596_v22, 9 }
 0x5ef   :  { %v9022_v2 = vmax.f32 %v7547_v32, %v14728_v44  ;;  %v9179_v59 = vmax.f32 %v9019_v4, %v9027_v42  ;;  %v9181_v27 = vmax.f32 %v9021_v26, %v9029_v56  ;;  %v20612_v46 = vmax.f32 %v7589_v36, %v14737_v28  ;;  %v20622_v42 = vld [vmem:[#allocation13] ss:$0 sm:$0xff]  ;;  %v17025_v44 = vld [vmem:[#allocation15] sm:$0xff]  }
 0x5f0   :  { %v14740_v10 = vrot.slane %v7598_v34, 9  ;;  %v20614_v21 = vmax.f32 %v7597_v53, %v14738_v12  ;;  %v9180_v33 = vmax.f32 %v9020_v47, %v9028_v55  ;;  %v20616_v63 = vmax.f32 %v7596_v22, %v14739_v60  ;;  %v22152_v26 = vld [vmem:[#allocation40_spill] sm:$0xff] }
 0x5f1   :  { %v9182_v18 = vmax.f32 %v9022_v2, %v9030_v14  ;;  %v15304_v3 = vpack.c.bf16 %v9179_v59, %v9179_v59  ;;  %v15306_v6 = vpack.c.bf16 %v9181_v27, %v9181_v27  ;;  %v6572_v56 = vadd.f32 %v20622_v42, %v6501_v0  ;;  %v17024_v0 = vld [vmem:[#allocation15 + $0x40] sm:$0xff]  }
 0x5f2   :  { %v20620_v32 = vmax.f32 %v7598_v34, %v14740_v10  ;;  %v9270_v36 = vsel %vm19725_vm8, 0, %v9269_v25  ;;  %v15305_v62 = vpack.c.bf16 %v9180_v33, %v9180_v33  ;;  %v9331_v14 = vsel %vm19697_vm5, 0, %v9330_v5  ;;  %v22153_v59 = vld [vmem:[#allocation41_spill] sm:$0xff]  ;;  %15681 = vmatprep.subr.bf16.mxu1 %v17024_v0 }
 0x5f3   :  { %v15307_v54 = vpack.c.bf16 %v9182_v18, %v9182_v18  ;;  %v9953_v55 = vunpack.c.l.b16 %v15304_v3  ;;  %9271 = vst [vmem:[#allocation3 + $0x78] sm:$0x1] %v9270_v36  ;;  %v9955_v52 = vunpack.c.l.b16 %v15306_v6  ;;  %v6636_v22 = vmax.f32 %v6572_v56, 0.0  ;;  %9332 = vst [vmem:[#allocation3 + $0x7c] sm:$0x1] %v9331_v14  ;;  %15682 = vmatpush3.bf16.msra.mxu1 %v17025_v44 }
 0x5f4   :  { %v9252_v53 = vsel %vm19725_vm8, 0, %v9251_v23  ;;  %v14976_v29 = vcombine.low %v20554_v1, %v20618_v50  ;;  %v9954_v4 = vunpack.c.l.b16 %v15305_v62  ;;  %v16526_v34 = vadd.f32 %v20338_v51, %v22152_v26 }
 0x5f5   :  { %v9956_v28 = vunpack.c.l.b16 %v15307_v54  ;;  %v10147_v30 = vrot.slane %v9953_v55, 7  ;;  %9253 = vst [vmem:[#allocation3 + $0x48] sm:$0x1] %v9252_v53  ;;  %v10150_v12 = vrot.slane %v9955_v52, 5  ;;  %v7548_v47 = vcombine.high %v6636_v22, %v6636_v22 }
 0x5f6   :  { %v7555_v2 = vrot.slane %v6636_v22, %v19814_v13  ;;  %10895 = vrot.lane.b32.xlu1 %v14976_v29, %s17512_s11  ;;  %v16527_v60 = vadd.f32 %v20340_v24, %v22153_v59  ;;  %v10148_v25 = vrot.slane %v9954_v4, 6  ;;  %v6506_v10 = vmul.f32 %v20605_v7, %v16526_v34 }
 0x5f7   :  { %v10152_v27 = vrot.slane %v9956_v28, 4  ;;  %v10544_v5 = vshrl.u32 %v20429_v9, 16  ;;  %v7562_v33 = vrot.slane %v7548_v47, %v19814_v13  ;;  %v10547_v24 = vshll.u32 %v20429_v9, 16 }
 0x5f8   :  { %v7563_v51 = vcombine.high %v7555_v2, %v7555_v2  ;;  %v14729_v18 = vrot.slane %v7555_v2, 9  ;;  %v6504_v3 = vmul.f32 %v20605_v7, %v16527_v60  ;;  %v10149_v23 = vsel %vm9987_vm9, %v10148_v25, %v10147_v30 }
 0x5f9   :  { %v6577_v6 = vadd.f32 %v20622_v42, %v6506_v10  ;;  %v20645_v56 = vrot.slane %v10544_v5, 4  ;;  %v10151_v36 = vsel %vm9990_vm10, %v10150_v12, %v10149_v23  ;;  %v7564_v62 = vcombine.high %v7562_v33, %v7562_v33 }
 0x5fa   :  { %v14730_v54 = vrot.slane %v7563_v51, 9  ;;  %v14731_v55 = vrot.slane %v7562_v33, 9  ;;  %v9023_v14 = vmax.f32 %v7555_v2, %v14729_v18  ;;  %v10153_v52 = vsel %vm9993_vm11, %v10152_v27, %v10151_v36 }
 0x5fb   :  { %v6641_v22 = vmax.f32 %v6577_v6, 0.0  ;;  %v6575_v53 = vadd.f32 %v20622_v42, %v6504_v3  ;;  %v14732_v29 = vrot.slane %v7564_v62, 9  ;;  %v10549_v28 = vrot.slane %v10547_v24, 5 }
 0x5fc   :  { %v9024_v0 = vmax.f32 %v7563_v51, %v14730_v54  ;;  %v9025_v44 = vmax.f32 %v7562_v33, %v14731_v55  ;;  %v20651_v4 = vld [vmem:[#allocation3 + $0x48] sm:$0xf]  ;;  %v9183_v30 = vmax.f32 %v9023_v14, %v20612_v46  ;;  %v17026_v54 = vld [vmem:[#allocation15 + $0x48] sm:$0xff]  }
 0x5fd   :  { %v14999_v9 = vcombine.low %v20618_v50, %v20651_v4  ;;  %v11067_v26 = vshrl.u32 %v20651_v4, 16  ;;  %v11070_v34 = vshll.u32 %v20651_v4, 16  ;;  %v9026_v12 = vmax.f32 %v7564_v62, %v14732_v29  ;;  %v17027_v55 = vld [vmem:[#allocation15 + $0x8] sm:$0xff]   ;;  %15683 = vmatprep.subr.bf16.mxu1 %v17026_v54 }
 0x5fe   :  { %v9184_v47 = vmax.f32 %v9024_v0, %v20614_v21  ;;  %v9185_v2 = vmax.f32 %v9025_v44, %v20616_v63  ;;  %v7633_v59 = vcombine.high %v6641_v22, %v6641_v22  ;;  %v15308_v60 = vpack.c.bf16 %v9183_v30, %v9183_v30  ;;  %v10341_v21 = vld [vmem:[#allocation3 + $0x7c] sm:$0x1]  ;;  %15684 = vmatpush3.bf16.msra.mxu1 %v17027_v55 }
 0x5ff   :  { %v20660_v25 = vrot.slane %v11067_v26, 4  ;;  %v20662_v27 = vrot.slane %v11070_v34, 5  ;;  %11040 = vrot.lane.b32.xlu0 %v14999_v9, %s17500_s20  ;;  %v7640_v46 = vrot.slane %v6641_v22, %v19814_v13  ;;  %v9186_v10 = vmax.f32 %v9026_v12, %v20620_v32 }
 0x600   :  { %v15309_v5 = vpack.c.bf16 %v9184_v47, %v9184_v47  ;;  %v15310_v33 = vpack.c.bf16 %v9185_v2, %v9185_v2  ;;  %v7647_v51 = vrot.slane %v7633_v59, %v19814_v13  ;;  %v9957_v18 = vunpack.c.l.b16 %v15308_v60 }
 0x601   :  { %v7648_v3 = vcombine.high %v7640_v46, %v7640_v46  ;;  %v14749_v63 = vrot.slane %v7640_v46, 9  ;;  %v6639_v23 = vmax.f32 %v6575_v53, 0.0  ;;  %v15348_v36 = vpack.c.bf16 %v9186_v10, %v9186_v10  ;;  %v10338_v10 = vld [vmem:[#allocation3 + $0x78] sm:$0xf] }
 0x602   :  { %v9958_v6 = vunpack.c.l.b16 %v15309_v5  ;;  %v9959_v24 = vunpack.c.l.b16 %v15310_v33  ;;  %v7649_v62 = vcombine.high %v7647_v51, %v7647_v51  ;;  %v10154_v14 = vrot.slane %v9957_v18, 3 }
 0x603   :  { %v14750_v29 = vrot.slane %v7648_v3, 9  ;;  %v14751_v22 = vrot.slane %v7647_v51, 9  ;;  %v9043_v0 = vmax.f32 %v7640_v46, %v14749_v63  ;;  %v10342_v30 = vsel %vm19725_vm8, %v15348_v36, %v10341_v21 }
 0x604   :  { %v10156_v32 = vrot.slane %v9958_v6, 2  ;;  %v10158_v44 = vrot.slane %v9959_v24, 1  ;;  %v14752_v9 = vrot.slane %v7649_v62, 9  ;;  %v10155_v26 = vsel %vm9996_vm12, %v10154_v14, %v10153_v52  ;;  %10343 = vst [vmem:[#allocation3 + $0x7c] sm:$0x1] %v10342_v30  ;;  %v22154_v30 = vld [vmem:[#allocation42_spill] sm:$0xff] }
 0x605   :  { %v9044_v53 = vmax.f32 %v7648_v3, %v14750_v29  ;;  %v9045_v34 = vmax.f32 %v7647_v51, %v14751_v22  ;;  %v7599_v12 = vcombine.high %v6639_v23, %v6639_v23  ;;  %v7606_v59 = vrot.slane %v6639_v23, %v19814_v13  ;;  %v9272_v22 = vld [vmem:[#allocation3 + $0x80] sm:$0x1] }
 0x606   :  { %v10157_v47 = vsel %vm9999_vm13, %v10156_v32, %v10155_v26  ;;  %v9046_v2 = vmax.f32 %v7649_v62, %v14752_v9  ;;  %v10550_v60 = vor.u32 %v10549_v28, %v20645_v56  ;;  %v10555_v52 = vrot.slane %v10553_v16, 5  ;;  %v17029_v16 = vld [vmem:[#allocation15 + $0x50] sm:$0xff]  }
 0x607   :  { %v10159_v46 = vsel %vm10002_vm15, %v10158_v44, %v10157_v47  ;;  %v7613_v5 = vrot.slane %v7599_v12, %v19814_v13  ;;  %v10558_v33 = vshrl.u32 %v20554_v1, 16  ;;  %v7614_v18 = vcombine.high %v7606_v59, %v7606_v59  ;;  %v17030_v62 = vld [vmem:[#allocation15 + $0x10] sm:$0xff]   ;;  %15685 = vmatprep.subr.bf16.mxu1 %v17029_v16  ;;  %v17033_v16 = vld [vmem:[#allocation15 + $0x60] sm:$0xff]  }
 0x608   :  { %v10223_v51 = vpack.c.b16 %v10159_v46, %v10159_v46  ;;  %v14741_v21 = vrot.slane %v7606_v59, 9  ;;  %v10551_v3 = vrot.slane %v10550_v60, 4  ;;  %v10561_v23 = vshll.u32 %v20554_v1, 16  ;;  %v9333_v46 = vld [vmem:[#allocation3 + $0x84] sm:$0x1]  ;;  %15686 = vmatpush3.bf16.msra.mxu1 %v17030_v62  ;;  %v17034_v62 = vld [vmem:[#allocation15 + $0x20] sm:$0xff]  }
 0x609   :  { %v7615_v63 = vcombine.high %v7613_v5, %v7613_v5  ;;  %v14743_v6 = vrot.slane %v7613_v5, 9  ;;  %v10560_v24 = vrot.slane %v10558_v33, 4  ;;  %v14742_v28 = vrot.slane %v7614_v18, 9 }
 0x60a   :  { %v10339_v56 = vsel %vm19886_vm2, %v10223_v51, %v10338_v10  ;;  %v9035_v36 = vmax.f32 %v7606_v59, %v14741_v21  ;;  %v10556_v39 = vsel %vm17881_vm14, %v10551_v3, %v10555_v52  ;;  %v10563_v14 = vrot.slane %v10561_v23, 5  ;;  %v22155_v59 = vld [vmem:[#allocation85_spill] sm:$0xff]  ;;  %v9312_v21 = vld [vmem:[#allocation3 + $0x4c] sm:$0x1] }
 0x60b   :  { %10340 = vst [vmem:[#allocation3 + $0x78] sm:$0xf] %v10339_v56  ;;  %v14744_v54 = vrot.slane %v7615_v63, 9  ;;  %v9037_v55 = vmax.f32 %v7613_v5, %v14743_v6  ;;  %v10569_v29 = vrot.slane %v10567_v37, 5  ;;  %v9036_v32 = vmax.f32 %v7614_v18, %v14742_v28 }
 0x60c   :  { %v9187_v1 = vmax.f32 %v9035_v36, %v9043_v0  ;;  %v14983_v44 = vcombine.low %v20506_v40, %v10556_v39  ;;  %v16528_v9 = vadd.f32 %v20385_v58, %v22154_v30  ;;  %v10564_v47 = vor.u32 %v10563_v14, %v10560_v24  ;;  %v17031_v0 = vld [vmem:[#allocation15 + $0x58] sm:$0xff]   ;;  %v20705_v36 = vld [vmem:[#allocation3 + $0x44] sm:$0x1] }
 0x60d   :  { %v9038_v26 = vmax.f32 %v7615_v63, %v14744_v54  ;;  %v9189_v12 = vmax.f32 %v9037_v55, %v9045_v34  ;;  %v16529_v60 = vadd.f32 %v20411_v11, %v22155_v59  ;;  %v9188_v10 = vmax.f32 %v9036_v32, %v9044_v53  ;;  %v17032_v58 = vld [vmem:[#allocation15 + $0x18] sm:$0xff]   ;;  %15687 = vmatprep.subr.bf16.mxu1 %v17031_v0 }
 0x60e   :  { %v15312_v31 = vpack.c.bf16 %v9187_v1, %v9187_v1  ;;  %10970 = vst.msk [vmem:[#allocation5 + $0x38] sm:$0xff] %vm10450_vm6, %v14983_v44  ;;  %v6507_v37 = vmul.f32 %v20605_v7, %v16528_v9  ;;  %v9273_v40 = vsel %vm19725_vm8, 0, %v9272_v22  ;;  %v10565_v34 = vrot.slane %v10564_v47, 4  ;;  %15688 = vmatpush3.bf16.msra.mxu1 %v17032_v58  ;;  %v17035_v22 = vld [vmem:[#allocation15 + $0x68] sm:$0xff]   ;;  %v17037_v58 = vld [vmem:[#allocation15 + $0x70] sm:$0xff]  }
 0x60f   :  { %v9190_v5 = vmax.f32 %v9038_v26, %v9046_v2  ;;  %v15314_v52 = vpack.c.bf16 %v9189_v12, %v9189_v12  ;;  %v6505_v33 = vmul.f32 %v20605_v7, %v16529_v60  ;;  %9274 = vst [vmem:[#allocation3 + $0x80] sm:$0x1] %v9273_v40  ;;  %v15313_v11 = vpack.c.bf16 %v9188_v10, %v9188_v10  ;;  %v17036_v10 = vld [vmem:[#allocation15 + $0x28] sm:$0xff]  }
 0x610   :  { %v9961_v51 = vunpack.c.l.b16 %v15312_v31  ;;  %v6578_v53 = vadd.f32 %v20622_v42, %v6507_v37  ;;  %v9334_v18 = vsel %vm19697_vm5, 0, %v9333_v46  ;;  %v20701_v6 = vsel %vm17881_vm14, %v10565_v34, %v10569_v29  ;;  %15689 = vmatprep.subr.bf16.mxu1 %v17033_v16 }
 0x611   :  { %v15315_v3 = vpack.c.bf16 %v9190_v5, %v9190_v5  ;;  %v9963_v63 = vunpack.c.l.b16 %v15314_v52  ;;  %v6576_v2 = vadd.f32 %v20622_v42, %v6505_v33  ;;  %9335 = vst [vmem:[#allocation3 + $0x84] sm:$0x1] %v9334_v18  ;;  %v9962_v24 = vunpack.c.l.b16 %v15313_v11 }
 0x612   :  { %v10160_v23 = vrot.slane %v9961_v51, 7  ;;  %v14944_v56 = vcombine.low %v10556_v39, %v20701_v6  ;;  %v6642_v28 = vmax.f32 %v6578_v53, 0.0  ;;  %v9313_v29 = vsel %vm19697_vm5, 0, %v9312_v21  ;;  %15690 = vmatpush3.bf16.msra.mxu1 %v17034_v62 }
 0x613   :  { %v9964_v54 = vunpack.c.l.b16 %v15315_v3  ;;  %v10163_v55 = vrot.slane %v9963_v63, 5  ;;  %v6640_v14 = vmax.f32 %v6576_v2, 0.0  ;;  %v10161_v32 = vrot.slane %v9962_v24, 6  ;;  %9314 = vst [vmem:[#allocation3 + $0x4c] sm:$0x1] %v9313_v29  ;;  %15691 = vmatprep.subr.bf16.mxu1 %v17035_v22  ;;  %v17038_v24 = vld [vmem:[#allocation15 + $0x30] sm:$0xff]  }
 0x614   :  { %11102 = vrot.lane.b32.xlu0 %v14944_v56, %s17512_s11  ;;  %10713 = vrot.lane.b32.xlu1 %v14944_v56, %s17494_s13  ;;  %v7650_v1 = vcombine.high %v6642_v28, %v6642_v28  ;;  %v7657_v39 = vrot.slane %v6642_v28, %v19814_v13  ;;  %v14989_v44 = vrot.slane %v20618_v50, 9  ;;  %v10980_v12 = vrot.slane %v20705_v36, 5 }
 0x615   :  { %v10165_v30 = vrot.slane %v9964_v54, 4  ;;  %v7616_v9 = vcombine.high %v6640_v14, %v6640_v14  ;;  %v7623_v26 = vrot.slane %v6640_v14, %v19814_v13  ;;  %v10162_v47 = vsel %vm9987_vm9, %v10161_v32, %v10160_v23  ;;  %v17039_v54 = vld [vmem:[#allocation15 + $0x78] sm:$0xff]  }
 0x616   :  { %v7664_v59 = vrot.slane %v7650_v1, %v19814_v13  ;;  %v7665_v60 = vcombine.high %v7657_v39, %v7657_v39  ;;  %v14753_v46 = vrot.slane %v7657_v39, 9  ;;  %v10164_v31 = vsel %vm9990_vm10, %v10163_v55, %v10162_v47  ;;  %15692 = vmatpush3.bf16.msra.mxu1 %v17036_v10 }
 0x617   :  { %v7630_v37 = vrot.slane %v7616_v9, %v19814_v13  ;;  %v7631_v40 = vcombine.high %v7623_v26, %v7623_v26  ;;  %v14745_v0 = vrot.slane %v7623_v26, 9  ;;  %v10166_v2 = vsel %vm9993_vm11, %v10165_v30, %v10164_v31  ;;  %15693 = vmatprep.subr.bf16.mxu1 %v17037_v58  ;;  %v9254_v9 = vld [vmem:[#allocation3 + $0x50] sm:$0x1] }
 0x618   :  { %v7666_v5 = vcombine.high %v7664_v59, %v7664_v59  ;;  %v14754_v52 = vrot.slane %v7665_v60, 9  ;;  %v14755_v34 = vrot.slane %v7664_v59, 9  ;;  %v9047_v33 = vmax.f32 %v7657_v39, %v14753_v46  ;;  %v22156_v46 = vld [vmem:[#allocation43_spill] sm:$0xff] }
 0x619   :  { %v7632_v11 = vcombine.high %v7630_v37, %v7630_v37  ;;  %v14746_v51 = vrot.slane %v7631_v40, 9  ;;  %v14747_v53 = vrot.slane %v7630_v37, 9  ;;  %v9039_v18 = vmax.f32 %v7623_v26, %v14745_v0  ;;  %v9315_v26 = vld [vmem:[#allocation3 + $0x54] sm:$0x1]  ;;  %v20734_v0 = vld [vmem:[#allocation3 + $0x5c] sm:$0x1] }
 0x61a   :  { %v14756_v21 = vrot.slane %v7666_v5, 9  ;;  %v9048_v3 = vmax.f32 %v7665_v60, %v14754_v52  ;;  %v9049_v63 = vmax.f32 %v7664_v59, %v14755_v34  ;;  %v20720_v62 = vld [vmem:[#allocation3 + $0x4c] sm:$0x1]  ;;  %v10981_v14 = vsel %vm18783_vm3, %v14989_v44, %v10980_v12  ;;  %15694 = vmatpush3.bf16.msra.mxu1 %v17038_v24 }
 0x61b   :  { %v14748_v23 = vrot.slane %v7632_v11, 9  ;;  %v9040_v56 = vmax.f32 %v7631_v40, %v14746_v51  ;;  %v9041_v28 = vmax.f32 %v7630_v37, %v14747_v53  ;;  %v9191_v16 = vmax.f32 %v9039_v18, %v9047_v33  ;;  %v20732_v40 = vld [vmem:[#allocation3 + $0x58] sm:$0xf]  ;;  %15695 = vmatprep.subr.bf16.mxu1 %v17039_v54 }
 0x61c   :  { %v9050_v55 = vmax.f32 %v7666_v5, %v14756_v21  ;;  %v15003_v29 = vrot.slane %v20651_v4, 9  ;;  %v11134_v22 = vrot.slane %v20720_v62, 5  ;;  %v14994_v47 = vcombine.low %v20577_v41, %v10981_v14  ;;  %v17040_v4 = vld [vmem:[#allocation15 + $0x38] sm:$0xff]   ;;  %v10347_v41 = vld [vmem:[#allocation3 + $0x84] sm:$0x1] }
 0x61d   :  { %v9042_v32 = vmax.f32 %v7632_v11, %v14748_v23  ;;  %v9192_v1 = vmax.f32 %v9040_v56, %v9048_v3  ;;  %v9193_v39 = vmax.f32 %v9041_v28, %v9049_v63  ;;  %v15316_v30 = vpack.c.bf16 %v9191_v16, %v9191_v16  ;;  %v22157_v21 = vld [vmem:[#allocation44_spill] sm:$0xff] }
 0x61e   :  { %v11135_v59 = vsel %vm18783_vm3, %v15003_v29, %v11134_v22  ;;  %v10932_v60 = vshll.u32 %v20705_v36, 16  ;;  %v16530_v44 = vadd.f32 %v20458_v20, %v22156_v46  ;;  %11002 = vrot.lane.b32.xlu0 %v14994_v47, %s17494_s13  ;;  %v9255_v20 = vsel %vm19725_vm8, 0, %v9254_v9  ;;  %15696 = vmatpush3.bf16.msra.mxu1 %v17040_v4 }
 0x61f   :  { %v9194_v12 = vmax.f32 %v9042_v32, %v9050_v55  ;;  %v15317_v10 = vpack.c.bf16 %v9192_v1, %v9192_v1  ;;  %v15318_v31 = vpack.c.bf16 %v9193_v39, %v9193_v39  ;;  %v9965_v37 = vunpack.c.l.b16 %v15316_v30  ;;  %9256 = vst [vmem:[#allocation3 + $0x50] sm:$0x1] %v9255_v20  ;;  %v10344_v32 = vld [vmem:[#allocation3 + $0x80] sm:$0xf] }
 0x620   :  { %v15005_v58 = vcombine.low %v10981_v14, %v11135_v59  ;;  %v6510_v36 = vmul.f32 %v20605_v7, %v16530_v44  ;;  %v9316_v5 = vsel %vm19697_vm5, 0, %v9315_v26  ;;  %v14958_v53 = vrot.slane %v20732_v40, 9 }
 0x621   :  { %v9966_v52 = vunpack.c.l.b16 %v15317_v10  ;;  %v9967_v34 = vunpack.c.l.b16 %v15318_v31  ;;  %v10167_v33 = vrot.slane %v9965_v37, 3  ;;  %v15349_v11 = vpack.c.bf16 %v9194_v12, %v9194_v12  ;;  %9317 = vst [vmem:[#allocation3 + $0x54] sm:$0x1] %v9316_v5 }
 0x622   :  { %11155 = vst.msk [vmem:[#allocation5 + $0x58] sm:$0xff] %vm10450_vm6, %v15005_v58  ;;  %v6581_v51 = vadd.f32 %v20622_v42, %v6510_v36  ;;  %v10794_v18 = vrot.slane %v20734_v0, 5  ;;  %v16531_v3 = vadd.f32 %v20465_v19, %v22157_v21  ;;  %v10923_v55 = vshrl.u32 %v20618_v50, 16 }
 0x623   :  { %v10168_v63 = vsel %vm9996_vm12, %v10167_v33, %v10166_v2  ;;  %v10169_v24 = vrot.slane %v9966_v52, 2  ;;  %v10171_v23 = vrot.slane %v9967_v34, 1  ;;  %v10348_v56 = vsel %vm19725_vm8, %v15349_v11, %v10347_v41 }
 0x624   :  { %10349 = vst [vmem:[#allocation3 + $0x84] sm:$0x1] %v10348_v56  ;;  %v6645_v28 = vmax.f32 %v6581_v51, 0.0  ;;  %v20753_v16 = vsel %vm18783_vm3, %v14958_v53, %v10794_v18  ;;  %v6508_v54 = vmul.f32 %v20605_v7, %v16531_v3  ;;  %v10926_v14 = vshll.u32 %v20618_v50, 16 }
 0x625   :  { %v10170_v19 = vsel %vm9999_vm13, %v10169_v24, %v10168_v63  ;;  %v10934_v2 = vrot.slane %v10932_v60, 5  ;;  %v11073_v29 = vor.u32 %v20662_v27, %v20660_v25  ;;  %v10925_v26 = vrot.slane %v10923_v55, 4  ;;  %v9275_v24 = vld [vmem:[#allocation3 + $0x88] sm:$0x1] }
 0x626   :  { %v10172_v22 = vsel %vm10002_vm15, %v10171_v23, %v10170_v19  ;;  %v7701_v1 = vcombine.high %v6645_v28, %v6645_v28  ;;  %v7708_v39 = vrot.slane %v6645_v28, %v19814_v13  ;;  %v6579_v30 = vadd.f32 %v20622_v42, %v6508_v54  ;;  %v20765_v60 = vld [vmem:[#allocation3 + $0x50] sm:$0xf]  ;;  %v22158_v54 = vld [vmem:[#allocation45_spill] sm:$0xff] }
 0x627   :  { %v10225_v9 = vpack.c.b16 %v10172_v22, %v10172_v22  ;;  %v10928_v47 = vrot.slane %v10926_v14, 5  ;;  %v11074_v59 = vrot.slane %v11073_v29, 4  ;;  %v14957_v12 = vrot.slane %v20765_v60, 9 }
 0x628   :  { %v7715_v46 = vrot.slane %v7701_v1, %v19814_v13  ;;  %v7716_v44 = vcombine.high %v7708_v39, %v7708_v39  ;;  %v14765_v50 = vrot.slane %v7708_v39, 9  ;;  %v20767_v4 = vld [vmem:[#allocation3 + $0x54] sm:$0x1]  ;;  %v6643_v25 = vmax.f32 %v6579_v30, 0.0 }
 0x629   :  { %v10345_v27 = vsel %vm19886_vm2, %v10225_v9, %v10344_v32  ;;  %v10790_v10 = vrot.slane %v20767_v4, 5  ;;  %v10929_v31 = vor.u32 %v10928_v47, %v10925_v26  ;;  %v11076_v56 = vshll.u32 %v20720_v62, 16  ;;  %v9336_v32 = vld [vmem:[#allocation3 + $0x8c] sm:$0x1]  ;;  %v20791_v47 = vld [vmem:[#allocation3 + $0x60] sm:$0xf] }
 0x62a   :  { %10346 = vst [vmem:[#allocation3 + $0x80] sm:$0xf] %v10345_v27  ;;  %v7717_v37 = vcombine.high %v7715_v46, %v7715_v46  ;;  %v14766_v41 = vrot.slane %v7716_v44, 9  ;;  %v14767_v58 = vrot.slane %v7715_v46, 9  ;;  %v9059_v36 = vmax.f32 %v7708_v39, %v14765_v50  ;;  %v22159_v39 = vld [vmem:[#allocation46_spill] sm:$0xff] }
 0x62b   :  { %v10791_v20 = vsel %vm18783_vm3, %v14957_v12, %v10790_v10  ;;  %v7667_v5 = vcombine.high %v6643_v25, %v6643_v25  ;;  %v7674_v52 = vrot.slane %v6643_v25, %v19814_v13  ;;  %v10930_v34 = vrot.slane %v10929_v31, 4 }
 0x62c   :  { %v14768_v33 = vrot.slane %v7717_v37, 9  ;;  %v9060_v11 = vmax.f32 %v7716_v44, %v14766_v41  ;;  %v9061_v51 = vmax.f32 %v7715_v46, %v14767_v58  ;;  %v14969_v53 = vcombine.low %v10791_v20, %v20753_v16 }
 0x62d   :  { %v7681_v18 = vrot.slane %v7667_v5, %v19814_v13  ;;  %v7682_v21 = vcombine.high %v7674_v52, %v7674_v52  ;;  %v14757_v3 = vrot.slane %v7674_v52, 9  ;;  %v10935_v63 = vsel %vm17881_vm14, %v10930_v34, %v10934_v2 }
 0x62e   :  { %v9062_v23 = vmax.f32 %v7717_v37, %v14768_v33  ;;  %10852 = vrot.lane.b32.xlu1 %v14969_v53, %s17500_s20  ;;  %v14984_v28 = vcombine.low %v20701_v6, %v10935_v63  ;;  %v16532_v55 = vadd.f32 %v20485_v48, %v22158_v54  ;;  %v11078_v1 = vrot.slane %v11076_v56, 5 }
 0x62f   :  { %v7683_v19 = vcombine.high %v7681_v18, %v7681_v18  ;;  %v14758_v14 = vrot.slane %v7682_v21, 9  ;;  %v14759_v29 = vrot.slane %v7681_v18, 9  ;;  %v9051_v22 = vmax.f32 %v7674_v52, %v14757_v3 }
 0x630   :  { %10971 = vst.msk [vmem:[#allocation5 + $0x50] sm:$0xff] %vm10450_vm6, %v14984_v28  ;;  %v6511_v2 = vmul.f32 %v20605_v7, %v16532_v55  ;;  %v16533_v30 = vadd.f32 %v20490_v35, %v22159_v39  ;;  %v9276_v62 = vsel %vm19725_vm8, 0, %v9275_v24  ;;  %v11079_v46 = vsel %vm17881_vm14, %v11074_v59, %v11078_v1 }
 0x631   :  { %v14760_v6 = vrot.slane %v7683_v19, 9  ;;  %v9052_v9 = vmax.f32 %v7682_v21, %v14758_v14  ;;  %v9053_v26 = vmax.f32 %v7681_v18, %v14759_v29  ;;  %v9195_v48 = vmax.f32 %v9051_v22, %v9059_v36  ;;  %9277 = vst [vmem:[#allocation3 + $0x88] sm:$0x1] %v9276_v62 }
 0x632   :  { %v6582_v44 = vadd.f32 %v20622_v42, %v6511_v2  ;;  %v6509_v50 = vmul.f32 %v20605_v7, %v16533_v30  ;;  %v9337_v35 = vsel %vm19697_vm5, 0, %v9336_v32  ;;  %v15001_v31 = vcombine.low %v10935_v63, %v11079_v46 }
 0x633   :  { %v9054_v25 = vmax.f32 %v7683_v19, %v14760_v6  ;;  %v9196_v27 = vmax.f32 %v9052_v9, %v9060_v11  ;;  %v9197_v12 = vmax.f32 %v9053_v26, %v9061_v51  ;;  %v15320_v10 = vpack.c.bf16 %v9195_v48, %v9195_v48  ;;  %9338 = vst [vmem:[#allocation3 + $0x8c] sm:$0x1] %v9337_v35  ;;  %v22160_v11 = vld [vmem:[#allocation47_spill] sm:$0xff] }
 0x634   :  { %v6646_v37 = vmax.f32 %v6582_v44, 0.0  ;;  %v6580_v41 = vadd.f32 %v20622_v42, %v6509_v50  ;;  %v14977_v58 = vcombine.low %v20732_v40, %v20791_v47  ;;  %11104 = vrot.lane.b32.xlu0 %v15001_v31, %s17512_s11  ;;  %v16534_v51 = vadd.f32 %v20498_v43, %v22160_v11  ;;  %v20812_v50 = vld [vmem:[#allocation3 + $0x64] sm:$0x1] }
 0x635   :  { %v9198_v59 = vmax.f32 %v9054_v25, %v9062_v23  ;;  %v15321_v36 = vpack.c.bf16 %v9196_v27, %v9196_v27  ;;  %v15322_v20 = vpack.c.bf16 %v9197_v12, %v9197_v12  ;;  %v9969_v5 = vunpack.c.l.b16 %v15320_v10 }
 0x636   :  { %v7718_v52 = vcombine.high %v6646_v37, %v6646_v37  ;;  %v7725_v34 = vrot.slane %v6646_v37, %v19814_v13  ;;  %v6644_v33 = vmax.f32 %v6580_v41, 0.0  ;;  %10897 = vrot.lane.b32.xlu1 %v14977_v58, %s17512_s11  ;;  %v6514_v27 = vmul.f32 %v20605_v7, %v16534_v51 }
 0x637   :  { %v15323_v53 = vpack.c.bf16 %v9198_v59, %v9198_v59  ;;  %v9970_v18 = vunpack.c.l.b16 %v15321_v36  ;;  %v9971_v21 = vunpack.c.l.b16 %v15322_v20  ;;  %v10173_v3 = vrot.slane %v9969_v5, 7  ;;  %v22161_v20 = vld [vmem:[#allocation48_spill] sm:$0xff] }
 0x638   :  { %v7732_v63 = vrot.slane %v7718_v52, %v19814_v13  ;;  %v7733_v24 = vcombine.high %v7725_v34, %v7725_v34  ;;  %v14769_v23 = vrot.slane %v7725_v34, 9  ;;  %v7684_v56 = vcombine.high %v6644_v33, %v6644_v33 }
 0x639   :  { %v9972_v28 = vunpack.c.l.b16 %v15323_v53  ;;  %v10174_v54 = vrot.slane %v9970_v18, 6  ;;  %v10176_v55 = vrot.slane %v9971_v21, 5  ;;  %v7691_v19 = vrot.slane %v6644_v33, %v19814_v13 }
 0x63a   :  { %v7734_v14 = vcombine.high %v7732_v63, %v7732_v63  ;;  %v14770_v29 = vrot.slane %v7733_v24, 9  ;;  %v14771_v22 = vrot.slane %v7732_v63, 9  ;;  %v9063_v32 = vmax.f32 %v7725_v34, %v14769_v23 }
 0x63b   :  { %v10175_v43 = vsel %vm9987_vm9, %v10174_v54, %v10173_v3  ;;  %v10178_v1 = vrot.slane %v9972_v28, 4  ;;  %v7698_v2 = vrot.slane %v7684_v56, %v19814_v13  ;;  %v7699_v39 = vcombine.high %v7691_v19, %v7691_v19  ;;  %v10353_v56 = vld [vmem:[#allocation3 + $0x8c] sm:$0x1] }
 0x63c   :  { %v10177_v30 = vsel %vm9990_vm10, %v10176_v55, %v10175_v43  ;;  %v14772_v62 = vrot.slane %v7734_v14, 9  ;;  %v9064_v6 = vmax.f32 %v7733_v24, %v14770_v29  ;;  %v9065_v9 = vmax.f32 %v7732_v63, %v14771_v22 }
 0x63d   :  { %v7700_v26 = vcombine.high %v7698_v2, %v7698_v2  ;;  %v14761_v48 = vrot.slane %v7691_v19, 9  ;;  %v14762_v46 = vrot.slane %v7699_v39, 9  ;;  %v14763_v44 = vrot.slane %v7698_v2, 9 }
 0x63e   :  { %v9066_v35 = vmax.f32 %v7734_v14, %v14772_v62  ;;  %v10179_v25 = vsel %vm9993_vm11, %v10178_v1, %v10177_v30  ;;  %v14959_v12 = vrot.slane %v20791_v47, 9  ;;  %v6585_v58 = vadd.f32 %v20622_v42, %v6514_v27 }
 0x63f   :  { %v14764_v10 = vrot.slane %v7700_v26, 9  ;;  %v9055_v31 = vmax.f32 %v7691_v19, %v14761_v48  ;;  %v9056_v37 = vmax.f32 %v7699_v39, %v14762_v46  ;;  %v9057_v41 = vmax.f32 %v7698_v2, %v14763_v44 }
 0x640   :  { %v10798_v59 = vrot.slane %v20812_v50, 5  ;;  %v10609_v36 = vshll.u32 %v20812_v50, 16  ;;  %v16535_v5 = vadd.f32 %v20534_v17, %v22161_v20  ;;  %v6649_v51 = vmax.f32 %v6585_v58, 0.0  ;;  %v10350_v58 = vld [vmem:[#allocation3 + $0x88] sm:$0xf] }
 0x641   :  { %v9058_v52 = vmax.f32 %v7700_v26, %v14764_v10  ;;  %v9199_v34 = vmax.f32 %v9055_v31, %v9063_v32  ;;  %v9200_v33 = vmax.f32 %v9056_v37, %v9064_v6  ;;  %v9201_v11 = vmax.f32 %v9057_v41, %v9065_v9  ;;  %v20839_v37 = vpop.permute.xlu1 %10844 }
 0x642   :  { %v20824_v53 = vsel %vm18783_vm3, %v14959_v12, %v10798_v59  ;;  %v6512_v18 = vmul.f32 %v20605_v7, %v16535_v5  ;;  %v10572_v21 = vshrl.u32 %v20765_v60, 16  ;;  %v7769_v28 = vcombine.high %v6649_v51, %v6649_v51 }
 0x643   :  { %v9202_v3 = vmax.f32 %v9058_v52, %v9066_v35  ;;  %v15324_v63 = vpack.c.bf16 %v9199_v34, %v9199_v34  ;;  %v15325_v24 = vpack.c.bf16 %v9200_v33, %v9200_v33  ;;  %v15326_v23 = vpack.c.bf16 %v9201_v11, %v9201_v11 }
 0x644   :  { %v7776_v17 = vrot.slane %v6649_v51, %v19814_v13  ;;  %v14995_v54 = vcombine.low %v20753_v16, %v20824_v53  ;;  %v6583_v55 = vadd.f32 %v20622_v42, %v6512_v18  ;;  %v7783_v7 = vrot.slane %v7769_v28, %v19814_v13 }
 0x645   :  { %v9973_v19 = vunpack.c.l.b16 %v15324_v63  ;;  %v9974_v14 = vunpack.c.l.b16 %v15325_v24  ;;  %v9975_v29 = vunpack.c.l.b16 %v15326_v23  ;;  %v15350_v22 = vpack.c.bf16 %v9202_v3, %v9202_v3 }
 0x646   :  { %v7784_v32 = vcombine.high %v7776_v17, %v7776_v17  ;;  %v14781_v43 = vrot.slane %v7776_v17, 9  ;;  %11004 = vrot.lane.b32.xlu0 %v14995_v54, %s17494_s13  ;;  %v6647_v1 = vmax.f32 %v6583_v55, 0.0  ;;  %v7785_v16 = vcombine.high %v7783_v7, %v7783_v7 }
 0x647   :  { %v10180_v2 = vrot.slane %v9973_v19, 3  ;;  %v10182_v39 = vrot.slane %v9974_v14, 2  ;;  %v10184_v30 = vrot.slane %v9975_v29, 1  ;;  %v10354_v62 = vsel %vm19725_vm8, %v15350_v22, %v10353_v56  ;;  %v20850_v29 = vpop.permute.xlu1 %10889 }
 0x648   :  { %10355 = vst [vmem:[#allocation3 + $0x8c] sm:$0x1] %v10354_v62  ;;  %v14782_v6 = vrot.slane %v7784_v32, 9  ;;  %v14783_v9 = vrot.slane %v7783_v7, 9  ;;  %v9075_v26 = vmax.f32 %v7776_v17, %v14781_v43  ;;  %v7735_v46 = vcombine.high %v6647_v1, %v6647_v1  ;;  %v20853_v62 = vpop.permute.xlu0 %10707 }
 0x649   :  { %v10181_v48 = vsel %vm9996_vm12, %v10180_v2, %v10179_v25  ;;  %v7742_v44 = vrot.slane %v6647_v1, %v19814_v13  ;;  %v10574_v35 = vrot.slane %v10572_v21, 4  ;;  %v14784_v12 = vrot.slane %v7785_v16, 9 }
 0x64a   :  { %v10183_v27 = vsel %vm9999_vm13, %v10182_v39, %v10181_v48  ;;  %v9076_v10 = vmax.f32 %v7784_v32, %v14782_v6  ;;  %v9077_v31 = vmax.f32 %v7783_v7, %v14783_v9  ;;  %v7749_v59 = vrot.slane %v7735_v46, %v19814_v13  ;;  %v20855_v48 = vld [vmem:[#allocation15 + $0x80] sm:$0xff]  }
 0x64b   :  { %v10185_v41 = vsel %vm10002_vm15, %v10184_v30, %v10183_v27  ;;  %v7750_v20 = vcombine.high %v7742_v44, %v7742_v44  ;;  %v14773_v5 = vrot.slane %v7742_v44, 9  ;;  %v9078_v25 = vmax.f32 %v7785_v16, %v14784_v12  ;;  %v20860_v27 = vpop.permute.xlu1 %11034  ;;  %16420 = vmatprep.subr.bf16.mxu1 %v20855_v48 }
 0x64c   :  { %v10227_v52 = vpack.c.b16 %v10185_v41, %v10185_v41  ;;  %v10575_v34 = vshll.u32 %v20765_v60, 16  ;;  %v10581_v33 = vshll.u32 %v20767_v4, 16  ;;  %v7751_v11 = vcombine.high %v7749_v59, %v7749_v59 }
 0x64d   :  { %v14774_v51 = vrot.slane %v7750_v20, 9  ;;  %v14775_v18 = vrot.slane %v7749_v59, 9  ;;  %v9067_v21 = vmax.f32 %v7742_v44, %v14773_v5  ;;  %v10586_v23 = vshrl.u32 %v20732_v40, 16 }
 0x64e   :  { %v10351_v3 = vsel %vm19886_vm2, %v10227_v52, %v10350_v58  ;;  %v10577_v63 = vrot.slane %v10575_v34, 5  ;;  %v10583_v24 = vrot.slane %v10581_v33, 5  ;;  %v14776_v56 = vrot.slane %v7751_v11, 9  ;;  %v9278_v58 = vld [vmem:[#allocation3 + $0x90] sm:$0x1]  ;;  %v22162_v52 = vld [vmem:[#allocation49_spill] sm:$0xff] }
 0x64f   :  { %10352 = vst [vmem:[#allocation3 + $0x88] sm:$0xf] %v10351_v3  ;;  %v9068_v28 = vmax.f32 %v7750_v20, %v14774_v51  ;;  %v9069_v17 = vmax.f32 %v7749_v59, %v14775_v18  ;;  %v9203_v54 = vmax.f32 %v9067_v21, %v9075_v26  ;;  %v10588_v19 = vrot.slane %v10586_v23, 4  ;;  %v22163_v51 = vld [vmem:[#allocation50_spill] sm:$0xff]  ;;  %v9339_v21 = vld [vmem:[#allocation3 + $0x94] sm:$0x1] }
 0x650   :  { %v10578_v55 = vor.u32 %v10577_v63, %v10574_v35  ;;  %v10589_v4 = vshll.u32 %v20732_v40, 16  ;;  %v10595_v14 = vshll.u32 %v20734_v0, 16  ;;  %v9070_v22 = vmax.f32 %v7751_v11, %v14776_v56  ;;  %v20875_v56 = vpop.permute.xlu0 %10996 }
 0x651   :  { %v9204_v7 = vmax.f32 %v9068_v28, %v9076_v10  ;;  %v9205_v32 = vmax.f32 %v9069_v17, %v9077_v31  ;;  %v15328_v43 = vpack.c.bf16 %v9203_v54, %v9203_v54  ;;  %v10600_v30 = vshrl.u32 %v20791_v47, 16  ;;  %11020 = vst.msk [vmem:[#allocation5 + $0x8] sm:$0xff] %vm10731_vm1, %v20875_v56 }
 0x652   :  { %v10579_v1 = vrot.slane %v10578_v55, 4  ;;  %v10591_v2 = vrot.slane %v10589_v4, 5  ;;  %v10597_v39 = vrot.slane %v10595_v14, 5  ;;  %v9206_v16 = vmax.f32 %v9070_v22, %v9078_v25  ;;  %v20882_v22 = vld [vmem:[#allocation3 + $0x70] sm:$0xf]  ;;  %11058 = vst.msk [vmem:[#allocation5 + $0x8] sm:$0xff] %vm10868_vm7, %v20860_v27 }
 0x653   :  { %v15329_v6 = vpack.c.bf16 %v9204_v7, %v9204_v7  ;;  %v15330_v9 = vpack.c.bf16 %v9205_v32, %v9205_v32  ;;  %v9977_v26 = vunpack.c.l.b16 %v15328_v43  ;;  %v10602_v44 = vrot.slane %v10600_v30, 4  ;;  %v20884_v7 = vpop.permute.xlu1 %10846  ;;  %v17188_v32 = vld [vmem:[#allocation13] ss:$0 sm:$0xff] }
 0x654   :  { %v10584_v0 = vsel %vm17881_vm14, %v10579_v1, %v10583_v24  ;;  %v10592_v46 = vor.u32 %v10591_v2, %v10588_v19  ;;  %v10603_v35 = vshll.u32 %v20791_v47, 16  ;;  %v15331_v12 = vpack.c.bf16 %v9206_v16, %v9206_v16  ;;  %v17187_v24 = vld [vmem:[#allocation12] ss:$0 sm:$0xff] }
 0x655   :  { %v9978_v10 = vunpack.c.l.b16 %v15329_v6  ;;  %v9979_v31 = vunpack.c.l.b16 %v15330_v9  ;;  %v10186_v41 = vrot.slane %v9977_v26, 7  ;;  %v10611_v5 = vrot.slane %v10609_v36, 5  ;;  %v20873_v36 = vld [vmem:[#allocation3 + $0x68] sm:$0xf]  ;;  %v20897_v9 = vpop.permute.xlu0 %11098 }
 0x656   :  { %v10593_v59 = vrot.slane %v10592_v46, 4  ;;  %v10605_v20 = vrot.slane %v10603_v35, 5  ;;  %v16536_v25 = vadd.f32 %v20586_v57, %v22162_v52  ;;  %v9980_v34 = vunpack.c.l.b16 %v15331_v12 }
 0x657   :  { %v10187_v33 = vrot.slane %v9978_v10, 6  ;;  %v10189_v11 = vrot.slane %v9979_v31, 5  ;;  %v16537_v18 = vadd.f32 %v20596_v61, %v22163_v51  ;;  %v9279_v50 = vsel %vm19725_vm8, 0, %v9278_v58  ;;  %v10389_v61 = vld [vmem:[#allocation3 + $0x6c] sm:$0x1] }
 0x658   :  { %v10598_v3 = vsel %vm17881_vm14, %v10593_v59, %v10597_v39  ;;  %v10606_v63 = vor.u32 %v10605_v20, %v10602_v44  ;;  %v6515_v23 = vmul.f32 %v17187_v24, %v16536_v25  ;;  %v10191_v28 = vrot.slane %v9980_v34, 4  ;;  %9280 = vst [vmem:[#allocation3 + $0x90] sm:$0x1] %v9279_v50  ;;  %v20916_v34 = vpop.permute.xlu1 %10891 }
 0x659   :  { %v10188_v57 = vsel %vm9987_vm9, %v10187_v33, %v10186_v41  ;;  %v14945_v17 = vcombine.low %v10584_v0, %v10598_v3  ;;  %v6513_v54 = vmul.f32 %v17187_v24, %v16537_v18  ;;  %v9340_v14 = vsel %vm19697_vm5, 0, %v9339_v21  ;;  %v20921_v24 = vpop.permute.xlu0 %10998 }
 0x65a   :  { %v10190_v55 = vsel %vm9990_vm10, %v10189_v11, %v10188_v57  ;;  %v10607_v19 = vrot.slane %v10606_v63, 4  ;;  %v6586_v4 = vadd.f32 %v20622_v42, %v6515_v23  ;;  %9341 = vst [vmem:[#allocation3 + $0x94] sm:$0x1] %v9340_v14  ;;  %v14938_v2 = vcombine.low %v20791_v47, %v20873_v36  ;;  %11021 = vst.msk [vmem:[#allocation5 + $0x20] sm:$0xff] %vm10731_vm1, %v20921_v24 }
 0x65b   :  { %10715 = vrot.lane.b32.xlu1 %v14945_v17, %s17494_s13  ;;  %v6584_v43 = vadd.f32 %v17188_v32, %v6513_v54  ;;  %v20888_v1 = vsel %vm9993_vm11, %v10191_v28, %v10190_v55  ;;  %v14960_v42 = vrot.slane %v20873_v36, 9  ;;  %v10802_v16 = vrot.slane %v10389_v61, 5  ;;  %v10391_v28 = vld [vmem:[#allocation3 + $0x74] sm:$0x1] }
 0x65c   :  { %v20895_v39 = vsel %vm17881_vm14, %v10607_v19, %v10611_v5  ;;  %v6650_v30 = vmax.f32 %v6586_v4, 0.0  ;;  %v10623_v6 = vshll.u32 %v10389_v61, 16  ;;  %11042 = vrot.lane.b32.xlu0 %v14938_v2, %s17500_s20  ;;  %10456 = vst.msk [vmem:[#allocation5 + $0x78] sm:$0xff] %vm10450_vm6, %v14938_v2  ;;  %v14978_v47 = vcombine.low %v20873_v36, %v20882_v22 }
 0x65d   :  { %v14985_v26 = vcombine.low %v10598_v3, %v20895_v39  ;;  %v6648_v0 = vmax.f32 %v6584_v43, 0.0  ;;  %v10614_v46 = vshrl.u32 %v20873_v36, 16  ;;  %v20908_v12 = vsel %vm18783_vm3, %v14960_v42, %v10802_v16  ;;  %v20924_v43 = vld [vmem:[#allocation3 + $0x78] sm:$0xf] }
 0x65e   :  { %v7786_v44 = vcombine.high %v6650_v30, %v6650_v30  ;;  %v7793_v35 = vrot.slane %v6650_v30, %v19814_v13  ;;  %v10617_v10 = vshll.u32 %v20873_v36, 16  ;;  %v14970_v58 = vcombine.low %v20824_v53, %v20908_v12 }
 0x65f   :  { %10972 = vst.msk [vmem:[#allocation5 + $0x68] sm:$0xff] %vm10450_vm6, %v14985_v26  ;;  %v7752_v31 = vcombine.high %v6648_v0, %v6648_v0  ;;  %v7759_v41 = vrot.slane %v6648_v0, %v19814_v13  ;;  %v10616_v59 = vrot.slane %v10614_v46, 4  ;;  %v10625_v18 = vrot.slane %v10623_v6, 5  ;;  %v20927_v6 = vpop.permute.xlu1 %10709 }
 0x660   :  { %v7800_v20 = vrot.slane %v7786_v44, %v19814_v13  ;;  %v7801_v5 = vcombine.high %v7793_v35, %v7793_v35  ;;  %v14785_v52 = vrot.slane %v7793_v35, 9  ;;  %v10619_v25 = vrot.slane %v10617_v10, 5  ;;  %10854 = vrot.lane.b32.xlu1 %v14970_v58, %s17500_s20  ;;  %11156 = vst.msk [vmem:[#allocation5 + $0x70] sm:$0xff] %vm10450_vm6, %v14970_v58 }
 0x661   :  { %v7766_v33 = vrot.slane %v7752_v31, %v19814_v13  ;;  %v7767_v11 = vcombine.high %v7759_v41, %v7759_v41  ;;  %v14777_v51 = vrot.slane %v7759_v41, 9  ;;  %v14961_v30 = vrot.slane %v20882_v22, 9  ;;  %10733 = vst.msk [vmem:[#allocation5 + $0x18] sm:$0xff] %vm10731_vm1, %v20927_v6 }
 0x662   :  { %v7802_v21 = vcombine.high %v7800_v20, %v7800_v20  ;;  %v14786_v3 = vrot.slane %v7801_v5, 9  ;;  %v14787_v53 = vrot.slane %v7800_v20, 9  ;;  %v9079_v63 = vmax.f32 %v7793_v35, %v14785_v52  ;;  %v10393_v35 = vld [vmem:[#allocation3 + $0x7c] sm:$0x1]  ;;  %v20941_v52 = vld [vmem:[#allocation3 + $0x80] sm:$0xf] }
 0x663   :  { %v7768_v23 = vcombine.high %v7766_v33, %v7766_v33  ;;  %v14778_v50 = vrot.slane %v7767_v11, 9  ;;  %v14779_v36 = vrot.slane %v7766_v33, 9  ;;  %v9071_v57 = vmax.f32 %v7759_v41, %v14777_v51  ;;  %v20939_v41 = vpop.permute.xlu0 %11036  ;;  %10870 = vst.msk [vmem:[#allocation5 + $0x18] sm:$0xff] %vm10868_vm7, %v20884_v7 }
 0x664   :  { %v14788_v17 = vrot.slane %v7802_v21, 9  ;;  %v9080_v54 = vmax.f32 %v7801_v5, %v14786_v3  ;;  %v9081_v61 = vmax.f32 %v7800_v20, %v14787_v53  ;;  %v10620_v55 = vor.u32 %v10619_v25, %v10616_v59  ;;  %10899 = vrot.lane.b32.xlu1 %v14978_v47, %s17512_s11  ;;  %v10359_v25 = vld [vmem:[#allocation3 + $0x94] sm:$0x1]  ;;  %11059 = vst.msk [vmem:[#allocation5 + $0x20] sm:$0xff] %vm10868_vm7, %v20939_v41 }
 0x665   :  { %v14780_v19 = vrot.slane %v7768_v23, 9  ;;  %v9072_v4 = vmax.f32 %v7767_v11, %v14778_v50  ;;  %v9073_v14 = vmax.f32 %v7766_v33, %v14779_v36  ;;  %v9207_v32 = vmax.f32 %v9071_v57, %v9079_v63 }
 0x666   :  { %v9082_v2 = vmax.f32 %v7802_v21, %v14788_v17  ;;  %v10621_v42 = vrot.slane %v10620_v55, 4  ;;  %v10806_v16 = vrot.slane %v10391_v28, 5  ;;  %v20937_v31 = vcombine.low %v20882_v22, %v20924_v43  ;;  %v20948_v21 = vpop.permute.xlu1 %10848 }
 0x667   :  { %v9074_v26 = vmax.f32 %v7768_v23, %v14780_v19  ;;  %v9208_v0 = vmax.f32 %v9072_v4, %v9080_v54  ;;  %v9209_v46 = vmax.f32 %v9073_v14, %v9081_v61  ;;  %v15332_v44 = vpack.c.bf16 %v9207_v32, %v9207_v32 }
 0x668   :  { %v20931_v10 = vsel %vm17881_vm14, %v10621_v42, %v10625_v18  ;;  %v10807_v47 = vsel %vm18783_vm3, %v14961_v30, %v10806_v16  ;;  %v10637_v11 = vshll.u32 %v10391_v28, 16  ;;  %10457 = vst.msk [vmem:[#allocation5 + $0x90] sm:$0xff] %vm10450_vm6, %v20937_v31  ;;  %v14962_v51 = vrot.slane %v20924_v43, 9  ;;  %v20958_v28 = vpop.permute.xlu0 %11100  ;;  %v9281_v42 = vld [vmem:[#allocation3 + $0x98] sm:$0x1] }
 0x669   :  { %v9210_v58 = vmax.f32 %v9074_v26, %v9082_v2  ;;  %v15333_v59 = vpack.c.bf16 %v9208_v0, %v9208_v0  ;;  %v15334_v20 = vpack.c.bf16 %v9209_v46, %v9209_v46  ;;  %v9981_v5 = vunpack.c.l.b16 %v15332_v44  ;;  %v20970_v2 = vld [vmem:[#allocation3 + $0x88] sm:$0xf]  ;;  %v20975_v0 = vld [vmem:[#allocation3 + $0x8c] sm:$0x1]  ;;  %v10356_v44 = vld [vmem:[#allocation3 + $0x90] sm:$0xf] }
 0x66a   :  { %v14946_v33 = vcombine.low %v20895_v39, %v20931_v10  ;;  %v10810_v18 = vrot.slane %v10393_v35, 5  ;;  %v14996_v50 = vcombine.low %v20908_v12, %v10807_v47  ;;  %v10651_v36 = vshll.u32 %v10393_v35, 16  ;;  %v20966_v12 = vld [vmem:[#allocation3 + $0x84] sm:$0x1] }
 0x66b   :  { %v9982_v3 = vunpack.c.l.b16 %v15333_v59  ;;  %v9983_v53 = vunpack.c.l.b16 %v15334_v20  ;;  %v10193_v63 = vrot.slane %v9981_v5, 3  ;;  %v15351_v23 = vpack.c.bf16 %v9210_v58, %v9210_v58  ;;  %v20983_v58 = vpop.permute.xlu1 %10893 }
 0x66c   :  { %11106 = vrot.lane.b32.xlu0 %v14946_v33, %s17512_s11  ;;  %10717 = vrot.lane.b32.xlu1 %v14946_v33, %s17494_s13  ;;  %v20955_v39 = vsel %vm18783_vm3, %v14962_v51, %v10810_v18  ;;  %v10628_v57 = vshrl.u32 %v20882_v22, 16  ;;  %v14979_v55 = vcombine.low %v20924_v43, %v20941_v52  ;;  %v10631_v32 = vshll.u32 %v20882_v22, 16  ;;  %v11001_v18 = vpop.permute.xlu0 %11000 }
 0x66d   :  { %v10194_v17 = vsel %vm9996_vm12, %v10193_v63, %v20888_v1  ;;  %v10195_v54 = vrot.slane %v9982_v3, 2  ;;  %v10360_v61 = vsel %vm19725_vm8, %v15351_v23, %v10359_v25  ;;  %v10197_v19 = vrot.slane %v9983_v53, 1  ;;  %11022 = vst.msk [vmem:[#allocation5 + $0x38] sm:$0xff] %vm10731_vm1, %v11001_v18 }
 0x66e   :  { %10361 = vst [vmem:[#allocation3 + $0x94] sm:$0x1] %v10360_v61  ;;  %v14971_v4 = vcombine.low %v10807_v47, %v20955_v39  ;;  %v10630_v14 = vrot.slane %v10628_v57, 4  ;;  %v10639_v30 = vrot.slane %v10637_v11, 5  ;;  %v10642_v16 = vshrl.u32 %v20924_v43, 16 }
 0x66f   :  { %v10196_v1 = vsel %vm9999_vm13, %v10195_v54, %v10194_v17  ;;  %v10645_v26 = vshll.u32 %v20924_v43, 16  ;;  %v10633_v22 = vrot.slane %v10631_v32, 5  ;;  %v14963_v35 = vrot.slane %v20941_v52, 9 }
 0x670   :  { %v10198_v46 = vsel %vm10002_vm15, %v10197_v19, %v10196_v1  ;;  %11006 = vrot.lane.b32.xlu0 %v14996_v50, %s17494_s13  ;;  %10856 = vrot.lane.b32.xlu1 %v14971_v4, %s17500_s20  ;;  %11157 = vst.msk [vmem:[#allocation5 + $0x88] sm:$0xff] %vm10450_vm6, %v14971_v4  ;;  %v10814_v47 = vrot.slane %v20966_v12, 5  ;;  %v10644_v43 = vrot.slane %v10642_v16, 4  ;;  %v20987_v5 = vcombine.low %v20941_v52, %v20970_v2 }
 0x671   :  { %v10229_v59 = vpack.c.b16 %v10198_v46, %v10198_v46  ;;  %v10647_v20 = vrot.slane %v10645_v26, 5  ;;  %v10634_v25 = vor.u32 %v10633_v22, %v10630_v14  ;;  %v10653_v33 = vrot.slane %v10651_v36, 5  ;;  %v10712_v14 = vpop.permute.xlu1 %10711  ;;  %v9342_v26 = vld [vmem:[#allocation3 + $0x9c] sm:$0x1]  ;;  %v11039_v46 = vpop.permute.xlu0 %11038  ;;  %v17190_v22 = vld [vmem:[#allocation3] sm:$0xf] }
 0x672   :  { %v14964_v11 = vrot.slane %v20970_v2, 9  ;;  %v10818_v51 = vrot.slane %v20975_v0, 5  ;;  %v20995_v63 = vsel %vm18783_vm3, %v14963_v35, %v10814_v47  ;;  %10458 = vst.msk [vmem:[#allocation5 + $0xa8] sm:$0xff] %vm10450_vm6, %v20987_v5  ;;  %v9282_v23 = vsel %vm19725_vm8, 0, %v9281_v42 }
 0x673   :  { %v10357_v3 = vsel %vm19886_vm2, %v10229_v59, %v10356_v44  ;;  %v10648_v53 = vor.u32 %v10647_v20, %v10644_v43  ;;  %v10635_v50 = vrot.slane %v10634_v25, 4  ;;  %9283 = vst [vmem:[#allocation3 + $0x98] sm:$0x1] %v9282_v23  ;;  %v10656_v36 = vshrl.u32 %v20941_v52, 16  ;;  %v17189_v44 = vld [vmem:[#allocation3 + $0x8] sm:$0xf] }
 0x674   :  { %10358 = vst [vmem:[#allocation3 + $0x90] sm:$0xf] %v10357_v3  ;;  %11044 = vrot.lane.b32.xlu0 %v20937_v31, %s17500_s20  ;;  %10901 = vrot.lane.b32.xlu1 %v14979_v55, %s17512_s11  ;;  %v21006_v15 = vsel %vm18783_vm3, %v14964_v11, %v10818_v51  ;;  %v10659_v57 = vshll.u32 %v20941_v52, 16  ;;  %v10665_v54 = vshll.u32 %v20966_v12, 16  ;;  %v10670_v31 = vshrl.u32 %v20970_v2, 16  ;;  %10734 = vst.msk [vmem:[#allocation5 + $0x30] sm:$0xff] %vm10731_vm1, %v10712_v14 }
 0x675   :  { %v10649_v17 = vrot.slane %v10648_v53, 4  ;;  %v21012_v8 = vcombine.low %v20995_v63, %v21006_v15  ;;  %v10640_v61 = vsel %vm17881_vm14, %v10635_v50, %v10639_v30  ;;  %v10658_v55 = vrot.slane %v10656_v36, 4  ;;  %10871 = vst.msk [vmem:[#allocation5 + $0x30] sm:$0xff] %vm10868_vm7, %v20948_v21  ;;  %11060 = vst.msk [vmem:[#allocation5 + $0x38] sm:$0xff] %vm10868_vm7, %v11039_v46  ;;  %v10399_v7 = vld [vmem:[#allocation3 + $0x94] sm:$0x1] }
 0x676   :  { %v10661_v19 = vrot.slane %v10659_v57, 5  ;;  %v10673_v4 = vshll.u32 %v20970_v2, 16  ;;  %v14986_v32 = vcombine.low %v20931_v10, %v10640_v61  ;;  %v10672_v12 = vrot.slane %v10670_v31, 4 }
 0x677   :  { %v21021_v52 = vsel %vm17881_vm14, %v10649_v17, %v10653_v33  ;;  %11158 = vst.msk [vmem:[#allocation5 + $0xa0] sm:$0xff] %vm10450_vm6, %v21012_v8  ;;  %v10679_v30 = vshll.u32 %v20975_v0, 16  ;;  %v14933_v35 = vcombine.low %v17190_v22, %v17189_v44  ;;  %v10667_v47 = vrot.slane %v10665_v54, 5  ;;  %v21039_v0 = vpop.permute.xlu1 %10850  ;;  %v11041_v33 = vpop.permute.xlu0 %11040 }
 0x678   :  { %v14947_v42 = vcombine.low %v10640_v61, %v21021_v52  ;;  %v10662_v1 = vor.u32 %v10661_v19, %v10658_v55  ;;  %v10675_v16 = vrot.slane %v10673_v4, 5  ;;  %10973 = vst.msk [vmem:[#allocation5 + $0x80] sm:$0xff] %vm10450_vm6, %v14986_v32  ;;  %v14997_v43 = vcombine.low %v20955_v39, %v20995_v63  ;;  %v17042_v19 = vld [vmem:[#allocation15 + $0x88] sm:$0xff]  }
 0x679   :  { %10451 = vst.msk [vmem:[#allocation5] sm:$0xff] %vm10450_vm6, %v14933_v35  ;;  %vm10913_vm8 = vcmask 1048320   ;;  %v9343_v56 = vsel %vm19697_vm5, 0, %v9342_v26  ;;  %v14937_v24 = vcombine.low %v20765_v60, %v20732_v40  ;;  %v10681_v39 = vrot.slane %v10679_v30, 5 }
 0x67a   :  { %11108 = vrot.lane.b32.xlu0 %v14947_v42, %s17512_s11  ;;  %10719 = vrot.lane.b32.xlu1 %v14947_v42, %s17494_s13  ;;  %v10663_v10 = vrot.slane %v10662_v1, 4  ;;  %v10676_v59 = vor.u32 %v10675_v16, %v10672_v12  ;;  %v21045_v25 = vld [vmem:[#allocation3 + $0x98] sm:$0xf]  ;;  %10732 = vst.msk [vmem:[#allocation5] sm:$0xff] %vm10731_vm1, %v20853_v62  ;;  %9344 = vst [vmem:[#allocation3 + $0x9c] sm:$0x1] %v9343_v56 }
 0x67b   :  { %v21043_v20 = vld [vmem:[#allocation3 + $0x90] sm:$0xf]  ;;  %v11081_v45 = vshrl.u32 %v21045_v25, 16  ;;  %v11084_v6 = vshll.u32 %v21045_v25, 16  ;;  %11122 = vst.msk [vmem:[#allocation5 + $0x8] sm:$0xff] %vm10913_vm8, %v20897_v9  ;;  %10915 = vst.msk [vmem:[#allocation5 + $0x18] sm:$0xff] %vm10913_vm8, %v20916_v34  ;;  %v10896_v11 = vpop.permute.xlu1 %10895 }
 0x67c   :  { %v10668_v27 = vsel %vm17881_vm14, %v10663_v10, %v10667_v47  ;;  %11123 = vst.msk [vmem:[#allocation5 + $0x20] sm:$0xff] %vm10913_vm8, %v20958_v28  ;;  %10916 = vst.msk [vmem:[#allocation5 + $0x30] sm:$0xff] %vm10913_vm8, %v20983_v58  ;;  %v10677_v40 = vrot.slane %v10676_v59, 4  ;;  %v10937_v41 = vshrl.u32 %v21043_v20, 16  ;;  %v10940_v62 = vshll.u32 %v21043_v20, 16 }
 0x67d   :  { %v14987_v60 = vcombine.low %v21021_v52, %v10668_v27  ;;  %10869 = vst.msk [vmem:[#allocation5] sm:$0xff] %vm10868_vm7, %v20839_v37  ;;  %v10946_v28 = vshll.u32 %v10399_v7, 16  ;;  %v14990_v37 = vrot.slane %v21043_v20, 9  ;;  %v11083_v51 = vrot.slane %v11081_v45, 4 }
 0x67e   :  { %10455 = vst.msk [vmem:[#allocation5 + $0x60] sm:$0xff] %vm10450_vm6, %v14937_v24  ;;  %11008 = vrot.lane.b32.xlu0 %v14997_v43, %s17494_s13  ;;  %10858 = vrot.lane.b32.xlu1 %v21012_v8, %s17500_s20  ;;  %v10682_v9 = vsel %vm17881_vm14, %v10677_v40, %v10681_v39  ;;  %v10939_v34 = vrot.slane %v10937_v41, 4  ;;  %v10942_v21 = vrot.slane %v10940_v62, 5  ;;  %v11086_v18 = vrot.slane %v11084_v6, 5 }
 0x67f   :  { %10914 = vst.msk [vmem:[#allocation5] sm:$0xff] %vm10913_vm8, %v20850_v29  ;;  %v14948_v58 = vcombine.low %v10668_v27, %v10682_v9  ;;  %v15000_v29 = vcombine.low %v21043_v20, %v21045_v25  ;;  %v10984_v53 = vrot.slane %v10399_v7, 5  ;;  %v15004_v63 = vrot.slane %v21045_v25, 9 }
 0x680   :  { %10974 = vst.msk [vmem:[#allocation5 + $0x98] sm:$0xff] %vm10450_vm6, %v14987_v60  ;;  %v10943_v3 = vor.u32 %v10942_v21, %v10939_v34  ;;  %v10948_v50 = vrot.slane %v10946_v28, 5  ;;  %v14980_v17 = vcombine.low %v20970_v2, %v21043_v20  ;;  %v11087_v31 = vor.u32 %v11086_v18, %v11083_v51 }
 0x681   :  { %v10401_v36 = vld [vmem:[#allocation3 + $0x9c] sm:$0x1]  ;;  %v10985_v8 = vsel %vm18783_vm3, %v14990_v37, %v10984_v53  ;;  %vm12292_vm5 = vcmask 518146   ;;  %vm12293_vm15 = vsmask.f32 7946 }
 0x682   :  { %11046 = vrot.lane.b32.xlu0 %v20987_v5, %s17500_s20  ;;  %10721 = vrot.lane.b32.xlu1 %v14948_v58, %s17494_s13  ;;  %v10944_v23 = vrot.slane %v10943_v3, 4  ;;  %v11161_v57 = vld [vmem:[#allocation5 + $0x8] sm:$0xff]  ;;  %v11138_v54 = vrot.slane %v10401_v36, 5  ;;  %v11090_v61 = vshll.u32 %v10401_v36, 16  ;;  %v11088_v38 = vrot.slane %v11087_v31, 4  ;;  %v11163_v30 = vld [vmem:[#allocation5 + $0x18] sm:$0xff] }
 0x683   :  { %11384 = vmatprep.mubr.bf16.mxu1 %v11161_v57  ;;  %v11164_v55 = vld [vmem:[#allocation5 + $0x20] sm:$0xff]  ;;  %v14998_v1 = vcombine.low %v21006_v15, %v10985_v8  ;;  %v11166_v44 = vld [vmem:[#allocation5 + $0x30] sm:$0xff]  ;;  %v11171_v36 = vld [vmem:[#allocation5 + $0x58] sm:$0xff]  ;;  %vm12565_vm2 = vsmask.f32 2306 }
 0x684   :  { %v10949_v5 = vsel %vm17881_vm14, %v10944_v23, %v10948_v50  ;;  %v11139_v2 = vsel %vm18783_vm3, %v15004_v63, %v11138_v54  ;;  %v11092_v42 = vrot.slane %v11090_v61, 5  ;;  %v11162_v63 = vld [vmem:[#allocation5 + $0x10] sm:$0xff]  ;;  %v11165_v23 = vld [vmem:[#allocation5 + $0x28] sm:$0xff]  ;;  %v11168_v50 = vld [vmem:[#allocation5 + $0x40] sm:$0xff]  ;;  %vm12254_vm3 = vcmask 516096  }
 0x685   :  { %v14988_v4 = vcombine.low %v10682_v9, %v10949_v5  ;;  %v15006_v12 = vcombine.low %v10985_v8, %v11139_v2  ;;  %v11174_v57 = vld [vmem:[#allocation5 + $0x70] sm:$0xff]  ;;  %v11180_v8 = vld [vmem:[#allocation5 + $0xa0] sm:$0xff]  ;;  %vm21168_vm12 = vmand %vm12254_vm3, %vm208_vm4 }
 0x686   :  { %11048 = vrot.lane.b32.xlu0 %v15000_v29, %s17500_s20  ;;  %10903 = vrot.lane.b32.xlu1 %v14980_v17, %s17512_s11  ;;  %v11160_v14 = vld [vmem:[#allocation5] sm:$0xff]  ;;  %v11103_v52 = vpop.permute.xlu0 %11102  ;;  %v10714_v32 = vpop.permute.xlu1 %10713  ;;  %v11093_v16 = vsel %vm17881_vm14, %v11088_v38, %v11092_v42  ;;  %v11177_v17 = vld [vmem:[#allocation5 + $0x88] sm:$0xff]  ;;  %vm12248_vm14 = vcmask 518144   ;;  %vm21182_vm4 = vmand %vm12292_vm5, %vm12293_vm15 }
 0x687   :  { %11385 = vmatmul.mubr.bf16.vlgmr.msra.gmra.mrb[64].mxu1 %v11160_v14  ;;  %11124 = vst.msk [vmem:[#allocation5 + $0x38] sm:$0xff] %vm10913_vm8, %v11103_v52 }
 0x688   :  { %10735 = vst.msk [vmem:[#allocation5 + $0x48] sm:$0xff] %vm10731_vm1, %v10714_v32  ;;  %11392 = vmatprep.mubr.bf16.mxu1 %v11164_v55  ;;  %16421 = vmatpush3.bf16.msra.mxu1 %v20855_v48  ;;  %v15002_v48 = vcombine.low %v10949_v5, %v11093_v16 }
 0x689   :  { %10975 = vst.msk [vmem:[#allocation5 + $0xb0] sm:$0xff] %vm10450_vm6, %v14988_v4  ;;  %11159 = vst.msk [vmem:[#allocation5 + $0xb8] sm:$0xff] %vm10450_vm6, %v15006_v12  ;;  %16422 = vmatprep.subr.bf16.mxu1 %v17042_v19 }
 0x68a   :  { %10872 = vst.msk [vmem:[#allocation5 + $0x48] sm:$0xff] %vm10868_vm7, %v21039_v0  ;;  %11110 = vrot.lane.b32.xlu0 %v14948_v58, %s17512_s11 }
 0x68b   :  { %10917 = vst.msk [vmem:[#allocation5 + $0x48] sm:$0xff] %vm10913_vm8, %v10896_v11 }
 0x68c   :  { %16423 = vmatpush3.bf16.msra.mxu1 %v17042_v19 }
 0x68e   :  { %11010 = vrot.lane.b32.xlu0 %v14998_v1, %s17494_s13  ;;  %v11167_v26 = vld [vmem:[#allocation5 + $0x38] sm:$0xff]  ;;  %s17515_s13 = smov [#allocation27]  }
 0x68f   :  { %11393 = vmatmul.mubr.bf16.gmra.mrb[68].mxu1 %v11163_v30 }
 0x690   :  { %11400 = vmatprep.mubr.bf16.mxu1 %v11167_v26  ;;  %v11003_v46 = vpop.permute.xlu0 %11002  ;;  %v11183_v54 = vld [vmem:[#allocation5 + $0xb8] sm:$0xff] }
 0x691   :  { %11023 = vst.msk [vmem:[#allocation5 + $0x50] sm:$0xff] %vm10731_vm1, %v11003_v46  ;;  %v12262_v46 = vld [vmem:[#allocation4 + $0x8] sm:$0x1] }
 0x692   :  { %11112 = vrot.lane.b32.xlu0 %v15002_v48, %s17512_s11  ;;  %11061 = vst.msk [vmem:[#allocation5 + $0x50] sm:$0xff] %vm10868_vm7, %v11041_v33  ;;  %v11169_v22 = vld [vmem:[#allocation5 + $0x48] sm:$0xff] }
 0x697   :  { %11401 = vmatmul.mubr.bf16.gmra.mrb[72].mxu1 %v11166_v44  ;;  %v17068_v44 = vld [vmem:[#allocation19 + $0x38] sm:$0xff]  }
 0x6a0   :  { %v10853_v10 = vpop.permute.xlu1 %10852 }
 0x6a6   :  { %v11105_v15 = vpop.permute.xlu0 %11104 }
 0x6a7   :  { %11125 = vst.msk [vmem:[#allocation5 + $0x50] sm:$0xff] %vm10913_vm8, %v11105_v15  ;;  %v12301_v15 = vld [vmem:[#allocation4 + $0x8] sm:$0x4] }
 0x6a8   :  { %v10898_v47 = vpop.permute.xlu1 %10897 }
 0x6ae   :  { %v11170_v49 = vld [vmem:[#allocation5 + $0x50] sm:$0xff] }
 0x6af   :  { %11408 = vmatprep.mubr.bf16.mxu1 %v11170_v49  ;;  %v22166_v49 = vmov 0  }
 0x6b0   :  { %11409 = vmatmul.mubr.bf16.gmra.mrb[76].mxu1 %v11169_v22  ;;  %12249 = vst.msk [vmem:[#allocation4] sm:$0x7] %vm12248_vm14, %v22166_v49  ;;  %12250 = vst.msk [vmem:[#allocation4 + $0x18] sm:$0x7] %vm12248_vm14, %v22166_v49  ;;  %v12263_v22 = vsel %vm21168_vm12, 0, %v12262_v46 }
 0x6b1   :  { %12252 = vst.msk [vmem:[#allocation4 + $0x14] sm:$0x7] %vm12248_vm14, %v22166_v49  ;;  %12253 = vst.msk [vmem:[#allocation4 + $0x2c] sm:$0x7] %vm12248_vm14, %v22166_v49 }
 0x6b2   :  { %12264 = vst [vmem:[#allocation4 + $0x8] sm:$0x1] %v12263_v22  ;;  %v12283_v22 = vld [vmem:[#allocation4 + $0x24] sm:$0x1] }
 0x6b8   :  { %v11005_v35 = vpop.permute.xlu0 %11004 }
 0x6b9   :  { %11024 = vst.msk [vmem:[#allocation5 + $0x68] sm:$0xff] %vm10731_vm1, %v11005_v35 }
 0x6cd   :  { %v10716_v59 = vpop.permute.xlu1 %10715 }
 0x6ce   :  { %10736 = vst.msk [vmem:[#allocation5 + $0x60] sm:$0xff] %vm10731_vm1, %v10716_v59  ;;  %v11043_v0 = vpop.permute.xlu0 %11042 }
 0x6cf   :  { %10873 = vst.msk [vmem:[#allocation5 + $0x60] sm:$0xff] %vm10868_vm7, %v10853_v10  ;;  %11062 = vst.msk [vmem:[#allocation5 + $0x68] sm:$0xff] %vm10868_vm7, %v11043_v0  ;;  %v12302_v10 = vsel %vm21182_vm4, 0, %v12301_v15 }
 0x6d0   :  { %10918 = vst.msk [vmem:[#allocation5 + $0x60] sm:$0xff] %vm10913_vm8, %v10898_v47  ;;  %12303 = vst [vmem:[#allocation4 + $0x8] sm:$0x4] %v12302_v10  ;;  %v12322_v10 = vld [vmem:[#allocation4 + $0x24] sm:$0x4] }
 0x6d2   :  { %v10855_v43 = vpop.permute.xlu1 %10854 }
 0x6d6   :  { %v10900_v20 = vpop.permute.xlu1 %10899 }
 0x6d7   :  { %v11172_v7 = vld [vmem:[#allocation5 + $0x60] sm:$0xff] }
 0x6de   :  { %v11107_v25 = vpop.permute.xlu0 %11106  ;;  %v10718_v56 = vpop.permute.xlu1 %10717 }
 0x6df   :  { %11126 = vst.msk [vmem:[#allocation5 + $0x68] sm:$0xff] %vm10913_vm8, %v11107_v25 }
 0x6e0   :  { %10737 = vst.msk [vmem:[#allocation5 + $0x78] sm:$0xff] %vm10731_vm1, %v10718_v56  ;;  %v12259_v56 = vld [vmem:[#allocation4 + $0x4] sm:$0x1] }
 0x6e1   :  { %10874 = vst.msk [vmem:[#allocation5 + $0x78] sm:$0xff] %vm10868_vm7, %v10855_v43 }
 0x6e2   :  { %10919 = vst.msk [vmem:[#allocation5 + $0x78] sm:$0xff] %vm10913_vm8, %v10900_v20  ;;  %v11007_v24 = vpop.permute.xlu0 %11006  ;;  %v10857_v45 = vpop.permute.xlu1 %10856 }
 0x6e3   :  { %11025 = vst.msk [vmem:[#allocation5 + $0x80] sm:$0xff] %vm10731_vm1, %v11007_v24  ;;  %v12298_v24 = vld [vmem:[#allocation4 + $0x4] sm:$0x4] }
 0x6e6   :  { %v11045_v6 = vpop.permute.xlu0 %11044  ;;  %v11173_v27 = vld [vmem:[#allocation5 + $0x68] sm:$0xff]  ;;  %v10902_v39 = vpop.permute.xlu1 %10901 }
 0x6e7   :  { %11063 = vst.msk [vmem:[#allocation5 + $0x80] sm:$0xff] %vm10868_vm7, %v11045_v6  ;;  %11416 = vmatprep.mubr.bf16.mxu1 %v11173_v27  ;;  %v12299_v6 = vsel %vm21182_vm4, 0, %v12298_v24  ;;  %v12268_v27 = vld [vmem:[#allocation4 + $0x10] sm:$0x1] }
 0x6e8   :  { %11417 = vmatmul.mubr.bf16.gmra.mrb[80].mxu1 %v11172_v7  ;;  %12300 = vst [vmem:[#allocation4 + $0x4] sm:$0x4] %v12299_v6  ;;  %v12269_v7 = vsel %vm21168_vm12, 0, %v12268_v27  ;;  %v12295_v6 = vld [vmem:[#allocation4] sm:$0x4] }
 0x6e9   :  { %v11175_v28 = vld [vmem:[#allocation5 + $0x78] sm:$0xff]  ;;  %12270 = vst [vmem:[#allocation4 + $0x10] sm:$0x1] %v12269_v7  ;;  %v12310_v27 = vld [vmem:[#allocation4 + $0x14] sm:$0x4] }
 0x6ea   :  { %v12311_v7 = vsel %vm21182_vm4, 0, %v12310_v27 }
 0x6eb   :  { %12312 = vst [vmem:[#allocation4 + $0x14] sm:$0x4] %v12311_v7 }
 0x6ec   :  { %v11109_v40 = vpop.permute.xlu0 %11108  ;;  %v10720_v60 = vpop.permute.xlu1 %10719 }
 0x6ed   :  { %11127 = vst.msk [vmem:[#allocation5 + $0x80] sm:$0xff] %vm10913_vm8, %v11109_v40 }
 0x6ee   :  { %10738 = vst.msk [vmem:[#allocation5 + $0x90] sm:$0xff] %vm10731_vm1, %v10720_v60  ;;  %v12265_v60 = vld [vmem:[#allocation4 + $0xc] sm:$0x1] }
 0x6ef   :  { %10875 = vst.msk [vmem:[#allocation5 + $0x90] sm:$0xff] %vm10868_vm7, %v10857_v45  ;;  %v12260_v45 = vsel %vm21168_vm12, 0, %v12259_v56  ;;  %v12271_v56 = vld [vmem:[#allocation4 + $0x14] sm:$0x1] }
 0x6f0   :  { %10920 = vst.msk [vmem:[#allocation5 + $0x90] sm:$0xff] %vm10913_vm8, %v10902_v39  ;;  %v11009_v41 = vpop.permute.xlu0 %11008  ;;  %v10859_v62 = vpop.permute.xlu1 %10858  ;;  %12261 = vst [vmem:[#allocation4 + $0x4] sm:$0x1] %v12260_v45  ;;  %v12307_v39 = vld [vmem:[#allocation4 + $0x10] sm:$0x4]  ;;  %v12272_v45 = vsel %vm21168_vm12, 0, %v12271_v56 }
 0x6f1   :  { %11026 = vst.msk [vmem:[#allocation5 + $0x98] sm:$0xff] %vm10731_vm1, %v11009_v41  ;;  %v12308_v40 = vsel %vm21182_vm4, 0, %v12307_v39  ;;  %v12304_v41 = vld [vmem:[#allocation4 + $0xc] sm:$0x4]  ;;  %12273 = vst [vmem:[#allocation4 + $0x14] sm:$0x1] %v12272_v45 }
 0x6f2   :  { %12309 = vst [vmem:[#allocation4 + $0x10] sm:$0x4] %v12308_v40  ;;  %v12296_v39 = vsel %vm21182_vm4, 0, %v12295_v6 }
 0x6f3   :  { %12297 = vst [vmem:[#allocation4] sm:$0x4] %v12296_v39 }
 0x6f4   :  { %v11047_v9 = vpop.permute.xlu0 %11046  ;;  %v11176_v34 = vld [vmem:[#allocation5 + $0x80] sm:$0xff]  ;;  %v10722_v21 = vpop.permute.xlu1 %10721 }
 0x6f5   :  { %11064 = vst.msk [vmem:[#allocation5 + $0x98] sm:$0xff] %vm10868_vm7, %v11047_v9  ;;  %11424 = vmatprep.mubr.bf16.mxu1 %v11176_v34  ;;  %v12305_v9 = vsel %vm21182_vm4, 0, %v12304_v41  ;;  %v12280_v34 = vld [vmem:[#allocation4 + $0x20] sm:$0x1] }
 0x6f6   :  { %10739 = vst.msk [vmem:[#allocation5 + $0xa8] sm:$0xff] %vm10731_vm1, %v10722_v21  ;;  %11425 = vmatmul.mubr.bf16.gmra.mrb[84].mxu1 %v11175_v28  ;;  %12306 = vst [vmem:[#allocation4 + $0xc] sm:$0x4] %v12305_v9  ;;  %v12319_v21 = vld [vmem:[#allocation4 + $0x20] sm:$0x4]  ;;  %v12281_v28 = vsel %vm21168_vm12, 0, %v12280_v34 }
 0x6f7   :  { %10876 = vst.msk [vmem:[#allocation5 + $0xa8] sm:$0xff] %vm10868_vm7, %v10859_v62  ;;  %v11178_v3 = vld [vmem:[#allocation5 + $0x90] sm:$0xff]  ;;  %v12266_v62 = vsel %vm21168_vm12, 0, %v12265_v60  ;;  %12282 = vst [vmem:[#allocation4 + $0x20] sm:$0x1] %v12281_v28 }
 0x6f8   :  { %v11049_v58 = vpop.permute.xlu0 %11048  ;;  %v10904_v37 = vpop.permute.xlu1 %10903  ;;  %12267 = vst [vmem:[#allocation4 + $0xc] sm:$0x1] %v12266_v62  ;;  %v21244_v60 = vld [vmem:[#allocation16] ss:$0 sm:$0xff]  ;;  %v21247_v9 = vld [vmem:[#allocation18] ss:$0 sm:$0xff] }
 0x6f9   :  { %10921 = vst.msk [vmem:[#allocation5 + $0xa8] sm:$0xff] %vm10913_vm8, %v10904_v37 }
 0x6fc   :  { %v11111_v33 = vpop.permute.xlu0 %11110 }
 0x6fd   :  { %11128 = vst.msk [vmem:[#allocation5 + $0x98] sm:$0xff] %vm10913_vm8, %v11111_v33 }
 0x700   :  { %v11011_v11 = vpop.permute.xlu0 %11010  ;;  %v11181_v53 = vld [vmem:[#allocation5 + $0xa8] sm:$0xff] }
 0x701   :  { %11027 = vst.msk [vmem:[#allocation5 + $0xb0] sm:$0xff] %vm10731_vm1, %v11011_v11  ;;  %vm12714_vm1 = vsmask.f32 1280 }
 0x702   :  { %11065 = vst.msk [vmem:[#allocation5 + $0xb0] sm:$0xff] %vm10868_vm7, %v11049_v58  ;;  %v12320_v58 = vsel %vm21182_vm4, 0, %v12319_v21  ;;  %vm12715_vm7 = vsmask.f32 3336 }
 0x703   :  { %12321 = vst [vmem:[#allocation4 + $0x20] sm:$0x4] %v12320_v58  ;;  %vm12716_vm3 = vmor %vm12714_vm1, %vm12715_vm7  ;;  %vm13939_vm1 = vcmask 1043456  }
 0x704   :  { %v11113_v51 = vpop.permute.xlu0 %11112  ;;  %v11179_v18 = vld [vmem:[#allocation5 + $0x98] sm:$0xff] }
 0x705   :  { %11129 = vst.msk [vmem:[#allocation5 + $0xb0] sm:$0xff] %vm10913_vm8, %v11113_v51  ;;  %11432 = vmatprep.mubr.bf16.mxu1 %v11179_v18  ;;  %vm12717_vm8 = vsmask.f32 5392 }
 0x706   :  { %11433 = vmatmul.mubr.bf16.gmra.mrb[88].mxu1 %v11178_v3  ;;  %vm21498_vm5 = vmor %vm12716_vm3, %vm12717_vm8 }
 0x70c   :  { %v11182_v29 = vld [vmem:[#allocation5 + $0xb0] sm:$0xff] }
 0x70d   :  { %11440 = vmatprep.mubr.bf16.mxu1 %v11182_v29  ;;  %v12277_v29 = vld [vmem:[#allocation4 + $0x1c] sm:$0x1] }
 0x70e   :  { %11441 = vmatmul.mubr.bf16.gmra.mrb[92].mxu1 %v11181_v53  ;;  %v12316_v53 = vld [vmem:[#allocation4 + $0x1c] sm:$0x4] }
 0x70f   :  { %16424 = vmatprep.mubr.msk.bf16.mxu1 %vm10450_vm6, %v11162_v63  ;;  %v12278_v63 = vsel %vm21168_vm12, 0, %v12277_v29 }
 0x710   :  { %12279 = vst [vmem:[#allocation4 + $0x1c] sm:$0x1] %v12278_v63 }
 0x716   :  { %16425 = vmatmul.mubr.msk.bf16.vlgmr.msra.gmra.mrb[96].mxu1 %vm10450_vm6, %v11165_v23  ;;  %v12317_v23 = vsel %vm21182_vm4, 0, %v12316_v53 }
 0x717   :  { %16428 = vmatprep.mubr.msk.bf16.mxu1 %vm10450_vm6, %v11168_v50  ;;  %12318 = vst [vmem:[#allocation4 + $0x1c] sm:$0x4] %v12317_v23 }
 0x71e   :  { %16429 = vmatmul.mubr.msk.bf16.gmra.mrb[100].mxu1 %vm10450_vm6, %v11171_v36 }
 0x71f   :  { %16432 = vmatprep.mubr.msk.bf16.mxu1 %vm10450_vm6, %v11174_v57 }
 0x726   :  { %16433 = vmatmul.mubr.msk.bf16.gmra.mrb[104].mxu1 %vm10450_vm6, %v11177_v17 }
 0x727   :  { %16436 = vmatprep.mubr.msk.bf16.mxu1 %vm10450_vm6, %v11180_v8 }
 0x72e   :  { %16437 = vmatmul.mubr.msk.bf16.gmra.mrb[108].mxu1 %vm10450_vm6, %v11183_v54  ;;  %vm21308_vm6 = vmand %vm12248_vm14, %vm12565_vm2  ;;  %vm12719_vm14 = vsmask.f32 7448  ;;  %vm17514_vm2 = vmmov 0  }
 0x72f   :  { %vm21519_vm15 = vmor %vm21498_vm5, %vm12719_vm14 }
 0x75a   :  { %v15697_v5 = vpop.f32.mrb[64].mxu1 }
 0x75b   :  { %v15698_v31 = vpop.f32.mrb[65].mxu1 }
 0x75c   :  { %v21155_v61 = vadd.f32 %v15698_v31, %v15697_v5  ;;  %v15700_v55 = vpop.f32.mrb[66].mxu1  ;;  %v12286_v5 = vld [vmem:[#allocation4 + $0x28] sm:$0x1]  ;;  %v12325_v31 = vld [vmem:[#allocation4 + $0x28] sm:$0x4] }
 0x75d   :  { %v15701_v19 = vpop.f32.mrb[67].mxu1 }
 0x75e   :  { %v21157_v4 = vadd.f32 %v15701_v19, %v15700_v55  ;;  %v12287_v19 = vsel %vm21168_vm12, 0, %v12286_v5 }
 0x75f   :  { %12288 = vst [vmem:[#allocation4 + $0x28] sm:$0x1] %v12287_v19 }
 0x762   :  { %v15703_v2 = vpop.f32.mrb[68].mxu1 }
 0x763   :  { %v15704_v14 = vpop.f32.mrb[69].mxu1 }
 0x764   :  { %v21159_v52 = vadd.f32 %v15704_v14, %v15703_v2  ;;  %v15706_v32 = vpop.f32.mrb[70].mxu1  ;;  %v12326_v2 = vsel %vm21182_vm4, 0, %v12325_v31 }
 0x765   :  { %v15707_v12 = vpop.f32.mrb[71].mxu1  ;;  %12327 = vst [vmem:[#allocation4 + $0x28] sm:$0x4] %v12326_v2 }
 0x766   :  { %v21161_v38 = vadd.f32 %v15707_v12, %v15706_v32 }
 0x76a   :  { %v15709_v42 = vpop.f32.mrb[72].mxu1 }
 0x76b   :  { %v15710_v1 = vpop.f32.mrb[73].mxu1 }
 0x76c   :  { %v21163_v16 = vadd.f32 %v15710_v1, %v15709_v42  ;;  %v15712_v30 = vpop.f32.mrb[74].mxu1 }
 0x76d   :  { %v15713_v26 = vpop.f32.mrb[75].mxu1 }
 0x76e   :  { %v21165_v48 = vadd.f32 %v15713_v26, %v15712_v30 }
 0x783   :  { %v15715_v47 = vpop.f32.mrb[76].mxu1 }
 0x784   :  { %v15716_v59 = vpop.f32.mrb[77].mxu1 }
 0x785   :  { %v21188_v0 = vadd.f32 %v15716_v59, %v15715_v47  ;;  %v15718_v43 = vpop.f32.mrb[78].mxu1  ;;  %v12284_v59 = vsel %vm21168_vm12, 0, %v12283_v22 }
 0x786   :  { %v15719_v20 = vpop.f32.mrb[79].mxu1  ;;  %12285 = vst [vmem:[#allocation4 + $0x24] sm:$0x1] %v12284_v59 }
 0x787   :  { %v21190_v25 = vadd.f32 %v15719_v20, %v15718_v43  ;;  %v12323_v43 = vsel %vm21182_vm4, 0, %v12322_v10  ;;  %v12256_v20 = vld [vmem:[#allocation4] sm:$0x1] }
 0x788   :  { %12324 = vst [vmem:[#allocation4 + $0x24] sm:$0x4] %v12323_v43  ;;  %v12257_v24 = vsel %vm21168_vm12, 0, %v12256_v20 }
 0x789   :  { %12258 = vst [vmem:[#allocation4] sm:$0x1] %v12257_v24 }
 0x790   :  { %v21258_v63 = vld [vmem:[#allocation4] sm:$0x7] }
 0x7bb   :  { %v15721_v37 = vpop.f32.mrb[80].mxu1 }
 0x7bc   :  { %v15722_v33 = vpop.f32.mrb[81].mxu1 }
 0x7bd   :  { %v21208_v11 = vadd.f32 %v15722_v33, %v15721_v37  ;;  %v15724_v51 = vpop.f32.mrb[82].mxu1 }
 0x7be   :  { %v15725_v18 = vpop.f32.mrb[83].mxu1 }
 0x7bf   :  { %v21210_v3 = vadd.f32 %v15725_v18, %v15724_v51 }
 0x7c9   :  { %v15727_v50 = vpop.f32.mrb[84].mxu1 }
 0x7ca   :  { %v15728_v36 = vpop.f32.mrb[85].mxu1 }
 0x7cb   :  { %v21216_v57 = vadd.f32 %v15728_v36, %v15727_v50  ;;  %v15730_v17 = vpop.f32.mrb[86].mxu1 }
 0x7cc   :  { %v15731_v8 = vpop.f32.mrb[87].mxu1 }
 0x7cd   :  { %v21218_v54 = vadd.f32 %v15731_v8, %v15730_v17 }
 0x7d9   :  { %v15733_v55 = vpop.f32.mrb[88].mxu1 }
 0x7da   :  { %v15734_v14 = vpop.f32.mrb[89].mxu1 }
 0x7db   :  { %v21224_v32 = vadd.f32 %v15734_v14, %v15733_v55  ;;  %v15736_v12 = vpop.f32.mrb[90].mxu1 }
 0x7dc   :  { %v15737_v42 = vpop.f32.mrb[91].mxu1 }
 0x7dd   :  { %v21226_v1 = vadd.f32 %v15737_v42, %v15736_v12 }
 0x7e1   :  { %v15739_v30 = vpop.f32.mrb[92].mxu1 }
 0x7e2   :  { %v15740_v26 = vpop.f32.mrb[93].mxu1 }
 0x7e3   :  { %v21228_v46 = vadd.f32 %v15740_v26, %v15739_v30  ;;  %v15742_v15 = vpop.f32.mrb[94].mxu1 }
 0x7e4   :  { %v15743_v49 = vpop.f32.mrb[95].mxu1 }
 0x7e5   :  { %v21230_v47 = vadd.f32 %v15743_v49, %v15742_v15 }
 0x7e9   :  { %v16426_v40 = vpop.f32.mrb[96].mxu1 }
 0x7ea   :  { %v11492_v41 = vadd.f32 %v16426_v40, %v21159_v52  ;;  %v11483_v62 = vpop.f32.mrb[97].mxu1 }
 0x7eb   :  { %v11484_v34 = vadd.f32 %v21155_v61, %v11483_v62  ;;  %v16427_v21 = vpop.f32.mrb[98].mxu1 }
 0x7ec   :  { %v11555_v28 = vmul.f32 %v21244_v60, %v11492_v41  ;;  %v11495_v58 = vadd.f32 %v16427_v21, %v21161_v38  ;;  %v11486_v37 = vpop.f32.mrb[99].mxu1 }
 0x7ed   :  { %v11553_v33 = vmul.f32 %v21244_v60, %v11484_v34  ;;  %v11487_v51 = vadd.f32 %v21157_v4, %v11486_v37  ;;  %v21264_v4 = vrot.slane %v21258_v63, %v19814_v13 }
 0x7ee   :  { %v11578_v18 = vadd.f32 %v21247_v9, %v11555_v28  ;;  %v11556_v29 = vmul.f32 %v21244_v60, %v11495_v58 }
 0x7ef   :  { %v11576_v52 = vadd.f32 %v21247_v9, %v11553_v33  ;;  %v11554_v53 = vmul.f32 %v21244_v60, %v11487_v51 }
 0x7f0   :  { %v11594_v61 = vmax.f32 %v11578_v18, 0.0  ;;  %v11579_v23 = vadd.f32 %v21247_v9, %v11556_v29 }
 0x7f1   :  { %v11592_v50 = vmax.f32 %v11576_v52, 0.0  ;;  %v11577_v38 = vadd.f32 %v21247_v9, %v11554_v53  ;;  %v16430_v36 = vpop.f32.mrb[100].mxu1 }
 0x7f2   :  { %v11658_v17 = vcombine.high %v11594_v61, %v11594_v61  ;;  %v11665_v8 = vrot.slane %v11594_v61, %v19814_v13  ;;  %v11595_v5 = vmax.f32 %v11579_v23, 0.0  ;;  %v11508_v31 = vadd.f32 %v16430_v36, %v21188_v0  ;;  %v11499_v55 = vpop.f32.mrb[101].mxu1 }
 0x7f3   :  { %v11624_v19 = vcombine.high %v11592_v50, %v11592_v50  ;;  %v11631_v2 = vrot.slane %v11592_v50, %v19814_v13  ;;  %v11593_v14 = vmax.f32 %v11577_v38, 0.0  ;;  %v21270_v12 = vadd.f32 %v21163_v16, %v11499_v55  ;;  %v21272_v42 = vpop.f32.mrb[102].mxu1 }
 0x7f4   :  { %v11672_v30 = vrot.slane %v11658_v17, %v19814_v13  ;;  %v11673_v26 = vcombine.high %v11665_v8, %v11665_v8  ;;  %v15043_v15 = vrot.slane %v11665_v8, 9  ;;  %v11675_v49 = vcombine.high %v11595_v5, %v11595_v5  ;;  %v21275_v22 = vpop.f32.mrb[103].mxu1 }
 0x7f5   :  { %v11638_v10 = vrot.slane %v11624_v19, %v19814_v13  ;;  %v11639_v0 = vcombine.high %v11631_v2, %v11631_v2  ;;  %v15035_v59 = vrot.slane %v11631_v2, 9  ;;  %v11682_v43 = vrot.slane %v11595_v5, %v19814_v13 }
 0x7f6   :  { %v11674_v20 = vcombine.high %v11672_v30, %v11672_v30  ;;  %v15044_v56 = vrot.slane %v11673_v26, 9  ;;  %v15045_v24 = vrot.slane %v11672_v30, 9  ;;  %v12160_v16 = vmax.f32 %v11665_v8, %v15043_v15 }
 0x7f7   :  { %v11640_v45 = vcombine.high %v11638_v10, %v11638_v10  ;;  %v15036_v6 = vrot.slane %v11639_v0, 9  ;;  %v15037_v27 = vrot.slane %v11638_v10, 9  ;;  %v12152_v39 = vmax.f32 %v11631_v2, %v15035_v59 }
 0x7f8   :  { %v15046_v7 = vrot.slane %v11674_v20, 9  ;;  %v12161_v40 = vmax.f32 %v11673_v26, %v15044_v56  ;;  %v12162_v41 = vmax.f32 %v11672_v30, %v15045_v24  ;;  %v11689_v62 = vrot.slane %v11675_v49, %v19814_v13 }
 0x7f9   :  { %v15038_v34 = vrot.slane %v11640_v45, 9  ;;  %v12153_v21 = vmax.f32 %v11639_v0, %v15036_v6  ;;  %v12154_v28 = vmax.f32 %v11638_v10, %v15037_v27  ;;  %v11690_v58 = vcombine.high %v11682_v43, %v11682_v43  ;;  %v21280_v37 = vpop.f32.mrb[104].mxu1 }
 0x7fa   :  { %v12163_v33 = vmax.f32 %v11674_v20, %v15046_v7  ;;  %v11691_v51 = vcombine.high %v11689_v62, %v11689_v62  ;;  %v15047_v18 = vrot.slane %v11682_v43, 9  ;;  %v15049_v29 = vrot.slane %v11689_v62, 9  ;;  %v21282_v52 = vpop.f32.mrb[105].mxu1 }
 0x7fb   :  { %v12155_v53 = vmax.f32 %v11640_v45, %v15038_v34  ;;  %v15048_v61 = vrot.slane %v11690_v58, 9  ;;  %v11641_v23 = vcombine.high %v11593_v14, %v11593_v14  ;;  %v11648_v50 = vrot.slane %v11593_v14, %v19814_v13  ;;  %v21285_v38 = vpop.f32.mrb[106].mxu1 }
 0x7fc   :  { %v15050_v36 = vrot.slane %v11691_v51, 9  ;;  %v12164_v17 = vmax.f32 %v11682_v43, %v15047_v18  ;;  %v12166_v8 = vmax.f32 %v11689_v62, %v15049_v29  ;;  %v11559_v5 = vmul.f32 %v21244_v60, %v11508_v31  ;;  %v21288_v55 = vpop.f32.mrb[107].mxu1 }
 0x7fd   :  { %v12165_v19 = vmax.f32 %v11690_v58, %v15048_v61  ;;  %v11655_v2 = vrot.slane %v11641_v23, %v19814_v13  ;;  %v11656_v30 = vcombine.high %v11648_v50, %v11648_v50  ;;  %v15039_v26 = vrot.slane %v11648_v50, 9 }
 0x7fe   :  { %v12167_v15 = vmax.f32 %v11691_v51, %v15050_v36  ;;  %v12220_v49 = vmax.f32 %v12160_v16, %v12164_v17  ;;  %v12222_v10 = vmax.f32 %v12162_v41, %v12166_v8  ;;  %v11582_v14 = vadd.f32 %v21247_v9, %v11559_v5 }
 0x7ff   :  { %v12221_v0 = vmax.f32 %v12161_v40, %v12165_v19  ;;  %v11657_v59 = vcombine.high %v11655_v2, %v11655_v2  ;;  %v15040_v20 = vrot.slane %v11656_v30, 9  ;;  %v15041_v43 = vrot.slane %v11655_v2, 9 }
 0x800   :  { %v12223_v56 = vmax.f32 %v12163_v33, %v12167_v15  ;;  %v15356_v24 = vpack.c.bf16 %v12220_v49, %v12220_v49  ;;  %v15358_v31 = vpack.c.bf16 %v12222_v10, %v12222_v10  ;;  %v12156_v45 = vmax.f32 %v11648_v50, %v15039_v26 }
 0x801   :  { %v15357_v6 = vpack.c.bf16 %v12221_v0, %v12221_v0  ;;  %v15042_v27 = vrot.slane %v11657_v59, 9  ;;  %v12157_v7 = vmax.f32 %v11656_v30, %v15040_v20  ;;  %v12158_v62 = vmax.f32 %v11655_v2, %v15041_v43  ;;  %v21292_v34 = vpop.f32.mrb[108].mxu1 }
 0x802   :  { %v15359_v58 = vpack.c.bf16 %v12223_v56, %v12223_v56  ;;  %v12463_v16 = vunpack.c.l.b16 %v15356_v24  ;;  %v12465_v41 = vunpack.c.l.b16 %v15358_v31  ;;  %v12216_v51 = vmax.f32 %v12152_v39, %v12156_v45  ;;  %v21294_v18 = vpop.f32.mrb[109].mxu1 }
 0x803   :  { %v12464_v40 = vunpack.c.l.b16 %v15357_v6  ;;  %v12159_v29 = vmax.f32 %v11657_v59, %v15042_v27  ;;  %v12217_v61 = vmax.f32 %v12153_v21, %v12157_v7  ;;  %v12218_v23 = vmax.f32 %v12154_v28, %v12158_v62  ;;  %v21296_v33 = vpop.f32.mrb[110].mxu1 }
 0x804   :  { %v12466_v36 = vunpack.c.l.b16 %v15359_v58  ;;  %v12498_v50 = vrot.slane %v12463_v16, 7  ;;  %v12501_v17 = vrot.slane %v12465_v41, 5  ;;  %v15352_v8 = vpack.c.bf16 %v12216_v51, %v12216_v51  ;;  %v21298_v5 = vpop.f32.mrb[111].mxu1 }
 0x805   :  { %v12499_v19 = vrot.slane %v12464_v40, 6  ;;  %v12219_v2 = vmax.f32 %v12155_v53, %v12159_v29  ;;  %v15353_v30 = vpack.c.bf16 %v12217_v61, %v12217_v61  ;;  %v15354_v26 = vpack.c.bf16 %v12218_v23, %v12218_v23 }
 0x806   :  { %v12503_v15 = vrot.slane %v12466_v36, 4  ;;  %v12459_v39 = vunpack.c.l.b16 %v15352_v8  ;;  %v11598_v49 = vmax.f32 %v11582_v14, 0.0  ;;  %v11557_v10 = vmul.f32 %v21244_v60, %v21270_v12  ;;  %v12570_v12 = vld [vmem:[#allocation4 + $0x8] sm:$0x7] }
 0x807   :  { %v12500_v21 = vsel %vm9987_vm9, %v12499_v19, %v12498_v50  ;;  %v15355_v28 = vpack.c.bf16 %v12219_v2, %v12219_v2  ;;  %v12460_v0 = vunpack.c.l.b16 %v15353_v30  ;;  %v12461_v59 = vunpack.c.l.b16 %v15354_v26 }
 0x808   :  { %v12502_v20 = vsel %vm9990_vm10, %v12501_v17, %v12500_v21  ;;  %v12491_v43 = vrot.slane %v12459_v39, 7  ;;  %v11726_v56 = vcombine.high %v11598_v49, %v11598_v49  ;;  %v11733_v24 = vrot.slane %v11598_v49, %v19814_v13  ;;  %v12567_v17 = vld [vmem:[#allocation4 + $0x4] sm:$0x7] }
 0x809   :  { %v12504_v53 = vsel %vm9993_vm11, %v12503_v15, %v12502_v20  ;;  %v12462_v31 = vunpack.c.l.b16 %v15355_v28  ;;  %v12492_v45 = vrot.slane %v12460_v0, 6  ;;  %v12494_v6 = vrot.slane %v12461_v59, 5 }
 0x80a   :  { %v12548_v27 = vpack.c.b16 %v12504_v53, %v12504_v53  ;;  %v11740_v7 = vrot.slane %v11726_v56, %v19814_v13  ;;  %v11741_v62 = vcombine.high %v11733_v24, %v11733_v24  ;;  %v15059_v58 = vrot.slane %v11733_v24, 9 }
 0x80b   :  { %v12493_v16 = vsel %vm9987_vm9, %v12492_v45, %v12491_v43  ;;  %v12496_v41 = vrot.slane %v12462_v31, 4  ;;  %v11580_v51 = vadd.f32 %v21247_v9, %v11557_v10  ;;  %v11511_v40 = vadd.f32 %v21272_v42, %v21190_v25 }
 0x80c   :  { %v12571_v29 = vsel %vm21308_vm6, %v12548_v27, %v12570_v12  ;;  %v12495_v61 = vsel %vm9990_vm10, %v12494_v6, %v12493_v16  ;;  %v11742_v23 = vcombine.high %v11740_v7, %v11740_v7  ;;  %v15060_v36 = vrot.slane %v11741_v62, 9 }
 0x80d   :  { %12572 = vst [vmem:[#allocation4 + $0x8] sm:$0x7] %v12571_v29  ;;  %v12497_v50 = vsel %vm9993_vm11, %v12496_v41, %v12495_v61  ;;  %v15061_v8 = vrot.slane %v11740_v7, 9  ;;  %v12176_v19 = vmax.f32 %v11733_v24, %v15059_v58  ;;  %v11596_v2 = vmax.f32 %v11580_v51, 0.0 }
 0x80e   :  { %v12547_v30 = vpack.c.b16 %v12497_v50, %v12497_v50  ;;  %v15062_v26 = vrot.slane %v11742_v23, 9  ;;  %v12177_v15 = vmax.f32 %v11741_v62, %v15060_v36  ;;  %v11560_v39 = vmul.f32 %v21244_v60, %v11511_v40 }
 0x80f   :  { %v12178_v25 = vmax.f32 %v11740_v7, %v15061_v8  ;;  %v11692_v42 = vcombine.high %v11596_v2, %v11596_v2  ;;  %v11699_v49 = vrot.slane %v11596_v2, %v19814_v13  ;;  %v11503_v10 = vadd.f32 %v21165_v48, %v21275_v22 }
 0x810   :  { %v12568_v21 = vsel %vm21308_vm6, %v12547_v30, %v12567_v17  ;;  %v12179_v28 = vmax.f32 %v11742_v23, %v15062_v26  ;;  %v11583_v0 = vadd.f32 %v21247_v9, %v11560_v39  ;;  %v11524_v59 = vadd.f32 %v21280_v37, %v21216_v57 }
 0x811   :  { %12569 = vst [vmem:[#allocation4 + $0x4] sm:$0x7] %v12568_v21  ;;  %v11706_v20 = vrot.slane %v11692_v42, %v19814_v13  ;;  %v11707_v43 = vcombine.high %v11699_v49, %v11699_v49  ;;  %v15051_v56 = vrot.slane %v11699_v49, 9  ;;  %v11558_v24 = vmul.f32 %v21244_v60, %v11503_v10 }
 0x812   :  { %v11599_v53 = vmax.f32 %v11583_v0, 0.0  ;;  %v11563_v12 = vmul.f32 %v21244_v60, %v11524_v59  ;;  %v11516_v48 = vadd.f32 %v21208_v11, %v21282_v52  ;;  %v11527_v22 = vadd.f32 %v21285_v38, %v21218_v54 }
 0x813   :  { %v11708_v31 = vcombine.high %v11706_v20, %v11706_v20  ;;  %v15052_v45 = vrot.slane %v11707_v43, 9  ;;  %v15053_v6 = vrot.slane %v11706_v20, 9  ;;  %v12168_v57 = vmax.f32 %v11699_v49, %v15051_v56 }
 0x814   :  { %v11743_v37 = vcombine.high %v11599_v53, %v11599_v53  ;;  %v11750_v27 = vrot.slane %v11599_v53, %v19814_v13  ;;  %v11581_v7 = vadd.f32 %v21247_v9, %v11558_v24  ;;  %v11586_v62 = vadd.f32 %v21247_v9, %v11563_v12 }
 0x815   :  { %v15054_v58 = vrot.slane %v11708_v31, 9  ;;  %v12169_v16 = vmax.f32 %v11707_v43, %v15052_v45  ;;  %v12170_v41 = vmax.f32 %v11706_v20, %v15053_v6  ;;  %v11561_v51 = vmul.f32 %v21244_v60, %v11516_v48 }
 0x816   :  { %v11757_v11 = vrot.slane %v11743_v37, %v19814_v13  ;;  %v11758_v52 = vcombine.high %v11750_v27, %v11750_v27  ;;  %v15063_v54 = vrot.slane %v11750_v27, 9  ;;  %v11597_v38 = vmax.f32 %v11581_v7, 0.0 }
 0x817   :  { %v12171_v40 = vmax.f32 %v11708_v31, %v15054_v58  ;;  %v11602_v29 = vmax.f32 %v11586_v62, 0.0  ;;  %v21343_v61 = vadd.f32 %v21247_v9, %v11561_v51  ;;  %v21346_v23 = vmul.f32 %v21244_v60, %v11527_v22  ;;  %v17054_v62 = vld [vmem:[#allocation19] sm:$0xff]   ;;  %v17055_v58 = vld [vmem:[#allocation19 + $0x48] sm:$0xff]  }
 0x818   :  { %v11759_v36 = vcombine.high %v11757_v11, %v11757_v11  ;;  %v15064_v50 = vrot.slane %v11758_v52, 9  ;;  %v15065_v17 = vrot.slane %v11757_v11, 9  ;;  %v12180_v8 = vmax.f32 %v11750_v27, %v15063_v54 }
 0x819   :  { %v11709_v2 = vcombine.high %v11597_v38, %v11597_v38  ;;  %v11716_v30 = vrot.slane %v11597_v38, %v19814_v13  ;;  %v11794_v26 = vcombine.high %v11602_v29, %v11602_v29  ;;  %v21350_v39 = vrot.slane %v11602_v29, %v19814_v13 }
 0x81a   :  { %v15066_v42 = vrot.slane %v11759_v36, 9  ;;  %v12181_v49 = vmax.f32 %v11758_v52, %v15064_v50  ;;  %v12182_v10 = vmax.f32 %v11757_v11, %v15065_v17  ;;  %v12228_v21 = vmax.f32 %v12176_v19, %v12180_v8  ;;  %v17053_v19 = vld [vmem:[#allocation19 + $0x40] sm:$0xff]  }
 0x81b   :  { %v11723_v0 = vrot.slane %v11709_v2, %v19814_v13  ;;  %v11724_v59 = vcombine.high %v11716_v30, %v11716_v30  ;;  %v15055_v20 = vrot.slane %v11716_v30, 9  ;;  %v21354_v43 = vrot.slane %v11794_v26, %v19814_v13  ;;  %15755 = vmatprep.subr.bf16.mxu1 %v17053_v19 }
 0x81c   :  { %v12183_v56 = vmax.f32 %v11759_v36, %v15066_v42  ;;  %v12229_v24 = vmax.f32 %v12177_v15, %v12181_v49  ;;  %v12230_v53 = vmax.f32 %v12178_v25, %v12182_v10  ;;  %v15364_v12 = vpack.c.bf16 %v12228_v21, %v12228_v21  ;;  %15756 = vmatpush3.bf16.msra.mxu1 %v17054_v62  ;;  %v17057_v49 = vld [vmem:[#allocation19 + $0x50] sm:$0xff]  }
 0x81d   :  { %v11725_v48 = vcombine.high %v11723_v0, %v11723_v0  ;;  %v15056_v22 = vrot.slane %v11724_v59, 9  ;;  %v15057_v31 = vrot.slane %v11723_v0, 9  ;;  %v12172_v45 = vmax.f32 %v11716_v30, %v15055_v20  ;;  %15757 = vmatprep.subr.bf16.mxu1 %v17055_v58 }
 0x81e   :  { %v12231_v6 = vmax.f32 %v12179_v28, %v12183_v56  ;;  %v15365_v37 = vpack.c.bf16 %v12229_v24, %v12229_v24  ;;  %v15366_v27 = vpack.c.bf16 %v12230_v53, %v12230_v53  ;;  %v12471_v7 = vunpack.c.l.b16 %v15364_v12  ;;  %v17056_v28 = vld [vmem:[#allocation19 + $0x8] sm:$0xff]  }
 0x81f   :  { %v15058_v51 = vrot.slane %v11725_v48, 9  ;;  %v12173_v11 = vmax.f32 %v11724_v59, %v15056_v22  ;;  %v12174_v52 = vmax.f32 %v11723_v0, %v15057_v31  ;;  %v12224_v54 = vmax.f32 %v12168_v57, %v12172_v45  ;;  %v12576_v22 = vld [vmem:[#allocation4 + $0x10] sm:$0x7] }
 0x820   :  { %v15367_v38 = vpack.c.bf16 %v12231_v6, %v12231_v6  ;;  %v12472_v29 = vunpack.c.l.b16 %v15365_v37  ;;  %v12473_v15 = vunpack.c.l.b16 %v15366_v27  ;;  %v12512_v25 = vrot.slane %v12471_v7, 7  ;;  %15758 = vmatpush3.bf16.msra.mxu1 %v17056_v28  ;;  %v17059_v37 = vld [vmem:[#allocation19 + $0x58] sm:$0xff]  }
 0x821   :  { %v12175_v36 = vmax.f32 %v11725_v48, %v15058_v51  ;;  %v12225_v50 = vmax.f32 %v12169_v16, %v12173_v11  ;;  %v12226_v17 = vmax.f32 %v12170_v41, %v12174_v52  ;;  %v15360_v8 = vpack.c.bf16 %v12224_v54, %v12224_v54  ;;  %v17058_v48 = vld [vmem:[#allocation19 + $0x10] sm:$0xff]   ;;  %15759 = vmatprep.subr.bf16.mxu1 %v17057_v49 }
 0x822   :  { %v12474_v2 = vunpack.c.l.b16 %v15367_v38  ;;  %v12513_v30 = vrot.slane %v12472_v29, 6  ;;  %v12515_v26 = vrot.slane %v12473_v15, 5  ;;  %v11809_v42 = vcombine.high %v21350_v39, %v21350_v39 }
 0x823   :  { %v12227_v57 = vmax.f32 %v12171_v40, %v12175_v36  ;;  %v15361_v10 = vpack.c.bf16 %v12225_v50, %v12225_v50  ;;  %v15362_v21 = vpack.c.bf16 %v12226_v17, %v12226_v17  ;;  %v12467_v0 = vunpack.c.l.b16 %v15360_v8  ;;  %v12573_v8 = vld [vmem:[#allocation4 + $0xc] sm:$0x7] }
 0x824   :  { %v12514_v59 = vsel %vm9987_vm9, %v12513_v30, %v12512_v25  ;;  %v12517_v20 = vrot.slane %v12474_v2, 4  ;;  %v11810_v16 = vcombine.high %v21354_v43, %v21354_v43  ;;  %v15075_v41 = vrot.slane %v21350_v39, 9  ;;  %15760 = vmatpush3.bf16.msra.mxu1 %v17058_v48  ;;  %v17060_v25 = vld [vmem:[#allocation19 + $0x18] sm:$0xff]  }
 0x825   :  { %v12516_v56 = vsel %vm9990_vm10, %v12515_v26, %v12514_v59  ;;  %v15363_v24 = vpack.c.bf16 %v12227_v57, %v12227_v57  ;;  %v12468_v53 = vunpack.c.l.b16 %v15361_v10  ;;  %v12469_v12 = vunpack.c.l.b16 %v15362_v21  ;;  %15761 = vmatprep.subr.bf16.mxu1 %v17059_v37 }
 0x826   :  { %v12518_v40 = vsel %vm9993_vm11, %v12517_v20, %v12516_v56  ;;  %v12505_v31 = vrot.slane %v12467_v0, 7  ;;  %v15076_v45 = vrot.slane %v11809_v42, 9  ;;  %v15077_v6 = vrot.slane %v21354_v43, 9 }
 0x827   :  { %v12550_v27 = vpack.c.b16 %v12518_v40, %v12518_v40  ;;  %v12470_v7 = vunpack.c.l.b16 %v15363_v24  ;;  %v12506_v19 = vrot.slane %v12468_v53, 6  ;;  %v12508_v62 = vrot.slane %v12469_v12, 5 }
 0x828   :  { %v15078_v58 = vrot.slane %v11810_v16, 9  ;;  %v12192_v51 = vmax.f32 %v21350_v39, %v15075_v41  ;;  %v12193_v11 = vmax.f32 %v11809_v42, %v15076_v45  ;;  %v12194_v52 = vmax.f32 %v21354_v43, %v15077_v6  ;;  %15762 = vmatpush3.bf16.msra.mxu1 %v17060_v25 }
 0x829   :  { %v12577_v54 = vsel %vm21308_vm6, %v12550_v27, %v12576_v22  ;;  %v12507_v38 = vsel %vm9987_vm9, %v12506_v19, %v12505_v31  ;;  %v12510_v29 = vrot.slane %v12470_v7, 4  ;;  %v11600_v15 = vmax.f32 %v21343_v61, 0.0 }
 0x82a   :  { %12578 = vst [vmem:[#allocation4 + $0x10] sm:$0x7] %v12577_v54  ;;  %v12509_v36 = vsel %vm9990_vm10, %v12508_v62, %v12507_v38  ;;  %v12195_v50 = vmax.f32 %v11810_v16, %v15078_v58  ;;  %v11587_v39 = vadd.f32 %v21247_v9, %v21346_v23  ;;  %v11519_v43 = vadd.f32 %v21210_v3, %v21288_v55 }
 0x82b   :  { %v12511_v17 = vsel %vm9993_vm11, %v12510_v29, %v12509_v36  ;;  %v11760_v28 = vcombine.high %v11600_v15, %v11600_v15  ;;  %v11767_v2 = vrot.slane %v11600_v15, %v19814_v13  ;;  %v11540_v61 = vadd.f32 %v21292_v34, %v21228_v46 }
 0x82c   :  { %v12549_v30 = vpack.c.b16 %v12511_v17, %v12511_v17  ;;  %v11603_v26 = vmax.f32 %v11587_v39, 0.0  ;;  %v11562_v42 = vmul.f32 %v21244_v60, %v11519_v43  ;;  %v21383_v23 = vadd.f32 %v21224_v32, %v21294_v18 }
 0x82d   :  { %v11774_v3 = vrot.slane %v11760_v28, %v19814_v13  ;;  %v11775_v55 = vcombine.high %v11767_v2, %v11767_v2  ;;  %v15067_v49 = vrot.slane %v11767_v2, 9  ;;  %v11567_v57 = vmul.f32 %v21244_v60, %v11540_v61 }
 0x82e   :  { %v12574_v10 = vsel %vm21308_vm6, %v12549_v30, %v12573_v8  ;;  %v11811_v21 = vcombine.high %v11603_v26, %v11603_v26  ;;  %v11818_v46 = vrot.slane %v11603_v26, %v19814_v13  ;;  %v11585_v34 = vadd.f32 %v21247_v9, %v11562_v42 }
 0x82f   :  { %12575 = vst [vmem:[#allocation4 + $0xc] sm:$0x7] %v12574_v10  ;;  %v11776_v0 = vcombine.high %v11774_v3, %v11774_v3  ;;  %v15068_v59 = vrot.slane %v11775_v55, 9  ;;  %v15069_v32 = vrot.slane %v11774_v3, 9  ;;  %v12184_v18 = vmax.f32 %v11767_v2, %v15067_v49 }
 0x830   :  { %v11825_v20 = vrot.slane %v11811_v21, %v19814_v13  ;;  %v11826_v16 = vcombine.high %v11818_v46, %v11818_v46  ;;  %v15079_v41 = vrot.slane %v11818_v46, 9  ;;  %v11601_v56 = vmax.f32 %v11585_v34, 0.0 }
 0x831   :  { %v15070_v24 = vrot.slane %v11776_v0, 9  ;;  %v12185_v53 = vmax.f32 %v11775_v55, %v15068_v59  ;;  %v12186_v12 = vmax.f32 %v11774_v3, %v15069_v32  ;;  %v11590_v48 = vadd.f32 %v21247_v9, %v11567_v57 }
 0x832   :  { %v11827_v40 = vcombine.high %v11825_v20, %v11825_v20  ;;  %v15080_v22 = vrot.slane %v11826_v16, 9  ;;  %v15081_v31 = vrot.slane %v11825_v20, 9  ;;  %v12196_v45 = vmax.f32 %v11818_v46, %v15079_v41 }
 0x833   :  { %v12187_v6 = vmax.f32 %v11776_v0, %v15070_v24  ;;  %v11777_v37 = vcombine.high %v11601_v56, %v11601_v56  ;;  %v11784_v27 = vrot.slane %v11601_v56, %v19814_v13  ;;  %v11606_v7 = vmax.f32 %v11590_v48, 0.0 }
 0x834   :  { %v15082_v19 = vrot.slane %v11827_v40, 9  ;;  %v12197_v62 = vmax.f32 %v11826_v16, %v15080_v22  ;;  %v12198_v58 = vmax.f32 %v11825_v20, %v15081_v31  ;;  %v12236_v54 = vmax.f32 %v12192_v51, %v12196_v45 }
 0x835   :  { %v11791_v38 = vrot.slane %v11777_v37, %v19814_v13  ;;  %v11792_v29 = vcombine.high %v11784_v27, %v11784_v27  ;;  %v15071_v15 = vrot.slane %v11784_v27, 9  ;;  %v11862_v25 = vcombine.high %v11606_v7, %v11606_v7 }
 0x836   :  { %v12199_v36 = vmax.f32 %v11827_v40, %v15082_v19  ;;  %v12237_v39 = vmax.f32 %v12193_v11, %v12197_v62  ;;  %v12238_v43 = vmax.f32 %v12194_v52, %v12198_v58  ;;  %v15372_v17 = vpack.c.bf16 %v12236_v54, %v12236_v54 }
 0x837   :  { %v11793_v8 = vcombine.high %v11791_v38, %v11791_v38  ;;  %v15072_v28 = vrot.slane %v11792_v29, 9  ;;  %v15073_v2 = vrot.slane %v11791_v38, 9  ;;  %v12188_v61 = vmax.f32 %v11784_v27, %v15071_v15  ;;  %v21399_v27 = vld [vmem:[#allocation4 + $0x14] sm:$0x7] }
 0x838   :  { %v12239_v30 = vmax.f32 %v12195_v50, %v12199_v36  ;;  %v15373_v26 = vpack.c.bf16 %v12237_v39, %v12237_v39  ;;  %v15374_v42 = vpack.c.bf16 %v12238_v43, %v12238_v43  ;;  %v12479_v3 = vunpack.c.l.b16 %v15372_v17  ;;  %v17061_v36 = vld [vmem:[#allocation19 + $0x60] sm:$0xff]   ;;  %v17063_v39 = vld [vmem:[#allocation19 + $0x68] sm:$0xff]  }
 0x839   :  { %v15074_v55 = vrot.slane %v11793_v8, 9  ;;  %v12189_v49 = vmax.f32 %v11792_v29, %v15072_v28  ;;  %v12190_v51 = vmax.f32 %v11791_v38, %v15073_v2  ;;  %v12232_v57 = vmax.f32 %v12184_v18, %v12188_v61  ;;  %15763 = vmatprep.subr.bf16.mxu1 %v17061_v36 }
 0x83a   :  { %v15375_v10 = vpack.c.bf16 %v12239_v30, %v12239_v30  ;;  %v12480_v21 = vunpack.c.l.b16 %v15373_v26  ;;  %v12481_v46 = vunpack.c.l.b16 %v15374_v42  ;;  %v12526_v34 = vrot.slane %v12479_v3, 7  ;;  %v12593_v42 = vld [vmem:[#allocation4 + $0x8] sm:$0x7]  ;;  %v12594_v3 = vld [vmem:[#allocation4 + $0xc] sm:$0x7] }
 0x83b   :  { %v12191_v0 = vmax.f32 %v11793_v8, %v15074_v55  ;;  %v12233_v11 = vmax.f32 %v12185_v53, %v12189_v49  ;;  %v12234_v52 = vmax.f32 %v12186_v12, %v12190_v51  ;;  %v15368_v59 = vpack.c.bf16 %v12232_v57, %v12232_v57 }
 0x83c   :  { %v12482_v32 = vunpack.c.l.b16 %v15375_v10  ;;  %v12527_v20 = vrot.slane %v12480_v21, 6  ;;  %v12529_v16 = vrot.slane %v12481_v46, 5  ;;  %v11869_v50 = vrot.slane %v11606_v7, %v19814_v13  ;;  %v12582_v7 = vld [vmem:[#allocation4 + $0x20] sm:$0x7]  ;;  %v21418_v10 = vld [vmem:[#allocation4 + $0x4] sm:$0x7] }
 0x83d   :  { %v12235_v41 = vmax.f32 %v12187_v6, %v12191_v0  ;;  %v15369_v56 = vpack.c.bf16 %v12233_v11, %v12233_v11  ;;  %v15370_v24 = vpack.c.bf16 %v12234_v52, %v12234_v52  ;;  %v12475_v48 = vunpack.c.l.b16 %v15368_v59  ;;  %v17064_v21 = vld [vmem:[#allocation19 + $0x28] sm:$0xff]  }
 0x83e   :  { %v12528_v40 = vsel %vm9987_vm9, %v12527_v20, %v12526_v34  ;;  %v12531_v18 = vrot.slane %v12482_v32, 4  ;;  %v11876_v22 = vrot.slane %v11862_v25, %v19814_v13  ;;  %v11877_v31 = vcombine.high %v11869_v50, %v11869_v50  ;;  %v17062_v25 = vld [vmem:[#allocation19 + $0x20] sm:$0xff]   ;;  %v12579_v34 = vld [vmem:[#allocation4 + $0x1c] sm:$0x7] }
 0x83f   :  { %v12530_v45 = vsel %vm9990_vm10, %v12529_v16, %v12528_v40  ;;  %v15371_v53 = vpack.c.bf16 %v12235_v41, %v12235_v41  ;;  %v12476_v12 = vunpack.c.l.b16 %v15369_v56  ;;  %v12477_v37 = vunpack.c.l.b16 %v15370_v24  ;;  %15764 = vmatpush3.bf16.msra.mxu1 %v17062_v25  ;;  %v12595_v52 = vld [vmem:[#allocation4 + $0x10] sm:$0x7] }
 0x840   :  { %v12532_v19 = vsel %vm9993_vm11, %v12531_v18, %v12530_v45  ;;  %v12519_v6 = vrot.slane %v12475_v48, 7  ;;  %v11878_v62 = vcombine.high %v11876_v22, %v11876_v22  ;;  %v15091_v58 = vrot.slane %v11869_v50, 9  ;;  %15765 = vmatprep.subr.bf16.mxu1 %v17063_v39 }
 0x841   :  { %v12552_v54 = vpack.c.b16 %v12532_v19, %v12532_v19  ;;  %v12478_v38 = vunpack.c.l.b16 %v15371_v53  ;;  %v12520_v29 = vrot.slane %v12476_v12, 6  ;;  %v12522_v15 = vrot.slane %v12477_v37, 5 }
 0x842   :  { %v15092_v43 = vrot.slane %v11877_v31, 9  ;;  %v15093_v17 = vrot.slane %v11876_v22, 9  ;;  %v15094_v8 = vrot.slane %v11878_v62, 9  ;;  %v21404_v28 = vrot.slane %v21399_v27, %v19814_v13 }
 0x843   :  { %v12583_v2 = vsel %vm21308_vm6, %v12552_v54, %v12582_v7  ;;  %v12521_v61 = vsel %vm9987_vm9, %v12520_v29, %v12519_v6  ;;  %v12524_v30 = vrot.slane %v12478_v38, 4  ;;  %v11565_v26 = vmul.f32 %v21244_v60, %v21383_v23  ;;  %15766 = vmatpush3.bf16.msra.mxu1 %v17064_v21 }
 0x844   :  { %12584 = vst [vmem:[#allocation4 + $0x20] sm:$0x7] %v12583_v2  ;;  %v12523_v55 = vsel %vm9990_vm10, %v12522_v15, %v12521_v61  ;;  %v21412_v49 = vmax.f32 %v11869_v50, %v15091_v58  ;;  %v21414_v51 = vmax.f32 %v11877_v31, %v15092_v43  ;;  %v21416_v57 = vmax.f32 %v11876_v22, %v15093_v17  ;;  %v17065_v22 = vld [vmem:[#allocation19 + $0x70] sm:$0xff]  }
 0x845   :  { %v12525_v46 = vsel %vm9993_vm11, %v12524_v30, %v12523_v55  ;;  %v11588_v23 = vadd.f32 %v21247_v9, %v11565_v26  ;;  %v11543_v0 = vadd.f32 %v21296_v33, %v21230_v47  ;;  %v11535_v11 = vadd.f32 %v21226_v1, %v21298_v5  ;;  %15767 = vmatprep.subr.bf16.mxu1 %v17065_v22 }
 0x846   :  { %v12551_v59 = vpack.c.b16 %v12525_v46, %v12525_v46  ;;  %v21426_v32 = vmax.f32 %v11878_v62, %v15094_v8  ;;  %v12612_v20 = vcombine.low %v12593_v42, %v12594_v3  ;;  %v21429_v16 = vrot.slane %v12593_v42, %v19814_v13 }
 0x847   :  { %v11604_v50 = vmax.f32 %v11588_v23, 0.0  ;;  %v11568_v41 = vmul.f32 %v21244_v60, %v11543_v0  ;;  %v11566_v56 = vmul.f32 %v21244_v60, %v11535_v11  ;;  %v12955_v24 = vcombine.low %v21418_v10, %v12593_v42 }
 0x848   :  { %v12580_v47 = vsel %vm21308_vm6, %v12551_v59, %v12579_v34  ;;  %v21437_v1 = vrot.slane %v12612_v20, %v19814_v13  ;;  %v21440_v33 = vrot.slane %v12594_v3, %v19814_v13  ;;  %v12956_v5 = vcombine.low %v12594_v3, %v12595_v52 }
 0x849   :  { %12581 = vst [vmem:[#allocation4 + $0x1c] sm:$0x7] %v12580_v47  ;;  %v11828_v48 = vcombine.high %v11604_v50, %v11604_v50  ;;  %v11835_v40 = vrot.slane %v11604_v50, %v19814_v13  ;;  %v11591_v18 = vadd.f32 %v21247_v9, %v11568_v41  ;;  %v11589_v60 = vadd.f32 %v21247_v9, %v11566_v56 }
 0x84a   :  { %v12963_v31 = vrot.slane %v12955_v24, %v19814_v13  ;;  %v12970_v45 = vrot.slane %v12956_v5, %v19814_v13  ;;  %v21448_v53 = vrot.slane %v12595_v52, %v19814_v13  ;;  %v13131_v12 = vcombine.low %v12595_v52, %v21399_v27 }
 0x84b   :  { %v11842_v37 = vrot.slane %v11828_v48, %v19814_v13  ;;  %v11843_v19 = vcombine.high %v11835_v40, %v11835_v40  ;;  %v15083_v7 = vrot.slane %v11835_v40, 9  ;;  %v11607_v6 = vmax.f32 %v11591_v18, 0.0 }
 0x84c   :  { %v11605_v62 = vmax.f32 %v11589_v60, 0.0  ;;  %v12971_v58 = vcombine.low %v12963_v31, %v12970_v45  ;;  %v21453_v9 = vrot.slane %v13131_v12, %v19814_v13  ;;  %v12611_v54 = vcombine.low %v21258_v63, %v21418_v10 }
 0x84d   :  { %v11844_v38 = vcombine.high %v11842_v37, %v11842_v37  ;;  %v15084_v29 = vrot.slane %v11843_v19, 9  ;;  %v15085_v15 = vrot.slane %v11842_v37, 9  ;;  %v12200_v36 = vmax.f32 %v11835_v40, %v15083_v7 }
 0x84e   :  { %v11879_v25 = vcombine.high %v11607_v6, %v11607_v6  ;;  %v11886_v27 = vrot.slane %v11607_v6, %v19814_v13  ;;  %v11845_v39 = vcombine.high %v11605_v62, %v11605_v62  ;;  %v11852_v43 = vrot.slane %v11605_v62, %v19814_v13  ;;  %12989 = vrot.lane.b32.xlu0 %v12971_v58, %s17500_s20 }
 0x84f   :  { %v15086_v17 = vrot.slane %v11844_v38, 9  ;;  %v12201_v8 = vmax.f32 %v11843_v19, %v15084_v29  ;;  %v12202_v2 = vmax.f32 %v11842_v37, %v15085_v15  ;;  %v21462_v61 = vrot.slane %v21418_v10, %v19814_v13  ;;  %v12328_v10 = vld [vmem:[#allocation4 + $0x2c] sm:$0x4] }
 0x850   :  { %v11893_v30 = vrot.slane %v11879_v25, %v19814_v13  ;;  %v11894_v26 = vcombine.high %v11886_v27, %v11886_v27  ;;  %v15095_v42 = vrot.slane %v11886_v27, 9  ;;  %v11859_v3 = vrot.slane %v11845_v39, %v19814_v13 }
 0x851   :  { %v12203_v55 = vmax.f32 %v11844_v38, %v15086_v17  ;;  %v11860_v21 = vcombine.high %v11852_v43, %v11852_v43  ;;  %v15087_v46 = vrot.slane %v11852_v43, 9  ;;  %v21468_v34 = vcombine.high %v21264_v4, %v21264_v4 }
 0x852   :  { %v11895_v23 = vcombine.high %v11893_v30, %v11893_v30  ;;  %v15096_v0 = vrot.slane %v11894_v26, 9  ;;  %v15097_v11 = vrot.slane %v11893_v30, 9  ;;  %v12212_v52 = vmax.f32 %v11886_v27, %v15095_v42 }
 0x853   :  { %v11861_v59 = vcombine.high %v11859_v3, %v11859_v3  ;;  %v15088_v20 = vrot.slane %v11860_v21, 9  ;;  %v15089_v50 = vrot.slane %v11859_v3, 9  ;;  %v12204_v41 = vmax.f32 %v11852_v43, %v15087_v46 }
 0x854   :  { %v15098_v56 = vrot.slane %v11895_v23, 9  ;;  %v12213_v24 = vmax.f32 %v11894_v26, %v15096_v0  ;;  %v12214_v47 = vmax.f32 %v11893_v30, %v15097_v11  ;;  %v12244_v5 = vmax.f32 %v21412_v49, %v12212_v52 }
 0x855   :  { %v15090_v48 = vrot.slane %v11861_v59, 9  ;;  %v12205_v40 = vmax.f32 %v11860_v21, %v15088_v20  ;;  %v12206_v18 = vmax.f32 %v11859_v3, %v15089_v50  ;;  %v12240_v60 = vmax.f32 %v12200_v36, %v12204_v41 }
 0x856   :  { %v12215_v22 = vmax.f32 %v11895_v23, %v15098_v56  ;;  %v12245_v31 = vmax.f32 %v21414_v51, %v12213_v24  ;;  %v12246_v45 = vmax.f32 %v21416_v57, %v12214_v47  ;;  %v15380_v12 = vpack.c.bf16 %v12244_v5, %v12244_v5  ;;  %v12588_v24 = vld [vmem:[#allocation4 + $0x28] sm:$0x7] }
 0x857   :  { %v12207_v37 = vmax.f32 %v11861_v59, %v15090_v48  ;;  %v12241_v19 = vmax.f32 %v12201_v8, %v12205_v40  ;;  %v12242_v7 = vmax.f32 %v12202_v2, %v12206_v18  ;;  %v15376_v6 = vpack.c.bf16 %v12240_v60, %v12240_v60  ;;  %v12585_v60 = vld [vmem:[#allocation4 + $0x24] sm:$0x7] }
 0x858   :  { %v12247_v62 = vmax.f32 %v21426_v32, %v12215_v22  ;;  %v15381_v58 = vpack.c.bf16 %v12245_v31, %v12245_v31  ;;  %v15382_v38 = vpack.c.bf16 %v12246_v45, %v12246_v45  ;;  %v12487_v49 = vunpack.c.l.b16 %v15380_v12 }
 0x859   :  { %v12243_v29 = vmax.f32 %v12203_v55, %v12207_v37  ;;  %v15377_v15 = vpack.c.bf16 %v12241_v19, %v12241_v19  ;;  %v15378_v25 = vpack.c.bf16 %v12242_v7, %v12242_v7  ;;  %v12483_v36 = vunpack.c.l.b16 %v15376_v6 }
 0x85a   :  { %v15383_v27 = vpack.c.bf16 %v12247_v62, %v12247_v62  ;;  %v12488_v51 = vunpack.c.l.b16 %v15381_v58  ;;  %v12489_v39 = vunpack.c.l.b16 %v15382_v38  ;;  %v12540_v57 = vrot.slane %v12487_v49, 7  ;;  %v12274_v49 = vld [vmem:[#allocation4 + $0x18] sm:$0x1] }
 0x85b   :  { %v15379_v43 = vpack.c.bf16 %v12243_v29, %v12243_v29  ;;  %v12484_v17 = vunpack.c.l.b16 %v15377_v15  ;;  %v12485_v30 = vunpack.c.l.b16 %v15378_v25  ;;  %v12533_v8 = vrot.slane %v12483_v36, 7 }
 0x85c   :  { %v12490_v2 = vunpack.c.l.b16 %v15383_v27  ;;  %v12541_v26 = vrot.slane %v12488_v51, 6  ;;  %v12543_v42 = vrot.slane %v12489_v39, 5  ;;  %v21476_v32 = vcombine.high %v21462_v61, %v21462_v61  ;;  %v12289_v51 = vld [vmem:[#allocation4 + $0x2c] sm:$0x1]  ;;  %v12313_v39 = vld [vmem:[#allocation4 + $0x18] sm:$0x4] }
 0x85d   :  { %v12486_v3 = vunpack.c.l.b16 %v15379_v43  ;;  %v12534_v55 = vrot.slane %v12484_v17, 6  ;;  %v12536_v21 = vrot.slane %v12485_v30, 5  ;;  %v21480_v46 = vcombine.high %v21429_v16, %v21429_v16 }
 0x85e   :  { %v12542_v23 = vsel %vm9987_vm9, %v12541_v26, %v12540_v57  ;;  %v12545_v0 = vrot.slane %v12490_v2, 4  ;;  %v21485_v11 = vcombine.high %v21440_v33, %v21440_v33  ;;  %v12722_v52 = vshrl.u32 %v21264_v4, 16  ;;  %v12599_v2 = vld [vmem:[#allocation4 + $0x20] sm:$0x7] }
 0x85f   :  { %v12544_v59 = vsel %vm9990_vm10, %v12543_v42, %v12542_v23  ;;  %v12535_v20 = vsel %vm9987_vm9, %v12534_v55, %v12533_v8  ;;  %v12538_v50 = vrot.slane %v12486_v3, 4  ;;  %v12725_v41 = vshll.u32 %v21264_v4, 16 }
 0x860   :  { %v12546_v56 = vsel %vm9993_vm11, %v12545_v0, %v12544_v59  ;;  %v12537_v47 = vsel %vm9990_vm10, %v12536_v21, %v12535_v20  ;;  %v12724_v5 = vrot.slane %v12722_v52, 6  ;;  %v12731_v48 = vshll.u32 %v21468_v34, 16  ;;  %v21532_v21 = vld [vmem:[#allocation4 + $0x1c] sm:$0x7] }
 0x861   :  { %v12554_v40 = vpack.c.b16 %v12546_v56, %v12546_v56  ;;  %v12539_v18 = vsel %vm9993_vm11, %v12538_v50, %v12537_v47  ;;  %v12727_v31 = vrot.slane %v12725_v41, 7  ;;  %v12736_v45 = vshrl.u32 %v21462_v61, 16  ;;  %v17066_v20 = vld [vmem:[#allocation19 + $0x30] sm:$0xff]   ;;  %v17067_v50 = vld [vmem:[#allocation19 + $0x78] sm:$0xff]  }
 0x862   :  { %v12553_v12 = vpack.c.b16 %v12539_v18, %v12539_v18  ;;  %v12733_v37 = vrot.slane %v12731_v48, 7  ;;  %v12739_v19 = vshll.u32 %v21462_v61, 16  ;;  %v12745_v7 = vshll.u32 %v21476_v32, 16  ;;  %15768 = vmatpush3.bf16.msra.mxu1 %v17066_v20 }
 0x863   :  { %v12589_v6 = vsel %vm21308_vm6, %v12554_v40, %v12588_v24  ;;  %v12728_v62 = vor.u32 %v12727_v31, %v12724_v5  ;;  %v12738_v58 = vrot.slane %v12736_v45, 6  ;;  %v12750_v38 = vshrl.u32 %v21429_v16, 16  ;;  %15769 = vmatprep.subr.bf16.mxu1 %v17067_v50 }
 0x864   :  { %12590 = vst [vmem:[#allocation4 + $0x28] sm:$0x7] %v12589_v6  ;;  %v12586_v29 = vsel %vm21308_vm6, %v12553_v12, %v12585_v60  ;;  %v21514_v15 = vrot.slane %v12611_v54, %v19814_v13  ;;  %v12741_v36 = vrot.slane %v12739_v19, 7  ;;  %v12753_v27 = vshll.u32 %v21429_v16, 16  ;;  %v17069_v12 = vld [vmem:[#allocation19 + $0xc0] sm:$0xff]  }
 0x865   :  { %12587 = vst [vmem:[#allocation4 + $0x24] sm:$0x7] %v12586_v29  ;;  %v12729_v14 = vrot.slane %v12728_v62, 2  ;;  %v12752_v57 = vrot.slane %v12750_v38, 6  ;;  %v12759_v43 = vshll.u32 %v21480_v46, 16  ;;  %v12764_v63 = vshrl.u32 %v21440_v33, 16 }
 0x866   :  { %v12742_v54 = vor.u32 %v12741_v36, %v12738_v58  ;;  %v12755_v17 = vrot.slane %v12753_v27, 7  ;;  %v12767_v30 = vshll.u32 %v21440_v33, 16  ;;  %v12773_v8 = vshll.u32 %v21485_v11, 16  ;;  %15770 = vmatpush3.bf16.msra.mxu1 %v17068_v44 }
 0x867   :  { %v12734_v26 = vsel %vm21519_vm15, %v12729_v14, %v12733_v37  ;;  %v12747_v42 = vrot.slane %v12745_v7, 7  ;;  %v12766_v3 = vrot.slane %v12764_v63, 6  ;;  %v12275_v55 = vsel %vm21168_vm12, 0, %v12274_v49  ;;  %15783 = vmatprep.subr.bf16.mxu1 %v17069_v12 }
 0x868   :  { %v12743_v23 = vrot.slane %v12742_v54, 2  ;;  %v12756_v0 = vor.u32 %v12755_v17, %v12752_v57  ;;  %v12761_v52 = vrot.slane %v12759_v43, 7  ;;  %v12769_v59 = vrot.slane %v12767_v30, 7  ;;  %12276 = vst [vmem:[#allocation4 + $0x18] sm:$0x1] %v12275_v55 }
 0x869   :  { %v12775_v41 = vrot.slane %v12773_v8, 7  ;;  %v12290_v56 = vsel %vm21168_vm12, 0, %v12289_v51  ;;  %v12314_v24 = vsel %vm21182_vm4, 0, %v12313_v39  ;;  %v12329_v47 = vsel %vm21182_vm4, 0, %v12328_v10  ;;  %vm12878_vm12 = vmor %vm2436_vm0, %vm9987_vm9 }
 0x86a   :  { %v12748_v5 = vsel %vm21519_vm15, %v12743_v23, %v12747_v42  ;;  %v12757_v48 = vrot.slane %v12756_v0, 2  ;;  %v12770_v40 = vor.u32 %v12769_v59, %v12766_v3  ;;  %12291 = vst [vmem:[#allocation4 + $0x2c] sm:$0x1] %v12290_v56  ;;  %12315 = vst [vmem:[#allocation4 + $0x18] sm:$0x4] %v12314_v24  ;;  %v21544_v18 = vrot.slane %v21532_v21, %v19814_v13 }
 0x86b   :  { %12330 = vst [vmem:[#allocation4 + $0x2c] sm:$0x4] %v12329_v47  ;;  %v12833_v60 = vcombine.low %v12734_v26, %v12748_v5  ;;  %v12601_v22 = vld [vmem:[#allocation4 + $0x28] sm:$0x7]  ;;  %v21547_v31 = vrot.slane %v12599_v2, %v19814_v13  ;;  %v12972_v35 = vcombine.low %v21532_v21, %v12599_v2  ;;  %v13014_v45 = vshrl.u32 %v21448_v53, 16  ;;  %vm12880_vm0 = vmor %vm12878_vm12, %vm9993_vm11 }
 0x86c   :  { %v12762_v37 = vsel %vm21519_vm15, %v12757_v48, %v12761_v52  ;;  %v12771_v19 = vrot.slane %v12770_v40, 2  ;;  %v12600_v7 = vld [vmem:[#allocation4 + $0x24] sm:$0x7]  ;;  %v21555_v6 = vcombine.high %v21448_v53, %v21448_v53  ;;  %v13017_v62 = vshll.u32 %v21448_v53, 16  ;;  %vm21666_vm11 = vmor %vm12880_vm0, %vm9999_vm13 }
 0x86d   :  { %v12841_v58 = vrot.slane %v12833_v60, %v19814_v13  ;;  %v13041_v38 = vcombine.low %v12748_v5, %v12762_v37  ;;  %v12629_v49 = vcombine.low %v12599_v2, %v12600_v7  ;;  %v21560_v29 = vrot.slane %v12601_v22, %v19814_v13 }
 0x86e   :  { %v12776_v36 = vsel %vm21519_vm15, %v12771_v19, %v12775_v41  ;;  %v21565_v27 = vrot.slane %v12600_v7, %v19814_v13  ;;  %v12973_v51 = vcombine.low %v12600_v7, %v12601_v22  ;;  %v13016_v39 = vrot.slane %v13014_v45, 6 }
 0x86f   :  { %v12834_v14 = vcombine.low %v12762_v37, %v12776_v36  ;;  %v21568_v57 = vrot.slane %v13041_v38, %v19814_v13  ;;  %v12980_v43 = vrot.slane %v12972_v35, %v19814_v13  ;;  %v13019_v63 = vrot.slane %v13017_v62, 7 }
 0x870   :  { %v21572_v10 = vrot.slane %v12629_v49, %v19814_v13  ;;  %v12987_v54 = vrot.slane %v12973_v51, %v19814_v13  ;;  %v13023_v17 = vshll.u32 %v21555_v6, 16  ;;  %v13170_v30 = vshrl.u32 %v21404_v28, 16 }
 0x871   :  { %v12848_v8 = vrot.slane %v12834_v14, %v19814_v13  ;;  %v21578_v2 = vld [vmem:[#allocation4 + $0x18] sm:$0x7]  ;;  %v13020_v42 = vor.u32 %v13019_v63, %v13016_v39  ;;  %v21582_v3 = vcombine.high %v21404_v28, %v21404_v28  ;;  %v13173_v55 = vshll.u32 %v21404_v28, 16 }
 0x872   :  { %v12602_v26 = vld [vmem:[#allocation4 + $0x2c] sm:$0x7]  ;;  %v21587_v23 = vrot.slane %v21578_v2, %v19814_v13  ;;  %v12988_v0 = vcombine.low %v12980_v43, %v12987_v54  ;;  %v21591_v59 = vcombine.high %v21544_v18, %v21544_v18  ;;  %v12628_v50 = vcombine.low %v21578_v2, %v21532_v21 }
 0x873   :  { %v13140_v52 = vcombine.low %v12601_v22, %v12602_v26  ;;  %v12849_v20 = vcombine.low %v12841_v58, %v12848_v8  ;;  %v13021_v41 = vrot.slane %v13020_v42, 2  ;;  %v13025_v56 = vrot.slane %v13023_v17, 7 }
 0x874   :  { %v21599_v47 = vrot.slane %v12602_v26, %v19814_v13  ;;  %12991 = vrot.lane.b32.xlu0 %v12988_v0, %s17500_s20  ;;  %v13172_v5 = vrot.slane %v13170_v30, 6  ;;  %v13175_v48 = vrot.slane %v13173_v55, 7  ;;  %v13179_v44 = vshll.u32 %v21582_v3, 16 }
 0x875   :  { %v21596_v24 = vrot.slane %v13140_v52, %v19814_v13  ;;  %12867 = vrot.lane.b32.xlu1 %v12849_v20, %s17500_s20  ;;  %v13026_v40 = vsel %vm21519_vm15, %v13021_v41, %v13025_v56  ;;  %v21608_v60 = vcombine.high %v21587_v23, %v21587_v23  ;;  %v21612_v22 = vcombine.high %v21547_v31, %v21547_v31 }
 0x876   :  { %v13042_v35 = vcombine.low %v12776_v36, %v13026_v40  ;;  %v13176_v45 = vor.u32 %v13175_v48, %v13172_v5  ;;  %v21616_v12 = vcombine.high %v21565_v27, %v21565_v27  ;;  %v12778_v37 = vshrl.u32 %v21587_v23, 16 }
 0x877   :  { %v13181_v19 = vrot.slane %v13179_v44, 7  ;;  %v12781_v7 = vshll.u32 %v21587_v23, 16  ;;  %v12787_v62 = vshll.u32 %v21608_v60, 16  ;;  %v12792_v58 = vshrl.u32 %v21544_v18, 16 }
 0x878   :  { %v21623_v38 = vrot.slane %v13042_v35, %v19814_v13  ;;  %v13177_v49 = vrot.slane %v13176_v45, 2  ;;  %v12780_v51 = vrot.slane %v12778_v37, 6  ;;  %v12795_v36 = vshll.u32 %v21544_v18, 16 }
 0x879   :  { %v12783_v39 = vrot.slane %v12781_v7, 7  ;;  %v12789_v14 = vrot.slane %v12787_v62, 7  ;;  %v12794_v43 = vrot.slane %v12792_v58, 6  ;;  %v12801_v63 = vshll.u32 %v21591_v59, 16 }
 0x87a   :  { %v13057_v54 = vcombine.low %v21568_v57, %v21623_v38  ;;  %v13182_v17 = vsel %vm21519_vm15, %v13177_v49, %v13181_v19  ;;  %v12797_v30 = vrot.slane %v12795_v36, 7  ;;  %v12806_v26 = vshrl.u32 %v21547_v31, 16 }
 0x87b   :  { %v13197_v42 = vcombine.low %v13026_v40, %v13182_v17  ;;  %v12784_v55 = vor.u32 %v12783_v39, %v12780_v51  ;;  %v12803_v0 = vrot.slane %v12801_v63, 7  ;;  %v12809_v52 = vshll.u32 %v21547_v31, 16 }
 0x87c   :  { %v12798_v20 = vor.u32 %v12797_v30, %v12794_v43  ;;  %v12808_v41 = vrot.slane %v12806_v26, 6  ;;  %v12815_v56 = vshll.u32 %v21612_v22, 16  ;;  %v12820_v5 = vshrl.u32 %v21565_v27, 16 }
 0x87d   :  { %v13204_v48 = vrot.slane %v13197_v42, %v19814_v13  ;;  %v12785_v57 = vrot.slane %v12784_v55, 2  ;;  %v12811_v44 = vrot.slane %v12809_v52, 7  ;;  %v12823_v35 = vshll.u32 %v21565_v27, 16 }
 0x87e   :  { %v12799_v45 = vrot.slane %v12798_v20, 2  ;;  %v12817_v37 = vrot.slane %v12815_v56, 7  ;;  %v12822_v19 = vrot.slane %v12820_v5, 6  ;;  %v12829_v40 = vshll.u32 %v21616_v12, 16 }
 0x87f   :  { %v13205_v7 = vcombine.low %v12848_v8, %v13204_v48  ;;  %v12790_v62 = vsel %vm21519_vm15, %v12785_v57, %v12789_v14  ;;  %v12812_v58 = vor.u32 %v12811_v44, %v12808_v41  ;;  %v12825_v38 = vrot.slane %v12823_v35, 7 }
 0x880   :  { %v12804_v49 = vsel %vm21519_vm15, %v12799_v45, %v12803_v0  ;;  %v12831_v51 = vrot.slane %v12829_v40, 7  ;;  %v21646_v36 = vcombine.high %v21560_v29, %v21560_v29  ;;  %v13028_v39 = vshrl.u32 %v21560_v29, 16 }
 0x881   :  { %13215 = vrot.lane.b32.xlu0 %v13205_v7, %s17500_s20  ;;  %v12813_v8 = vrot.slane %v12812_v58, 2  ;;  %v12826_v43 = vor.u32 %v12825_v38, %v12822_v19  ;;  %v12850_v14 = vcombine.low %v12790_v62, %v12804_v49  ;;  %v13031_v63 = vshll.u32 %v21560_v29, 16 }
 0x882   :  { %v13030_v17 = vrot.slane %v13028_v39, 6  ;;  %v13037_v30 = vshll.u32 %v21646_v36, 16  ;;  %v21654_v26 = vcombine.high %v21599_v47, %v21599_v47  ;;  %v13184_v42 = vshrl.u32 %v21599_v47, 16 }
 0x883   :  { %v12818_v55 = vsel %vm21519_vm15, %v12813_v8, %v12817_v37  ;;  %v12827_v0 = vrot.slane %v12826_v43, 2  ;;  %v12858_v52 = vrot.slane %v12850_v14, %v19814_v13  ;;  %v13033_v20 = vrot.slane %v13031_v63, 7 }
 0x884   :  { %v13058_v41 = vcombine.low %v12804_v49, %v12818_v55  ;;  %v13039_v56 = vrot.slane %v13037_v30, 7  ;;  %v13186_v5 = vrot.slane %v13184_v42, 6  ;;  %v13187_v48 = vshll.u32 %v21599_v47, 16 }
 0x885   :  { %v12832_v57 = vsel %vm21519_vm15, %v12827_v0, %v12831_v51  ;;  %v13034_v44 = vor.u32 %v13033_v20, %v13030_v17  ;;  %v13193_v35 = vshll.u32 %v21654_v26, 16  ;;  %vm12647_vm4 = vcmask 523264  }
 0x886   :  { %v12851_v37 = vcombine.low %v12818_v55, %v12832_v57  ;;  %v13066_v19 = vrot.slane %v13058_v41, %v19814_v13  ;;  %v13189_v40 = vrot.slane %v13187_v48, 7  ;;  %v15131_v7 = vrot.slane %v21264_v4, 9  ;;  %13077 = vst.msk [vmem:[#allocation6 + $0x10] sm:$0xff] %vm12647_vm4, %v13057_v54 }
 0x887   :  { %v13035_v62 = vrot.slane %v13034_v44, 2  ;;  %v13195_v58 = vrot.slane %v13193_v35, 7  ;;  %v12885_v38 = vrot.slane %v21468_v34, 7  ;;  %v15132_v49 = vrot.slane %v21462_v61, 9 }
 0x888   :  { %v12865_v51 = vrot.slane %v12851_v37, %v19814_v13  ;;  %v13190_v39 = vor.u32 %v13189_v40, %v13186_v5  ;;  %v12889_v8 = vrot.slane %v21476_v32, 7  ;;  %v15133_v43 = vrot.slane %v21429_v16, 9 }
 0x889   :  { %v13040_v14 = vsel %vm21519_vm15, %v13035_v62, %v13039_v56  ;;  %v12886_v4 = vsel %vm21666_vm11, %v15131_v7, %v12885_v38  ;;  %v12893_v54 = vrot.slane %v21480_v46, 7  ;;  %v15134_v63 = vrot.slane %v21440_v33, 9 }
 0x88a   :  { %v12866_v34 = vcombine.low %v12858_v52, %v12865_v51  ;;  %v13059_v17 = vcombine.low %v12832_v57, %v13040_v14  ;;  %v13191_v61 = vrot.slane %v13190_v39, 2  ;;  %v12890_v30 = vsel %vm21666_vm11, %v15132_v49, %v12889_v8 }
 0x88b   :  { %v12894_v32 = vsel %vm21666_vm11, %v15133_v43, %v12893_v54  ;;  %v12897_v16 = vrot.slane %v21485_v11, 7  ;;  %v12915_v42 = vcombine.low %v12886_v4, %v12890_v30  ;;  %v15139_v55 = vrot.slane %v21448_v53, 9 }
 0x88c   :  { %12869 = vrot.lane.b32.xlu1 %v12866_v34, %s17500_s20  ;;  %v13073_v46 = vrot.slane %v13059_v17, %v19814_v13  ;;  %v13196_v33 = vsel %vm21519_vm15, %v13191_v61, %v13195_v58  ;;  %v13081_v0 = vrot.slane %v21555_v6, 7  ;;  %v13087_v52 = vcombine.low %v12890_v30, %v12894_v32 }
 0x88d   :  { %v13206_v20 = vcombine.low %v13040_v14, %v13196_v33  ;;  %v12898_v41 = vsel %vm21666_vm11, %v15134_v63, %v12897_v16  ;;  %v12923_v56 = vrot.slane %v12915_v42, %v19814_v13  ;;  %v15141_v11 = vrot.slane %v21404_v28, 9  ;;  %v17070_v33 = vld [vmem:[#allocation19 + $0x80] sm:$0xff]  }
 0x88e   :  { %v13074_v5 = vcombine.low %v13066_v19, %v13073_v46  ;;  %v12916_v53 = vcombine.low %v12894_v32, %v12898_v41  ;;  %v13082_v48 = vsel %vm21666_vm11, %v15139_v55, %v13081_v0  ;;  %v13095_v57 = vrot.slane %v13087_v52, %v19814_v13  ;;  %v17071_v0 = vld [vmem:[#allocation19 + $0xc8] sm:$0xff]  }
 0x88f   :  { %v13213_v25 = vrot.slane %v13206_v20, %v19814_v13  ;;  %v13088_v44 = vcombine.low %v12898_v41, %v13082_v48  ;;  %v13225_v6 = vrot.slane %v21582_v3, 7  ;;  %v15135_v35 = vrot.slane %v21587_v23, 9  ;;  %v17072_v41 = vld [vmem:[#allocation19 + $0x88] sm:$0xff]  }
 0x890   :  { %v12930_v37 = vrot.slane %v12916_v53, %v19814_v13  ;;  %13078 = vst.msk [vmem:[#allocation6 + $0x38] sm:$0xff] %vm12647_vm4, %v13074_v5  ;;  %v12901_v28 = vrot.slane %v21608_v60, 7  ;;  %v15136_v19 = vrot.slane %v21544_v18, 9  ;;  %v12905_v40 = vrot.slane %v21591_v59, 7  ;;  %v17074_v5 = vld [vmem:[#allocation19 + $0x90] sm:$0xff]   ;;  %v17075_v53 = vld [vmem:[#allocation19 + $0xd8] sm:$0xff]  }
 0x891   :  { %v13214_v7 = vcombine.low %v12865_v51, %v13213_v25  ;;  %v13102_v62 = vrot.slane %v13088_v44, %v19814_v13  ;;  %v13226_v58 = vsel %vm21666_vm11, %v15141_v11, %v13225_v6  ;;  %v15137_v3 = vrot.slane %v21547_v31, 9  ;;  %v17078_v25 = vld [vmem:[#allocation19 + $0xa0] sm:$0xff]   ;;  %v17079_v6 = vld [vmem:[#allocation19 + $0xe8] sm:$0xff]  }
 0x892   :  { %v12931_v38 = vcombine.low %v12923_v56, %v12930_v37  ;;  %v13231_v23 = vcombine.low %v13082_v48, %v13226_v58  ;;  %v12902_v49 = vsel %vm21666_vm11, %v15135_v35, %v12901_v28  ;;  %v12906_v60 = vsel %vm21666_vm11, %v15136_v19, %v12905_v40  ;;  %v17073_v56 = vld [vmem:[#allocation19 + $0xd0] sm:$0xff]   ;;  %v17076_v48 = vld [vmem:[#allocation19 + $0x98] sm:$0xff]   ;;  %v17080_v35 = vld [vmem:[#allocation19 + $0xa8] sm:$0xff]  }
 0x893   :  { %13217 = vrot.lane.b32.xlu0 %v13214_v7, %s17500_s20  ;;  %v13103_v18 = vcombine.low %v13095_v57, %v13102_v62  ;;  %v12909_v59 = vrot.slane %v21612_v22, 7  ;;  %v15138_v51 = vrot.slane %v21565_v27, 9  ;;  %v12913_v39 = vrot.slane %v21616_v12, 7  ;;  %v17077_v57 = vld [vmem:[#allocation19 + $0xe0] sm:$0xff]   ;;  %v17082_v19 = vld [vmem:[#allocation19 + $0xb0] sm:$0xff]   ;;  %v17083_v7 = vld [vmem:[#allocation19 + $0xf8] sm:$0xff]  }
 0x894   :  { %v13238_v8 = vrot.slane %v13231_v23, %v19814_v13  ;;  %12951 = vst.msk [vmem:[#allocation6 + $0x8] sm:$0xff] %vm12647_vm4, %v12931_v38  ;;  %v12932_v31 = vcombine.low %v12902_v49, %v12906_v60  ;;  %v15140_v43 = vrot.slane %v21560_v29, 9  ;;  %v13085_v14 = vrot.slane %v21646_v36, 7  ;;  %v17085_v38 = vld [vmem:[#allocation19 + $0x100] sm:$0xff]   ;;  %v17086_v23 = vld [vmem:[#allocation19 + $0x108] sm:$0xff]  }
 0x895   :  { %13121 = vrot.lane.b32.xlu1 %v13103_v18, %s17500_s20  ;;  %v12910_v4 = vsel %vm21666_vm11, %v15137_v3, %v12909_v59  ;;  %v12914_v22 = vsel %vm21666_vm11, %v15138_v51, %v12913_v39  ;;  %v15142_v27 = vrot.slane %v21599_v47, 9  ;;  %v13229_v12 = vrot.slane %v21654_v26, 7  ;;  %v17084_v3 = vld [vmem:[#allocation19 + $0xb8] sm:$0xff]   ;;  %v17087_v59 = vld [vmem:[#allocation19 + $0x110] sm:$0xff]  }
 0x896   :  { %v12636_v54 = vrot.slane %v12628_v50, %v19814_v13  ;;  %v13239_v29 = vcombine.low %v12930_v37, %v13238_v8  ;;  %v12933_v63 = vcombine.low %v12910_v4, %v12914_v22  ;;  %v13086_v36 = vsel %vm21666_vm11, %v15140_v43, %v13085_v14  ;;  %v17081_v37 = vld [vmem:[#allocation19 + $0xf0] sm:$0xff]   ;;  %v17088_v51 = vld [vmem:[#allocation19 + $0x118] sm:$0xff]   ;;  %v17089_v43 = vld [vmem:[#allocation24] sm:$0xff]  }
 0x897   :  { %v12940_v34 = vrot.slane %v12932_v31, %v19814_v13  ;;  %v13104_v17 = vcombine.low %v12906_v60, %v12910_v4  ;;  %v13105_v61 = vcombine.low %v12914_v22, %v13086_v36  ;;  %v13230_v30 = vsel %vm21666_vm11, %v15142_v27, %v13229_v12  ;;  %v17090_v4 = vld [vmem:[#allocation24 + $0x8] sm:$0xff]   ;;  %v17091_v22 = vld [vmem:[#allocation24 + $0x10] sm:$0xff]   ;;  %v17092_v27 = vld [vmem:[#allocation24 + $0x18] sm:$0xff]  }
 0x898   :  { %13251 = vst.msk [vmem:[#allocation6 + $0x20] sm:$0xff] %vm12647_vm4, %v13239_v29  ;;  %v12947_v47 = vrot.slane %v12933_v63, %v19814_v13  ;;  %v13240_v26 = vcombine.low %v13086_v36, %v13230_v30  ;;  %v12627_v21 = vcombine.low %v21514_v15, %v21437_v1  ;;  %v13139_v2 = vcombine.low %v21437_v1, %v21453_v9  ;;  %v17093_v12 = vld [vmem:[#allocation24 + $0x20] sm:$0xff]   ;;  %v17095_v29 = vld [vmem:[#allocation24 + $0x30] sm:$0xff]   ;;  %v17096_v63 = vld [vmem:[#allocation24 + $0x38] sm:$0xff]  }
 0x899   :  { %v13112_v50 = vrot.slane %v13104_v17, %v19814_v13  ;;  %v13119_v32 = vrot.slane %v13105_v61, %v19814_v13  ;;  %v12644_v16 = vcombine.low %v12636_v54, %v21572_v10  ;;  %v13148_v45 = vcombine.low %v21572_v10, %v21596_v24  ;;  %v17094_v54 = vld [vmem:[#allocation24 + $0x28] sm:$0xff]  }
 0x89a   :  { %v12948_v42 = vcombine.low %v12940_v34, %v12947_v47  ;;  %v13247_v55 = vrot.slane %v13240_v26, %v19814_v13  ;;  %12648 = vst.msk [vmem:[#allocation6] sm:$0xff] %vm12647_vm4, %v12627_v21  ;;  %13151 = vst.msk [vmem:[#allocation6 + $0x18] sm:$0xff] %vm12647_vm4, %v13139_v2  ;;  %vm12873_vm13 = vcmask 1048064   ;;  %v17513_v14 = vmov 0.0  }
 0x89b   :  { %v13120_v15 = vcombine.low %v13112_v50, %v13119_v32  ;;  %12649 = vst.msk [vmem:[#allocation6 + $0x28] sm:$0xff] %vm12647_vm4, %v12644_v16  ;;  %13152 = vst.msk [vmem:[#allocation6 + $0x40] sm:$0xff] %vm12647_vm4, %v13148_v45  ;;  %vm13930_vm6 = vcmask 1041409  }
 0x89c   :  { %v13248_v1 = vcombine.low %v12947_v47, %v13247_v55  ;;  %12952 = vst.msk [vmem:[#allocation6 + $0x30] sm:$0xff] %vm12647_vm4, %v12948_v42 }
 0x89d   :  { %13123 = vrot.lane.b32.xlu1 %v13120_v15, %s17500_s20  ;;  %s14084_s20 = sshll.u32 %s17515_s13, 4  ;;  %s14085_s20 = int_to_ptr.vmem [resolvable:$true] %s14084_s20 }
 0x89e   :  { %13252 = vst.msk [vmem:[#allocation6 + $0x48] sm:$0xff] %vm12647_vm4, %v13248_v1  ;;  %s17455_s6 = scalar_lea.vmem %s14085_s20, 32  ;;  %p17460_p13 = scmp.lt.s32.totalorder %s14085_s20, %s14085_s20 }
 0x89f   :  { %v13257_v8 = vld [vmem:[#allocation6 + $0x20] sm:$0xff]  ;;  %p17456_p12 = scmp.ne.s32.totalorder %s14085_s20, %s17455_s6  ;;  %p17461_p0 = scmp.lt.s32.totalorder %s17455_s6, %s17455_s6 }
 0x8a1   :  { %p17462_p1 = por %p17461_p0, %p17460_p13 }
 0x8a3   :  { %p17463_p2 = pnand %p17462_p1, %p17456_p12 }
 0x8a5   :  { %v13262_v31 = vld [vmem:[#allocation6 + $0x48] sm:$0xff] }
 0x8c0   :  { %v12990_v9 = vpop.permute.xlu0 %12989 }
 0x8c1   :  { %12995 = vst.msk [vmem:[#allocation6 + $0x8] sm:$0xff] %vm12873_vm13, %v12990_v9 }
 0x8c8   :  { %v13254_v10 = vld [vmem:[#allocation6 + $0x8] sm:$0xff] }
 0x8c9   :  { %13589 = vmatprep.mubr.bf16.mxu1 %v13254_v10 }
 0x8e6   :  { %v12992_v24 = vpop.permute.xlu0 %12991 }
 0x8e7   :  { %v12868_v46 = vpop.permute.xlu1 %12867  ;;  %12996 = vst.msk [vmem:[#allocation6 + $0x30] sm:$0xff] %vm12873_vm13, %v12992_v24 }
 0x8e8   :  { %12874 = vst.msk [vmem:[#allocation6] sm:$0xff] %vm12873_vm13, %v12868_v46 }
 0x8ee   :  { %v13259_v52 = vld [vmem:[#allocation6 + $0x30] sm:$0xff] }
 0x8ef   :  { %v13253_v20 = vld [vmem:[#allocation6] sm:$0xff] }
 0x8f0   :  { %13590 = vmatmul.mubr.bf16.vlgmr.msra.gmra.mrb[112].mxu1 %v13253_v20 }
 0x8f1   :  { %15784 = vmatpush3.bf16.msra.mxu1 %v17070_v33  ;;  %13597 = vmatprep.mubr.bf16.mxu1 %v13259_v52 }
 0x8f2   :  { %15785 = vmatprep.subr.bf16.mxu1 %v17071_v0 }
 0x8f3   :  { %v13216_v11 = vpop.permute.xlu0 %13215 }
 0x8f4   :  { %13221 = vst.msk [vmem:[#allocation6 + $0x18] sm:$0xff] %vm12873_vm13, %v13216_v11 }
 0x8f5   :  { %15786 = vmatpush3.bf16.msra.mxu1 %v17072_v41 }
 0x8f6   :  { %15787 = vmatprep.subr.bf16.mxu1 %v17073_v56 }
 0x8f9   :  { %15788 = vmatpush3.bf16.msra.mxu1 %v17074_v5 }
 0x8fa   :  { %15789 = vmatprep.subr.bf16.mxu1 %v17075_v53  ;;  %v15181_v53 = vld [vmem:[#allocation21] ss:$0 sm:$0xff] }
 0x8fb   :  { %v13256_v58 = vld [vmem:[#allocation6 + $0x18] sm:$0xff] }
 0x8fd   :  { %15790 = vmatpush3.bf16.msra.mxu1 %v17076_v48 }
 0x8fe   :  { %v12870_v44 = vpop.permute.xlu1 %12869  ;;  %15791 = vmatprep.subr.bf16.mxu1 %v17077_v57 }
 0x8ff   :  { %12875 = vst.msk [vmem:[#allocation6 + $0x28] sm:$0xff] %vm12873_vm13, %v12870_v44 }
 0x901   :  { %15792 = vmatpush3.bf16.msra.mxu1 %v17078_v25  ;;  %v15182_v25 = vld [vmem:[#allocation22] ss:$0 sm:$0xff] }
 0x902   :  { %15793 = vmatprep.subr.bf16.mxu1 %v17079_v6 }
 0x905   :  { %v13218_v28 = vpop.permute.xlu0 %13217  ;;  %15794 = vmatpush3.bf16.msra.mxu1 %v17080_v35 }
 0x906   :  { %13222 = vst.msk [vmem:[#allocation6 + $0x40] sm:$0xff] %vm12873_vm13, %v13218_v28  ;;  %v13258_v40 = vld [vmem:[#allocation6 + $0x28] sm:$0xff]  ;;  %15795 = vmatprep.subr.bf16.mxu1 %v17081_v37 }
 0x907   :  { %v13122_v62 = vpop.permute.xlu1 %13121  ;;  %13598 = vmatmul.mubr.bf16.gmra.mrb[116].mxu1 %v13258_v40 }
 0x908   :  { %13127 = vst.msk [vmem:[#allocation6 + $0x10] sm:$0xff] %vm12873_vm13, %v13122_v62  ;;  %13638 = vmatprep.mubr.bf16.mxu1 %v13256_v58 }
 0x909   :  { %15796 = vmatpush3.bf16.msra.mxu1 %v17082_v19 }
 0x90a   :  { %15797 = vmatprep.subr.bf16.mxu1 %v17083_v7 }
 0x90d   :  { %15798 = vmatpush3.bf16.msra.mxu1 %v17084_v3  ;;  %v13261_v18 = vld [vmem:[#allocation6 + $0x40] sm:$0xff] }
 0x90e   :  { %16440 = vmatprep.subr.bf16.mxu1 %v17085_v38 }
 0x90f   :  { %v13124_v49 = vpop.permute.xlu1 %13123  ;;  %v13255_v60 = vld [vmem:[#allocation6 + $0x10] sm:$0xff] }
 0x910   :  { %13128 = vst.msk [vmem:[#allocation6 + $0x38] sm:$0xff] %vm12873_vm13, %v13124_v49  ;;  %13639 = vmatmul.mubr.bf16.vlgmr.msra.gmra.mrb[120].mxu1 %v13255_v60 }
 0x911   :  { %13646 = vmatprep.mubr.bf16.mxu1 %v13261_v18  ;;  %16441 = vmatpush3.bf16.msra.mxu1 %v17085_v38 }
 0x912   :  { %16442 = vmatprep.subr.bf16.mxu1 %v17086_v23 }
 0x915   :  { %16443 = vmatpush3.bf16.msra.mxu1 %v17086_v23 }
 0x916   :  { %16444 = vmatprep.subr.bf16.mxu1 %v17087_v59 }
 0x917   :  { %v13260_v39 = vld [vmem:[#allocation6 + $0x38] sm:$0xff] }
 0x918   :  { %13647 = vmatmul.mubr.bf16.gmra.mrb[124].mxu1 %v13260_v39 }
 0x919   :  { %16445 = vmatpush3.bf16.msra.mxu1 %v17087_v59  ;;  %16448 = vmatprep.mubr.msk.bf16.mxu1 %vm12647_vm4, %v13257_v8 }
 0x91a   :  { %16446 = vmatprep.subr.bf16.mxu1 %v17088_v51 }
 0x91d   :  { %16447 = vmatpush3.bf16.msra.mxu1 %v17088_v51 }
 0x91e   :  { %16452 = vmatprep.subr.bf16.mxu1 %v17513_v14 }
 0x920   :  { %16449 = vmatmul.mubr.msk.bf16.vlgmr.msra.gmra.mrb[128].mxu1 %vm12647_vm4, %v13262_v31 }
 0x921   :  { %16468 = vmatprep.mubr.msk.bf16.mxu1 %vm17514_vm2, %v17513_v14  ;;  %16453 = vmatpush3.bf16.msra.mxu1 %v17089_v43 }
 0x922   :  { %16454 = vmatprep.subr.bf16.mxu1 %v17513_v14 }
 0x925   :  { %16455 = vmatpush3.bf16.msra.mxu1 %v17090_v4 }
 0x926   :  { %16456 = vmatprep.subr.bf16.mxu1 %v17513_v14 }
 0x929   :  { %16457 = vmatpush3.bf16.msra.mxu1 %v17091_v22 }
 0x92a   :  { %16458 = vmatprep.subr.bf16.mxu1 %v17513_v14 }
 0x92d   :  { %16459 = vmatpush3.bf16.msra.mxu1 %v17092_v27 }
 0x92e   :  { %16460 = vmatprep.subr.bf16.mxu1 %v17513_v14 }
 0x931   :  { %16461 = vmatpush3.bf16.msra.mxu1 %v17093_v12 }
 0x932   :  { %16462 = vmatprep.subr.bf16.mxu1 %v17513_v14 }
 0x935   :  { %16463 = vmatpush3.bf16.msra.mxu1 %v17094_v54 }
 0x936   :  { %16464 = vmatprep.subr.bf16.mxu1 %v17513_v14 }
 0x939   :  { %16465 = vmatpush3.bf16.msra.mxu1 %v17095_v29 }
 0x93a   :  { %16466 = vmatprep.subr.bf16.mxu1 %v17513_v14 }
 0x93d   :  { %16467 = vmatpush3.bf16.msra.mxu1 %v17096_v63 }
 0x9c3   :  { %v15771_v36 = vpop.f32.mrb[112].mxu1 }
 0x9c4   :  { %v15772_v34 = vpop.f32.mrb[113].mxu1 }
 0x9c5   :  { %v15773_v17 = vadd.f32 %v15772_v34, %v15771_v36  ;;  %v15774_v61 = vpop.f32.mrb[114].mxu1  ;;  %v22177_v36 = vld [vmem:[#allocation51_spill] sm:$0xff] }
 0x9c6   :  { %v15775_v30 = vpop.f32.mrb[115].mxu1  ;;  %v21777_v34 = vsub.s32 0, %v22177_v36 }
 0x9c7   :  { %v15776_v47 = vadd.f32 %v15775_v30, %v15774_v61 }
 0x9da   :  { %v15777_v26 = vpop.f32.mrb[116].mxu1 }
 0x9db   :  { %v15778_v21 = vpop.f32.mrb[117].mxu1 }
 0x9dc   :  { %v15779_v2 = vadd.f32 %v15778_v21, %v15777_v26  ;;  %v15780_v50 = vpop.f32.mrb[118].mxu1 }
 0x9dd   :  { %v15781_v32 = vpop.f32.mrb[119].mxu1 }
 0x9de   :  { %v15782_v16 = vadd.f32 %v15781_v32, %v15780_v50 }
 0x9e3   :  { %v15799_v45 = vpop.f32.mrb[120].mxu1 }
 0x9e4   :  { %v15800_v42 = vpop.f32.mrb[121].mxu1 }
 0x9e5   :  { %v15801_v55 = vadd.f32 %v15800_v42, %v15799_v45  ;;  %v15802_v15 = vpop.f32.mrb[122].mxu1 }
 0x9e6   :  { %v15803_v1 = vpop.f32.mrb[123].mxu1 }
 0x9e7   :  { %v15804_v9 = vadd.f32 %v15803_v1, %v15802_v15  ;;  %v13641_v10 = vadd.f32 %v15801_v55, %v15773_v17 }
 0x9e9   :  { %v13644_v24 = vadd.f32 %v15804_v9, %v15776_v47 }
 0x9eb   :  { %v15805_v46 = vpop.f32.mrb[124].mxu1 }
 0x9ec   :  { %v15806_v33 = vpop.f32.mrb[125].mxu1 }
 0x9ed   :  { %v15807_v0 = vadd.f32 %v15806_v33, %v15805_v46  ;;  %v15808_v52 = vpop.f32.mrb[126].mxu1 }
 0x9ee   :  { %v15809_v20 = vpop.f32.mrb[127].mxu1 }
 0x9ef   :  { %v15810_v41 = vadd.f32 %v15809_v20, %v15808_v52  ;;  %v13649_v56 = vadd.f32 %v15807_v0, %v15779_v2 }
 0x9f1   :  { %v13652_v11 = vadd.f32 %v15810_v41, %v15782_v16 }
 0x9f3   :  { %v16450_v5 = vpop.f32.mrb[128].mxu1 }
 0x9f4   :  { %v13698_v48 = vadd.f32 %v16450_v5, %v13649_v56  ;;  %v13689_v57 = vpop.f32.mrb[129].mxu1 }
 0x9f5   :  { %v13690_v44 = vadd.f32 %v13689_v57, %v13641_v10  ;;  %v16451_v6 = vpop.f32.mrb[130].mxu1 }
 0x9f6   :  { %v13713_v35 = vmul.f32 %v15181_v53, %v13698_v48  ;;  %v13701_v37 = vadd.f32 %v16451_v6, %v13652_v11  ;;  %v13692_v28 = vpop.f32.mrb[131].mxu1 }
 0x9f7   :  { %v13711_v19 = vmul.f32 %v15181_v53, %v13690_v44  ;;  %v13693_v40 = vadd.f32 %v13692_v28, %v13644_v24 }
 0x9f8   :  { %v13724_v7 = vadd.f32 %v15182_v25, %v13713_v35  ;;  %v13714_v62 = vmul.f32 %v15181_v53, %v13701_v37 }
 0x9f9   :  { %v13722_v58 = vadd.f32 %v15182_v25, %v13711_v19  ;;  %v13712_v3 = vmul.f32 %v15181_v53, %v13693_v40 }
 0x9fa   :  { %v13728_v38 = vmax.f32 %v13724_v7, 0.0  ;;  %v13725_v23 = vadd.f32 %v15182_v25, %v13714_v62 }
 0x9fb   :  { %v13726_v49 = vmax.f32 %v13722_v58, 0.0  ;;  %v13723_v8 = vadd.f32 %v15182_v25, %v13712_v3 }
 0x9fc   :  { %v13768_v60 = vcombine.high %v13728_v38, %v13728_v38  ;;  %v13775_v18 = vrot.slane %v13728_v38, %v19814_v13  ;;  %v13729_v59 = vmax.f32 %v13725_v23, 0.0 }
 0x9fd   :  { %v13734_v51 = vcombine.high %v13726_v49, %v13726_v49  ;;  %v13741_v39 = vrot.slane %v13726_v49, %v19814_v13  ;;  %v13727_v30 = vmax.f32 %v13723_v8, 0.0 }
 0x9fe   :  { %v13782_v31 = vrot.slane %v13768_v60, %v19814_v13  ;;  %v13783_v43 = vcombine.high %v13775_v18, %v13775_v18  ;;  %v13785_v14 = vcombine.high %v13729_v59, %v13729_v59  ;;  %v15191_v4 = vrot.slane %v13775_v18, 9 }
 0x9ff   :  { %v13748_v22 = vrot.slane %v13734_v51, %v19814_v13  ;;  %v13749_v27 = vcombine.high %v13741_v39, %v13741_v39  ;;  %v13792_v12 = vrot.slane %v13729_v59, %v19814_v13  ;;  %v15183_v61 = vrot.slane %v13741_v39, 9 }
 0xa00   :  { %v13784_v54 = vcombine.high %v13782_v31, %v13782_v31  ;;  %v15192_v29 = vrot.slane %v13783_v43, 9  ;;  %v15193_v63 = vrot.slane %v13782_v31, 9  ;;  %v13799_v2 = vrot.slane %v13785_v14, %v19814_v13 }
 0xa01   :  { %v13750_v17 = vcombine.high %v13748_v22, %v13748_v22  ;;  %v15184_v21 = vrot.slane %v13749_v27, 9  ;;  %v13874_v50 = vmax.f32 %v13775_v18, %v15191_v4  ;;  %v15185_v32 = vrot.slane %v13748_v22, 9 }
 0xa02   :  { %v15194_v47 = vrot.slane %v13784_v54, 9  ;;  %v13876_v26 = vmax.f32 %v13782_v31, %v15193_v63  ;;  %v13800_v45 = vcombine.high %v13792_v12, %v13792_v12  ;;  %v13875_v42 = vmax.f32 %v13783_v43, %v15192_v29 }
 0xa03   :  { %v15186_v16 = vrot.slane %v13750_v17, 9  ;;  %v13801_v15 = vcombine.high %v13799_v2, %v13799_v2  ;;  %v15195_v1 = vrot.slane %v13792_v12, 9  ;;  %v15197_v46 = vrot.slane %v13799_v2, 9 }
 0xa04   :  { %v13877_v55 = vmax.f32 %v13784_v54, %v15194_v47  ;;  %v13886_v9 = vmax.f32 %v13874_v50, %v13876_v26  ;;  %v15196_v24 = vrot.slane %v13800_v45, 9  ;;  %v13867_v0 = vmax.f32 %v13749_v27, %v15184_v21 }
 0xa05   :  { %v13869_v10 = vmax.f32 %v13750_v17, %v15186_v16  ;;  %v15198_v52 = vrot.slane %v13801_v15, 9  ;;  %v13868_v20 = vmax.f32 %v13748_v22, %v15185_v32  ;;  %v13878_v41 = vmax.f32 %v13792_v12, %v15195_v1 }
 0xa06   :  { %v13887_v33 = vmax.f32 %v13875_v42, %v13877_v55  ;;  %v13879_v56 = vmax.f32 %v13800_v45, %v15196_v24  ;;  %v13880_v11 = vmax.f32 %v13799_v2, %v15197_v46  ;;  %v13751_v53 = vcombine.high %v13727_v30, %v13727_v30 }
 0xa07   :  { %v13881_v5 = vmax.f32 %v13801_v15, %v15198_v52  ;;  %v13758_v48 = vrot.slane %v13727_v30, %v19814_v13  ;;  %v13917_v25 = vrot.slane %v13886_v9, %v21777_v34  ;;  %v13866_v44 = vmax.f32 %v13741_v39, %v15183_v61 }
 0xa08   :  { %v13921_v57 = vrot.slane %v13887_v33, %v21777_v34  ;;  %v13883_v6 = vmax.f32 %v13867_v0, %v13869_v10  ;;  %v13888_v35 = vmax.f32 %v13878_v41, %v13880_v11  ;;  %v13765_v28 = vrot.slane %v13751_v53, %v19814_v13  ;;  %v15199_v0 = vld [vmem:[#allocation25] ss:$0 sm:$0xff] }
 0xa09   :  { %v13889_v37 = vmax.f32 %v13879_v56, %v13881_v5  ;;  %v13766_v19 = vcombine.high %v13758_v48, %v13758_v48  ;;  %v15187_v40 = vrot.slane %v13758_v48, 9  ;;  %v13882_v7 = vmax.f32 %v13866_v44, %v13868_v20 }
 0xa0a   :  { %v13925_v62 = vrot.slane %v13888_v35, %v21777_v34  ;;  %v13934_v58 = vsel %vm13930_vm6, %v13921_v57, %v13917_v25  ;;  %v13767_v38 = vcombine.high %v13765_v28, %v13765_v28  ;;  %v15189_v49 = vrot.slane %v13765_v28, 9 }
 0xa0b   :  { %v13929_v3 = vrot.slane %v13889_v37, %v21777_v34  ;;  %v15188_v23 = vrot.slane %v13766_v19, 9  ;;  %v13905_v60 = vrot.slane %v13883_v6, %v21777_v34  ;;  %v13870_v51 = vmax.f32 %v13758_v48, %v15187_v40 }
 0xa0c   :  { %v13935_v18 = vsel %vm9987_vm9, %v13925_v62, %v13934_v58  ;;  %v15190_v59 = vrot.slane %v13767_v38, 9  ;;  %v13872_v13 = vmax.f32 %v13765_v28, %v15189_v49  ;;  %v13901_v8 = vrot.slane %v13882_v7, %v21777_v34 }
 0xa0d   :  { %v13936_v39 = vsel %vm9990_vm10, %v13929_v3, %v13935_v18  ;;  %v13871_v43 = vmax.f32 %v13766_v19, %v15188_v23 }
 0xa0e   :  { %v13947_v31 = vsel %vm13939_vm1, %v13936_v39, 0.0  ;;  %v13873_v14 = vmax.f32 %v13767_v38, %v15190_v59  ;;  %v13884_v4 = vmax.f32 %v13870_v51, %v13872_v13  ;;  %v13931_v27 = vsel %vm13930_vm6, %v13905_v60, %v13901_v8 }
 0xa0f   :  { %v13948_v22 = vrot.slane %v13947_v31, 4 }
 0xa10   :  { %v13885_v12 = vmax.f32 %v13871_v43, %v13873_v14  ;;  %v13909_v54 = vrot.slane %v13884_v4, %v21777_v34 }
 0xa11   :  { %v13949_v29 = vadd.f32 %v13948_v22, %v13947_v31 }
 0xa12   :  { %v13913_v63 = vrot.slane %v13885_v12, %v21777_v34  ;;  %v13932_v36 = vsel %vm9987_vm9, %v13909_v54, %v13931_v27 }
 0xa13   :  { %v13950_v17 = vrot.slane %v13949_v29, 2 }
 0xa14   :  { %v13933_v61 = vsel %vm9990_vm10, %v13913_v63, %v13932_v36 }
 0xa15   :  { %v13951_v30 = vadd.f32 %v13950_v17, %v13949_v29  ;;  %v13940_v47 = vsel %vm13939_vm1, %v13933_v61, 0.0 }
 0xa16   :  { %v13941_v26 = vrot.slane %v13940_v47, 4 }
 0xa17   :  { %v13952_v21 = vrot.slane %v13951_v30, 1 }
 0xa18   :  { %v13942_v2 = vadd.f32 %v13941_v26, %v13940_v47 }
 0xa19   :  { %v13953_v50 = vadd.f32 %v13952_v21, %v13951_v30 }
 0xa1a   :  { %v13943_v32 = vrot.slane %v13942_v2, 2 }
 0xa1b   :  { %v13955_v16 = vmul.f32 0.25, %v13953_v50 }
 0xa1c   :  { %v13944_v45 = vadd.f32 %v13943_v32, %v13942_v2 }
 0xa1d   :  { %v13957_v42 = vpack.c.bf16 %v13955_v16, %v13955_v16 }
 0xa1e   :  { %v13945_v55 = vrot.slane %v13944_v45, 1 }
 0xa1f   :  { %v13984_v1 = vunpack.c.l.b16 %v13957_v42 }
 0xa20   :  { %v13946_v15 = vadd.f32 %v13945_v55, %v13944_v45 }
 0xa21   :  { %v13985_v10 = vrot.slane %v13984_v1, 7 }
 0xa22   :  { %v13954_v34 = vmul.f32 0.25, %v13946_v15 }
 0xa24   :  { %v13956_v9 = vpack.c.bf16 %v13954_v34, %v13954_v34 }
 0xa26   :  { %v13983_v24 = vunpack.c.l.b16 %v13956_v9 }
 0xa28   :  { %v13986_v46 = vsel %vm13930_vm6, %v13985_v10, %v13983_v24 }
 0xa29   :  { %v13987_v33 = vpack.c.b16 %v13986_v46, %v13986_v46 }
 0xa2b   :  { %16469 = vmatmul.mubr.bf16.vlgmr.msra.gmra.mrb[132].mxu1 %v13987_v33 }
 0xafe   :  { %v14071_v52 = vpop.f32.mrb[132].mxu1 }
 0xaff   :  { %v14072_v20 = vadd.f32 %v15199_v0, %v14071_v52  ;;  %v16470_v41 = vpop.f32.mrb[133].mxu1 }
 0xb00   :  { %v14074_v56 = vpop.f32.mrb[134].mxu1 }
 0xb01   :  { %14077 = vst [vmem:[#allocation27] sm:$0x3] %v14072_v20  ;;  %v16471_v11 = vpop.f32.mrb[135].mxu1 }
 0xb02   :  { %17466 = shalt.err (!%p17463_p2)
}
 0xb03   :  { %s17467_s7 = scalar_lea.hbm %s21823_s12, 32 }
 0xb04   :  { %p17468_p3 = scmp.ne.s32.totalorder %s21823_s12, %s17467_s7  ;;  %p17471_p4 = scmp.lt.u32.totalorder %s17467_s7, %s21823_s12 }
 0xb06   :  { %p17473_p5 = pnand %p17471_p4, %p17468_p3 }
 0xb08   :  { %17476 = shalt.err (!%p17473_p5)
}
 0xb09   :  { %14087 = dma.vmem_to_hbm [thread:$0]  %s14085_s20, 32, %s21823_s12, [#allocation9]  }
 0xb0a   :  { %17491 = dma.done.wait [#allocation9], 32  }
 0xb0b   :  { %17492 = vsyncadd [#allocation9], 4294967264 }
 0xb0c   :  { %14091 = vsyncpa [#allocation8], 1 }
 0xb0d   :  { %14092 = vsyncpa [#allocation11], 1 }
 0xb0e   :  { %14093 = vsyncpa [#allocation14], 1 }
 0xb0f   :  { %14094 = vsyncpa [#allocation17], 1 }
 0xb10   :  { %14095 = vsyncpa [#allocation20], 1 }
 0xb11   :  { %14096 = vsyncpa [#allocation23], 1 }
 0xb12   :  { %14097 = vsyncpa [#allocation26], 1 }
 0xb13   :  { %14098 = vsyncpa [#allocation9], 1 }

</bundles_post_ra>
